<compile_context>
chip_gen: v5e
topology: v5e:2x2
jax: 0.10.0
libtpu: 0.0.40
codegen_flags: <defaults>
</compile_context>

<pallas_src>
import functools

import jax
import jax.numpy as jnp
from jax.experimental import pallas as pl
from jax.experimental.pallas import tpu as pltpu

EPS = 1e-5


def _round_up(a, b):
    return -(-a // b) * b


def _vmem_limit_bytes():
    # v7x has 64 MiB of VMEM vs 128 MiB on v5e/v6e: derive the limit from the
    # hardware and leave ~25% headroom for compiler-internal scratch.
    cap = 128 * 1024 * 1024
    try:
        cap = int(getattr(pltpu.get_tpu_info(), "vmem_capacity_bytes", cap))
    except Exception:
        pass
    return min((cap * 3) // 4, 100 * 1024 * 1024)


# ---------------------------------------------------------------------------
# Fused bottleneck kernel
# ---------------------------------------------------------------------------
def _bottleneck_kernel(x_ref, w1_ref, b1_ref, w2_ref, b2_ref, w3_ref, b3_ref,
                       o_ref, stg_ref, scr_ref, *, W, HW, B, R, top):
    # x_ref : (B*HW, C)   bf16  packed NHWC rows, row = (n*H + y)*W + x
    # w1_ref: (C, P)      bf16  conv1 weight, BN1 scale folded
    # b1_ref: (1, P)      f32   BN1 bias
    # w2_ref: (3, 3P, P)  bf16  conv2 weight, dy-major, rows ordered dx*P + cin
    # b2_ref: (1, P)      f32
    # w3_ref: (P, C)      bf16  conv3 weight, BN3 scale folded
    # b3_ref: (1, C)      f32
    # o_ref : (B*HW, C)   bf16
    # stg_ref: (T, P)     bf16  staged conv1 output, one image per R-row slot
    # scr_ref: (T, 3P)    bf16  dx-concatenated conv1 output with zero halos
    P = w1_ref.shape[1]
    CR = (B - 1) * R + HW            # rows covered by the conv2/conv3 matmuls

    # Zero the vertical-halo / inter-image separator rows of the wide scratch.
    # Done every grid step (tiny regions) so the kernel stays correct when the
    # "parallel" grid axis is split across TensorCores.
    scr_ref[0:top, :] = jnp.zeros((top, 3 * P), scr_ref.dtype)
    for i in range(B):
        s = top + i * R + HW
        e = top + (i + 1) * R
        scr_ref[s:e, :] = jnp.zeros((e - s, 3 * P), scr_ref.dtype)

    # conv1 (1x1) + bn1 + relu for the whole batch block: one MXU matmul.
    h1 = jnp.dot(x_ref[...], w1_ref[...], preferred_element_type=jnp.float32)
    h1 = jnp.maximum(h1 + b1_ref[...], 0.0).astype(jnp.bfloat16)   # (B*HW, P)

    # Column masks: a flat-row shift of +-1 wraps across image rows, so the
    # dx=0 channel block must drop x == 0 and the dx=2 block must drop x == W-1.
    col = jax.lax.broadcasted_iota(jnp.int32, (HW, 1), 0) % W
    not_first = col != 0
    not_last = col != W - 1

    # Stage h1 per image, build the dx-concatenated (HW, 3P) activations
    # [h1@(x-1) | h1@x | h1@(x+1)] via +-1-row reads of the staged copy, and
    # store them into the zero-halo scratch.  Image slots start on 8-aligned
    # rows, so the wide stores and the conv2 tap loads are row-aligned.
    for i in range(B):
        base = top + i * R
        h1_i = h1[i * HW:(i + 1) * HW, :]
        stg_ref[base:base + HW, :] = h1_i
        left = jnp.where(not_first, stg_ref[base - 1:base - 1 + HW, :], 0.0)
        right = jnp.where(not_last, stg_ref[base + 1:base + 1 + HW, :], 0.0)
        scr_ref[base:base + HW, :] = jnp.concatenate([left, h1_i, right],
                                                     axis=1)

    # conv2 (3x3, stride 1, pad 1) + bn2 + relu: three accumulating MXU
    # matmuls with contraction K = 3P (one per kernel row dy); vertical taps
    # hit the zero halo rows between images, reproducing the conv padding.
    acc = None
    for dy in range(3):
        start = top + (dy - 1) * W
        part = jnp.dot(scr_ref[start:start + CR, :], w2_ref[dy],
                       preferred_element_type=jnp.float32)
        acc = part if acc is None else acc + part
    h2 = jnp.maximum(acc + b2_ref[...], 0.0).astype(jnp.bfloat16)   # (CR, P)

    # conv3 (1x1) + bn3, then identity residual + relu in f32.
    h3 = jnp.dot(h2, w3_ref[...],
                 preferred_element_type=jnp.float32) + b3_ref[...]  # (CR, C)
    for i in range(B):
        xi = x_ref[i * HW:(i + 1) * HW, :].astype(jnp.float32)
        y = h3[i * R:i * R + HW, :] + xi
        o_ref[i * HW:(i + 1) * HW, :] = jnp.maximum(y, 0.0).astype(o_ref.dtype)


# ---------------------------------------------------------------------------
# Wrapper (layout / BN folding / pallas_call plumbing)
# ---------------------------------------------------------------------------
def _fold_bn(gamma, beta, mean, var):
    scale = gamma / jnp.sqrt(var + EPS)
    return scale, beta - mean * scale


def identify_block_nhwc(x_nhwc, params, *, block_batch=None,
                        out_dtype=jnp.bfloat16):
    """Fused IdentifyBlock forward on NHWC input (bf16 preferred); NHWC out."""
    N, H, W, C = x_nhwc.shape
    planes = params["w1"].shape[0]
    assert C == 4 * planes, "identity shortcut requires in_planes == 4*planes"

    s1, b1 = _fold_bn(*params["bn1"])
    s2, b2 = _fold_bn(*params["bn2"])
    s3, b3 = _fold_bn(*params["bn3"])

    # Fold the BN scales into the conv output channels; kernel only adds bias.
    w1 = (params["w1"].reshape(planes, C).T * s1[None, :]).astype(jnp.bfloat16)
    # (out, in, ky, kx) -> (ky, kx*in, out): rows match the dx-concatenated
    # activation layout [dx block, input channel].
    w2 = (jnp.transpose(params["w2"], (2, 3, 1, 0)).reshape(3, 3 * planes,
                                                            planes)
          * s2[None, None, :]).astype(jnp.bfloat16)
    w3 = (params["w3"].reshape(C, planes).T * s3[None, :]).astype(jnp.bfloat16)

    HW = H * W
    if block_batch is None:
        # ~4 MiB of bf16 input per grid step, 1..8 images per step.
        block_batch = max(1, min(N, 8, (4 << 20) // max(1, HW * C * 2)))
    B = int(block_batch)
    if (B * HW) % 8 != 0:
        B = N                 # block == full extent, always a legal BlockSpec
    Np = _round_up(N, B)

    # Packed flat layout: rows = (n*H + y)*W + x, channels on lanes.  The
    # reshape is free; no NCHW<->NHWC transpose or dtype round-trip in HBM.
    x_flat = x_nhwc.reshape(N * HW, C).astype(jnp.bfloat16)
    if Np != N:
        x_flat = jnp.pad(x_flat, ((0, (Np - N) * HW), (0, 0)))

    # Scratch geometry: each image gets an R-row slot (R >= HW + W, 8-aligned)
    # so the 3x3 conv's vertical taps read zero halo rows between images.
    R = _round_up(HW + W, 8)
    top = _round_up(W, 8)
    T = top + B * R

    kernel = functools.partial(_bottleneck_kernel, W=W, HW=HW, B=B, R=R,
                               top=top)

    out = pl.pallas_call(
        kernel,
        out_shape=jax.ShapeDtypeStruct((Np * HW, C), out_dtype),
        grid=(Np // B,),
        in_specs=[
            pl.BlockSpec((B * HW, C), lambda n: (n, 0)),
            # Grid-invariant weights/biases (constant index_map): fetched once
            # and re-used across all grid steps by the pipeline.
            pl.BlockSpec((C, planes), lambda n: (0, 0)),
            pl.BlockSpec((1, planes), lambda n: (0, 0)),
            pl.BlockSpec((3, 3 * planes, planes), lambda n: (0, 0, 0)),
            pl.BlockSpec((1, planes), lambda n: (0, 0)),
            pl.BlockSpec((planes, C), lambda n: (0, 0)),
            pl.BlockSpec((1, C), lambda n: (0, 0)),
        ],
        out_specs=pl.BlockSpec((B * HW, C), lambda n: (n, 0)),
        scratch_shapes=[
            pltpu.VMEM((T, planes), jnp.bfloat16),       # staged conv1 output
            pltpu.VMEM((T, 3 * planes), jnp.bfloat16),   # dx-concat + halos
        ],
        compiler_params=pltpu.CompilerParams(
            dimension_semantics=("parallel",),
            vmem_limit_bytes=_vmem_limit_bytes()),
    )(x_flat, w1, b1.reshape(1, -1).astype(jnp.float32), w2,
      b2.reshape(1, -1).astype(jnp.float32), w3,
      b3.reshape(1, -1).astype(jnp.float32))

    if Np != N:
        out = out[:N * HW]
    return out.reshape(N, H, W, C)


# ---------------------------------------------------------------------------
# Pure-JAX reference (NHWC, mirrors the PyTorch module in eval mode)
# ---------------------------------------------------------------------------
def _reference_nhwc(x, params):
    def conv(x, w, pad):
        return jax.lax.conv_general_dilated(
            x, jnp.transpose(w, (2, 3, 1, 0)), (1, 1),
            [(pad, pad), (pad, pad)],
            dimension_numbers=("NHWC", "HWIO", "NHWC"),
            precision=jax.lax.Precision.HIGHEST)

    def bn(x, p):
        gamma, beta, mean, var = p
        s = gamma / jnp.sqrt(var + EPS)
        return x * s + (beta - mean * s)

    out = jax.nn.relu(bn(conv(x, params["w1"], 0), params["bn1"]))
    out = jax.nn.relu(bn(conv(out, params["w2"], 1), params["bn2"]))
    out = bn(conv(out, params["w3"], 0), params["bn3"])
    return jax.nn.relu(out + x)


# ---------------------------------------------------------------------------
def _bn_params(key, c):
    k1, k2, k3, k4 = jax.random.split(key, 4)
    gamma = 1.0 + 0.1 * jax.random.normal(k1, (c,), jnp.float32)
    beta = 0.1 * jax.random.normal(k2, (c,), jnp.float32)
    mean = 0.1 * jax.random.normal(k3, (c,), jnp.float32)
    var = 0.5 + 0.5 * jnp.abs(jax.random.normal(k4, (c,), jnp.float32))
    return gamma, beta, mean, var


def _make_params(key, in_planes, planes):
    ks = jax.random.split(key, 6)
    return {
        "w1": 0.1 * jax.random.normal(ks[0], (planes, in_planes, 1, 1),
                                      jnp.float32),
        "w2": 0.1 * jax.random.normal(ks[1], (planes, planes, 3, 3),
                                      jnp.float32),
        "w3": 0.1 * jax.random.normal(ks[2], (4 * planes, planes, 1, 1),
                                      jnp.float32),
        "bn1": _bn_params(ks[3], planes),
        "bn2": _bn_params(ks[4], planes),
        "bn3": _bn_params(ks[5], 4 * planes),
    }


def _run_case(key, *, N, H, W, planes, block_batch):
    in_planes = 4 * planes
    kp, kx = jax.random.split(key)
    params = _make_params(kp, in_planes, planes)
    x = jax.random.normal(kx, (N, H, W, in_planes),
                          jnp.float32).astype(jnp.bfloat16)

    out = jax.block_until_ready(
        identify_block_nhwc(x, params, block_batch=block_batch))
    assert out.shape == (N, H, W, in_planes), out.shape
    assert out.dtype == jnp.bfloat16, out.dtype

    ref = _reference_nhwc(x.astype(jnp.float32), params)
    err = jnp.max(jnp.abs(out.astype(jnp.float32) - ref))
    scale = jnp.maximum(1.0, jnp.max(jnp.abs(ref)))
    rel = float(err / scale)
    assert rel < 5e-2, f"mismatch vs reference: rel_err={rel}"
    return rel


if __name__ == "__main__":
    root = jax.random.PRNGKey(0)
    k1, k2 = jax.random.split(root)
    # Small smoke-test shape (2 grid steps of 2 images each).
    _run_case(k1, N=4, H=16, W=16, planes=8, block_batch=2)
    # Representative ResNet-50 stage-1 IdentifyBlock shape (C=256, P=64, 56x56)
    # exercising 128+ lane channels and the aligned vertical-tap path.
    _run_case(k2, N=2, H=56, W=56, planes=64, block_batch=2)
    print("KERNEL_OK")
</pallas_src>

<mosaic_0001>
module attributes {stable_mosaic.version = 11 : i64} {
  func.func @_bottleneck_kernel(%arg0: i32, %arg1: memref<512x32xbf16, #tpu.memory_space<vmem>>, %arg2: memref<32x8xbf16, #tpu.memory_space<vmem>>, %arg3: memref<1x8xf32, #tpu.memory_space<vmem>>, %arg4: memref<3x24x8xbf16, #tpu.memory_space<vmem>>, %arg5: memref<1x8xf32, #tpu.memory_space<vmem>>, %arg6: memref<8x32xbf16, #tpu.memory_space<vmem>>, %arg7: memref<1x32xf32, #tpu.memory_space<vmem>>, %arg8: memref<512x32xbf16, #tpu.memory_space<vmem>>, %arg9: memref<560x8xbf16, #tpu.memory_space<vmem>>, %arg10: memref<560x24xbf16, #tpu.memory_space<vmem>>) attributes {dimension_semantics = [#tpu.dimension_semantics<parallel>], iteration_bounds = array<i64: 2>, scalar_prefetch = 0 : i64, scratch_operands = 2 : i64, tpu.core_type = #tpu.core_type<tc>, window_params = [{transform_indices = @transform_0, window_bounds = array<i64: 512, 32>}, {pipeline_mode = #tpu.pipeline_mode<synchronous>, transform_indices = @transform_1, window_bounds = array<i64: 32, 8>}, {pipeline_mode = #tpu.pipeline_mode<synchronous>, transform_indices = @transform_2, window_bounds = array<i64: 1, 8>}, {pipeline_mode = #tpu.pipeline_mode<synchronous>, transform_indices = @transform_3, window_bounds = array<i64: 3, 24, 8>}, {pipeline_mode = #tpu.pipeline_mode<synchronous>, transform_indices = @transform_4, window_bounds = array<i64: 1, 8>}, {pipeline_mode = #tpu.pipeline_mode<synchronous>, transform_indices = @transform_5, window_bounds = array<i64: 8, 32>}, {pipeline_mode = #tpu.pipeline_mode<synchronous>, transform_indices = @transform_6, window_bounds = array<i64: 1, 32>}, {transform_indices = @transform_7, window_bounds = array<i64: 512, 32>}]} {
    %cst = arith.constant 0.000000e+00 : bf16
    %0 = vector.broadcast %cst : bf16 to vector<16x24xbf16>
    %c0 = arith.constant 0 : index
    %c0_0 = arith.constant 0 : index
    %1 = vector.load %arg10[%c0, %c0_0] : memref<560x24xbf16, #tpu.memory_space<vmem>>, vector<16x24xbf16>
    tpu.vector_store %arg10[%c0, %c0_0], %0 {strides = array<i32>} : memref<560x24xbf16, #tpu.memory_space<vmem>>, vector<16x24xbf16>,
    %cst_1 = arith.constant 0.000000e+00 : bf16
    %2 = vector.broadcast %cst_1 : bf16 to vector<16x24xbf16>
    %c272 = arith.constant 272 : index
    %c0_2 = arith.constant 0 : index
    %3 = vector.load %arg10[%c272, %c0_2] : memref<560x24xbf16, #tpu.memory_space<vmem>>, vector<16x24xbf16>
    tpu.vector_store %arg10[%c272, %c0_2], %2 {strides = array<i32>} : memref<560x24xbf16, #tpu.memory_space<vmem>>, vector<16x24xbf16>,
    %cst_3 = arith.constant 0.000000e+00 : bf16
    %4 = vector.broadcast %cst_3 : bf16 to vector<16x24xbf16>
    %c544 = arith.constant 544 : index
    %c0_4 = arith.constant 0 : index
    %5 = vector.load %arg10[%c544, %c0_4] : memref<560x24xbf16, #tpu.memory_space<vmem>>, vector<16x24xbf16>
    tpu.vector_store %arg10[%c544, %c0_4], %4 {strides = array<i32>} : memref<560x24xbf16, #tpu.memory_space<vmem>>, vector<16x24xbf16>,
    %c0_5 = arith.constant 0 : index
    %c0_6 = arith.constant 0 : index
    %6 = vector.load %arg1[%c0_5, %c0_6] : memref<512x32xbf16, #tpu.memory_space<vmem>>, vector<512x32xbf16>
    %c0_7 = arith.constant 0 : index
    %c0_8 = arith.constant 0 : index
    %7 = vector.load %arg2[%c0_7, %c0_8] : memref<32x8xbf16, #tpu.memory_space<vmem>>, vector<32x8xbf16>
    %cst_9 = arith.constant dense<0.000000e+00> : vector<512x8xf32>
    %8 = tpu.matmul %6, %7, %cst_9 {dimension_numbers = #tpu.dot_dimension_numbers<[1], [0], [0], [1], [0, 0, 1, 1], [], []>} : vector<512x32xbf16>, vector<32x8xbf16>, vector<512x8xf32> -> vector<512x8xf32>
    %c0_10 = arith.constant 0 : index
    %c0_11 = arith.constant 0 : index
    %9 = vector.load %arg3[%c0_10, %c0_11] : memref<1x8xf32, #tpu.memory_space<vmem>>, vector<1x8xf32>
    %10 = vector.broadcast %9 : vector<1x8xf32> to vector<512x8xf32>
    %11 = arith.addf %8, %10 : vector<512x8xf32>
    %cst_12 = arith.constant 0.000000e+00 : f32
    %12 = vector.broadcast %cst_12 : f32 to vector<512x8xf32>
    %13 = arith.maximumf %11, %12 : vector<512x8xf32>
    %14 = arith.truncf %13 : vector<512x8xf32> to vector<512x8xbf16>
    %15 = tpu.iota {dimensions = array<i32: 0>} : vector<256x1xi32>
    %c16_i32 = arith.constant 16 : i32
    %c0_i32 = arith.constant 0 : i32
    %16 = arith.cmpi eq, %c16_i32, %c0_i32 : i32
    %c1_i32 = arith.constant 1 : i32
    %17 = arith.select %16, %c1_i32, %c16_i32 : i32
    %18 = vector.broadcast %17 : i32 to vector<256x1xi32>
    %19 = arith.remsi %15, %18 : vector<256x1xi32>
    %c0_i32_13 = arith.constant 0 : i32
    %20 = vector.broadcast %c0_i32_13 : i32 to vector<256x1xi32>
    %21 = arith.cmpi ne, %19, %20 : vector<256x1xi32>
    %c0_i32_14 = arith.constant 0 : i32
    %22 = vector.broadcast %c0_i32_14 : i32 to vector<256x1xi32>
    %23 = arith.cmpi slt, %19, %22 : vector<256x1xi32>
    %c0_i32_15 = arith.constant 0 : i32
    %24 = arith.cmpi slt, %17, %c0_i32_15 : i32
    %25 = vector.broadcast %24 : i1 to vector<256x1xi1>
    %26 = vector.broadcast %25 : vector<256x1xi1> to vector<256x1xi1>
    %27 = arith.xori %23, %26 : vector<256x1xi1>
    %28 = arith.andi %27, %21 : vector<256x1xi1>
    %29 = vector.broadcast %17 : i32 to vector<256x1xi32>
    %30 = arith.addi %19, %29 : vector<256x1xi32>
    %31 = arith.select %28, %30, %19 : vector<256x1xi1>, vector<256x1xi32>
    %c0_i32_16 = arith.constant 0 : i32
    %32 = vector.broadcast %c0_i32_16 : i32 to vector<256x1xi32>
    %33 = arith.cmpi ne, %31, %32 : vector<256x1xi32>
    %c15_i32 = arith.constant 15 : i32
    %34 = vector.broadcast %c15_i32 : i32 to vector<256x1xi32>
    %35 = arith.cmpi ne, %31, %34 : vector<256x1xi32>
    %36 = vector.extract_strided_slice %14 {offsets = [0, 0], sizes = [256, 8], strides = [1, 1]} : vector<512x8xbf16> to vector<256x8xbf16>
    %c16 = arith.constant 16 : index
    %c0_17 = arith.constant 0 : index
    %37 = vector.load %arg9[%c16, %c0_17] : memref<560x8xbf16, #tpu.memory_space<vmem>>, vector<256x8xbf16>
    tpu.vector_store %arg9[%c16, %c0_17], %36 {strides = array<i32>} : memref<560x8xbf16, #tpu.memory_space<vmem>>, vector<256x8xbf16>,
    %c15 = arith.constant 15 : index
    %c0_18 = arith.constant 0 : index
    %38 = vector.load %arg9[%c15, %c0_18] : memref<560x8xbf16, #tpu.memory_space<vmem>>, vector<256x8xbf16>
    %cst_19 = arith.constant 0.000000e+00 : f32
    %39 = arith.truncf %cst_19 : f32 to bf16
    %40 = vector.shape_cast %33 : vector<256x1xi1> to vector<256x1xi1>
    %41 = vector.broadcast %40 : vector<256x1xi1> to vector<256x8xi1>
    %42 = vector.broadcast %39 : bf16 to vector<256x8xbf16>
    %43 = arith.select %41, %38, %42 : vector<256x8xi1>, vector<256x8xbf16>
    %c17 = arith.constant 17 : index
    %c0_20 = arith.constant 0 : index
    %44 = vector.load %arg9[%c17, %c0_20] : memref<560x8xbf16, #tpu.memory_space<vmem>>, vector<256x8xbf16>
    %cst_21 = arith.constant 0.000000e+00 : f32
    %45 = arith.truncf %cst_21 : f32 to bf16
    %46 = vector.shape_cast %35 : vector<256x1xi1> to vector<256x1xi1>
    %47 = vector.broadcast %46 : vector<256x1xi1> to vector<256x8xi1>
    %48 = vector.broadcast %45 : bf16 to vector<256x8xbf16>
    %49 = arith.select %47, %44, %48 : vector<256x8xi1>, vector<256x8xbf16>
    %50 = tpu.concatenate %43, %36, %49 in 1 : vector<256x8xbf16>, vector<256x8xbf16>, vector<256x8xbf16> -> vector<256x24xbf16>
    %c16_22 = arith.constant 16 : index
    %c0_23 = arith.constant 0 : index
    %51 = vector.load %arg10[%c16_22, %c0_23] : memref<560x24xbf16, #tpu.memory_space<vmem>>, vector<256x24xbf16>
    tpu.vector_store %arg10[%c16_22, %c0_23], %50 {strides = array<i32>} : memref<560x24xbf16, #tpu.memory_space<vmem>>, vector<256x24xbf16>,
    %52 = vector.extract_strided_slice %14 {offsets = [256, 0], sizes = [256, 8], strides = [1, 1]} : vector<512x8xbf16> to vector<256x8xbf16>
    %c288 = arith.constant 288 : index
    %c0_24 = arith.constant 0 : index
    %53 = vector.load %arg9[%c288, %c0_24] : memref<560x8xbf16, #tpu.memory_space<vmem>>, vector<256x8xbf16>
    tpu.vector_store %arg9[%c288, %c0_24], %52 {strides = array<i32>} : memref<560x8xbf16, #tpu.memory_space<vmem>>, vector<256x8xbf16>,
    %c287 = arith.constant 287 : index
    %c0_25 = arith.constant 0 : index
    %54 = vector.load %arg9[%c287, %c0_25] : memref<560x8xbf16, #tpu.memory_space<vmem>>, vector<256x8xbf16>
    %cst_26 = arith.constant 0.000000e+00 : f32
    %55 = arith.truncf %cst_26 : f32 to bf16
    %56 = vector.shape_cast %33 : vector<256x1xi1> to vector<256x1xi1>
    %57 = vector.broadcast %56 : vector<256x1xi1> to vector<256x8xi1>
    %58 = vector.broadcast %55 : bf16 to vector<256x8xbf16>
    %59 = arith.select %57, %54, %58 : vector<256x8xi1>, vector<256x8xbf16>
    %c289 = arith.constant 289 : index
    %c0_27 = arith.constant 0 : index
    %60 = vector.load %arg9[%c289, %c0_27] : memref<560x8xbf16, #tpu.memory_space<vmem>>, vector<256x8xbf16>
    %cst_28 = arith.constant 0.000000e+00 : f32
    %61 = arith.truncf %cst_28 : f32 to bf16
    %62 = vector.shape_cast %35 : vector<256x1xi1> to vector<256x1xi1>
    %63 = vector.broadcast %62 : vector<256x1xi1> to vector<256x8xi1>
    %64 = vector.broadcast %61 : bf16 to vector<256x8xbf16>
    %65 = arith.select %63, %60, %64 : vector<256x8xi1>, vector<256x8xbf16>
    %66 = tpu.concatenate %59, %52, %65 in 1 : vector<256x8xbf16>, vector<256x8xbf16>, vector<256x8xbf16> -> vector<256x24xbf16>
    %c288_29 = arith.constant 288 : index
    %c0_30 = arith.constant 0 : index
    %67 = vector.load %arg10[%c288_29, %c0_30] : memref<560x24xbf16, #tpu.memory_space<vmem>>, vector<256x24xbf16>
    tpu.vector_store %arg10[%c288_29, %c0_30], %66 {strides = array<i32>} : memref<560x24xbf16, #tpu.memory_space<vmem>>, vector<256x24xbf16>,
    %c0_31 = arith.constant 0 : index
    %c0_32 = arith.constant 0 : index
    %68 = vector.load %arg10[%c0_31, %c0_32] : memref<560x24xbf16, #tpu.memory_space<vmem>>, vector<528x24xbf16>
    %c0_33 = arith.constant 0 : index
    %c0_34 = arith.constant 0 : index
    %c0_35 = arith.constant 0 : index
    %69 = vector.load %arg4[%c0_33, %c0_34, %c0_35] : memref<3x24x8xbf16, #tpu.memory_space<vmem>>, vector<1x24x8xbf16>
    %70 = vector.shape_cast %69 : vector<1x24x8xbf16> to vector<24x8xbf16>
    %cst_36 = arith.constant dense<0.000000e+00> : vector<528x8xf32>
    %71 = tpu.matmul %68, %70, %cst_36 {dimension_numbers = #tpu.dot_dimension_numbers<[1], [0], [0], [1], [0, 0, 1, 1], [], []>} : vector<528x24xbf16>, vector<24x8xbf16>, vector<528x8xf32> -> vector<528x8xf32>
    %c16_37 = arith.constant 16 : index
    %c0_38 = arith.constant 0 : index
    %72 = vector.load %arg10[%c16_37, %c0_38] : memref<560x24xbf16, #tpu.memory_space<vmem>>, vector<528x24xbf16>
    %c1 = arith.constant 1 : index
    %c0_39 = arith.constant 0 : index
    %c0_40 = arith.constant 0 : index
    %73 = vector.load %arg4[%c1, %c0_39, %c0_40] : memref<3x24x8xbf16, #tpu.memory_space<vmem>>, vector<1x24x8xbf16>
    %74 = vector.shape_cast %73 : vector<1x24x8xbf16> to vector<24x8xbf16>
    %cst_41 = arith.constant dense<0.000000e+00> : vector<528x8xf32>
    %75 = tpu.matmul %72, %74, %cst_41 {dimension_numbers = #tpu.dot_dimension_numbers<[1], [0], [0], [1], [0, 0, 1, 1], [], []>} : vector<528x24xbf16>, vector<24x8xbf16>, vector<528x8xf32> -> vector<528x8xf32>
    %76 = arith.addf %71, %75 : vector<528x8xf32>
    %c32 = arith.constant 32 : index
    %c0_42 = arith.constant 0 : index
    %77 = vector.load %arg10[%c32, %c0_42] : memref<560x24xbf16, #tpu.memory_space<vmem>>, vector<528x24xbf16>
    %c2 = arith.constant 2 : index
    %c0_43 = arith.constant 0 : index
    %c0_44 = arith.constant 0 : index
    %78 = vector.load %arg4[%c2, %c0_43, %c0_44] : memref<3x24x8xbf16, #tpu.memory_space<vmem>>, vector<1x24x8xbf16>
    %79 = vector.shape_cast %78 : vector<1x24x8xbf16> to vector<24x8xbf16>
    %cst_45 = arith.constant dense<0.000000e+00> : vector<528x8xf32>
    %80 = tpu.matmul %77, %79, %cst_45 {dimension_numbers = #tpu.dot_dimension_numbers<[1], [0], [0], [1], [0, 0, 1, 1], [], []>} : vector<528x24xbf16>, vector<24x8xbf16>, vector<528x8xf32> -> vector<528x8xf32>
    %81 = arith.addf %76, %80 : vector<528x8xf32>
    %c0_46 = arith.constant 0 : index
    %c0_47 = arith.constant 0 : index
    %82 = vector.load %arg5[%c0_46, %c0_47] : memref<1x8xf32, #tpu.memory_space<vmem>>, vector<1x8xf32>
    %83 = vector.broadcast %82 : vector<1x8xf32> to vector<528x8xf32>
    %84 = arith.addf %81, %83 : vector<528x8xf32>
    %cst_48 = arith.constant 0.000000e+00 : f32
    %85 = vector.broadcast %cst_48 : f32 to vector<528x8xf32>
    %86 = arith.maximumf %84, %85 : vector<528x8xf32>
    %87 = arith.truncf %86 : vector<528x8xf32> to vector<528x8xbf16>
    %c0_49 = arith.constant 0 : index
    %c0_50 = arith.constant 0 : index
    %88 = vector.load %arg6[%c0_49, %c0_50] : memref<8x32xbf16, #tpu.memory_space<vmem>>, vector<8x32xbf16>
    %cst_51 = arith.constant dense<0.000000e+00> : vector<528x32xf32>
    %89 = tpu.matmul %87, %88, %cst_51 {dimension_numbers = #tpu.dot_dimension_numbers<[1], [0], [0], [1], [0, 0, 1, 1], [], []>} : vector<528x8xbf16>, vector<8x32xbf16>, vector<528x32xf32> -> vector<528x32xf32>
    %c0_52 = arith.constant 0 : index
    %c0_53 = arith.constant 0 : index
    %90 = vector.load %arg7[%c0_52, %c0_53] : memref<1x32xf32, #tpu.memory_space<vmem>>, vector<1x32xf32>
    %91 = vector.broadcast %90 : vector<1x32xf32> to vector<528x32xf32>
    %92 = arith.addf %89, %91 : vector<528x32xf32>
    %c0_54 = arith.constant 0 : index
    %c0_55 = arith.constant 0 : index
    %93 = vector.load %arg1[%c0_54, %c0_55] : memref<512x32xbf16, #tpu.memory_space<vmem>>, vector<256x32xbf16>
    %94 = arith.extf %93 : vector<256x32xbf16> to vector<256x32xf32>
    %95 = vector.extract_strided_slice %92 {offsets = [0, 0], sizes = [256, 32], strides = [1, 1]} : vector<528x32xf32> to vector<256x32xf32>
    %96 = arith.addf %95, %94 : vector<256x32xf32>
    %cst_56 = arith.constant 0.000000e+00 : f32
    %97 = vector.broadcast %cst_56 : f32 to vector<256x32xf32>
    %98 = arith.maximumf %96, %97 : vector<256x32xf32>
    %99 = arith.truncf %98 : vector<256x32xf32> to vector<256x32xbf16>
    %c0_57 = arith.constant 0 : index
    %c0_58 = arith.constant 0 : index
    %100 = vector.load %arg8[%c0_57, %c0_58] : memref<512x32xbf16, #tpu.memory_space<vmem>>, vector<256x32xbf16>
    tpu.vector_store %arg8[%c0_57, %c0_58], %99 {strides = array<i32>} : memref<512x32xbf16, #tpu.memory_space<vmem>>, vector<256x32xbf16>,
    %c256 = arith.constant 256 : index
    %c0_59 = arith.constant 0 : index
    %101 = vector.load %arg1[%c256, %c0_59] : memref<512x32xbf16, #tpu.memory_space<vmem>>, vector<256x32xbf16>
    %102 = arith.extf %101 : vector<256x32xbf16> to vector<256x32xf32>
    %103 = vector.extract_strided_slice %92 {offsets = [272, 0], sizes = [256, 32], strides = [1, 1]} : vector<528x32xf32> to vector<256x32xf32>
    %104 = arith.addf %103, %102 : vector<256x32xf32>
    %cst_60 = arith.constant 0.000000e+00 : f32
    %105 = vector.broadcast %cst_60 : f32 to vector<256x32xf32>
    %106 = arith.maximumf %104, %105 : vector<256x32xf32>
    %107 = arith.truncf %106 : vector<256x32xf32> to vector<256x32xbf16>
    %c256_61 = arith.constant 256 : index
    %c0_62 = arith.constant 0 : index
    %108 = vector.load %arg8[%c256_61, %c0_62] : memref<512x32xbf16, #tpu.memory_space<vmem>>, vector<256x32xbf16>
    tpu.vector_store %arg8[%c256_61, %c0_62], %107 {strides = array<i32>} : memref<512x32xbf16, #tpu.memory_space<vmem>>, vector<256x32xbf16>,
    return
  }
  func.func @transform_0(%arg0: i32) -> (i32, i32) {
    %c0_i32 = arith.constant 0 : i32
    %c0_i32_0 = arith.constant 0 : i32
    return %arg0, %c0_i32 : i32, i32
  }
  func.func @transform_1(%arg0: i32) -> (i32, i32) {
    %c0_i32 = arith.constant 0 : i32
    %c0_i32_0 = arith.constant 0 : i32
    %c0_i32_1 = arith.constant 0 : i32
    return %c0_i32, %c0_i32_0 : i32, i32
  }
  func.func @transform_2(%arg0: i32) -> (i32, i32) {
    %c0_i32 = arith.constant 0 : i32
    %c0_i32_0 = arith.constant 0 : i32
    %c0_i32_1 = arith.constant 0 : i32
    return %c0_i32, %c0_i32_0 : i32, i32
  }
  func.func @transform_3(%arg0: i32) -> (i32, i32, i32) {
    %c0_i32 = arith.constant 0 : i32
    %c0_i32_0 = arith.constant 0 : i32
    %c0_i32_1 = arith.constant 0 : i32
    %c0_i32_2 = arith.constant 0 : i32
    return %c0_i32, %c0_i32_0, %c0_i32_1 : i32, i32, i32
  }
  func.func @transform_4(%arg0: i32) -> (i32, i32) {
    %c0_i32 = arith.constant 0 : i32
    %c0_i32_0 = arith.constant 0 : i32
    %c0_i32_1 = arith.constant 0 : i32
    return %c0_i32, %c0_i32_0 : i32, i32
  }
  func.func @transform_5(%arg0: i32) -> (i32, i32) {
    %c0_i32 = arith.constant 0 : i32
    %c0_i32_0 = arith.constant 0 : i32
    %c0_i32_1 = arith.constant 0 : i32
    return %c0_i32, %c0_i32_0 : i32, i32
  }
  func.func @transform_6(%arg0: i32) -> (i32, i32) {
    %c0_i32 = arith.constant 0 : i32
    %c0_i32_0 = arith.constant 0 : i32
    %c0_i32_1 = arith.constant 0 : i32
    return %c0_i32, %c0_i32_0 : i32, i32
  }
  func.func @transform_7(%arg0: i32) -> (i32, i32) {
    %c0_i32 = arith.constant 0 : i32
    %c0_i32_0 = arith.constant 0 : i32
    return %arg0, %c0_i32 : i32, i32
  }
}

</mosaic_0001>

<bundles_post_ra>
// kernel: tpu_custom_call.1
= control target key start
LH: loop header
LB: loop body
LE: loop exit
PB: predicated region body
PF: predicated region fallthrough
CT: control target
= control target key end

     0   :  { %s8233_s24 = smov 0   ;;  %s12499_s0 = inlined_call_operand.vmem [shape: bf16[1024,32], index: 0, kind: input, shape index: {}]   ;;  %s12500_s1 = inlined_call_operand.vmem [shape: bf16[32,8], index: 1, kind: input, shape index: {}]   ;;  %s12501_s2 = inlined_call_operand.vmem [shape: f32[1,8], index: 2, kind: input, shape index: {}]   ;;  %s12502_s3 = inlined_call_operand.vmem [shape: bf16[3,24,8], index: 3, kind: input, shape index: {}]   ;;  %s12503_s4 = inlined_call_operand.vmem [shape: f32[1,8], index: 4, kind: input, shape index: {}]   ;;  %s12504_s5 = inlined_call_operand.vmem [shape: bf16[8,32], index: 5, kind: input, shape index: {}]   ;;  %s12505_s6 = inlined_call_operand.vmem [shape: f32[1,32], index: 6, kind: input, shape index: {}]   ;;  %s12506_s7 = inlined_call_operand.vmem [shape: bf16[1024,32], index: 7, kind: output, shape index: {}]  }
   0x1 LB: > { %s7233_s25 = sadd.s32 4294967295, %s8187_s24   ;;  %p7237_p0 = scmp.ge.s32.totalorder %s8187_s24, 1  ;;  %s8187_s24 = sphi %s8233_s24, %s17_s24  }
   0x2   : > { %p238_p1 = scmp.lt.s32.totalorder %s8187_s24, 3 }
   0x4   : > { %p239_p2 = pnand %p7237_p0, %p238_p1 }
   0x6   : > { %242 = sbr.rel (%p239_p2) target bundleno = 1403 (0x57b), region = 48 }
   0xb   : > { %v7865_v0 = vld [vmem:[%s12500_s1 + $0x8] sm:$0xff]  ;;  %s7238_s28 = sshll.u32 %s7233_s25, 6  ;;  %v7864_v1 = vld [vmem:[%s12500_s1] sm:$0xff]  ;;  %vm12509_vm0 = vcmask 261120   ;;  %v930_v19 = vlaneseq  ;;  %v12522_v29 = vmov 0   ;;  %vm8190_vm4 = vmmov 1  }
   0xc   : > { %p271_p3 = scmp.lt.s32.totalorder %s7238_s28, 127  ;;  %639 = vmatpush.bf16.msra.mxu0 %v7865_v0  ;;  %8095 = vmatpush.bf16.msra.mxu1 %v7865_v0  ;;  %vm1542_vm5 = vmpackc.low %vm8190_vm4, %vm8190_vm4  ;;  %v8327_v49 = vld [vmem:[%s12501_s2] ss:$0 sm:$0xff]  ;;  %vm12508_vm10 = vsmask.f32 3328  ;;  %v8341_v58 = vunpack.c.l.b16 %v12522_v29  ;;  %s8191_s14 = smov 8  }
   0xd   : > { %8096 = vmatpush.bf16.msra.mxu2 %v7865_v0  ;;  %8097 = vmatpush.bf16.msra.mxu3 %v7865_v0  ;;  %v8292_v21 = vshrl.u32 %v930_v19, 7  ;;  %v1574_v37 = vsel %vm1542_vm5, 65537, %v12522_v29  ;;  %vm1606_vm12 = vsmask.f32 7440  ;;  %vm2320_vm13 = vsmask.f32 256 }
   0xe   : > { %s13854_s28 = smov (!%p271_p3, %s7238_s28), 127  ;;  %v1622_v43 = vshrl.u32 %v1574_v37, 16  ;;  %v1618_v47 = vshll.u32 %v1574_v37, 16  ;;  %vm2321_vm14 = vsmask.f32 4368  ;;  %vm8351_vm15 = vmor %vm12508_vm10, %vm1606_vm12  ;;  %v12789_v19 = vmov 0 }
   0xf   : > { %s7239_s8 = sshll.u32 %s13854_s28, 2  ;;  %v967_v23 = vand.u32 15, %v8292_v21  ;;  %v932_v24 = vadd.s32 8, %v8292_v21  ;;  %v933_v31 = vadd.s32 16, %v8292_v21  ;;  %v934_v36 = vadd.s32 24, %v8292_v21  ;;  %s8192_s15 = smov 16  }
  0x10   : > { %640 = vmatpush.bf16.msra.mxu0 %v7864_v1  ;;  %s8255_s11 = scalar_lea.vmem %s12499_s0, %s7239_s8  ;;  %8098 = vmatpush.bf16.msra.mxu1 %v7864_v1  ;;  %v1624_v51 = vrot.slane %v1622_v43, 4  ;;  %v2326_v52 = vrot.slane %v1622_v43, 7  ;;  %v8338_v57 = vrot.slane %v1618_v47, 5  ;;  %s11978_s26 = scalar_lea.vmem %s12506_s7, %s7239_s8 }
  0x11   : > { %v7832_v2 = vld [vmem:[%s8255_s11] sm:$0xff]  ;;  %8099 = vmatpush.bf16.msra.mxu2 %v7864_v1  ;;  %8100 = vmatpush.bf16.msra.mxu3 %v7864_v1  ;;  %v7833_v4 = vld [vmem:[%s8255_s11 + $0x8] sm:$0xff]  ;;  %v7834_v6 = vld [vmem:[%s8255_s11 + $0x10] sm:$0xff]  ;;  %vm1347_vm1 = vcmp.ne.s32.totalorder %v967_v23, 0  ;;  %v974_v27 = vand.u32 15, %v932_v24  ;;  %v981_v34 = vand.u32 15, %v933_v31 }
  0x12   : > { %v7840_v3 = vld [vmem:[%s8255_s11 + $0x40] sm:$0xff]  ;;  %v7841_v5 = vld [vmem:[%s8255_s11 + $0x48] sm:$0xff]  ;;  %v7842_v7 = vld [vmem:[%s8255_s11 + $0x50] sm:$0xff]  ;;  %v988_v40 = vand.u32 15, %v934_v36  ;;  %v1625_v1 = vor.u32 %v1624_v51, %v8338_v57 }
  0x13   : > { %7378 = vmatmul.msk.bf16.vlgmr.msra.gmra.mxu0 %vm12509_vm0, %v7832_v2  ;;  %7386 = vmatmul.msk.bf16.vlgmr.msra.gmra.mxu1 %vm12509_vm0, %v7840_v3  ;;  %v7848_v8 = vld [vmem:[%s8255_s11 + $0x80] sm:$0xff]  ;;  %v7835_v9 = vld [vmem:[%s8255_s11 + $0x18] sm:$0xff]  ;;  %v7849_v11 = vld [vmem:[%s8255_s11 + $0x88] sm:$0xff]  ;;  %vm1380_vm3 = vcmp.ne.s32.totalorder %v974_v27, 15  ;;  %vm8312_vm7 = vcmp.ne.s32.totalorder %v981_v34, 0  ;;  %v8347_v2 = vunpack.c.h.b16 %v12522_v29 }
  0x14   : > { %7394 = vmatmul.msk.bf16.vlgmr.msra.gmra.mxu2 %vm12509_vm0, %v7848_v8  ;;  %v7843_v10 = vld [vmem:[%s8255_s11 + $0x58] sm:$0xff]  ;;  %v7836_v12 = vld [vmem:[%s8255_s11 + $0x20] sm:$0xff]  ;;  %v7850_v14 = vld [vmem:[%s8255_s11 + $0x90] sm:$0xff]  ;;  %vm8316_vm8 = vcmp.ne.s32.totalorder %v988_v40, 15 }
  0x15   : > { %v7844_v13 = vld [vmem:[%s8255_s11 + $0x60] sm:$0xff]  ;;  %v7837_v15 = vld [vmem:[%s8255_s11 + $0x28] sm:$0xff]  ;;  %v7851_v18 = vld [vmem:[%s8255_s11 + $0x98] sm:$0xff] }
  0x16   : > { %v7845_v16 = vld [vmem:[%s8255_s11 + $0x68] sm:$0xff]  ;;  %v7856_v17 = vld [vmem:[%s8255_s11 + $0xc0] sm:$0xff]  ;;  %v7838_v20 = vld [vmem:[%s8255_s11 + $0x30] sm:$0xff] }
  0x17   : > { %7402 = vmatmul.msk.bf16.vlgmr.msra.gmra.mxu3 %vm12509_vm0, %v7856_v17  ;;  %v7846_v22 = vld [vmem:[%s8255_s11 + $0x70] sm:$0xff]  ;;  %v7857_v25 = vld [vmem:[%s8255_s11 + $0xc8] sm:$0xff]  ;;  %vm1541_vm2 = vmpackc.low %vm1347_vm1, %vm1347_vm1  ;;  %vm12513_vm1 = vcmask 60416   ;;  %v8372_v17 = vrot.slane %v1625_v1, 4 }
  0x18   : > { %v7852_v26 = vld [vmem:[%s8255_s11 + $0xa0] sm:$0xff]  ;;  %v7839_v28 = vld [vmem:[%s8255_s11 + $0x38] sm:$0xff]  ;;  %v1573_v30 = vsel %vm1541_vm2, 65537, %v12522_v29  ;;  %vm2257_vm6 = vmpackc.low %vm1380_vm3, %vm1380_vm3 }
  0x19   : > { %v1609_v32 = vshll.u32 %v1573_v30, 16  ;;  %v1612_v33 = vshrl.u32 %v1573_v30, 16  ;;  %v7847_v35 = vld [vmem:[%s8255_s11 + $0x78] sm:$0xff]  ;;  %v2289_v39 = vsel %vm2257_vm6, 65537, %v12522_v29  ;;  %vm1543_vm9 = vmpackc.low %vm8312_vm7, %vm8312_vm7  ;;  %v7858_v46 = vld [vmem:[%s8255_s11 + $0xd0] sm:$0xff] }
  0x1a   : > { %v2332_v44 = vshrl.u32 %v2289_v39, 16  ;;  %v7853_v50 = vld [vmem:[%s8255_s11 + $0xa8] sm:$0xff]  ;;  %vm2259_vm11 = vmpackc.low %vm8316_vm8, %vm8316_vm8  ;;  %v1575_v53 = vsel %vm1543_vm9, 65537, %v12522_v29  ;;  %v2335_v55 = vshll.u32 %v2289_v39, 16  ;;  %v7859_v45 = vld [vmem:[%s8255_s11 + $0xd8] sm:$0xff] }
  0x1b   : > { %v1611_v38 = vrot.slane %v1609_v32, 5  ;;  %v1614_v41 = vrot.slane %v1612_v33, 4  ;;  %v1632_v56 = vshrl.u32 %v1575_v53, 16  ;;  %v2291_v62 = vsel %vm2259_vm11, 65537, %v12522_v29  ;;  %vm8358_vm2 = vmor %vm2320_vm13, %vm2321_vm14  ;;  %v1444_v32 = vld [vmem:[#allocation2 + $0x4] sm:$0x8] }
  0x1c   : > { %v8335_v54 = vrot.slane %v2332_v44, 7  ;;  %v1628_v63 = vshll.u32 %v1575_v53, 16  ;;  %v12794_v53 = vmov 0 }
  0x1d   : > { %v1615_v48 = vor.u32 %v1614_v41, %v1611_v38  ;;  %v1927_v60 = vunpack.c.l.b16 %v1611_v38 }
  0x1e   : > { %v2339_v31 = vrot.slane %v8335_v54, 4 }
  0x1f   : > { %v1616_v59 = vrot.slane %v1615_v48, 4  ;;  %vm8368_vm3 = vcmp.ne.s32.totalorder %v1927_v60, %v8341_v58  ;;  %v12800_v60 = vmov 0 }
  0x23   : > { %7379 = vmatmul.msk.bf16.gmra.mxu0 %vm12509_vm0, %v7833_v4  ;;  %7387 = vmatmul.msk.bf16.gmra.mxu1 %vm12509_vm0, %v7841_v5  ;;  %v1928_v4 = vunpack.c.h.b16 %v1611_v38  ;;  %v8355_v5 = vrot.slane %v2326_v52, 4 }
  0x24   : > { %7395 = vmatmul.msk.bf16.gmra.mxu2 %vm12509_vm0, %v7849_v11  ;;  %v2350_v11 = vshrl.u32 %v2291_v62, 16 }
  0x25   : > { %vm8376_vm4 = vcmp.ne.s32.totalorder %v1928_v4, %v8347_v2 }
  0x26   : > { %v12790_v19 = vsel %vm8376_vm4, 4294967295, %v12789_v19  ;;  %v8385_v24 = vrot.slane %v2350_v11, 7  ;;  %vm12507_vm5 = vmpackc.low %vm8376_vm4, %vm8368_vm3 }
  0x27   : > { %7403 = vmatmul.msk.bf16.gmra.mxu3 %vm12509_vm0, %v7857_v25  ;;  %12791 = vst [vmem:[#allocation5_spill] sm:$0xff] %v12790_v19  ;;  %v2353_v25 = vshll.u32 %v2291_v62, 16  ;;  %v12805_v62 = vmov 0 }
  0x28   : > { %v2357_v36 = vrot.slane %v8385_v24, 4 }
  0x33   : > { %7380 = vmatmul.msk.bf16.gmra.mxu0 %vm12509_vm0, %v7834_v6  ;;  %7388 = vmatmul.msk.bf16.gmra.mxu1 %vm12509_vm0, %v7842_v7  ;;  %v2337_v6 = vor.u32 %v2335_v55, %v8335_v54  ;;  %v1634_v7 = vrot.slane %v1632_v56, 4  ;;  %v12796_v54 = vmov 0  ;;  %v7854_v55 = vld [vmem:[%s8255_s11 + $0xb0] sm:$0xff] }
  0x34   : > { %7396 = vmatmul.msk.bf16.gmra.mxu2 %vm12509_vm0, %v7850_v14  ;;  %v12786_v14 = vmov 0 }
  0x35   : > { %v12787_v14 = vsel %vm8368_vm3, 4294967295, %v12786_v14 }
  0x36   : > { %12788 = vst [vmem:[#allocation4_spill] sm:$0xff] %v12787_v14 }
  0x37   : > { %7404 = vmatmul.msk.bf16.gmra.mxu3 %vm12509_vm0, %v7858_v46  ;;  %v2355_v46 = vor.u32 %v2353_v25, %v8385_v24  ;;  %v938_v24 = vadd.s32 56, %v8292_v21 }
  0x43   : > { %7381 = vmatmul.msk.bf16.gmra.mxu0 %vm12509_vm0, %v7835_v9  ;;  %7389 = vmatmul.msk.bf16.gmra.mxu1 %vm12509_vm0, %v7843_v10 }
  0x44   : > { %7397 = vmatmul.msk.bf16.gmra.mxu2 %vm12509_vm0, %v7851_v18  ;;  %v936_v18 = vadd.s32 40, %v8292_v21 }
  0x47   : > { %7405 = vmatmul.msk.bf16.gmra.mxu3 %vm12509_vm0, %v7859_v45 }
  0x53   : > { %7382 = vmatmul.msk.bf16.gmra.mxu0 %vm12509_vm0, %v7836_v12  ;;  %7390 = vmatmul.msk.bf16.gmra.mxu1 %vm12509_vm0, %v7844_v13  ;;  %v8362_v12 = vor.u32 %v2326_v52, %v1618_v47  ;;  %v1621_v13 = vsel %vm8351_vm15, %v1616_v59, %v8338_v57  ;;  %v8414_v47 = vsel %vm12507_vm5, %v1444_v32, 0  ;;  %v12798_v59 = vmov 0 }
  0x54   : > { %7398 = vmatmul.msk.bf16.gmra.mxu2 %vm12509_vm0, %v7852_v26  ;;  %v1002_v26 = vand.u32 15, %v936_v18  ;;  %v1934_v33 = vunpack.c.l.b16 %v1621_v13  ;;  %v1935_v40 = vunpack.c.h.b16 %v1621_v13  ;;  %v12808_v13 = vmov 0 }
  0x55   : > { %v2611_v30 = vunpack.c.h.b16 %v8362_v12  ;;  %v8419_v48 = vsel %vm8358_vm2, %v2339_v31, %v8362_v12 }
  0x56   : > { %vm8395_vm6 = vcmp.ne.s32.totalorder %v1002_v26, 15  ;;  %vm8454_vm13 = vcmp.ne.s32.totalorder %v1934_v33, %v8341_v58  ;;  %vm8459_vm14 = vcmp.ne.s32.totalorder %v1935_v40, %v8347_v2 }
  0x57   : > { %vm2261_vm7 = vmpackc.low %vm8395_vm6, %vm8395_vm6  ;;  %vm8427_vm9 = vcmp.ne.s32.totalorder %v2611_v30, %v8347_v2  ;;  %v12806_v62 = vsel %vm8459_vm14, 4294967295, %v12805_v62 }
  0x58   : > { %v12797_v54 = vsel %vm8427_vm9, 4294967295, %v12796_v54  ;;  %v8441_v56 = vsel %vm2261_vm7, 65537, %v12522_v29  ;;  %12807 = vst [vmem:[#allocation7_spill] sm:$0xff] %v12806_v62 }
  0x59   : > { %v2368_v11 = vshrl.u32 %v8441_v56, 16 }
  0x63   : > { %7383 = vmatmul.msk.bf16.gmra.mxu0 %vm12509_vm0, %v7837_v15  ;;  %7391 = vmatmul.msk.bf16.gmra.mxu1 %vm12509_vm0, %v7845_v16  ;;  %v1630_v15 = vrot.slane %v1628_v63, 5 }
  0x64   : > { %7399 = vmatmul.msk.bf16.gmra.mxu2 %vm12509_vm0, %v7853_v50 }
  0x65   : > { %v1631_v37 = vsel %vm8351_vm15, %v8372_v17, %v1630_v15 }
  0x66   : > { %v1941_v50 = vunpack.c.l.b16 %v1631_v37  ;;  %v1942_v51 = vunpack.c.h.b16 %v1631_v37  ;;  %v8504_v37 = vrot.slane %v2368_v11, 7 }
  0x68   : > { %vm8478_vm6 = vcmp.ne.s32.totalorder %v1941_v50, %v8341_v58  ;;  %vm8483_vm7 = vcmp.ne.s32.totalorder %v1942_v51, %v8347_v2 }
  0x69   : > { %v12809_v13 = vsel %vm8478_vm6, 4294967295, %v12808_v13 }
  0x6a   : > { %12810 = vst [vmem:[#allocation8_spill] sm:$0xff] %v12809_v13 }
  0x73   : > { %7384 = vmatmul.msk.bf16.gmra.mxu0 %vm12509_vm0, %v7838_v20  ;;  %7392 = vmatmul.msk.bf16.gmra.mxu1 %vm12509_vm0, %v7846_v22  ;;  %v2338_v20 = vsel %vm8358_vm2, %v8355_v5, %v2337_v6  ;;  %v1635_v22 = vor.u32 %v1634_v7, %v1630_v15  ;;  %v8471_v6 = vsel %vm8358_vm2, %v8355_v5, %v2355_v46  ;;  %v2624_v7 = vunpack.c.l.b16 %v8419_v48 }
  0x74   : > { %v2617_v38 = vunpack.c.l.b16 %v2338_v20  ;;  %v2618_v39 = vunpack.c.h.b16 %v2338_v20  ;;  %7400 = vmatmul.msk.bf16.gmra.mxu2 %vm12509_vm0, %v7854_v55  ;;  %v12811_v15 = vmov 0  ;;  %v2632_v25 = vunpack.c.h.b16 %v8471_v6 }
  0x75   : > { %v1636_v41 = vrot.slane %v1635_v22, 4  ;;  %v12812_v15 = vsel %vm8483_vm7, 4294967295, %v12811_v15 }
  0x76   : > { %vm8444_vm11 = vcmp.ne.s32.totalorder %v2617_v38, %v8341_v58  ;;  %vm8449_vm12 = vcmp.ne.s32.totalorder %v2618_v39, %v8347_v2  ;;  %12813 = vst [vmem:[#allocation9_spill] sm:$0xff] %v12812_v15 }
  0x77   : > { %v12799_v59 = vsel %vm8444_vm11, 4294967295, %v12798_v59  ;;  %v12801_v60 = vsel %vm8449_vm12, 4294967295, %v12800_v60  ;;  %vm12512_vm10 = vmpackc.low %vm8449_vm12, %vm8444_vm11  ;;  %vm8567_vm11 = vcmp.ne.s32.totalorder %v2624_v7, %v8341_v58 }
  0x83   : > { %7385 = vmatmul.msk.bf16.gmra.mxu0 %vm12509_vm0, %v7839_v28  ;;  %7393 = vmatmul.msk.bf16.gmra.mxu1 %vm12509_vm0, %v7847_v35  ;;  %v2610_v28 = vunpack.c.l.b16 %v8362_v12 }
  0x85   : > { %vm8422_vm8 = vcmp.ne.s32.totalorder %v2610_v28, %v8341_v58 }
  0x86   : > { %v12795_v53 = vsel %vm8422_vm8, 4294967295, %v12794_v53  ;;  %vm12510_vm5 = vmpackc.low %vm8427_vm9, %vm8422_vm8  ;;  %vm12835_vm8 = vcmask 261120  }
  0x87   : > { %vm12831_vm9 = vmpackc.low %vm8483_vm7, %vm8478_vm6 }
  0x90   : > { %v642_v61 = vpop.f32.mrf.mxu0  ;;  %v682_v10 = vpop.f32.mrf.mxu1 }
  0x91   : > { %v643_v0 = vadd.f32 %v8327_v49, %v642_v61  ;;  %v683_v23 = vadd.f32 %v8327_v49, %v682_v10  ;;  %v12802_v61 = vmov 0  ;;  %v2625_v10 = vunpack.c.h.b16 %v8419_v48 }
  0x92   : > { %v12803_v61 = vsel %vm8454_vm13, 4294967295, %v12802_v61 }
  0x93   : > { %v802_v8 = vmax.f32 %v643_v0, 0.0  ;;  %v818_v35 = vmax.f32 %v683_v23, 0.0  ;;  %12804 = vst [vmem:[#allocation6_spill] sm:$0xff] %v12803_v61  ;;  %v1641_v0 = vsel %vm8351_vm15, %v1636_v41, %v8338_v57  ;;  %v2631_v23 = vunpack.c.l.b16 %v8471_v6 }
  0x94   : > { %v1948_v22 = vunpack.c.l.b16 %v1641_v0  ;;  %v1949_v26 = vunpack.c.h.b16 %v1641_v0 }
  0x95   : > { %v866_v16 = vpack.c.bf16 %v802_v8, %v802_v8  ;;  %v8405_v43 = vpack.c.bf16 %v818_v35, %v818_v35  ;;  %vm8578_vm4 = vcmp.ne.s32.totalorder %v2631_v23, %v8341_v58 }
  0x96   : > { %vm8537_vm3 = vcmp.ne.s32.totalorder %v1949_v26, %v8347_v2 }
  0x97   : > { %1412 = vst.msk [vmem:[#allocation2 + $0x8] sm:$0xf] %vm12513_vm1, %v866_v16  ;;  %v2989_v1 = vunpack.c.l.b16 %v866_v16  ;;  %v3005_v35 = vunpack.c.l.b16 %v8405_v43 }
  0x98   : > { %v644_v27 = vpop.f32.mrf.mxu0  ;;  %v684_v44 = vpop.f32.mrf.mxu1  ;;  %1428 = vst.msk [vmem:[#allocation2 + $0x48] sm:$0xf] %vm12513_vm1, %v8405_v43  ;;  %v2371_v43 = vshll.u32 %v8441_v56, 16 }
  0x99   : > { %v645_v34 = vadd.f32 %v8327_v49, %v644_v27  ;;  %v685_v20 = vadd.f32 %v8327_v49, %v684_v44  ;;  %v935_v27 = vadd.s32 32, %v8292_v21 }
  0x9b   : > { %v803_v42 = vmax.f32 %v645_v34, 0.0  ;;  %v819_v33 = vmax.f32 %v685_v20, 0.0  ;;  %v995_v38 = vand.u32 15, %v935_v27  ;;  %v2373_v20 = vor.u32 %v2371_v43, %v8504_v37 }
  0x9d   : > { %v867_v52 = vpack.c.bf16 %v803_v42, %v803_v42  ;;  %v883_v42 = vpack.c.bf16 %v819_v33, %v819_v33  ;;  %vm8516_vm0 = vcmp.ne.s32.totalorder %v995_v38, 0  ;;  %v7860_v33 = vld [vmem:[%s8255_s11 + $0xe0] sm:$0xff]  ;;  %v7855_v38 = vld [vmem:[%s8255_s11 + $0xb8] sm:$0xff] }
  0x9e   : > { %v8492_v32 = vld [vmem:[#allocation2 + $0x8] sm:$0xf]  ;;  %7401 = vmatmul.msk.bf16.gmra.mxu2 %vm12835_vm8, %v7855_v38  ;;  %vm12843_vm8 = vcmask 60416  }
  0x9f   : > { %1413 = vst.msk [vmem:[#allocation2 + $0xc] sm:$0xf] %vm12513_vm1, %v867_v52  ;;  %v2990_v4 = vunpack.c.l.b16 %v867_v52  ;;  %v2841_v45 = vsel %vm12510_vm5, %v8492_v32, 0  ;;  %v3006_v51 = vunpack.c.l.b16 %v883_v42  ;;  %vm8530_vm5 = vcmp.ne.s32.totalorder %v1948_v22, %v8341_v58 }
  0xa0   : > { %v647_v8 = vpop.f32.mrf.mxu0  ;;  %v687_v34 = vpop.f32.mrf.mxu1  ;;  %v12816_v52 = vmov 0  ;;  %1429 = vst.msk [vmem:[#allocation2 + $0x4c] sm:$0xf] %vm12513_vm1, %v883_v42  ;;  %v8607_v42 = vsel %vm8358_vm2, %v8355_v5, %v2373_v20 }
  0xa1   : > { %v648_v16 = vadd.f32 %v8327_v49, %v647_v8  ;;  %v3021_v18 = vpack.c.b16 %v2990_v4, %v2989_v1  ;;  %v12817_v52 = vsel %vm8530_vm5, 4294967295, %v12816_v52  ;;  %v688_v0 = vadd.f32 %v8327_v49, %v687_v34 }
  0xa2   : > { %12818 = vst [vmem:[#allocation10_spill] sm:$0xff] %v12817_v52  ;;  %v1016_v1 = vand.u32 15, %v938_v24  ;;  %v12819_v4 = vmov 0  ;;  %v3247_v8 = vunpack.c.l.b16 %v2841_v45  ;;  %v8547_v11 = vpack.c.b16 %v3006_v51, %v3005_v35 }
  0xa3   : > { %v804_v28 = vmax.f32 %v648_v16, 0.0  ;;  %v3038_v30 = vshrl.u32 %v3021_v18, 16  ;;  %v3041_v31 = vshll.u32 %v3021_v18, 16  ;;  %v12820_v4 = vsel %vm8537_vm3, 4294967295, %v12819_v4 }
  0xa4   : > { %12821 = vst [vmem:[#allocation11_spill] sm:$0xff] %v12820_v4  ;;  %v8552_v16 = vsel %vm8358_vm2, %v2357_v36, %v8362_v12  ;;  %v820_v18 = vmax.f32 %v688_v0, 0.0  ;;  %v12826_v34 = vmov 0  ;;  %v12828_v35 = vmov 0 }
  0xa5   : > { %v8506_v39 = vpack.c.bf16 %v804_v28, %v804_v28  ;;  %v3040_v40 = vrot.slane %v3038_v30, 4  ;;  %v3043_v41 = vrot.slane %v3041_v31, 5  ;;  %v12822_v28 = vmov 0 }
  0xa6   : > { %v1446_v44 = vld [vmem:[#allocation2 + $0xc] sm:$0xf]  ;;  %v12823_v28 = vsel %vm8567_vm11, 4294967295, %v12822_v28  ;;  %v12827_v34 = vsel %vm8578_vm4, 4294967295, %v12826_v34  ;;  %v8587_v7 = vpack.c.bf16 %v820_v18, %v820_v18  ;;  %v2638_v23 = vunpack.c.l.b16 %v8552_v16 }
  0xa7   : > { %1414 = vst.msk [vmem:[#allocation2 + $0x10] sm:$0xf] %vm12513_vm1, %v8506_v39  ;;  %v8522_v48 = vor.u32 %v3043_v41, %v3040_v40  ;;  %v2842_v50 = vsel %vm12512_vm10, %v1446_v44, 0  ;;  %vm1545_vm10 = vmpackc.low %vm8516_vm0, %vm8516_vm0  ;;  %vm1386_vm1 = vcmp.ne.s32.totalorder %v1016_v1, 15  ;;  %vm8572_vm0 = vcmp.ne.s32.totalorder %v2625_v10, %v8347_v2 }
  0xa8   : > { %v649_v55 = vpop.f32.mrf.mxu0  ;;  %v3248_v56 = vunpack.c.l.b16 %v2842_v50  ;;  %v1577_v22 = vsel %vm1545_vm10, 65537, %v12522_v29  ;;  %v689_v31 = vpop.f32.mrf.mxu1  ;;  %vm2263_vm12 = vmpackc.low %vm1386_vm1, %vm1386_vm1  ;;  %vm8583_vm10 = vcmp.ne.s32.totalorder %v2632_v25, %v8347_v2  ;;  %vm12830_vm1 = vcmask 261120  }
  0xa9   : > { %v650_v6 = vadd.f32 %v8327_v49, %v649_v55  ;;  %3180 = vrot.lane.b32.xlu2 %v8522_v48, %s8191_s14  ;;  %v12829_v35 = vsel %vm8583_vm10, 4294967295, %v12828_v35  ;;  %v2295_v10 = vsel %vm2263_vm12, 65537, %v12522_v29  ;;  %7406 = vmatmul.msk.bf16.gmra.mxu3 %vm12830_vm1, %v7860_v33  ;;  %v2160_v25 = vsel %vm12831_vm9, %v1446_v44, 0  ;;  %vm12833_vm1 = vmpackc.low %vm8459_vm14, %vm8454_vm13 }
  0xaa   : > { %v8564_v27 = vpack.c.b16 %v3248_v56, %v3247_v8  ;;  %v1648_v40 = vshll.u32 %v1577_v22, 16  ;;  %vm12832_vm12 = vcmask 60416   ;;  %v2639_v45 = vunpack.c.h.b16 %v8552_v16  ;;  %vm12844_vm13 = vmmov %vm12843_vm8 }
  0xab   : > { %v805_v26 = vmax.f32 %v650_v6, 0.0  ;;  %1430 = vst.msk [vmem:[#allocation2 + $0x50] sm:$0xf] %vm12832_vm12, %v8587_v7  ;;  %v2386_v43 = vshrl.u32 %v2295_v10, 16  ;;  %v8616_v44 = vsel %vm12833_vm1, %v8492_v32, 0  ;;  %v2991_v24 = vunpack.c.l.b16 %v8506_v39  ;;  %vm12834_vm9 = vmmov %vm12832_vm12 }
  0xac   : > { %v3298_v50 = vrot.slane %v8564_v27, 5  ;;  %vm12519_vm12 = vmpackc.low %vm8572_vm0, %vm8567_vm11  ;;  %v2389_v39 = vshll.u32 %v2295_v10, 16  ;;  %v2909_v55 = vunpack.c.l.b16 %v2160_v25  ;;  %v1652_v0 = vshrl.u32 %v1577_v22, 16 }
  0xad   : > { %v869_v36 = vpack.c.bf16 %v805_v26, %v805_v26  ;;  %vm12836_vm1 = vmpackc.low %vm8537_vm3, %vm8530_vm5  ;;  %v690_v8 = vadd.f32 %v8327_v49, %v689_v31  ;;  %v1650_v16 = vrot.slane %v1648_v40, 5  ;;  %v8641_v20 = vrot.slane %v2386_v43, 7 }
  0xae   : > { %v1447_v41 = vld [vmem:[#allocation2 + $0x10] sm:$0xf]  ;;  %v1654_v26 = vrot.slane %v1652_v0, 4  ;;  %v3007_v31 = vunpack.c.l.b16 %v8587_v7  ;;  %v12837_v40 = vmov 0  ;;  %v2645_v43 = vunpack.c.l.b16 %v8607_v42 }
  0xaf   : > { %1415 = vst.msk [vmem:[#allocation2 + $0x14] sm:$0xf] %vm12834_vm9, %v869_v36  ;;  %v2992_v46 = vunpack.c.l.b16 %v869_v36  ;;  %v2161_v32 = vsel %vm12836_vm1, %v1447_v41, 0  ;;  %v2843_v18 = vsel %vm12519_vm12, %v1447_v41, 0  ;;  %v821_v38 = vmax.f32 %v690_v8, 0.0  ;;  %vm12521_vm9 = vmpackc.low %vm8583_vm10, %vm8578_vm4 }
  0xb0   : > { %v652_v51 = vpop.f32.mrf.mxu0  ;;  %v2910_v56 = vunpack.c.l.b16 %v2161_v32  ;;  %v692_v25 = vpop.f32.mrf.mxu1  ;;  %vm8651_vm1 = vcmp.ne.s32.totalorder %v2638_v23, %v8341_v58  ;;  %vm8656_vm12 = vcmp.ne.s32.totalorder %v2639_v45, %v8347_v2  ;;  %v12840_v41 = vmov 0 }
  0xb1   : > { %v3022_v1 = vpack.c.b16 %v2992_v46, %v2991_v24  ;;  %v653_v6 = vadd.f32 %v8327_v49, %v652_v51  ;;  %3331 = vrot.lane.b32.xlu2 %v3298_v50, %s8192_s15  ;;  %v12838_v40 = vsel %vm8651_vm1, 4294967295, %v12837_v40  ;;  %v12841_v41 = vsel %vm8656_vm12, 4294967295, %v12840_v41 }
  0xb2   : > { %v8643_v22 = vpack.c.b16 %v2910_v56, %v2909_v55  ;;  %12839 = vst [vmem:[#allocation12_spill] sm:$0xff] %v12838_v40  ;;  %v1655_v46 = vor.u32 %v1654_v26, %v1650_v16  ;;  %v885_v7 = vpack.c.bf16 %v821_v38, %v821_v38  ;;  %v3249_v23 = vunpack.c.l.b16 %v2843_v18 }
  0xb3   : > { %v806_v33 = vmax.f32 %v653_v6, 0.0  ;;  %v3046_v10 = vshrl.u32 %v3022_v1, 16  ;;  %v3049_v36 = vshll.u32 %v3022_v1, 16  ;;  %12842 = vst [vmem:[#allocation13_spill] sm:$0xff] %v12841_v41  ;;  %v2375_v0 = vrot.slane %v8504_v37, 4 }
  0xb4   : > { %v2391_v45 = vor.u32 %v2389_v39, %v8641_v20  ;;  %v1651_v1 = vsel %vm8351_vm15, %v8372_v17, %v1650_v16  ;;  %v3008_v18 = vunpack.c.l.b16 %v885_v7  ;;  %v5105_v37 = vld [vmem:[%s12502_s3 + $0x8] sm:$0xf]  ;;  %v940_v39 = vadd.s32 72, %v8292_v21  ;;  %1431 = vst.msk [vmem:[#allocation2 + $0x54] sm:$0xf] %vm12844_vm13, %v885_v7 }
  0xb5   : > { %v8662_v32 = vpack.c.bf16 %v806_v33, %v806_v33  ;;  %v3048_v51 = vrot.slane %v3046_v10, 4  ;;  %v3051_v55 = vrot.slane %v3049_v36, 5  ;;  %v693_v33 = vadd.f32 %v8327_v49, %v692_v25 }
  0xb6   : > { %v8664_v56 = vld [vmem:[#allocation2 + $0x14] sm:$0xf]  ;;  %v5574_v10 = vunpack.c.l.b16 %v5105_v37  ;;  %v1656_v36 = vrot.slane %v1655_v46, 4  ;;  %v7861_v46 = vld [vmem:[%s8255_s11 + $0xe8] sm:$0xff]  ;;  %vm12846_vm13 = vcmask 261120   ;;  %vm12856_vm5 = vcmask 60416  }
  0xb7   : > { %1416 = vst.msk [vmem:[#allocation2 + $0x18] sm:$0xf] %vm12843_vm8, %v8662_v32  ;;  %v8673_v6 = vor.u32 %v3051_v55, %v3048_v51  ;;  %v2844_v8 = vsel %vm12521_vm9, %v8664_v56, 0  ;;  %vm12845_vm8 = vsmask.f32 3328  ;;  %v8691_v55 = vpack.c.b16 %v3008_v18, %v3007_v31 }
  0xb8   : > { %v654_v16 = vpop.f32.mrf.mxu0  ;;  %v3250_v26 = vunpack.c.l.b16 %v2844_v8  ;;  %vm12524_vm9 = vcmask 1043456   ;;  %v2646_v8 = vunpack.c.h.b16 %v8607_v42  ;;  %v822_v7 = vmax.f32 %v693_v33, 0.0  ;;  %v694_v37 = vpop.f32.mrf.mxu1 }
  0xb9   : > { %v655_v38 = vadd.f32 %v8327_v49, %v654_v16  ;;  %v3053_v51 = vsel %vm12845_vm8, %v8522_v48, %v8673_v6  ;;  %v5576_v63 = vpack.c.b16 %v5574_v10, %v5574_v10  ;;  %v8701_v16 = vsel %vm8358_vm2, %v2375_v0, %v8362_v12  ;;  %7407 = vmatmul.msk.bf16.gmra.mxu3 %vm12846_vm13, %v7861_v46 }
  0xba   : > { %3182 = vrot.lane.b32.xlu0 %v3053_v51, %s8191_s14  ;;  %v8694_v24 = vpack.c.b16 %v3250_v26, %v3249_v23  ;;  %v1030_v48 = vand.u32 15, %v940_v39  ;;  %v1955_v31 = vunpack.c.l.b16 %v1651_v1  ;;  %v8704_v29 = vpack.c.bf16 %v822_v7, %v822_v7  ;;  %v722_v7 = vpop.f32.mrf.mxu2 }
  0xbb   : > { %v807_v25 = vmax.f32 %v655_v38, 0.0  ;;  %v5582_v23 = vsel %vm12524_vm9, %v5576_v63, 0  ;;  %v1956_v26 = vunpack.c.h.b16 %v1651_v1  ;;  %v8711_v33 = vsel %vm8358_vm2, %v8355_v5, %v2391_v45 }
  0xbc   : > { %v12528_v18 = vrot.slane %v8694_v24, 5  ;;  %5590 = vmatpush.bf16.msrb.mxu2 %v5582_v23  ;;  %vm8713_vm8 = vcmp.ne.s32.totalorder %v1030_v48, 15  ;;  %v8720_v39 = vsel %vm8351_vm15, %v1656_v36, %v8338_v57  ;;  %vm12849_vm9 = vcmask 1042432   ;;  %1432 = vst.msk [vmem:[#allocation2 + $0x58] sm:$0xf] %vm12856_vm5, %v8704_v29 }
  0xbd   : > { %v871_v42 = vpack.c.bf16 %v807_v25, %v807_v25  ;;  %vm8728_vm13 = vcmp.ne.s32.totalorder %v2645_v43, %v8341_v58  ;;  %v12850_v1 = vmov 0  ;;  %vm8733_vm14 = vcmp.ne.s32.totalorder %v2646_v8, %v8347_v2  ;;  %vm2265_vm3 = vmpackc.low %vm8713_vm8, %vm8713_vm8 }
  0xbe   : > { %v3300_v63 = vsel %vm12849_vm9, %v3298_v50, %v12528_v18  ;;  %v12851_v1 = vsel %vm8728_vm13, 4294967295, %v12850_v1  ;;  %v12853_v45 = vmov 0  ;;  %v2652_v10 = vunpack.c.l.b16 %v8701_v16  ;;  %vm12857_vm9 = vmmov %vm12856_vm5  ;;  %v8746_v43 = vld [vmem:[#allocation2 + $0x18] sm:$0xf] }
  0xbf   : > { %12852 = vst [vmem:[#allocation14_spill] sm:$0xff] %v12851_v1  ;;  %v12854_v45 = vsel %vm8733_vm14, 4294967295, %v12853_v45  ;;  %v2993_v27 = vunpack.c.l.b16 %v8662_v32  ;;  %v2994_v50 = vunpack.c.l.b16 %v871_v42  ;;  %3333 = vrot.lane.b32.xlu1 %v3300_v63, %s8192_s15  ;;  %vm12537_vm5 = vmpackc.low %vm8656_vm12, %vm8651_vm1  ;;  %v12858_v38 = vmov 0  }
  0xc0   : > { %12855 = vst [vmem:[#allocation15_spill] sm:$0xff] %v12854_v45  ;;  %v2297_v51 = vsel %vm2265_vm3, 65537, %v12858_v38  ;;  %v657_v8 = vpop.f32.mrf.mxu0  ;;  %v2393_v32 = vrot.slane %v8641_v20, 4  ;;  %vm8757_vm8 = vcmp.ne.s32.totalorder %v1955_v31, %v8341_v58  ;;  %v12859_v46 = vmov 0  ;;  %v7627_v20 = vld [vmem:[%s12502_s3 + $0x20] sm:$0xf]  ;;  %v697_v14 = vpop.f32.mrf.mxu1  ;;  %vm12874_vm12 = vmpackc.low %vm8733_vm14, %vm8728_vm13 }
  0xc1   : > { %1417 = vst.msk [vmem:[#allocation2 + $0x1c] sm:$0xf] %vm12857_vm9, %v871_v42  ;;  %v2404_v25 = vshrl.u32 %v2297_v51, 16  ;;  %v12860_v46 = vsel %vm8757_vm8, 4294967295, %v12859_v46  ;;  %vm8762_vm9 = vcmp.ne.s32.totalorder %v1956_v26, %v8347_v2  ;;  %v12862_v48 = vmov 0 }
  0xc2   : > { %12861 = vst [vmem:[#allocation16_spill] sm:$0xff] %v12860_v46  ;;  %v12863_v48 = vsel %vm8762_vm9, 4294967295, %v12862_v48  ;;  %v1962_v23 = vunpack.c.l.b16 %v8720_v39  ;;  %v3023_v42 = vpack.c.b16 %v2994_v50, %v2993_v27  ;;  %v658_v0 = vadd.f32 %v8327_v49, %v657_v8  ;;  %v7414_v31 = vld [vmem:[%s12502_s3 + $0x14] sm:$0xf]  ;;  %vm12892_vm13 = vmpackc.low %vm8762_vm9, %vm8757_vm8 }
  0xc3   : > { %12864 = vst [vmem:[#allocation17_spill] sm:$0xff] %v12863_v48  ;;  %v695_v63 = vadd.f32 %v8327_v49, %v694_v37  ;;  %v1963_v26 = vunpack.c.h.b16 %v8720_v39  ;;  %v2845_v27 = vsel %vm12537_vm5, %v8746_v43, 0  ;;  %v3009_v50 = vunpack.c.l.b16 %v8704_v29 }
  0xc4   : > { %v5998_v8 = vunpack.c.l.b16 %v7627_v20  ;;  %v5282_v18 = vunpack.c.l.b16 %v7414_v31  ;;  %v808_v36 = vmax.f32 %v658_v0, 0.0  ;;  %v3055_v37 = vshrl.u32 %v3023_v42, 16 }
  0xc5   : > { %v3058_v61 = vshll.u32 %v3023_v42, 16  ;;  %v823_v62 = vmax.f32 %v695_v63, 0.0  ;;  %vm8788_vm6 = vcmp.ne.s32.totalorder %v2652_v10, %v8341_v58  ;;  %v12865_v52 = vmov 0 }
  0xc6   : > { %v6000_v39 = vpack.c.b16 %v5998_v8, %v5998_v8  ;;  %v5284_v19 = vpack.c.b16 %v5282_v18, %v5282_v18  ;;  %v12866_v52 = vsel %vm8788_vm6, 4294967295, %v12865_v52  ;;  %v8792_v29 = vrot.slane %v2404_v25, 7 }
  0xc7   : > { %12867 = vst [vmem:[#allocation18_spill] sm:$0xff] %v12866_v52  ;;  %v2407_v20 = vshll.u32 %v2297_v51, 16  ;;  %v8794_v0 = vpack.c.bf16 %v808_v36, %v808_v36  ;;  %v3057_v42 = vrot.slane %v3055_v37, 4  ;;  %v3060_v63 = vrot.slane %v3058_v61, 5 }
  0xc8   : > { %v887_v31 = vpack.c.bf16 %v823_v62, %v823_v62  ;;  %v1450_v4 = vld [vmem:[#allocation2 + $0x1c] sm:$0xf]  ;;  %v3251_v13 = vunpack.c.l.b16 %v2845_v27  ;;  %vm12868_vm5 = vcmask 1043456   ;;  %vm8799_vm7 = vcmp.ne.s32.totalorder %v1962_v23, %v8341_v58  ;;  %v659_v36 = vpop.f32.mrf.mxu0 }
  0xc9   : > { %v6102_v15 = vsel %vm12868_vm5, %v6000_v39, 0  ;;  %vm12869_vm3 = vmmov %vm12868_vm5  ;;  %v12870_v18 = vmov 0  ;;  %vm12873_vm1 = vcmask 60416   ;;  %v8805_v10 = vor.u32 %v3060_v63, %v3057_v42 }
  0xca   : > { %v5388_v8 = vsel %vm12869_vm3, %v5284_v19, 0  ;;  %v12871_v18 = vsel %vm8799_vm7, 4294967295, %v12870_v18  ;;  %1418 = vst.msk [vmem:[#allocation2 + $0x20] sm:$0xf] %vm12873_vm1, %v8794_v0  ;;  %v2846_v61 = vsel %vm12874_vm12, %v1450_v4, 0  ;;  %6110 = vmatpush.bf16.msrb.mxu3 %v6102_v15  ;;  %v3010_v62 = vunpack.c.l.b16 %v887_v31  ;;  %vm12875_vm5 = vmmov %vm12873_vm1 }
  0xcb   : > { %12872 = vst [vmem:[#allocation19_spill] sm:$0xff] %v12871_v18  ;;  %5396 = vmatpush.bf16.msrb.mxu1 %v5388_v8  ;;  %v942_v19 = vadd.s32 88, %v8292_v21  ;;  %v3252_v51 = vunpack.c.l.b16 %v2846_v61  ;;  %v698_v25 = vadd.f32 %v8327_v49, %v697_v14  ;;  %v723_v23 = vadd.f32 %v8327_v49, %v722_v7 }
  0xcc   : > { %1433 = vst.msk [vmem:[#allocation2 + $0x5c] sm:$0xf] %vm12875_vm5, %v887_v31  ;;  %vm8817_vm1 = vcmp.ne.s32.totalorder %v1963_v26, %v8347_v2  ;;  %v12876_v27 = vmov 0  ;;  %v660_v15 = vadd.f32 %v8327_v49, %v659_v36  ;;  %vm12879_vm12 = vsmask.f32 3328  ;;  %v724_v26 = vpop.f32.mrf.mxu2 }
  0xcd   : > { %v12877_v27 = vsel %vm8817_vm1, 4294967295, %v12876_v27  ;;  %v3062_v4 = vsel %vm12879_vm12, %v8673_v6, %v8805_v10  ;;  %v8825_v37 = vpack.c.b16 %v3010_v62, %v3009_v50  ;;  %v2409_v39 = vor.u32 %v2407_v20, %v8792_v29  ;;  %v699_v20 = vpop.f32.mrf.mxu1 }
  0xce   : > { %12878 = vst [vmem:[#allocation20_spill] sm:$0xff] %v12877_v27  ;;  %3184 = vrot.lane.b32.xlu0 %v3062_v4, %s8191_s14  ;;  %v8829_v14 = vpack.c.b16 %v3252_v51, %v3251_v13  ;;  %v824_v7 = vmax.f32 %v698_v25, 0.0  ;;  %v834_v42 = vmax.f32 %v723_v23, 0.0  ;;  %v2401_v63 = vsel %vm8358_vm2, %v2393_v32, %v8362_v12  ;;  %v7862_v13 = vld [vmem:[%s8255_s11 + $0xf0] sm:$0xff] }
  0xcf   : > { %v809_v31 = vmax.f32 %v660_v15, 0.0  ;;  %v12880_v8 = vunpack.c.h.b16 %v8701_v16  ;;  %v12881_v6 = vmov 0  ;;  %v2660_v50 = vunpack.c.h.b16 %v8711_v33 }
  0xd0   : > { %v1044_v61 = vand.u32 15, %v942_v19  ;;  %v12547_v32 = vrot.slane %v8829_v14, 5  ;;  %v12884_v62 = vunpack.c.l.b16 %v8711_v33  ;;  %v12885_v16 = vmov 0 }
  0xd1   : > { %vm8837_vm3 = vcmp.ne.s32.totalorder %v12880_v8, %v8347_v2  ;;  %v8855_v36 = vpack.c.bf16 %v824_v7, %v824_v7  ;;  %v2411_v51 = vrot.slane %v8792_v29, 4  ;;  %v873_v19 = vpack.c.bf16 %v809_v31, %v809_v31  ;;  %v1451_v31 = vld [vmem:[#allocation2 + $0x20] sm:$0xf] }
  0xd2   : > { %v12882_v6 = vsel %vm8837_vm3, 4294967295, %v12881_v6  ;;  %vm8851_vm12 = vcmp.ne.s32.totalorder %v12884_v62, %v8341_v58  ;;  %vm12888_vm5 = vcmask 261120   ;;  %v8866_v33 = vsel %vm8358_vm2, %v8355_v5, %v2409_v39 }
  0xd3   : > { %12883 = vst [vmem:[#allocation21_spill] sm:$0xff] %v12882_v6  ;;  %v12886_v16 = vsel %vm8851_vm12, 4294967295, %v12885_v16  ;;  %7408 = vmatmul.msk.bf16.gmra.mxu3 %vm12888_vm5, %v7862_v13  ;;  %v2666_v25 = vunpack.c.l.b16 %v2401_v63  ;;  %vm1390_vm14 = vcmp.ne.s32.totalorder %v1044_v61, 15  ;;  %v12889_v23 = vrot.slane %v8694_v24, 5 }
  0xd4   : > { %12887 = vst [vmem:[#allocation22_spill] sm:$0xff] %v12886_v16  ;;  %vm12890_vm4 = vcmask 1042432   ;;  %vm12891_vm10 = vcmask 60416   ;;  %v8875_v15 = vpack.c.bf16 %v834_v42, %v834_v42  ;;  %v2667_v4 = vunpack.c.h.b16 %v2401_v63  ;;  %vm2267_vm5 = vmpackc.low %vm1390_vm14, %vm1390_vm14  ;;  %v727_v8 = vpop.f32.mrf.mxu2 }
  0xd5   : > { %v3302_v29 = vsel %vm12890_vm4, %v12889_v23, %v12547_v32  ;;  %1434 = vst.msk [vmem:[#allocation2 + $0x60] sm:$0xf] %vm12891_vm10, %v8855_v36  ;;  %v2162_v39 = vsel %vm12892_vm13, %v8664_v56, 0  ;;  %v2995_v7 = vunpack.c.l.b16 %v8794_v0  ;;  %vm12893_vm11 = vmmov %vm12891_vm10  ;;  %v2996_v24 = vunpack.c.l.b16 %v873_v19  ;;  %v662_v0 = vpop.f32.mrf.mxu0 }
  0xd6   : > { %1419 = vst.msk [vmem:[#allocation2 + $0x24] sm:$0xf] %vm12893_vm11, %v873_v19  ;;  %3335 = vrot.lane.b32.xlu1 %v3302_v29, %s8192_s15  ;;  %vm12554_vm4 = vmpackc.low %vm8837_vm3, %vm8788_vm6  ;;  %v2299_v42 = vsel %vm2267_vm5, 65537, %v12858_v38  ;;  %vm8898_vm11 = vcmp.ne.s32.totalorder %v2660_v50, %v8347_v2  ;;  %v12895_v63 = vmov 0  ;;  %v8908_v13 = vsel %vm8358_vm2, %v2411_v51, %v8362_v12 }
  0xd7   : > { %vm12894_vm14 = vmpackc.low %vm8817_vm1, %vm8799_vm7  ;;  %v12896_v63 = vsel %vm8898_vm11, 4294967295, %v12895_v63  ;;  %3891 = vst.msk [vmem:[#allocation2 + $0x90] sm:$0xf] %vm12891_vm10, %v8875_v15  ;;  %v2422_v61 = vshrl.u32 %v2299_v42, 16  ;;  %v3024_v62 = vpack.c.b16 %v2996_v24, %v2995_v7  ;;  %v700_v19 = vadd.f32 %v8327_v49, %v699_v20 }
  0xd8   : > { %v2163_v56 = vsel %vm12894_vm14, %v8746_v43, 0  ;;  %12897 = vst [vmem:[#allocation23_spill] sm:$0xff] %v12896_v63  ;;  %v663_v43 = vadd.f32 %v8327_v49, %v662_v0  ;;  %v725_v50 = vadd.f32 %v8327_v49, %v724_v26  ;;  %v2847_v23 = vsel %vm12554_vm4, %v1451_v31, 0  ;;  %v702_v31 = vpop.f32.mrf.mxu1  ;;  %vm12555_vm14 = vmpackc.low %vm8898_vm11, %vm8851_vm12 }
  0xd9   : > { %v3011_v29 = vunpack.c.l.b16 %v8855_v36  ;;  %v2911_v32 = vunpack.c.l.b16 %v2162_v39  ;;  %v2912_v51 = vunpack.c.l.b16 %v2163_v56  ;;  %v3064_v27 = vshrl.u32 %v3024_v62, 16  ;;  %vm12904_vm4 = vmmov %vm12891_vm10 }
  0xda   : > { %v810_v18 = vmax.f32 %v663_v43, 0.0  ;;  %v3067_v7 = vshll.u32 %v3024_v62, 16  ;;  %v825_v24 = vmax.f32 %v700_v19, 0.0  ;;  %vm8920_vm13 = vcmp.ne.s32.totalorder %v2666_v25, %v8341_v58 }
  0xdb   : > { %v12898_v20 = vmov 0  ;;  %vm8925_vm5 = vcmp.ne.s32.totalorder %v2667_v4, %v8347_v2  ;;  %v12901_v26 = vmov 0  ;;  %v835_v36 = vmax.f32 %v725_v50, 0.0 }
  0xdc   : > { %v12899_v20 = vsel %vm8920_vm13, 4294967295, %v12898_v20  ;;  %v12902_v26 = vsel %vm8925_vm5, 4294967295, %v12901_v26  ;;  %v8933_v39 = vrot.slane %v2422_v61, 7  ;;  %v2425_v56 = vshll.u32 %v2299_v42, 16 }
  0xdd   : > { %12900 = vst [vmem:[#allocation24_spill] sm:$0xff] %v12899_v20  ;;  %v8935_v0 = vpack.c.b16 %v2912_v51, %v2911_v32  ;;  %v8937_v25 = vpack.c.bf16 %v810_v18, %v810_v18  ;;  %v3066_v62 = vrot.slane %v3064_v27, 4  ;;  %v3069_v43 = vrot.slane %v3067_v7, 5  ;;  %v1452_v19 = vld [vmem:[#allocation2 + $0x24] sm:$0xf]  ;;  %v664_v42 = vpop.f32.mrf.mxu0 }
  0xde   : > { %12903 = vst [vmem:[#allocation25_spill] sm:$0xff] %v12902_v26  ;;  %v889_v4 = vpack.c.bf16 %v825_v24, %v825_v24  ;;  %v3253_v46 = vunpack.c.l.b16 %v2847_v23  ;;  %v4138_v48 = vunpack.c.l.b16 %v8875_v15  ;;  %v899_v52 = vpack.c.bf16 %v835_v36, %v835_v36 }
  0xdf   : > { %v939_v6 = vadd.s32 64, %v8292_v21  ;;  %1420 = vst.msk [vmem:[#allocation2 + $0x28] sm:$0xf] %vm12891_vm10, %v8937_v25  ;;  %v8943_v61 = vor.u32 %v3069_v43, %v3066_v62  ;;  %v2848_v18 = vsel %vm12555_vm14, %v1452_v19, 0  ;;  %v944_v32 = vadd.s32 104, %v8292_v21  ;;  %vm12906_vm14 = vmmov %vm12904_vm4  ;;  %v729_v19 = vpop.f32.mrf.mxu2 }
  0xe0   : > { %v3012_v27 = vunpack.c.l.b16 %v889_v4  ;;  %v3254_v50 = vunpack.c.l.b16 %v2848_v18  ;;  %1435 = vst.msk [vmem:[#allocation2 + $0x64] sm:$0xf] %vm12904_vm4, %v889_v4  ;;  %v4139_v15 = vunpack.c.l.b16 %v899_v52  ;;  %v703_v23 = vadd.f32 %v8327_v49, %v702_v31  ;;  %v704_v16 = vpop.f32.mrf.mxu1 }
  0xe1   : > { %v728_v51 = vadd.f32 %v8327_v49, %v727_v8  ;;  %v665_v7 = vadd.f32 %v8327_v49, %v664_v42  ;;  %vm12905_vm10 = vsmask.f32 3328  ;;  %3892 = vst.msk [vmem:[#allocation2 + $0x94] sm:$0xf] %vm12906_vm14, %v899_v52  ;;  %v2427_v62 = vor.u32 %v2425_v56, %v8933_v39 }
  0xe2   : > { %v3071_v24 = vsel %vm12905_vm10, %v8805_v10, %v8943_v61  ;;  %v8958_v36 = vpack.c.b16 %v3012_v27, %v3011_v29  ;;  %v8963_v43 = vpack.c.b16 %v3254_v50, %v3253_v46  ;;  %v8965_v31 = vpack.c.b16 %v4139_v15, %v4138_v48  ;;  %v7863_v10 = vld [vmem:[%s8255_s11 + $0xf8] sm:$0xff] }
  0xe3   : > { %3186 = vrot.lane.b32.xlu0 %v3071_v24, %s8191_s14  ;;  %v826_v4 = vmax.f32 %v703_v23, 0.0  ;;  %v836_v8 = vmax.f32 %v728_v51, 0.0  ;;  %v811_v18 = vmax.f32 %v665_v7, 0.0  ;;  %v2674_v42 = vunpack.c.h.b16 %v8866_v33 }
  0xe4   : > { %v2680_v29 = vunpack.c.l.b16 %v8908_v13  ;;  %v1058_v27 = vand.u32 15, %v944_v32  ;;  %v12561_v52 = vrot.slane %v8963_v43, 5  ;;  %v1023_v46 = vand.u32 15, %v939_v6 }
  0xe5   : > { %v8971_v56 = vpack.c.bf16 %v826_v4, %v826_v4  ;;  %v8973_v24 = vpack.c.bf16 %v836_v8, %v836_v8  ;;  %v875_v48 = vpack.c.bf16 %v811_v18, %v811_v18  ;;  %vm12907_vm4 = vcmask 261120  }
  0xe6   : > { %7409 = vmatmul.msk.bf16.gmra.mxu3 %vm12907_vm4, %v7863_v10  ;;  %v8979_v50 = vsel %vm8358_vm2, %v8355_v5, %v2427_v62  ;;  %v2681_v15 = vunpack.c.h.b16 %v8908_v13  ;;  %vm8982_vm14 = vcmp.ne.s32.totalorder %v1058_v27, 15  ;;  %v12910_v32 = vrot.slane %v8829_v14, 5  ;;  %v1453_v4 = vld [vmem:[#allocation2 + $0x28] sm:$0xf] }
  0xe7   : > { %vm12911_vm10 = vcmask 1042432   ;;  %vm12912_vm7 = vcmask 60416   ;;  %v12913_v13 = vunpack.c.l.b16 %v8414_v47  ;;  %v12914_v51 = vunpack.c.l.b16 %v8616_v44  ;;  %v667_v44 = vpop.f32.mrf.mxu0 }
  0xe8   : > { %v3304_v6 = vsel %vm12911_vm10, %v12910_v32, %v12561_v52  ;;  %1436 = vst.msk [vmem:[#allocation2 + $0x68] sm:$0xf] %vm12912_vm7, %v8971_v56  ;;  %v2997_v62 = vunpack.c.l.b16 %v8937_v25  ;;  %vm12915_vm1 = vmmov %vm12912_vm7  ;;  %v2998_v14 = vunpack.c.l.b16 %v875_v48  ;;  %v12916_v8 = vunpack.c.l.b16 %v8866_v33 }
  0xe9   : > { %v9001_v7 = vpack.c.b16 %v12914_v51, %v12913_v13  ;;  %1421 = vst.msk [vmem:[#allocation2 + $0x2c] sm:$0xf] %vm12915_vm1, %v875_v48  ;;  %3337 = vrot.lane.b32.xlu1 %v3304_v6, %s8192_s15  ;;  %v12917_v18 = vmov 0  ;;  %vm9014_vm7 = vcmp.ne.s32.totalorder %v2674_v42, %v8347_v2  ;;  %v12920_v47 = vmov 0  ;;  %vm2269_vm1 = vmpackc.low %vm8982_vm14, %vm8982_vm14  ;;  %v732_v13 = vpop.f32.mrf.mxu2 }
  0xea   : > { %vm9009_vm10 = vcmp.ne.s32.totalorder %v12916_v8, %v8341_v58  ;;  %v12921_v47 = vsel %vm9014_vm7, 4294967295, %v12920_v47  ;;  %vm12923_vm4 = vcmask 60416   ;;  %v2687_v25 = vunpack.c.l.b16 %v8979_v50 }
  0xeb   : > { %v12918_v18 = vsel %vm9009_vm10, 4294967295, %v12917_v18  ;;  %12922 = vst [vmem:[#allocation27_spill] sm:$0xff] %v12921_v47  ;;  %v2688_v33 = vunpack.c.h.b16 %v8979_v50  ;;  %v2301_v10 = vsel %vm2269_vm1, 65537, %v12858_v38  ;;  %vm9026_vm8 = vcmp.ne.s32.totalorder %v1023_v46, 0  ;;  %vm12932_vm1 = vmpackc.low %vm8925_vm5, %vm8920_vm13 }
  0xec   : > { %12919 = vst [vmem:[#allocation26_spill] sm:$0xff] %v12918_v18  ;;  %v3025_v42 = vpack.c.b16 %v2998_v14, %v2997_v62  ;;  %v668_v48 = vadd.f32 %v8327_v49, %v667_v44  ;;  %v705_v23 = vadd.f32 %v8327_v49, %v704_v16  ;;  %v730_v32 = vadd.f32 %v8327_v49, %v729_v19  ;;  %v707_v44 = vpop.f32.mrf.mxu1  ;;  %vm12934_vm13 = vmpackc.low %vm9014_vm7, %vm9009_vm10 }
  0xed   : > { %3893 = vst.msk [vmem:[#allocation2 + $0x98] sm:$0xf] %vm12923_vm4, %v8973_v24  ;;  %vm9034_vm14 = vcmp.ne.s32.totalorder %v2680_v29, %v8341_v58  ;;  %v12926_v6 = vmov 0  ;;  %vm9039_vm4 = vcmp.ne.s32.totalorder %v2681_v15, %v8347_v2  ;;  %v12929_v50 = vmov 0 }
  0xee   : > { %v12927_v6 = vsel %vm9034_vm14, 4294967295, %v12926_v6  ;;  %v12930_v50 = vsel %vm9039_vm4, 4294967295, %v12929_v50  ;;  %v2849_v46 = vsel %vm12932_vm1, %v1453_v4, 0  ;;  %v2429_v16 = vrot.slane %v8933_v39, 4  ;;  %vm12949_vm7 = vmpackc.low %vm9039_vm4, %vm9034_vm14 }
  0xef   : > { %12928 = vst [vmem:[#allocation28_spill] sm:$0xff] %v12927_v6  ;;  %v2440_v19 = vshrl.u32 %v2301_v10, 16  ;;  %v2443_v51 = vshll.u32 %v2301_v10, 16  ;;  %v812_v29 = vmax.f32 %v668_v48, 0.0  ;;  %v3073_v62 = vshrl.u32 %v3025_v42, 16 }
  0xf0   : > { %12931 = vst [vmem:[#allocation29_spill] sm:$0xff] %v12930_v50  ;;  %v3076_v14 = vshll.u32 %v3025_v42, 16  ;;  %v827_v8 = vmax.f32 %v705_v23, 0.0  ;;  %v3013_v15 = vunpack.c.l.b16 %v8971_v56  ;;  %v4140_v52 = vunpack.c.l.b16 %v8973_v24  ;;  %v1454_v42 = vld [vmem:[#allocation2 + $0x2c] sm:$0xf] }
  0xf1   : > { %v837_v4 = vmax.f32 %v730_v32, 0.0  ;;  %v9055_v20 = vrot.slane %v2440_v19, 7  ;;  %v9057_v39 = vpack.c.bf16 %v812_v29, %v812_v29  ;;  %v3075_v10 = vrot.slane %v3073_v62, 4  ;;  %v669_v19 = vpop.f32.mrf.mxu0 }
  0xf2   : > { %v3078_v48 = vrot.slane %v3076_v14, 5  ;;  %v891_v26 = vpack.c.bf16 %v827_v8, %v827_v8  ;;  %v3255_v23 = vunpack.c.l.b16 %v2849_v46  ;;  %v9062_v1 = vsel %vm8358_vm2, %v2429_v16, %v8362_v12 }
  0xf3   : > { %v901_v63 = vpack.c.bf16 %v837_v4, %v837_v4  ;;  %v2445_v56 = vor.u32 %v2443_v51, %v9055_v20  ;;  %vm12933_vm9 = vcmask 60416   ;;  %v2850_v32 = vsel %vm12934_vm13, %v1454_v42, 0 }
  0xf4   : > { %1422 = vst.msk [vmem:[#allocation2 + $0x30] sm:$0xf] %vm12933_vm9, %v9057_v39  ;;  %v9070_v24 = vor.u32 %v3078_v48, %v3075_v10  ;;  %v3014_v46 = vunpack.c.l.b16 %v891_v26  ;;  %v946_v16 = vadd.s32 120, %v8292_v21  ;;  %v3256_v51 = vunpack.c.l.b16 %v2850_v32  ;;  %vm12935_vm5 = vmmov %vm12933_vm9  ;;  %v709_v42 = vpop.f32.mrf.mxu1 }
  0xf5   : > { %1437 = vst.msk [vmem:[#allocation2 + $0x6c] sm:$0xf] %vm12935_vm5, %v891_v26  ;;  %v4141_v29 = vunpack.c.l.b16 %v901_v63  ;;  %v708_v62 = vadd.f32 %v8327_v49, %v707_v44  ;;  %v733_v14 = vadd.f32 %v8327_v49, %v732_v13  ;;  %v670_v8 = vadd.f32 %v8327_v49, %v669_v19  ;;  %vm12937_vm13 = vmmov %vm12935_vm5 }
  0xf6   : > { %vm12936_vm9 = vsmask.f32 3328  ;;  %v9085_v10 = vpack.c.b16 %v3014_v46, %v3013_v15  ;;  %3894 = vst.msk [vmem:[#allocation2 + $0x9c] sm:$0xf] %vm12937_vm13, %v901_v63  ;;  %vm9089_vm1 = vcmp.ne.s32.totalorder %v2687_v25, %v8341_v58  ;;  %v12938_v48 = vmov 0  ;;  %vm12941_vm5 = vmpackc.low %vm9026_vm8, %vm9026_vm8  ;;  %v734_v25 = vpop.f32.mrf.mxu2 }
  0xf7   : > { %v3080_v4 = vsel %vm12936_vm9, %v8943_v61, %v9070_v24  ;;  %v12939_v48 = vsel %vm9089_vm1, 4294967295, %v12938_v48  ;;  %v9099_v49 = vsel %vm12941_vm5, 65537, %v12858_v38  ;;  %v9102_v26 = vpack.c.b16 %v3256_v51, %v3255_v23 }
  0xf8   : > { %12940 = vst [vmem:[#allocation30_spill] sm:$0xff] %v12939_v48  ;;  %3188 = vrot.lane.b32.xlu2 %v3080_v4, %s8191_s14  ;;  %v9104_v61 = vpack.c.b16 %v4141_v29, %v4140_v52  ;;  %v828_v63 = vmax.f32 %v708_v62, 0.0  ;;  %v838_v13 = vmax.f32 %v733_v14, 0.0  ;;  %v813_v44 = vmax.f32 %v670_v8, 0.0 }
  0xf9   : > { %vm9107_vm9 = vcmp.ne.s32.totalorder %v2688_v33, %v8347_v2  ;;  %v12942_v15 = vmov 0  ;;  %v9114_v27 = vsel %vm8358_vm2, %v8355_v5, %v2445_v56  ;;  %v2694_v23 = vunpack.c.l.b16 %v9062_v1 }
  0xfa   : > { %v12943_v15 = vsel %vm9107_vm9, 4294967295, %v12942_v15  ;;  %v12570_v52 = vrot.slane %v9102_v26, 5  ;;  %v9122_v32 = vpack.c.bf16 %v828_v63, %v828_v63  ;;  %v9124_v33 = vpack.c.bf16 %v838_v13, %v838_v13  ;;  %v672_v63 = vpop.f32.mrf.mxu0 }
  0xfb   : > { %12944 = vst [vmem:[#allocation31_spill] sm:$0xff] %v12943_v15  ;;  %v1072_v46 = vand.u32 15, %v946_v16  ;;  %v877_v19 = vpack.c.bf16 %v813_v44, %v813_v44  ;;  %v2695_v51 = vunpack.c.h.b16 %v9062_v1  ;;  %v2447_v56 = vrot.slane %v9055_v20, 4  ;;  %v1455_v4 = vld [vmem:[#allocation2 + $0x30] sm:$0xf] }
  0xfc   : > { %v2999_v62 = vunpack.c.l.b16 %v9057_v39  ;;  %v12945_v14 = vrot.slane %v8963_v43, 5  ;;  %vm12946_vm13 = vcmask 1042432   ;;  %vm12947_vm5 = vcmask 60416   ;;  %v712_v50 = vpop.f32.mrf.mxu1 }
  0xfd   : > { %1438 = vst.msk [vmem:[#allocation2 + $0x70] sm:$0xf] %vm12947_vm5, %v9122_v32  ;;  %vm1394_vm8 = vcmp.ne.s32.totalorder %v1072_v46, 15  ;;  %v9138_v16 = vadd.s32 136, %v8292_v21  ;;  %vm12948_vm10 = vmmov %vm12947_vm5  ;;  %v3000_v1 = vunpack.c.l.b16 %v877_v19  ;;  %v9147_v20 = vsel %vm12949_vm7, %v1455_v4, 0  ;;  %v762_v46 = vpop.f32.mrf.mxu3 }
  0xfe   : > { %v3306_v8 = vsel %vm12946_vm13, %v12945_v14, %v12570_v52  ;;  %1423 = vst.msk [vmem:[#allocation2 + $0x34] sm:$0xf] %vm12948_vm10, %v877_v19  ;;  %v2701_v43 = vunpack.c.l.b16 %v9114_v27  ;;  %v2702_v39 = vunpack.c.h.b16 %v9114_v27  ;;  %vm2271_vm13 = vmpackc.low %vm1394_vm8, %vm1394_vm8  ;;  %v3015_v13 = vunpack.c.l.b16 %v9122_v32  ;;  %v9166_v27 = vld [vmem:[%s12501_s2] ss:$0 sm:$0xff] }
  0xff   : > { %3339 = vrot.lane.b32.xlu0 %v3306_v8, %s8192_s15  ;;  %vm12950_vm10 = vmmov %vm12947_vm5  ;;  %v4142_v44 = vunpack.c.l.b16 %v9124_v33  ;;  %v9156_v19 = vsel %vm2271_vm13, 65537, %v12858_v38  ;;  %v9161_v14 = vsel %vm8358_vm2, %v2447_v56, %v8362_v12  ;;  %v3026_v8 = vpack.c.b16 %v3000_v1, %v2999_v62  ;;  %v737_v1 = vpop.f32.mrf.mxu2 }
 0x100   : > { %3895 = vst.msk [vmem:[#allocation2 + $0xa0] sm:$0xf] %vm12950_vm10, %v9124_v33  ;;  %v673_v32 = vadd.f32 %v9166_v27, %v672_v63  ;;  %v710_v4 = vadd.f32 %v9166_v27, %v709_v42  ;;  %v735_v33 = vadd.f32 %v9166_v27, %v734_v25  ;;  %vm9172_vm7 = vcmp.ne.s32.totalorder %v2694_v23, %v8341_v58  ;;  %vm12579_vm13 = vmpackc.low %vm9107_vm9, %vm9089_vm1 }
 0x101   : > { %v12951_v29 = vmov 0  ;;  %vm9177_vm8 = vcmp.ne.s32.totalorder %v2695_v51, %v8347_v2  ;;  %v12953_v56 = vmov 0  ;;  %v3257_v62 = vunpack.c.l.b16 %v9147_v20 }
 0x102   : > { %v12952_v29 = vsel %vm9172_vm7, 4294967295, %v12951_v29  ;;  %v12954_v56 = vsel %vm9177_vm8, 4294967295, %v12953_v56  ;;  %vm12578_vm5 = vcmask 191488   ;;  %v2458_v63 = vshrl.u32 %v9156_v19, 16  ;;  %vm12969_vm14 = vmpackc.low %vm9177_vm8, %vm9172_vm7 }
 0x103   : > { %v814_v52 = vmax.f32 %v673_v32, 0.0  ;;  %v3082_v25 = vshrl.u32 %v3026_v8, 16  ;;  %v3085_v6 = vshll.u32 %v3026_v8, 16  ;;  %v829_v23 = vmax.f32 %v710_v4, 0.0  ;;  %286 = vst.msk [vmem:[#allocation3] sm:$0xf] %vm12578_vm5, %v12858_v38 }
 0x104   : > { %v839_v51 = vmax.f32 %v735_v33, 0.0  ;;  %287 = vst.msk [vmem:[#allocation3 + $0x4] sm:$0xf] %vm12578_vm5, %v12858_v38  ;;  %v3109_v20 = vshrl.u32 %v8547_v11, 16  ;;  %v2461_v32 = vshll.u32 %v9156_v19, 16  ;;  %v3112_v33 = vshll.u32 %v8547_v11, 16 }
 0x105   : > { %v9195_v4 = vpack.c.bf16 %v814_v52, %v814_v52  ;;  %v3084_v42 = vrot.slane %v3082_v25, 4  ;;  %v3087_v18 = vrot.slane %v3085_v6, 5  ;;  %v893_v47 = vpack.c.bf16 %v829_v23, %v829_v23  ;;  %288 = vst.msk [vmem:[#allocation3 + $0x88] sm:$0xf] %vm12578_vm5, %v12858_v38  ;;  %v1456_v45 = vld [vmem:[#allocation2 + $0x34] sm:$0xf] }
 0x106   : > { %v903_v40 = vpack.c.bf16 %v839_v51, %v839_v51  ;;  %289 = vst.msk [vmem:[#allocation3 + $0x8c] sm:$0xf] %vm12578_vm5, %v12858_v38  ;;  %v9202_v41 = vrot.slane %v2458_v63, 7  ;;  %v2852_v6 = vsel %vm12579_vm13, %v1456_v45, 0  ;;  %v3111_v23 = vrot.slane %v3109_v20, 4  ;;  %v674_v51 = vpop.f32.mrf.mxu0  ;;  %vm12955_vm5 = vmmov %vm12950_vm10 }
 0x107   : > { %1424 = vst.msk [vmem:[#allocation2 + $0x38] sm:$0xf] %vm12950_vm10, %v9195_v4  ;;  %v9207_v52 = vor.u32 %v3087_v18, %v3084_v42  ;;  %v3016_v25 = vunpack.c.l.b16 %v893_v47  ;;  %v3258_v8 = vunpack.c.l.b16 %v2852_v6  ;;  %v763_v63 = vadd.f32 %v9166_v27, %v762_v46  ;;  %v7899_v18 = vld [vmem:[%s12502_s3] sm:$0xff]  ;;  %v7935_v42 = vld [vmem:[%s12502_s3 + $0x18] sm:$0xff] }
 0x108   : > { %1439 = vst.msk [vmem:[#allocation2 + $0x74] sm:$0xf] %vm12955_vm5, %v893_v47  ;;  %v4143_v11 = vunpack.c.l.b16 %v903_v40  ;;  %v713_v19 = vadd.f32 %v9166_v27, %v712_v50  ;;  %v675_v45 = vadd.f32 %v9166_v27, %v674_v51  ;;  %vm12956_vm10 = vsmask.f32 3328  ;;  %5591 = vmatpush.bf16.msrb.mxu2 %v7899_v18  ;;  %6111 = vmatpush.bf16.msrb.mxu3 %v7935_v42 }
 0x109   : > { %v3089_v20 = vsel %vm12956_vm10, %v9070_v24, %v9207_v52  ;;  %v9227_v47 = vpack.c.b16 %v3016_v25, %v3015_v13  ;;  %3896 = vst.msk [vmem:[#allocation2 + $0xa4] sm:$0xf] %vm12955_vm5, %v903_v40  ;;  %vm9231_vm13 = vcmp.ne.s32.totalorder %v2701_v43, %v8341_v58  ;;  %v12957_v50 = vmov 0  ;;  %v764_v13 = vpop.f32.mrf.mxu3 }
 0x10a   : > { %v12958_v50 = vsel %vm9231_vm13, 4294967295, %v12957_v50  ;;  %vm9236_vm1 = vcmp.ne.s32.totalorder %v2702_v39, %v8347_v2  ;;  %v12960_v46 = vmov 0  ;;  %v738_v6 = vadd.f32 %v9166_v27, %v737_v1  ;;  %3190 = vrot.lane.b32.xlu1 %v3089_v20, %s8191_s14  ;;  %v7901_v39 = vld [vmem:[%s12502_s3 + $0xc] sm:$0xff] }
 0x10b   : > { %12959 = vst [vmem:[#allocation32_spill] sm:$0xff] %v12958_v50  ;;  %v12961_v46 = vsel %vm9236_vm1, 4294967295, %v12960_v46  ;;  %v9242_v51 = vpack.c.b16 %v3258_v8, %v3257_v62  ;;  %v9244_v24 = vpack.c.b16 %v4143_v11, %v4142_v44  ;;  %vm12963_vm10 = vcmask 191488   ;;  %v714_v8 = vpop.f32.mrf.mxu1  ;;  %5397 = vmatpush.bf16.msrb.mxu1 %v7901_v39  ;;  %vm12986_vm8 = vmpackc.low %vm9236_vm1, %vm9231_vm13 }
 0x10c   : > { %12962 = vst [vmem:[#allocation33_spill] sm:$0xff] %v12961_v46  ;;  %v850_v40 = vmax.f32 %v763_v63, 0.0  ;;  %v830_v43 = vmax.f32 %v713_v19, 0.0  ;;  %v815_v25 = vmax.f32 %v675_v45, 0.0  ;;  %vm12964_vm5 = vmmov %vm12963_vm10  ;;  %v840_v1 = vmax.f32 %v738_v6, 0.0  ;;  %v739_v45 = vpop.f32.mrf.mxu2 }
 0x10d   : > { %290 = vst.msk [vmem:[#allocation3 + $0x110] sm:$0xf] %vm12963_vm10, %v12858_v38  ;;  %v765_v62 = vadd.f32 %v9166_v27, %v764_v13  ;;  %v3114_v44 = vrot.slane %v3112_v33, 5  ;;  %v12585_v11 = vrot.slane %v9242_v51, 5  ;;  %v715_v18 = vadd.f32 %v9166_v27, %v714_v8 }
 0x10e   : > { %291 = vst.msk [vmem:[#allocation3 + $0x114] sm:$0xf] %vm12964_vm5, %v12858_v38  ;;  %v914_v19 = vpack.c.bf16 %v850_v40, %v850_v40  ;;  %v894_v63 = vpack.c.bf16 %v830_v43, %v830_v43  ;;  %v879_v20 = vpack.c.bf16 %v815_v25, %v815_v25  ;;  %v740_v42 = vadd.f32 %v9166_v27, %v739_v45  ;;  %v1457_v40 = vld [vmem:[#allocation2 + $0x38] sm:$0xf]  ;;  %v677_v25 = vpop.f32.mrf.mxu0 }
 0x10f   : > { %v851_v6 = vmax.f32 %v765_v62, 0.0  ;;  %v2463_v33 = vor.u32 %v2461_v32, %v9202_v41  ;;  %v3001_v13 = vunpack.c.l.b16 %v9195_v4  ;;  %v12965_v48 = vrot.slane %v9102_v26, 5 }
 0x110   : > { %vm12966_vm5 = vcmask 1042432   ;;  %vm12967_vm10 = vcmask 60416   ;;  %v904_v43 = vpack.c.bf16 %v840_v1, %v840_v1  ;;  %v831_v8 = vmax.f32 %v715_v18, 0.0 }
 0x111   : > { %v3308_v15 = vsel %vm12966_vm5, %v12965_v48, %v12585_v11  ;;  %3907 = vst.msk [vmem:[#allocation2 + $0xd0] sm:$0xf] %vm12967_vm10, %v914_v19  ;;  %vm12968_vm9 = vmmov %vm12967_vm10  ;;  %v3002_v39 = vunpack.c.l.b16 %v879_v20  ;;  %v2853_v32 = vsel %vm12969_vm14, %v1457_v40, 0  ;;  %v4154_v4 = vunpack.c.l.b16 %v914_v19 }
 0x112   : > { %1425 = vst.msk [vmem:[#allocation2 + $0x3c] sm:$0xf] %vm12968_vm9, %v879_v20  ;;  %3341 = vrot.lane.b32.xlu2 %v3308_v15, %s8192_s15  ;;  %v915_v26 = vpack.c.bf16 %v851_v6, %v851_v6  ;;  %vm12970_vm5 = vmmov %vm12968_vm9  ;;  %v3017_v48 = vunpack.c.l.b16 %v894_v63  ;;  %v9277_v62 = vor.u32 %v3114_v44, %v3111_v23  ;;  %v895_v1 = vpack.c.bf16 %v831_v8, %v831_v8  ;;  %v3181_v8 = vpop.permute.xlu2 %3180 }
 0x113   : > { %1440 = vst.msk [vmem:[#allocation2 + $0x78] sm:$0xf] %vm12970_vm5, %v894_v63  ;;  %v841_v18 = vmax.f32 %v740_v42, 0.0  ;;  %v3027_v45 = vpack.c.b16 %v3002_v39, %v3001_v13  ;;  %v678_v20 = vadd.f32 %v9166_v27, %v677_v25  ;;  %vm12971_vm10 = vmmov %vm12970_vm5  ;;  %v2464_v19 = vsel %vm8358_vm2, %v8355_v5, %v2463_v33 }
 0x114   : > { %3897 = vst.msk [vmem:[#allocation2 + $0xa8] sm:$0xf] %vm12971_vm10, %v904_v43  ;;  %v4155_v15 = vunpack.c.l.b16 %v915_v26  ;;  %v12972_v6 = vunpack.c.l.b16 %v9161_v14  ;;  %v12973_v63 = vmov 0  ;;  %v3259_v23 = vunpack.c.l.b16 %v2853_v32  ;;  %vm12977_vm10 = vmmov %vm12970_vm5 }
 0x115   : > { %v4144_v44 = vunpack.c.l.b16 %v904_v43  ;;  %3908 = vst.msk [vmem:[#allocation2 + $0xd4] sm:$0xf] %vm12970_vm5, %v915_v26  ;;  %v3018_v42 = vunpack.c.l.b16 %v895_v1  ;;  %v905_v13 = vpack.c.bf16 %v841_v18, %v841_v18  ;;  %v816_v40 = vmax.f32 %v678_v20, 0.0  ;;  %vm12978_vm7 = vmmov %vm12970_vm5 }
 0x116   : > { %vm9287_vm14 = vcmp.ne.s32.totalorder %v12972_v6, %v8341_v58  ;;  %v3091_v39 = vshrl.u32 %v3027_v45, 16  ;;  %v3094_v25 = vshll.u32 %v3027_v45, 16  ;;  %v9292_v11 = vpack.c.b16 %v4155_v15, %v4154_v4  ;;  %1441 = vst.msk [vmem:[#allocation2 + $0x7c] sm:$0xf] %vm12977_vm10, %v895_v1  ;;  %v767_v15 = vpop.f32.mrf.mxu3  ;;  %vm12984_vm10 = vmmov %vm12968_vm9 }
 0x117   : > { %v12974_v63 = vsel %vm9287_vm14, 4294967295, %v12973_v63  ;;  %v9299_v33 = vpack.c.b16 %v3018_v42, %v3017_v48  ;;  %3898 = vst.msk [vmem:[#allocation2 + $0xac] sm:$0xf] %vm12978_vm7, %v905_v13  ;;  %v4145_v43 = vunpack.c.l.b16 %v905_v13  ;;  %v12979_v32 = vunpack.c.h.b16 %v9161_v14 }
 0x118   : > { %12975 = vst [vmem:[#allocation34_spill] sm:$0xff] %v12974_v63  ;;  %v12980_v26 = vmov 0  ;;  %v2715_v4 = vunpack.c.l.b16 %v2464_v19  ;;  %v9309_v18 = vpack.c.bf16 %v816_v40, %v816_v40  ;;  %v3093_v1 = vrot.slane %v3091_v39, 4  ;;  %v1462_v63 = vld [vmem:[#allocation2 + $0x4c] sm:$0xf] }
 0x119   : > { %12976 = vst [vmem:[#allocation35_spill] sm:$0xff] %v9292_v11  ;;  %vm9305_vm5 = vcmp.ne.s32.totalorder %v12979_v32, %v8347_v2  ;;  %v3096_v45 = vrot.slane %v3094_v25, 5  ;;  %v2716_v20 = vunpack.c.h.b16 %v2464_v19  ;;  %v1458_v6 = vld [vmem:[#allocation2 + $0x3c] sm:$0xf]  ;;  %v9311_v48 = vpack.c.b16 %v4145_v43, %v4144_v44  ;;  %v679_v44 = vpop.f32.mrf.mxu0 }
 0x11a   : > { %v12981_v26 = vsel %vm9305_vm5, 4294967295, %v12980_v26  ;;  %v768_v42 = vadd.f32 %v9166_v27, %v767_v15  ;;  %v12983_v13 = vand.u32 15, %v9138_v16  ;;  %v2465_v14 = vrot.slane %v9202_v41, 4  ;;  %1426 = vst.msk [vmem:[#allocation2 + $0x40] sm:$0xf] %vm12984_vm10, %v9309_v18 }
 0x11b   : > { %12982 = vst [vmem:[#allocation36_spill] sm:$0xff] %v12981_v26  ;;  %vm12985_vm9 = vcmask 64512   ;;  %v9321_v39 = vor.u32 %v3096_v45, %v3093_v1  ;;  %v2854_v19 = vsel %vm12986_vm8, %v1458_v6, 0  ;;  %v950_v16 = vadd.s32 152, %v8292_v21 }
 0x11c   : > { %vm1396_vm7 = vcmp.ne.s32.totalorder %v12983_v13, 15  ;;  %v3368_v40 = vsel %vm12985_vm9, %v9001_v7, %v3181_v8  ;;  %v3260_v25 = vunpack.c.l.b16 %v2854_v19  ;;  %v852_v41 = vmax.f32 %v768_v42, 0.0 }
 0x11d   : > { %vm2273_vm4 = vmpackc.low %vm1396_vm7, %vm1396_vm7  ;;  %v2473_v7 = vsel %vm8358_vm2, %v2465_v14, %v8362_v12  ;;  %v680_v8 = vadd.f32 %v9166_v27, %v679_v44  ;;  %vm12987_vm9 = vsmask.f32 3328  ;;  %vm9338_vm8 = vcmp.ne.s32.totalorder %v2715_v4, %v8341_v58  ;;  %v3332_v44 = vpop.permute.xlu2 %3331 }
 0x11e   : > { %v2305_v43 = vsel %vm2273_vm4, 65537, %v12858_v38  ;;  %v3098_v32 = vsel %vm12987_vm9, %v9207_v52, %v9321_v39  ;;  %v12988_v1 = vmov 0  ;;  %v9343_v6 = vpack.c.b16 %v3260_v25, %v3259_v23  ;;  %vm12995_vm9 = vmmov %vm12984_vm10 }
 0x11f   : > { %v12989_v1 = vsel %vm9338_vm8, 4294967295, %v12988_v1  ;;  %v2476_v45 = vshrl.u32 %v2305_v43, 16  ;;  %v2479_v15 = vshll.u32 %v2305_v43, 16  ;;  %3192 = vrot.lane.b32.xlu0 %v3098_v32, %s8191_s14  ;;  %v9345_v42 = vpack.c.bf16 %v852_v41, %v852_v41  ;;  %v1461_v41 = vld [vmem:[#allocation2 + $0x48] sm:$0xf] }
 0x120   : > { %12990 = vst [vmem:[#allocation37_spill] sm:$0xff] %v12989_v1  ;;  %v2722_v13 = vunpack.c.l.b16 %v2473_v7  ;;  %v2723_v14 = vunpack.c.h.b16 %v2473_v7  ;;  %v817_v19 = vmax.f32 %v680_v8, 0.0  ;;  %vm9348_vm4 = vcmp.ne.s32.totalorder %v2716_v20, %v8347_v2 }
 0x121   : > { %v12991_v52 = vmov 0  ;;  %v2478_v4 = vrot.slane %v2476_v45, 7  ;;  %v1100_v11 = vand.u32 15, %v950_v16  ;;  %v3003_v50 = vunpack.c.l.b16 %v9309_v18  ;;  %3909 = vst.msk [vmem:[#allocation2 + $0xd8] sm:$0xf] %vm12995_vm9, %v9345_v42 }
 0x122   : > { %v12992_v52 = vsel %vm9348_vm4, 4294967295, %v12991_v52  ;;  %vm12994_vm7 = vcmask 130048   ;;  %v12594_v23 = vrot.slane %v9343_v6, 5  ;;  %vm9362_vm13 = vcmp.ne.s32.totalorder %v2722_v13, %v8341_v58  ;;  %v1459_v32 = vld [vmem:[#allocation2 + $0x40] sm:$0xf] }
 0x123   : > { %12993 = vst [vmem:[#allocation38_spill] sm:$0xff] %v12992_v52  ;;  %v3419_v43 = vsel %vm12994_vm7, %v3368_v40, %v3332_v44  ;;  %v12996_v20 = vmov 0  ;;  %v881_v16 = vpack.c.bf16 %v817_v19, %v817_v19  ;;  %v2481_v40 = vor.u32 %v2479_v15, %v2478_v4 }
 0x124   : > { %v12997_v20 = vsel %vm9362_vm13, 4294967295, %v12996_v20  ;;  %v3469_v25 = vunpack.c.l.b16 %v3419_v43  ;;  %v3470_v18 = vunpack.c.h.b16 %v3419_v43  ;;  %v12999_v7 = vrot.slane %v9242_v51, 5 }
 0x125   : > { %12998 = vst [vmem:[#allocation39_spill] sm:$0xff] %v12997_v20  ;;  %vm13000_vm7 = vcmask 1042432   ;;  %vm9372_vm10 = vcmp.ne.s32.totalorder %v2723_v14, %v8347_v2  ;;  %v13001_v45 = vmov 0  ;;  %vm9376_vm9 = vcmp.ne.s32.totalorder %v1100_v11, 15  ;;  %v717_v11 = vpop.f32.mrf.mxu1 }
 0x126   : > { %v3310_v8 = vsel %vm13000_vm7, %v12999_v7, %v12594_v23  ;;  %v13002_v45 = vsel %vm9372_vm10, 4294967295, %v13001_v45  ;;  %v2483_v19 = vrot.slane %v2478_v4, 4  ;;  %vm13006_vm1 = vcmask 60416   ;;  %vm13007_vm7 = vmpackc.low %vm9305_vm5, %vm9287_vm14 }
 0x127   : > { %13003 = vst [vmem:[#allocation40_spill] sm:$0xff] %v13002_v45  ;;  %v3004_v15 = vunpack.c.l.b16 %v881_v16  ;;  %v3502_v44 = vpack.c.b16 %v3469_v25, %v3469_v25  ;;  %v3503_v43 = vpack.c.b16 %v3470_v18, %v3470_v18  ;;  %3343 = vrot.lane.b32.xlu1 %v3310_v8, %s8192_s15  ;;  %v2855_v51 = vsel %vm13007_vm7, %v1459_v32, 0  ;;  %vm12599_vm12 = vmpackc.low %vm9372_vm10, %vm9362_vm13 }
 0x128   : > { %1427 = vst.msk [vmem:[#allocation2 + $0x44] sm:$0xf] %vm13006_vm1, %v881_v16  ;;  %v3261_v14 = vunpack.c.l.b16 %v2855_v51  ;;  %v2482_v4 = vsel %vm8358_vm2, %v8355_v5, %v2481_v40  ;;  %v2857_v16 = vsel %vm12599_vm12, %v1461_v41, 0  ;;  %vm2275_vm1 = vmpackc.low %vm9376_vm9, %vm9376_vm9  ;;  %v718_v25 = vadd.f32 %v9166_v27, %v717_v11 }
 0x129   : > { %v3028_v18 = vpack.c.b16 %v3004_v15, %v3003_v50  ;;  %v3536_v7 = vshrl.u32 %v3502_v44, 16  ;;  %v3541_v8 = vshrl.u32 %v3503_v43, 16  ;;  %v2491_v32 = vsel %vm8358_vm2, %v2483_v19, %v8362_v12  ;;  %vm12606_vm9 = vmpackc.low %vm9348_vm4, %vm9338_vm8 }
 0x12a   : > { %v3544_v40 = vshll.u32 %v3503_v43, 16  ;;  %v2729_v51 = vunpack.c.l.b16 %v2482_v4  ;;  %v2730_v23 = vunpack.c.h.b16 %v2482_v4  ;;  %v2307_v20 = vsel %vm2275_vm1, 65537, %v12858_v38 }
 0x12b   : > { %v9407_v45 = vrot.slane %v3541_v8, 7  ;;  %v3100_v41 = vshrl.u32 %v3028_v18, 16  ;;  %v3103_v13 = vshll.u32 %v3028_v18, 16  ;;  %v3263_v26 = vunpack.c.l.b16 %v2857_v16 }
 0x12c   : > { %vm9414_vm7 = vcmp.ne.s32.totalorder %v2729_v51, %v8341_v58  ;;  %v13008_v50 = vmov 0  ;;  %vm9419_vm12 = vcmp.ne.s32.totalorder %v2730_v23, %v8347_v2  ;;  %v13011_v19 = vmov 0 }
 0x12d   : > { %v13009_v50 = vsel %vm9414_vm7, 4294967295, %v13008_v50  ;;  %v13012_v19 = vsel %vm9419_vm12, 4294967295, %v13011_v19  ;;  %v2494_v15 = vshrl.u32 %v2307_v20, 16  ;;  %v2497_v44 = vshll.u32 %v2307_v20, 16  ;;  %vm12603_vm1 = vmpackc.low %vm9419_vm12, %vm9414_vm7 }
 0x12e   : > { %13010 = vst [vmem:[#allocation41_spill] sm:$0xff] %v13009_v50  ;;  %v7410_v43 = vrot.slane %v3536_v7, 11  ;;  %v3546_v11 = vor.u32 %v3544_v40, %v9407_v45  ;;  %v3102_v4 = vrot.slane %v3100_v41, 4  ;;  %v3105_v16 = vrot.slane %v3103_v13, 5 }
 0x12f   : > { %13013 = vst [vmem:[#allocation42_spill] sm:$0xff] %v13012_v19  ;;  %v1460_v18 = vld [vmem:[#allocation2 + $0x44] sm:$0xf]  ;;  %v2858_v23 = vsel %vm12603_vm1, %v1462_v63, 0  ;;  %v9433_v8 = vrot.slane %v2494_v15, 7  ;;  %v2736_v20 = vunpack.c.l.b16 %v2491_v32  ;;  %v2737_v7 = vunpack.c.h.b16 %v2491_v32 }
 0x130   : > { %v3547_v40 = vsel %vm8358_vm2, %v7410_v43, %v3546_v11  ;;  %v3106_v51 = vor.u32 %v3105_v16, %v3102_v4  ;;  %v2856_v41 = vsel %vm12606_vm9, %v1460_v18, 0  ;;  %v3264_v13 = vunpack.c.l.b16 %v2858_v23  ;;  %v1463_v19 = vld [vmem:[#allocation2 + $0x50] sm:$0xf]  ;;  %v742_v16 = vpop.f32.mrf.mxu2 }
 0x131   : > { %vm13014_vm13 = vcmask 191488   ;;  %v3262_v50 = vunpack.c.l.b16 %v2856_v41  ;;  %v2499_v63 = vor.u32 %v2497_v44, %v9433_v8  ;;  %vm9445_vm1 = vcmp.ne.s32.totalorder %v2736_v20, %v8341_v58 }
 0x132   : > { %3859 = vst.msk [vmem:[#allocation3 + $0x8] sm:$0xf] %vm13014_vm13, %v3547_v40  ;;  %v13015_v32 = vmov 0  ;;  %vm9450_vm7 = vcmp.ne.s32.totalorder %v2737_v7, %v8347_v2  ;;  %v13018_v15 = vmov 0  ;;  %vm13021_vm12 = vsmask.f32 3328 }
 0x133   : > { %v13016_v32 = vsel %vm9445_vm1, 4294967295, %v13015_v32  ;;  %v13019_v15 = vsel %vm9450_vm7, 4294967295, %v13018_v15  ;;  %v3107_v43 = vsel %vm13021_vm12, %v9321_v39, %v3106_v51  ;;  %vm13022_vm9 = vmmov %vm13021_vm12  ;;  %v9458_v4 = vpack.c.b16 %v3264_v13, %v3263_v26 }
 0x134   : > { %13017 = vst [vmem:[#allocation43_spill] sm:$0xff] %v13016_v32  ;;  %v3116_v11 = vsel %vm13022_vm9, %v3106_v51, %v9277_v62  ;;  %vm12607_vm13 = vmpackc.low %vm9450_vm7, %vm9445_vm1  ;;  %v832_v44 = vmax.f32 %v718_v25, 0.0  ;;  %3194 = vrot.lane.b32.xlu2 %v3107_v43, %s8191_s14  ;;  %v3287_v18 = vpack.c.b16 %v3262_v50, %v3261_v14  ;;  %v2500_v39 = vsel %vm8358_vm2, %v8355_v5, %v2499_v63  ;;  %v1464_v51 = vld [vmem:[#allocation2 + $0x54] sm:$0xf]  ;;  %v769_v43 = vpop.f32.mrf.mxu3 }
 0x135   : > { %13020 = vst [vmem:[#allocation44_spill] sm:$0xff] %v13019_v15  ;;  %3196 = vrot.lane.b32.xlu1 %v3116_v11, %s8191_s14  ;;  %v743_v23 = vadd.f32 %v9166_v27, %v742_v16  ;;  %v13023_v26 = vshll.u32 %v9099_v49, 16  ;;  %v3313_v7 = vrot.slane %v9458_v4, 5  ;;  %v2743_v40 = vunpack.c.l.b16 %v2500_v39 }
 0x136   : > { %v2744_v25 = vunpack.c.h.b16 %v2500_v39  ;;  %v2859_v14 = vsel %vm12607_vm13, %v1463_v19, 0  ;;  %v3311_v50 = vrot.slane %v3287_v18, 5  ;;  %v9480_v41 = vpack.c.bf16 %v832_v44, %v832_v44 }
 0x137   : > { %v9472_v20 = vrot.slane %v13023_v26, 5  ;;  %v842_v13 = vmax.f32 %v743_v23, 0.0  ;;  %v3118_v63 = vshrl.u32 %v8691_v55, 16  ;;  %vm9484_vm12 = vcmp.ne.s32.totalorder %v2743_v40, %v8341_v58 }
 0x138   : > { %v13024_v11 = vmov 0  ;;  %vm9489_vm9 = vcmp.ne.s32.totalorder %v2744_v25, %v8347_v2  ;;  %v13027_v4 = vmov 0  ;;  %v3121_v19 = vshll.u32 %v8691_v55, 16  ;;  %v719_v25 = vpop.f32.mrf.mxu1 }
 0x139   : > { %v13025_v11 = vsel %vm9484_vm12, 4294967295, %v13024_v11  ;;  %v13028_v4 = vsel %vm9489_vm9, 4294967295, %v13027_v4  ;;  %v770_v16 = vadd.f32 %v9166_v27, %v769_v43  ;;  %v13030_v44 = vrot.slane %v9343_v6, 5  ;;  %vm12615_vm1 = vmpackc.low %vm9489_vm9, %vm9484_vm12 }
 0x13a   : > { %13026 = vst [vmem:[#allocation45_spill] sm:$0xff] %v13025_v11  ;;  %vm13031_vm13 = vcmask 1042432   ;;  %v4156_v39 = vunpack.c.l.b16 %v9345_v42  ;;  %v3265_v23 = vunpack.c.l.b16 %v2859_v14  ;;  %vm13032_vm7 = vcmask 60416  }
 0x13b   : > { %13029 = vst [vmem:[#allocation46_spill] sm:$0xff] %v13028_v4  ;;  %v3312_v18 = vsel %vm13031_vm13, %v13030_v44, %v3311_v50  ;;  %v9505_v26 = vpack.c.bf16 %v842_v13, %v842_v13  ;;  %v2860_v55 = vsel %vm12615_vm1, %v1464_v51, 0  ;;  %v3120_v6 = vrot.slane %v3118_v63, 4  ;;  %vm13033_vm10 = vmmov %vm13032_vm7 }
 0x13c   : > { %1442 = vst.msk [vmem:[#allocation2 + $0x80] sm:$0xf] %vm13032_vm7, %v9480_v41  ;;  %3345 = vrot.lane.b32.xlu0 %v3312_v18, %s8192_s15  ;;  %v3123_v42 = vrot.slane %v3121_v19, 5  ;;  %v853_v40 = vmax.f32 %v770_v16, 0.0  ;;  %v3314_v43 = vsel %vm13031_vm13, %v3311_v50, %v3313_v7  ;;  %v3266_v14 = vunpack.c.l.b16 %v2860_v55 }
 0x13d   : > { %3899 = vst.msk [vmem:[#allocation2 + $0xb0] sm:$0xf] %vm13033_vm10, %v9505_v26  ;;  %v3127_v13 = vshrl.u32 %v8825_v37, 16  ;;  %v3130_v44 = vshll.u32 %v8825_v37, 16  ;;  %v3136_v11 = vshrl.u32 %v8958_v36, 16  ;;  %v3139_v51 = vshll.u32 %v8958_v36, 16  ;;  %3347 = vrot.lane.b32.xlu2 %v3314_v43, %s8192_s15 }
 0x13e   : > { %v3124_v18 = vor.u32 %v3123_v42, %v3120_v6  ;;  %v917_v4 = vpack.c.bf16 %v853_v40, %v853_v40  ;;  %v9521_v63 = vpack.c.b16 %v3266_v14, %v3265_v23  ;;  %v720_v16 = vadd.f32 %v9166_v27, %v719_v25  ;;  %v744_v40 = vpop.f32.mrf.mxu2 }
 0x13f   : > { %v3129_v19 = vrot.slane %v3127_v13, 4  ;;  %v3132_v50 = vrot.slane %v3130_v44, 5  ;;  %vm13034_vm10 = vsmask.f32 3328  ;;  %v3138_v6 = vrot.slane %v3136_v11, 4 }
 0x140   : > { %v3125_v55 = vsel %vm13034_vm10, %v9277_v62, %v3124_v18  ;;  %3910 = vst.msk [vmem:[#allocation2 + $0xdc] sm:$0xf] %vm13032_vm7, %v917_v4  ;;  %v4157_v37 = vunpack.c.l.b16 %v917_v4  ;;  %v3141_v42 = vrot.slane %v3139_v51, 5  ;;  %v12620_v32 = vrot.slane %v9521_v63, 5  ;;  %v772_v51 = vpop.f32.mrf.mxu3  ;;  %vm13036_vm7 = vmmov %vm13034_vm10 }
 0x141   : > { %v3133_v36 = vor.u32 %v3132_v50, %v3129_v19  ;;  %v833_v15 = vmax.f32 %v720_v16, 0.0  ;;  %v745_v23 = vadd.f32 %v9166_v27, %v744_v40  ;;  %v952_v25 = vadd.s32 168, %v8292_v21 }
 0x142   : > { %v9529_v43 = vpack.c.b16 %v4157_v37, %v4156_v39  ;;  %v9531_v14 = vor.u32 %v3141_v42, %v3138_v6  ;;  %v2501_v62 = vrot.slane %v9433_v8, 4  ;;  %v3316_v11 = vsel %vm13031_vm13, %v3313_v7, %v12620_v32  ;;  %v3334_v32 = vpop.permute.xlu1 %3333 }
 0x143   : > { %v3134_v4 = vsel %vm13034_vm10, %v3124_v18, %v3133_v36  ;;  %v9539_v13 = vpack.c.bf16 %v833_v15, %v833_v15  ;;  %v843_v44 = vmax.f32 %v745_v23, 0.0  ;;  %3349 = vrot.lane.b32.xlu1 %v3316_v11, %s8192_s15  ;;  %v1114_v19 = vand.u32 15, %v952_v25 }
 0x144   : > { %13035 = vst [vmem:[#allocation47_spill] sm:$0xff] %v9529_v43  ;;  %3198 = vrot.lane.b32.xlu0 %v3125_v55, %s8191_s14  ;;  %v3143_v39 = vsel %vm13036_vm7, %v3133_v36, %v9531_v14  ;;  %v2509_v8 = vsel %vm8358_vm2, %v2501_v62, %v8362_v12  ;;  %v773_v7 = vadd.f32 %v9166_v27, %v772_v51  ;;  %v4146_v18 = vunpack.c.l.b16 %v9505_v26  ;;  %v1465_v55 = vld [vmem:[#allocation2 + $0x58] sm:$0xf]  ;;  %v3183_v51 = vpop.permute.xlu0 %3182 }
 0x145   : > { %vm13037_vm13 = vcmask 60416   ;;  %v907_v15 = vpack.c.bf16 %v843_v44, %v843_v44  ;;  %v2750_v50 = vunpack.c.l.b16 %v2509_v8  ;;  %v2751_v16 = vunpack.c.h.b16 %v2509_v8  ;;  %3200 = vrot.lane.b32.xlu2 %v3134_v4, %s8191_s14 }
 0x146   : > { %1443 = vst.msk [vmem:[#allocation2 + $0x84] sm:$0xf] %vm13037_vm13, %v9539_v13  ;;  %vm1400_vm10 = vcmp.ne.s32.totalorder %v1114_v19, 15  ;;  %v854_v37 = vmax.f32 %v773_v7, 0.0  ;;  %v954_v6 = vadd.s32 184, %v8292_v21  ;;  %v956_v42 = vadd.s32 200, %v8292_v21  ;;  %vm13038_vm7 = vmmov %vm13037_vm13 }
 0x147   : > { %3900 = vst.msk [vmem:[#allocation2 + $0xb4] sm:$0xf] %vm13038_vm7, %v907_v15  ;;  %v4147_v26 = vunpack.c.l.b16 %v907_v15  ;;  %vm2277_vm1 = vmpackc.low %vm1400_vm10, %vm1400_vm10  ;;  %vm9558_vm13 = vcmp.ne.s32.totalorder %v2750_v50, %v8341_v58  ;;  %v13039_v36 = vmov 0  ;;  %vm9563_vm12 = vcmp.ne.s32.totalorder %v2751_v16, %v8347_v2 }
 0x148   : > { %v13040_v36 = vsel %vm9558_vm13, 4294967295, %v13039_v36  ;;  %v13042_v23 = vmov 0  ;;  %v2309_v25 = vsel %vm2277_vm1, 65537, %v12858_v38  ;;  %vm12626_vm9 = vmpackc.low %vm9563_vm12, %vm9558_vm13  ;;  %v9572_v62 = vpack.c.bf16 %v854_v37, %v854_v37  ;;  %v7866_v37 = vld [vmem:[#allocation3] sm:$0xff]  ;;  %v774_v15 = vpop.f32.mrf.mxu3 }
 0x149   : > { %13041 = vst [vmem:[#allocation48_spill] sm:$0xff] %v13040_v36  ;;  %v13043_v23 = vsel %vm9563_vm12, 4294967295, %v13042_v23  ;;  %v1128_v11 = vand.u32 15, %v954_v6  ;;  %v1142_v4 = vand.u32 15, %v956_v42  ;;  %v9574_v44 = vpack.c.b16 %v4147_v26, %v4146_v18  ;;  %vm13046_vm10 = vmmov %vm13038_vm7  ;;  %v747_v18 = vpop.f32.mrf.mxu2 }
 0x14a   : > { %13044 = vst [vmem:[#allocation49_spill] sm:$0xff] %v13043_v23  ;;  %v2512_v19 = vshrl.u32 %v2309_v25, 16  ;;  %v2515_v8 = vshll.u32 %v2309_v25, 16  ;;  %v9581_v7 = vsel %vm12626_vm9, %v1465_v55, 0  ;;  %vm13045_vm1 = vcmask 64512  }
 0x14b   : > { %v3371_v50 = vsel %vm13045_vm1, %v8643_v22, %v3183_v51  ;;  %3911 = vst.msk [vmem:[#allocation2 + $0xe0] sm:$0xf] %vm13046_vm10, %v9572_v62  ;;  %vm1402_vm7 = vcmp.ne.s32.totalorder %v1128_v11, 15  ;;  %vm9589_vm4 = vcmp.ne.s32.totalorder %v1142_v4, 15  ;;  %v9594_v55 = vadd.f32 %v9166_v27, %v747_v18  ;;  %3202 = vrot.lane.b32.xlu1 %v3143_v39, %s8191_s14 }
 0x14c   : > { %v2514_v6 = vrot.slane %v2512_v19, 7  ;;  %vm2279_vm8 = vmpackc.low %vm1402_vm7, %vm1402_vm7  ;;  %v3145_v26 = vshrl.u32 %v9085_v10, 16  ;;  %v3148_v11 = vshll.u32 %v9085_v10, 16  ;;  %vm12627_vm10 = vcmask 195584  }
 0x14d   : > { %v2311_v25 = vsel %vm2279_vm8, 65537, %v12858_v38  ;;  %vm2281_vm1 = vmpackc.low %vm9589_vm4, %vm9589_vm4  ;;  %7592 = vmatmul.msk.bf16.vlgmr.msrb.gmra.mxu2 %vm12627_vm10, %v7866_v37  ;;  %v844_v22 = vmax.f32 %v9594_v55, 0.0  ;;  %v9610_v42 = vadd.f32 %v9166_v27, %v774_v15  ;;  %vm13049_vm8 = vcmask 130048  }
 0x14e   : > { %v2517_v4 = vor.u32 %v2515_v8, %v2514_v6  ;;  %v2519_v51 = vrot.slane %v2514_v6, 4  ;;  %v2530_v19 = vshrl.u32 %v2311_v25, 16  ;;  %v2533_v18 = vshll.u32 %v2311_v25, 16 }
 0x14f   : > { %v2313_v39 = vsel %vm2281_vm1, 65537, %v12858_v38  ;;  %v9607_v40 = vrot.slane %v3145_v26, 4  ;;  %v3421_v8 = vsel %vm13049_vm8, %v3371_v50, %v3334_v32  ;;  %v1466_v26 = vld [vmem:[#allocation2 + $0x5c] sm:$0xf]  ;;  %v3150_v1 = vrot.slane %v3148_v11, 5 }
 0x150   : > { %v2518_v10 = vsel %vm8358_vm2, %v8355_v5, %v2517_v4  ;;  %v2527_v37 = vsel %vm8358_vm2, %v2519_v51, %v8362_v12  ;;  %v2532_v6 = vrot.slane %v2530_v19, 7  ;;  %v3471_v36 = vunpack.c.l.b16 %v3421_v8  ;;  %v1467_v51 = vld [vmem:[#allocation2 + $0x60] sm:$0xf] }
 0x151   : > { %v2757_v25 = vunpack.c.l.b16 %v2518_v10  ;;  %v2758_v16 = vunpack.c.h.b16 %v2518_v10  ;;  %v3472_v55 = vunpack.c.h.b16 %v3421_v8  ;;  %v2764_v43 = vunpack.c.l.b16 %v2527_v37 }
 0x152   : > { %v2535_v23 = vor.u32 %v2533_v18, %v2532_v6  ;;  %v2765_v15 = vunpack.c.h.b16 %v2527_v37  ;;  %v13050_v52 = vmov 0  ;;  %v13053_v32 = vmov 0 }
 0x153   : > { %vm9620_vm4 = vcmp.ne.s32.totalorder %v2757_v25, %v8341_v58  ;;  %vm9625_vm7 = vcmp.ne.s32.totalorder %v2758_v16, %v8347_v2  ;;  %v3504_v50 = vpack.c.b16 %v3471_v36, %v3471_v36  ;;  %v3505_v4 = vpack.c.b16 %v3472_v55, %v3472_v55 }
 0x154   : > { %v13051_v52 = vsel %vm9620_vm4, 4294967295, %v13050_v52  ;;  %v13054_v32 = vsel %vm9625_vm7, 4294967295, %v13053_v32  ;;  %vm12631_vm1 = vmpackc.low %vm9625_vm7, %vm9620_vm4  ;;  %v2536_v11 = vsel %vm8358_vm2, %v8355_v5, %v2535_v23  ;;  %vm9637_vm8 = vcmp.ne.s32.totalorder %v2764_v43, %v8341_v58 }
 0x155   : > { %13052 = vst [vmem:[#allocation50_spill] sm:$0xff] %v13051_v52  ;;  %v13056_v19 = vmov 0  ;;  %vm9642_vm9 = vcmp.ne.s32.totalorder %v2765_v15, %v8347_v2  ;;  %v13058_v16 = vmov 0  ;;  %v2537_v36 = vrot.slane %v2532_v6, 4 }
 0x156   : > { %13055 = vst [vmem:[#allocation51_spill] sm:$0xff] %v13054_v32  ;;  %v13057_v19 = vsel %vm9637_vm8, 4294967295, %v13056_v19  ;;  %v13059_v16 = vsel %vm9642_vm9, 4294967295, %v13058_v16  ;;  %v2862_v18 = vsel %vm12631_vm1, %v1466_v26, 0  ;;  %v3550_v10 = vshrl.u32 %v3504_v50, 16  ;;  %vm12633_vm10 = vmpackc.low %vm9642_vm9, %vm9637_vm8 }
 0x157   : > { %v3553_v8 = vshll.u32 %v3504_v50, 16  ;;  %v3559_v23 = vshrl.u32 %v3505_v4, 16  ;;  %v3268_v43 = vunpack.c.l.b16 %v2862_v18  ;;  %v3562_v37 = vshll.u32 %v3505_v4, 16  ;;  %v1468_v32 = vld [vmem:[#allocation2 + $0x64] sm:$0xf] }
 0x158   : > { %v2771_v25 = vunpack.c.l.b16 %v2536_v11  ;;  %v2772_v55 = vunpack.c.h.b16 %v2536_v11  ;;  %v3552_v15 = vrot.slane %v3550_v10, 7  ;;  %v2863_v26 = vsel %vm12633_vm10, %v1467_v51, 0 }
 0x159   : > { %v9655_v6 = vrot.slane %v3559_v23, 7  ;;  %v2548_v50 = vshrl.u32 %v2313_v39, 16  ;;  %v13060_v52 = vunpack.c.l.b16 %v9581_v7  ;;  %v13061_v18 = vmov 0 }
 0x15a   : > { %vm9665_vm1 = vcmp.ne.s32.totalorder %v2771_v25, %v8341_v58  ;;  %vm9670_vm4 = vcmp.ne.s32.totalorder %v2772_v55, %v8347_v2  ;;  %v13063_v4 = vmov 0  ;;  %v2545_v11 = vsel %vm8358_vm2, %v2537_v36, %v8362_v12 }
 0x15b   : > { %v3290_v46 = vpack.c.b16 %v3268_v43, %v13060_v52  ;;  %v13062_v18 = vsel %vm9665_vm1, 4294967295, %v13061_v18  ;;  %v13064_v4 = vsel %vm9670_vm4, 4294967295, %v13063_v4  ;;  %v3555_v10 = vor.u32 %v3553_v8, %v3552_v15  ;;  %vm12637_vm10 = vmpackc.low %vm9670_vm4, %vm9665_vm1 }
 0x15c   : > { %13065 = vst [vmem:[#allocation52_spill] sm:$0xff] %v13064_v4  ;;  %v3557_v51 = vrot.slane %v3552_v15, 4  ;;  %v3564_v23 = vor.u32 %v3562_v37, %v9655_v6  ;;  %v3269_v52 = vunpack.c.l.b16 %v2863_v26  ;;  %v2864_v43 = vsel %vm12637_vm10, %v1468_v32, 0 }
 0x15d   : > { %v3317_v7 = vrot.slane %v3290_v46, 5  ;;  %v9687_v25 = vrot.slane %v2548_v50, 7  ;;  %v2551_v36 = vshll.u32 %v2313_v39, 16  ;;  %v13066_v8 = vrot.slane %v9407_v45, 4 }
 0x15e   : > { %v3565_v55 = vsel %vm8358_vm2, %v3557_v51, %v3564_v23  ;;  %v3270_v15 = vunpack.c.l.b16 %v2864_v43  ;;  %v2778_v26 = vunpack.c.l.b16 %v2545_v11  ;;  %v13067_v46 = vrot.slane %v9521_v63, 5 }
 0x15f   : > { %v3556_v37 = vsel %vm8358_vm2, %v13066_v8, %v3555_v10  ;;  %vm13068_vm8 = vcmask 1042432   ;;  %vm13069_vm9 = vcmask 191488   ;;  %v2553_v32 = vor.u32 %v2551_v36, %v9687_v25  ;;  %v1469_v10 = vld [vmem:[#allocation2 + $0x68] sm:$0xf]  ;;  %v1470_v36 = vld [vmem:[#allocation2 + $0x6c] sm:$0xf] }
 0x160   : > { %v3318_v4 = vsel %vm13068_vm8, %v13067_v46, %v3317_v7  ;;  %3860 = vst.msk [vmem:[#allocation3 + $0xc] sm:$0xf] %vm13069_vm9, %v3556_v37  ;;  %v2779_v50 = vunpack.c.h.b16 %v2545_v11  ;;  %v9700_v39 = vpack.c.bf16 %v844_v22, %v844_v22  ;;  %vm13070_vm10 = vmmov %vm13069_vm9  ;;  %v9704_v45 = vpack.c.b16 %v3270_v15, %v3269_v52 }
 0x161   : > { %3351 = vrot.lane.b32.xlu0 %v3318_v4, %s8192_s15  ;;  %3861 = vst.msk [vmem:[#allocation3 + $0x10] sm:$0xf] %vm13070_vm10, %v3565_v55  ;;  %vm9707_vm1 = vcmp.ne.s32.totalorder %v2778_v26, %v8341_v58  ;;  %v13071_v51 = vmov 0  ;;  %v3151_v63 = vor.u32 %v3150_v1, %v9607_v40  ;;  %v855_v23 = vmax.f32 %v9610_v42, 0.0  ;;  %v3185_v26 = vpop.permute.xlu0 %3184 }
 0x162   : > { %v13072_v51 = vsel %vm9707_vm1, 4294967295, %v13071_v51  ;;  %v2554_v22 = vsel %vm8358_vm2, %v8355_v5, %v2553_v32  ;;  %vm9717_vm9 = vcmp.ne.s32.totalorder %v2779_v50, %v8347_v2  ;;  %v13074_v4 = vmov 0 }
 0x163   : > { %13073 = vst [vmem:[#allocation53_spill] sm:$0xff] %v13072_v51  ;;  %v13075_v4 = vsel %vm9717_vm9, 4294967295, %v13074_v4  ;;  %vm13077_vm10 = vcmask 60416   ;;  %v3154_v52 = vshrl.u32 %v9227_v47, 16  ;;  %v3319_v1 = vrot.slane %v9704_v45, 5  ;;  %vm12641_vm8 = vmpackc.low %vm9717_vm9, %vm9707_vm1  ;;  %v777_v51 = vpop.f32.mrf.mxu3 }
 0x164   : > { %13076 = vst [vmem:[#allocation54_spill] sm:$0xff] %v13075_v4  ;;  %v2785_v40 = vunpack.c.l.b16 %v2554_v22  ;;  %v2786_v42 = vunpack.c.h.b16 %v2554_v22  ;;  %vm13078_vm4 = vsmask.f32 3328  ;;  %v2865_v8 = vsel %vm12641_vm8, %v1469_v10, 0 }
 0x165   : > { %3901 = vst.msk [vmem:[#allocation2 + $0xb8] sm:$0xf] %vm13077_vm10, %v9700_v39  ;;  %v3152_v43 = vsel %vm13078_vm4, %v9531_v14, %v3151_v63  ;;  %v919_v37 = vpack.c.bf16 %v855_v23, %v855_v23  ;;  %v3156_v55 = vrot.slane %v3154_v52, 4  ;;  %v3157_v15 = vshll.u32 %v9227_v47, 16  ;;  %v749_v23 = vpop.f32.mrf.mxu2 }
 0x166   : > { %vm13079_vm10 = vcmask 1042432   ;;  %vm9740_vm7 = vcmp.ne.s32.totalorder %v2785_v40, %v8341_v58  ;;  %v13080_v32 = vmov 0  ;;  %vm9745_vm4 = vcmp.ne.s32.totalorder %v2786_v42, %v8347_v2 }
 0x167   : > { %v3320_v46 = vsel %vm13079_vm10, %v3317_v7, %v3319_v1  ;;  %v13081_v32 = vsel %vm9740_vm7, 4294967295, %v13080_v32  ;;  %v13083_v14 = vmov 0  ;;  %v3271_v50 = vunpack.c.l.b16 %v2865_v8  ;;  %vm12647_vm8 = vmpackc.low %vm9745_vm4, %vm9740_vm7  ;;  %v3336_v8 = vpop.permute.xlu1 %3335 }
 0x168   : > { %13082 = vst [vmem:[#allocation55_spill] sm:$0xff] %v13081_v32  ;;  %v13084_v14 = vsel %vm9745_vm4, 4294967295, %v13083_v14  ;;  %3353 = vrot.lane.b32.xlu2 %v3320_v46, %s8192_s15  ;;  %vm13086_vm1 = vcmask 60416   ;;  %v4159_v47 = vunpack.c.l.b16 %v919_v37  ;;  %v3159_v7 = vrot.slane %v3157_v15, 5 }
 0x169   : > { %13085 = vst [vmem:[#allocation56_spill] sm:$0xff] %v13084_v14  ;;  %v3163_v45 = vshrl.u32 %v9299_v33, 16  ;;  %v3166_v10 = vshll.u32 %v9299_v33, 16  ;;  %v2866_v22 = vsel %vm12647_vm8, %v1470_v36, 0  ;;  %v750_v52 = vadd.f32 %v9166_v27, %v749_v23  ;;  %3204 = vrot.lane.b32.xlu0 %v3152_v43, %s8191_s14 }
 0x16a   : > { %3912 = vst.msk [vmem:[#allocation2 + $0xe4] sm:$0xf] %vm13086_vm1, %v919_v37  ;;  %vm13087_vm10 = vcmask 64512   ;;  %v958_v42 = vadd.s32 216, %v8292_v21  ;;  %v3272_v37 = vunpack.c.l.b16 %v2866_v22  ;;  %v13088_v15 = vunpack.c.l.b16 %v9572_v62 }
 0x16b   : > { %v3374_v40 = vsel %vm13087_vm10, %v8935_v0, %v3185_v26  ;;  %v3160_v33 = vor.u32 %v3159_v7, %v3156_v55  ;;  %v3165_v11 = vrot.slane %v3163_v45, 4  ;;  %v3168_v32 = vrot.slane %v3166_v10, 5 }
 0x16c   : > { %v9768_v46 = vpack.c.b16 %v4159_v47, %v13088_v15  ;;  %v845_v14 = vmax.f32 %v750_v52, 0.0  ;;  %v1156_v36 = vand.u32 15, %v958_v42  ;;  %v2555_v23 = vrot.slane %v9687_v25, 4 }
 0x16d   : > { %v9772_v4 = vpack.c.b16 %v3272_v37, %v3271_v50  ;;  %vm13089_vm1 = vsmask.f32 3328  ;;  %v778_v26 = vadd.f32 %v9166_v27, %v777_v51  ;;  %vm13090_vm10 = vcmask 130048  }
 0x16e   : > { %v3161_v0 = vsel %vm13089_vm1, %v3151_v63, %v3160_v33  ;;  %v3423_v62 = vsel %vm13090_vm10, %v3374_v40, %v3336_v8  ;;  %v9777_v47 = vor.u32 %v3168_v32, %v3165_v11  ;;  %v909_v55 = vpack.c.bf16 %v845_v14, %v845_v14  ;;  %v1471_v14 = vld [vmem:[#allocation2 + $0x70] sm:$0xf] }
 0x16f   : > { %vm1406_vm8 = vcmp.ne.s32.totalorder %v1156_v36, 15  ;;  %v2563_v43 = vsel %vm8358_vm2, %v2555_v23, %v8362_v12  ;;  %v12650_v7 = vrot.slane %v9772_v4, 5  ;;  %v856_v45 = vmax.f32 %v778_v26, 0.0 }
 0x170   : > { %vm2283_vm7 = vmpackc.low %vm1406_vm8, %vm1406_vm8  ;;  %v2792_v25 = vunpack.c.l.b16 %v2563_v43  ;;  %v2793_v50 = vunpack.c.h.b16 %v2563_v43  ;;  %v3170_v63 = vsel %vm13089_vm1, %v3160_v33, %v9777_v47  ;;  %vm13091_vm4 = vcmask 60416   ;;  %3206 = vrot.lane.b32.xlu2 %v3161_v0, %s8191_s14  ;;  %v7867_v43 = vld [vmem:[#allocation3 + $0x8] sm:$0xff] }
 0x171   : > { %3902 = vst.msk [vmem:[#allocation2 + $0xbc] sm:$0xf] %vm13091_vm4, %v909_v55  ;;  %v4149_v27 = vunpack.c.l.b16 %v909_v55  ;;  %v2315_v51 = vsel %vm2283_vm7, 65537, %v12858_v38  ;;  %v3473_v11 = vunpack.c.l.b16 %v3423_v62  ;;  %vm13092_vm10 = vcmask 1042432   ;;  %v752_v55 = vpop.f32.mrf.mxu2 }
 0x172   : > { %v3322_v32 = vsel %vm13092_vm10, %v3319_v1, %v12650_v7  ;;  %v2566_v10 = vshrl.u32 %v2315_v51, 16  ;;  %v2569_v22 = vshll.u32 %v2315_v51, 16  ;;  %vm9792_vm8 = vcmp.ne.s32.totalorder %v2792_v25, %v8341_v58 }
 0x173   : > { %v13093_v52 = vmov 0  ;;  %3355 = vrot.lane.b32.xlu1 %v3322_v32, %s8192_s15  ;;  %v13095_v40 = vunpack.c.l.b16 %v9700_v39  ;;  %vm9802_vm7 = vcmp.ne.s32.totalorder %v2793_v50, %v8347_v2  ;;  %v13096_v8 = vmov 0 }
 0x174   : > { %v13094_v52 = vsel %vm9792_vm8, 4294967295, %v13093_v52  ;;  %v13097_v8 = vsel %vm9802_vm7, 4294967295, %v13096_v8  ;;  %v9806_v1 = vpack.c.bf16 %v856_v45, %v856_v45  ;;  %v3474_v37 = vunpack.c.h.b16 %v3423_v62  ;;  %vm12651_vm4 = vmpackc.low %vm9802_vm7, %vm9792_vm8 }
 0x175   : > { %v9799_v42 = vpack.c.b16 %v4149_v27, %v13095_v40  ;;  %v2568_v15 = vrot.slane %v2566_v10, 7  ;;  %v3506_v33 = vpack.c.b16 %v3473_v11, %v3473_v11  ;;  %v960_v36 = vadd.s32 232, %v8292_v21  ;;  %v9826_v27 = vld [vmem:[%s12501_s2] ss:$0 sm:$0xff] }
 0x176   : > { %v962_v39 = vadd.s32 248, %v8292_v21  ;;  %v3566_v0 = vrot.slane %v9655_v6, 4  ;;  %v2867_v26 = vsel %vm12651_vm4, %v1471_v14, 0  ;;  %vm13098_vm1 = vcmask 60416  }
 0x177   : > { %3913 = vst.msk [vmem:[#allocation2 + $0xe8] sm:$0xf] %vm13098_vm1, %v9806_v1  ;;  %v3507_v62 = vpack.c.b16 %v3474_v37, %v3474_v37  ;;  %v2571_v25 = vor.u32 %v2569_v22, %v2568_v15  ;;  %v3273_v50 = vunpack.c.l.b16 %v2867_v26  ;;  %v3568_v45 = vshrl.u32 %v3506_v33, 16 }
 0x178   : > { %v753_v6 = vadd.f32 %v9826_v27, %v752_v55  ;;  %v3571_v51 = vshll.u32 %v3506_v33, 16  ;;  %v1170_v32 = vand.u32 15, %v960_v36  ;;  %v2573_v14 = vrot.slane %v2568_v15, 4  ;;  %v1472_v15 = vld [vmem:[#allocation2 + $0x74] sm:$0xf] }
 0x179   : > { %v3577_v11 = vshrl.u32 %v3507_v62, 16  ;;  %vm13099_vm10 = vcmask 195584   ;;  %v2572_v10 = vsel %vm8358_vm2, %v8355_v5, %v2571_v25  ;;  %v3570_v22 = vrot.slane %v3568_v45, 7 }
 0x17a   : > { %7551 = vmatmul.msk.bf16.vlgmr.msrb.gmra.mxu1 %vm13099_vm10, %v7867_v43  ;;  %vm13100_vm1 = vmmov %vm13099_vm10  ;;  %v3580_v40 = vshll.u32 %v3507_v62, 16  ;;  %v1184_v37 = vand.u32 15, %v962_v39  ;;  %v2799_v26 = vunpack.c.l.b16 %v2572_v10  ;;  %v2800_v7 = vunpack.c.h.b16 %v2572_v10 }
 0x17b   : > { %7593 = vmatmul.msk.bf16.gmra.mxu2 %vm13100_vm1, %v7867_v43  ;;  %v9834_v23 = vrot.slane %v3577_v11, 7  ;;  %vm9836_vm4 = vcmp.ne.s32.totalorder %v1170_v32, 15  ;;  %v3573_v36 = vor.u32 %v3571_v51, %v3570_v22  ;;  %v3575_v55 = vrot.slane %v3570_v22, 4  ;;  %3208 = vrot.lane.b32.xlu1 %v3170_v63, %s8191_s14  ;;  %v1473_v11 = vld [vmem:[#allocation2 + $0x78] sm:$0xf] }
 0x17c   : > { %vm2285_vm10 = vmpackc.low %vm9836_vm4, %vm9836_vm4  ;;  %v2581_v62 = vsel %vm8358_vm2, %v2573_v14, %v8362_v12  ;;  %vm9846_vm1 = vcmp.ne.s32.totalorder %v1184_v37, 15  ;;  %vm9852_vm8 = vcmp.ne.s32.totalorder %v2799_v26, %v8341_v58  ;;  %v13105_v43 = vmov 0 }
 0x17d   : > { %v13106_v43 = vsel %vm9852_vm8, 4294967295, %v13105_v43  ;;  %vm9857_vm7 = vcmp.ne.s32.totalorder %v2800_v7, %v8347_v2  ;;  %v13107_v25 = vmov 0  ;;  %v3582_v45 = vor.u32 %v3580_v40, %v9834_v23 }
 0x17e   : > { %v13108_v25 = vsel %vm9857_vm7, 4294967295, %v13107_v25  ;;  %v846_v51 = vmax.f32 %v753_v6, 0.0  ;;  %vm12658_vm9 = vmpackc.low %vm9857_vm7, %vm9852_vm8  ;;  %v3574_v63 = vsel %vm8358_vm2, %v3566_v0, %v3573_v36  ;;  %v2317_v7 = vsel %vm2285_vm10, 65537, %v12858_v38 }
 0x17f   : > { %v2806_v32 = vunpack.c.l.b16 %v2581_v62  ;;  %v2807_v14 = vunpack.c.h.b16 %v2581_v62  ;;  %v2868_v10 = vsel %vm12658_vm9, %v1472_v15, 0  ;;  %v3583_v6 = vsel %vm8358_vm2, %v3575_v55, %v3582_v45 }
 0x180   : > { %vm13109_vm4 = vcmask 191488   ;;  %v2584_v22 = vshrl.u32 %v2317_v7, 16  ;;  %v2587_v40 = vshll.u32 %v2317_v7, 16  ;;  %v3274_v37 = vunpack.c.l.b16 %v2868_v10 }
 0x181   : > { %3862 = vst.msk [vmem:[#allocation3 + $0x14] sm:$0xf] %vm13109_vm4, %v3574_v63  ;;  %vm13110_vm13 = vmmov %vm13109_vm4  ;;  %vm9882_vm10 = vcmp.ne.s32.totalorder %v2806_v32, %v8341_v58  ;;  %v13111_v0 = vmov 0  ;;  %vm9887_vm12 = vcmp.ne.s32.totalorder %v2807_v14, %v8347_v2  ;;  %v13113_v26 = vmov 0 }
 0x182   : > { %3863 = vst.msk [vmem:[#allocation3 + $0x18] sm:$0xf] %vm13110_vm13, %v3583_v6  ;;  %v13112_v0 = vsel %vm9882_vm10, 4294967295, %v13111_v0  ;;  %v13114_v26 = vsel %vm9887_vm12, 4294967295, %v13113_v26  ;;  %vm13115_vm4 = vmpackc.low %vm9846_vm1, %vm9846_vm1  ;;  %v2586_v15 = vrot.slane %v2584_v22, 7  ;;  %v9901_v62 = vpack.c.bf16 %v846_v51, %v846_v51 }
 0x183   : > { %v2319_v33 = vsel %vm13115_vm4, 65537, %v12858_v38  ;;  %vm12657_vm13 = vmpackc.low %vm9887_vm12, %vm9882_vm10  ;;  %v9903_v45 = vpack.c.b16 %v3274_v37, %v3273_v50  ;;  %v1691_v63 = vsel %vm8351_vm15, %v8372_v17, %v9472_v20  ;;  %v1692_v7 = vshrl.u32 %v9099_v49, 16 }
 0x184   : > { %v2602_v36 = vshrl.u32 %v2319_v33, 16  ;;  %v2605_v55 = vshll.u32 %v2319_v33, 16  ;;  %v2869_v39 = vsel %vm12657_vm13, %v1473_v11, 0  ;;  %v13116_v32 = vunpack.c.l.b16 %v9480_v41 }
 0x185   : > { %v13117_v51 = vunpack.c.l.b16 %v9539_v13  ;;  %v2589_v50 = vor.u32 %v2587_v40, %v2586_v15  ;;  %v2591_v10 = vrot.slane %v2586_v15, 4  ;;  %vm13118_vm1 = vcmask 60416  }
 0x186   : > { %v9919_v6 = vrot.slane %v2602_v36, 7  ;;  %3903 = vst.msk [vmem:[#allocation2 + $0xc0] sm:$0xf] %vm13118_vm1, %v9901_v62  ;;  %v12666_v11 = vrot.slane %v9903_v45, 5  ;;  %v3275_v22 = vunpack.c.l.b16 %v2869_v39  ;;  %v1694_v37 = vrot.slane %v1692_v7, 4 }
 0x187   : > { %v3036_v14 = vpack.c.b16 %v13117_v51, %v13116_v32  ;;  %v1983_v33 = vunpack.c.l.b16 %v1691_v63  ;;  %v2590_v49 = vsel %vm8358_vm2, %v8355_v5, %v2589_v50  ;;  %v2599_v41 = vsel %vm8358_vm2, %v2591_v10, %v8362_v12  ;;  %v1474_v51 = vld [vmem:[#allocation2 + $0x7c] sm:$0xf] }
 0x188   : > { %v2607_v13 = vor.u32 %v2605_v55, %v9919_v6  ;;  %v1984_v40 = vunpack.c.h.b16 %v1691_v63  ;;  %v13119_v15 = vrot.slane %v9772_v4, 5  ;;  %vm13120_vm4 = vcmask 1042432   ;;  %v779_v4 = vpop.f32.mrf.mxu3 }
 0x189   : > { %v2813_v39 = vunpack.c.l.b16 %v2590_v49  ;;  %v2814_v7 = vunpack.c.h.b16 %v2590_v49  ;;  %v2820_v32 = vunpack.c.l.b16 %v2599_v41  ;;  %v2821_v12 = vunpack.c.h.b16 %v2599_v41 }
 0x18a   : > { %v3324_v36 = vsel %vm13120_vm4, %v13119_v15, %v12666_v11  ;;  %v2608_v50 = vsel %vm8358_vm2, %v8355_v5, %v2607_v13  ;;  %v1695_v55 = vor.u32 %v1694_v37, %v9472_v20  ;;  %vm9942_vm1 = vcmp.ne.s32.totalorder %v1983_v33, %v8341_v58  ;;  %v1475_v5 = vld [vmem:[#allocation2 + $0x80] sm:$0xf] }
 0x18b   : > { %3357 = vrot.lane.b32.xlu0 %v3324_v36, %s8192_s15  ;;  %v13121_v63 = vmov 0  ;;  %vm9947_vm4 = vcmp.ne.s32.totalorder %v2813_v39, %v8341_v58  ;;  %v13124_v10 = vmov 0  ;;  %vm9952_vm13 = vcmp.ne.s32.totalorder %v2814_v7, %v8347_v2  ;;  %v1476_v39 = vld [vmem:[#allocation2 + $0x84] sm:$0xf] }
 0x18c   : > { %v13122_v63 = vsel %vm9942_vm1, 4294967295, %v13121_v63  ;;  %v13125_v10 = vsel %vm9947_vm4, 4294967295, %v13124_v10  ;;  %v13127_v49 = vmov 0  ;;  %vm9957_vm9 = vcmp.ne.s32.totalorder %v2820_v32, %v8341_v58  ;;  %vm12665_vm10 = vmpackc.low %vm9952_vm13, %vm9947_vm4 }
 0x18d   : > { %13123 = vst [vmem:[#allocation57_spill] sm:$0xff] %v13122_v63  ;;  %v13128_v49 = vsel %vm9952_vm13, 4294967295, %v13127_v49  ;;  %v13130_v20 = vmov 0  ;;  %v2827_v37 = vunpack.c.l.b16 %v2608_v50  ;;  %vm9966_vm12 = vcmp.ne.s32.totalorder %v2821_v12, %v8347_v2 }
 0x18e   : > { %13126 = vst [vmem:[#allocation58_spill] sm:$0xff] %v13125_v10  ;;  %v13131_v20 = vsel %vm9957_vm9, 4294967295, %v13130_v20  ;;  %v13133_v33 = vmov 0  ;;  %v2828_v41 = vunpack.c.h.b16 %v2608_v50  ;;  %v1696_v13 = vrot.slane %v1695_v55, 4  ;;  %vm12669_vm7 = vmpackc.low %vm9966_vm12, %vm9957_vm9 }
 0x18f   : > { %13129 = vst [vmem:[#allocation59_spill] sm:$0xff] %v13128_v49  ;;  %v13134_v33 = vsel %vm9966_vm12, 4294967295, %v13133_v33  ;;  %vm9971_vm8 = vcmp.ne.s32.totalorder %v1984_v40, %v8347_v2  ;;  %v13136_v15 = vmov 0  ;;  %v2870_v36 = vsel %vm12665_vm10, %v1474_v51, 0 }
 0x190   : > { %13132 = vst [vmem:[#allocation60_spill] sm:$0xff] %v13131_v20  ;;  %v13137_v15 = vsel %vm9971_vm8, 4294967295, %v13136_v15  ;;  %vm9985_vm14 = vcmp.ne.s32.totalorder %v2827_v37, %v8341_v58  ;;  %v13139_v7 = vmov 0  ;;  %v3172_v40 = vshrl.u32 %v3036_v14, 16 }
 0x191   : > { %13135 = vst [vmem:[#allocation61_spill] sm:$0xff] %v13134_v33  ;;  %v13140_v7 = vsel %vm9985_vm14, 4294967295, %v13139_v7  ;;  %v3175_v32 = vshll.u32 %v3036_v14, 16  ;;  %v3276_v50 = vunpack.c.l.b16 %v2870_v36  ;;  %vm9990_vm5 = vcmp.ne.s32.totalorder %v2828_v41, %v8347_v2 }
 0x192   : > { %13138 = vst [vmem:[#allocation62_spill] sm:$0xff] %v13137_v15  ;;  %v13142_v12 = vmov 0  ;;  %v2871_v51 = vsel %vm12669_vm7, %v1475_v5, 0  ;;  %v1701_v55 = vsel %vm8351_vm15, %v1696_v13, %v8338_v57  ;;  %vm12672_vm10 = vmpackc.low %vm9990_vm5, %vm9985_vm14  ;;  %v4160_v36 = vunpack.c.l.b16 %v9806_v1 }
 0x193   : > { %13141 = vst [vmem:[#allocation63_spill] sm:$0xff] %v13140_v7  ;;  %v13143_v12 = vsel %vm9990_vm5, 4294967295, %v13142_v12  ;;  %v3277_v14 = vunpack.c.l.b16 %v2871_v51  ;;  %v1990_v37 = vunpack.c.l.b16 %v1701_v55  ;;  %v1991_v41 = vunpack.c.h.b16 %v1701_v55  ;;  %v754_v55 = vpop.f32.mrf.mxu2  ;;  %vm13153_vm14 = vmpackc.low %vm9971_vm8, %vm9942_vm1 }
 0x194   : > { %13144 = vst [vmem:[#allocation64_spill] sm:$0xff] %v13143_v12  ;;  %v3294_v11 = vpack.c.b16 %v3276_v50, %v3275_v22  ;;  %v2872_v5 = vsel %vm12672_vm10, %v1476_v39, 0  ;;  %v3174_v20 = vrot.slane %v3172_v40, 4  ;;  %v13145_v13 = vmov 0 }
 0x195   : > { %v3278_v33 = vunpack.c.l.b16 %v2872_v5  ;;  %vm10017_vm9 = vcmp.ne.s32.totalorder %v1990_v37, %v8341_v58  ;;  %vm10022_vm12 = vcmp.ne.s32.totalorder %v1991_v41, %v8347_v2  ;;  %v13148_v1 = vmov 0  ;;  %v8118_v41 = vld [vmem:[#allocation2 + $0x28] sm:$0xf] }
 0x196   : > { %v13146_v13 = vsel %vm10017_vm9, 4294967295, %v13145_v13  ;;  %v13149_v1 = vsel %vm10022_vm12, 4294967295, %v13148_v1  ;;  %v3177_v22 = vrot.slane %v3175_v32, 5  ;;  %v3325_v50 = vrot.slane %v3294_v11, 5  ;;  %vm12677_vm10 = vmpackc.low %vm10022_vm12, %vm10017_vm9 }
 0x197   : > { %13147 = vst [vmem:[#allocation65_spill] sm:$0xff] %v13146_v13  ;;  %v780_v39 = vadd.f32 %v9826_v27, %v779_v4  ;;  %v4187_v40 = vshrl.u32 %v8965_v31, 16  ;;  %v4190_v51 = vshll.u32 %v8965_v31, 16  ;;  %v10033_v37 = vpack.c.b16 %v3278_v33, %v3277_v14  ;;  %v8119_v31 = vld [vmem:[#allocation2 + $0x24] sm:$0xf]  ;;  %v782_v13 = vpop.f32.mrf.mxu3 }
 0x198   : > { %13150 = vst [vmem:[#allocation66_spill] sm:$0xff] %v13149_v1  ;;  %v2167_v11 = vsel %vm12677_vm10, %v8118_v41, 0  ;;  %v3178_v32 = vor.u32 %v3177_v22, %v3174_v20  ;;  %v755_v5 = vadd.f32 %v9826_v27, %v754_v55  ;;  %v13151_v7 = vrot.slane %v9903_v45, 5  ;;  %v10056_v1 = vpop.permute.xlu0 %3186 }
 0x199   : > { %vm13152_vm7 = vcmask 1042432   ;;  %v4150_v12 = vunpack.c.l.b16 %v9901_v62  ;;  %v2166_v33 = vsel %vm13153_vm14, %v8119_v31, 0  ;;  %v857_v14 = vmax.f32 %v780_v39, 0.0 }
 0x19a   : > { %v3326_v4 = vsel %vm13152_vm7, %v13151_v7, %v3325_v50  ;;  %v3327_v20 = vrot.slane %v10033_v37, 5  ;;  %v2916_v22 = vunpack.c.l.b16 %v2167_v11  ;;  %vm13154_vm10 = vsmask.f32 3328  ;;  %vm13155_vm14 = vmmov %vm13152_vm7 }
 0x19b   : > { %3359 = vrot.lane.b32.xlu2 %v3326_v4, %s8192_s15  ;;  %v3179_v45 = vsel %vm13154_vm10, %v9777_v47, %v3178_v32  ;;  %v847_v7 = vmax.f32 %v755_v5, 0.0  ;;  %v921_v62 = vpack.c.bf16 %v857_v14, %v857_v14  ;;  %v4189_v55 = vrot.slane %v4187_v40, 4 }
 0x19c   : > { %3210 = vrot.lane.b32.xlu0 %v3179_v45, %s8191_s14  ;;  %v937_v41 = vadd.s32 48, %v8292_v21  ;;  %v2609_v39 = vrot.slane %v9919_v6, 4  ;;  %v3328_v4 = vsel %vm13155_vm14, %v3325_v50, %v3327_v20  ;;  %v4192_v31 = vrot.slane %v4190_v51, 5  ;;  %v3189_v45 = vpop.permute.xlu2 %3188  ;;  %v2191_v51 = vld [vmem:[#allocation2 + $0x88] sm:$0x1] }
 0x19d   : > { %v911_v11 = vpack.c.bf16 %v847_v7, %v847_v7  ;;  %v783_v63 = vadd.f32 %v9826_v27, %v782_v13  ;;  %3361 = vrot.lane.b32.xlu1 %v3328_v4, %s8192_s15  ;;  %v2915_v47 = vunpack.c.l.b16 %v2166_v33  ;;  %vm13156_vm7 = vcmask 60416  }
 0x19e   : > { %3914 = vst.msk [vmem:[#allocation2 + $0xec] sm:$0xf] %vm13156_vm7, %v921_v62  ;;  %v4161_v40 = vunpack.c.l.b16 %v921_v62  ;;  %v1009_v5 = vand.u32 15, %v937_v41  ;;  %v2834_v14 = vunpack.c.l.b16 %v2609_v39  ;;  %vm13157_vm10 = vmmov %vm13156_vm7  ;;  %v2835_v15 = vunpack.c.h.b16 %v2609_v39 }
 0x19f   : > { %3904 = vst.msk [vmem:[#allocation2 + $0xc4] sm:$0xf] %vm13157_vm10, %v911_v11  ;;  %v4151_v6 = vunpack.c.l.b16 %v911_v11  ;;  %v858_v10 = vmax.f32 %v783_v63, 0.0  ;;  %v2944_v49 = vpack.c.b16 %v2916_v22, %v2915_v47  ;;  %v4193_v33 = vor.u32 %v4192_v31, %v4189_v55  ;;  %v3924_v47 = vld [vmem:[#allocation2 + $0x90] sm:$0xf] }
 0x1a0   : > { %v10066_v50 = vpack.c.b16 %v4161_v40, %v4160_v36  ;;  %vm1353_vm14 = vcmp.ne.s32.totalorder %v1009_v5, 0  ;;  %vm2838_vm9 = vcmp.ne.s32.totalorder %v2834_v14, %v8341_v58  ;;  %vm2839_vm12 = vcmp.ne.s32.totalorder %v2835_v15, %v8347_v2  ;;  %v757_v15 = vpop.f32.mrf.mxu2  ;;  %v3925_v40 = vld [vmem:[#allocation2 + $0x94] sm:$0xf]  ;;  %v784_v5 = vpop.f32.mrf.mxu3 }
 0x1a1   : > { %vm1547_vm7 = vmpackc.low %vm1353_vm14, %vm1353_vm14  ;;  %v10071_v7 = vpack.c.bf16 %v858_v10, %v858_v10  ;;  %vm13158_vm1 = vcmask 64512   ;;  %v10074_v41 = vpack.c.b16 %v4151_v6, %v4150_v12  ;;  %v13159_v36 = vmov 0  ;;  %v7868_v12 = vld [vmem:[#allocation3 + $0x10] sm:$0xff]  ;;  %v3340_v14 = vpop.permute.xlu0 %3339 }
 0x1a2   : > { %v3380_v62 = vsel %vm13158_vm1, %v2944_v49, %v3189_v45  ;;  %v1579_v63 = vsel %vm1547_vm7, 65537, %v12858_v38  ;;  %vm10077_vm10 = vmpackc.low %vm2839_vm12, %vm2838_vm9  ;;  %v10082_v22 = vadd.s32 80, %v8292_v21  ;;  %vm13161_vm1 = vcmask 60416  }
 0x1a3   : > { %v13160_v36 = vsel %vm10077_vm10, 4294967295, %v13159_v36  ;;  %3212 = vrot.lane.b32.xlu2 %v3178_v32, %s8191_s14  ;;  %v1668_v55 = vshll.u32 %v1579_v63, 16  ;;  %v1672_v39 = vshrl.u32 %v1579_v63, 16  ;;  %v2873_v10 = vsel %vm10077_vm10, %v2191_v51, 0  ;;  %3915 = vst.msk [vmem:[#allocation2 + $0xf0] sm:$0xf] %vm13161_vm1, %v10071_v7 }
 0x1a4   : > { %v3279_v4 = vunpack.c.l.b16 %v2873_v10  ;;  %v4195_v31 = vshrl.u32 %v9104_v61, 16  ;;  %v4198_v11 = vshll.u32 %v9104_v61, 16  ;;  %v758_v32 = vadd.f32 %v9826_v27, %v757_v15  ;;  %v3926_v51 = vld [vmem:[#allocation2 + $0x98] sm:$0xf]  ;;  %v3927_v15 = vld [vmem:[#allocation2 + $0x9c] sm:$0xf] }
 0x1a5   : > { %v1670_v45 = vrot.slane %v1668_v55, 5  ;;  %v1674_v6 = vrot.slane %v1672_v39, 4  ;;  %v785_v63 = vadd.f32 %v9826_v27, %v784_v5  ;;  %vm13162_vm12 = vcmask 195584   ;;  %4329 = vrot.lane.b32.xlu1 %v4193_v33, %s8191_s14  ;;  %v7902_v39 = vld [vmem:[#allocation3 + $0x10] sm:$0xff] }
 0x1a6   : > { %7552 = vmatmul.msk.bf16.gmra.mxu1 %vm13162_vm12, %v7868_v12  ;;  %vm13163_vm9 = vmmov %vm13162_vm12  ;;  %vm13164_vm14 = vcmask 130048   ;;  %v3296_v61 = vpack.c.b16 %v3279_v4, %v3279_v4  ;;  %v4197_v13 = vrot.slane %v4195_v31, 4  ;;  %v4200_v49 = vrot.slane %v4198_v11, 5 }
 0x1a7   : > { %7594 = vmatmul.msk.bf16.gmra.mxu2 %vm13163_vm9, %v7868_v12  ;;  %v10097_v10 = vsel %vm13164_vm14, %v3380_v62, %v3340_v14  ;;  %vm13165_vm7 = vnez %v12797_v54  ;;  %vm13166_vm1 = vnez %v12795_v53  ;;  %v1671_v12 = vsel %vm8351_vm15, %v8372_v17, %v1670_v45 }
 0x1a8   : > { %vm13167_vm8 = vmpackc.low %vm13165_vm7, %vm13166_vm1  ;;  %v1675_v5 = vor.u32 %v1674_v6, %v1670_v45  ;;  %vm13168_vm12 = vnez %v12801_v60  ;;  %vm13169_vm9 = vnez %v12799_v59  ;;  %vm13171_vm10 = vnez %v12823_v28  ;;  %v8120_v6 = vld [vmem:[#allocation2 + $0x1c] sm:$0xf] }
 0x1a9   : > { %v3990_v55 = vsel %vm13167_vm8, %v3924_v47, 0  ;;  %vm13170_vm14 = vmpackc.low %vm13168_vm12, %vm13169_vm9  ;;  %v1969_v54 = vunpack.c.l.b16 %v1671_v12  ;;  %v1970_v4 = vunpack.c.h.b16 %v1671_v12  ;;  %v3329_v31 = vrot.slane %v3296_v61, 5 }
 0x1aa   : > { %v3991_v62 = vsel %vm13170_vm14, %v3925_v40, 0  ;;  %vm13172_vm5 = vmpackc.low %vm8572_vm0, %vm13171_vm10  ;;  %v10118_v11 = vor.u32 %v4200_v49, %v4197_v13  ;;  %vm13173_vm8 = vcmask 195584   ;;  %v1676_v47 = vrot.slane %v1675_v5, 4 }
 0x1ab   : > { %v3992_v53 = vsel %vm13172_vm5, %v3926_v51, 0  ;;  %7764 = vmatmul.msk.bf16.vlgmr.msrb.gmra.mxu3 %vm13173_vm8, %v7902_v39  ;;  %vm13174_vm7 = vnez %v12829_v35  ;;  %vm13175_vm1 = vnez %v12827_v34  ;;  %v4396_v60 = vunpack.c.l.b16 %v3990_v55 }
 0x1ac   : > { %vm13176_vm12 = vmpackc.low %vm13174_vm7, %vm13175_vm1  ;;  %v4397_v30 = vunpack.c.l.b16 %v3991_v62  ;;  %vm10127_vm9 = vcmp.ne.s32.totalorder %v1969_v54, %v8341_v58  ;;  %v13177_v28 = vmov 0  ;;  %vm10132_vm0 = vcmp.ne.s32.totalorder %v1970_v4, %v8347_v2  ;;  %v3928_v54 = vld [vmem:[#allocation2 + $0xa0] sm:$0xf] }
 0x1ad   : > { %v3993_v59 = vsel %vm13176_vm12, %v3927_v15, 0  ;;  %v13178_v28 = vsel %vm10127_vm9, 4294967295, %v13177_v28  ;;  %v13179_v13 = vmov 0  ;;  %vm13181_vm5 = vcmask 1042432   ;;  %vm12690_vm14 = vmpackc.low %vm10132_vm0, %vm10127_vm9 }
 0x1ae   : > { %v13180_v13 = vsel %vm10132_vm0, 4294967295, %v13179_v13  ;;  %v3330_v35 = vsel %vm13181_vm5, %v3327_v20, %v3329_v31  ;;  %vm13182_vm10 = vsmask.f32 3328  ;;  %v1681_v49 = vsel %vm8351_vm15, %v1676_v47, %v8338_v57  ;;  %v759_v47 = vpop.f32.mrf.mxu2 }
 0x1af   : > { %v4202_v34 = vsel %vm13182_vm10, %v4193_v33, %v10118_v11  ;;  %3363 = vrot.lane.b32.xlu0 %v3330_v35, %s8192_s15  ;;  %v4398_v40 = vunpack.c.l.b16 %v3992_v53  ;;  %v4399_v37 = vunpack.c.l.b16 %v3993_v59  ;;  %v4429_v14 = vpack.c.b16 %v4397_v30, %v4396_v60  ;;  %v3929_v59 = vld [vmem:[#allocation2 + $0xa4] sm:$0xf]  ;;  %v8121_v60 = vld [vmem:[#allocation2 + $0x20] sm:$0xf] }
 0x1b0   : > { %4331 = vrot.lane.b32.xlu2 %v4202_v34, %s8191_s14  ;;  %v1976_v20 = vunpack.c.l.b16 %v1681_v49  ;;  %v1977_v45 = vunpack.c.h.b16 %v1681_v49  ;;  %v2164_v33 = vsel %vm12690_vm14, %v8120_v6, 0  ;;  %v848_v51 = vmax.f32 %v758_v32, 0.0 }
 0x1b1   : > { %v2913_v61 = vunpack.c.l.b16 %v2164_v33  ;;  %v10155_v15 = vpack.c.b16 %v4399_v37, %v4398_v40  ;;  %v4446_v55 = vrot.slane %v4429_v14, 5  ;;  %v859_v39 = vmax.f32 %v785_v63, 0.0  ;;  %v13189_v33 = vld [vmem:[#allocation13_spill] sm:$0xff] }
 0x1b2   : > { %vm10158_vm8 = vcmp.ne.s32.totalorder %v1976_v20, %v8341_v58  ;;  %v13183_v12 = vmov 0  ;;  %vm10163_vm7 = vcmp.ne.s32.totalorder %v1977_v45, %v8347_v2  ;;  %v13185_v5 = vmov 0 }
 0x1b3   : > { %v13184_v12 = vsel %vm10158_vm8, 4294967295, %v13183_v12  ;;  %v13186_v5 = vsel %vm10163_vm7, 4294967295, %v13185_v5  ;;  %v912_v62 = vpack.c.bf16 %v848_v51, %v848_v51  ;;  %v4204_v53 = vshrl.u32 %v9244_v24, 16  ;;  %vm12689_vm1 = vmpackc.low %vm10163_vm7, %vm10158_vm8  ;;  %v13191_v51 = vld [vmem:[#allocation12_spill] sm:$0xff] }
 0x1b4   : > { %v4447_v32 = vrot.slane %v10155_v15, 5  ;;  %v923_v63 = vpack.c.bf16 %v859_v39, %v859_v39  ;;  %v4207_v4 = vshll.u32 %v9244_v24, 16  ;;  %v4213_v31 = vshrl.u32 %v9311_v48, 16  ;;  %v3338_v39 = vpop.permute.xlu1 %3337 }
 0x1b5   : > { %v2165_v30 = vsel %vm12689_vm1, %v8121_v60, 0  ;;  %vm13187_vm12 = vcmask 60416   ;;  %v4152_v35 = vunpack.c.l.b16 %v912_v62  ;;  %v4206_v34 = vrot.slane %v4204_v53, 4 }
 0x1b6   : > { %3905 = vst.msk [vmem:[#allocation2 + $0xc8] sm:$0xf] %vm13187_vm12, %v912_v62  ;;  %v4216_v49 = vshll.u32 %v9311_v48, 16  ;;  %v2914_v40 = vunpack.c.l.b16 %v2165_v30  ;;  %v4448_v24 = vsel %vm13181_vm5, %v4446_v55, %v4447_v32  ;;  %vm13188_vm10 = vmmov %vm13187_vm12  ;;  %v4163_v37 = vunpack.c.l.b16 %v923_v63 }
 0x1b7   : > { %3916 = vst.msk [vmem:[#allocation2 + $0xf4] sm:$0xf] %vm13188_vm10, %v923_v63  ;;  %v4209_v14 = vrot.slane %v4207_v4, 5  ;;  %4481 = vrot.lane.b32.xlu1 %v4448_v24, %s8192_s15  ;;  %v4215_v20 = vrot.slane %v4213_v31, 4  ;;  %v760_v6 = vadd.f32 %v9826_v27, %v759_v47  ;;  %vm13190_vm1 = vnez %v13189_v33  ;;  %4479 = vrot.lane.b32.xlu0 %v4446_v55, %s8192_s15  ;;  %v13195_v4 = vld [vmem:[#allocation15_spill] sm:$0xff]  ;;  %v13197_v31 = vld [vmem:[#allocation14_spill] sm:$0xff] }
 0x1b8   : > { %v4218_v45 = vrot.slane %v4216_v49, 5  ;;  %vm13192_vm12 = vnez %v13191_v51  ;;  %v2943_v48 = vpack.c.b16 %v2914_v40, %v2913_v61  ;;  %v13194_v62 = vunpack.c.l.b16 %v10071_v7  ;;  %v787_v61 = vpop.f32.mrf.mxu3 }
 0x1b9   : > { %vm13193_vm14 = vmpackc.low %vm13190_vm1, %vm13192_vm12  ;;  %v4210_v63 = vor.u32 %v4209_v14, %v4206_v34  ;;  %vm13196_vm5 = vnez %v13195_v4  ;;  %vm13198_vm10 = vnez %v13197_v31  ;;  %v849_v30 = vmax.f32 %v760_v6, 0.0 }
 0x1ba   : > { %v3994_v15 = vsel %vm13193_vm14, %v3928_v54, 0  ;;  %v10194_v53 = vpack.c.b16 %v4163_v37, %v13194_v62  ;;  %vm13199_vm8 = vmpackc.low %vm13196_vm5, %vm13198_vm10  ;;  %v10201_v60 = vor.u32 %v4218_v45, %v4215_v20  ;;  %vm13200_vm14 = vcmask 64512  }
 0x1bb   : > { %v3995_v47 = vsel %vm13199_vm8, %v3929_v59, 0  ;;  %v4400_v49 = vunpack.c.l.b16 %v3994_v15  ;;  %v3377_v55 = vsel %vm13200_vm14, %v2943_v48, %v10056_v1  ;;  %vm13201_vm1 = vsmask.f32 3328  ;;  %vm13208_vm14 = vmpackc.low %vm8837_vm3, %vm8788_vm6 }
 0x1bc   : > { %v4401_v54 = vunpack.c.l.b16 %v3995_v47  ;;  %v4211_v7 = vsel %vm13201_vm1, %v10118_v11, %v4210_v63  ;;  %v788_v34 = vadd.f32 %v9826_v27, %v787_v61  ;;  %v3477_v40 = vunpack.c.l.b16 %v10097_v10  ;;  %vm13203_vm8 = vmmov %vm13201_vm1  ;;  %v3930_v11 = vld [vmem:[#allocation2 + $0xa8] sm:$0xf] }
 0x1bd   : > { %vm13202_vm12 = vcmask 130048   ;;  %4333 = vrot.lane.b32.xlu2 %v4211_v7, %s8191_s14  ;;  %v4220_v59 = vsel %vm13203_vm8, %v4210_v63, %v10201_v60  ;;  %v913_v37 = vpack.c.bf16 %v849_v30, %v849_v30  ;;  %v3478_v6 = vunpack.c.h.b16 %v10097_v10  ;;  %v3931_v30 = vld [vmem:[#allocation2 + $0xac] sm:$0xf] }
 0x1be   : > { %v3425_v24 = vsel %vm13202_vm12, %v3377_v55, %v3338_v39  ;;  %v10213_v14 = vpack.c.b16 %v4401_v54, %v4400_v49  ;;  %v860_v1 = vmax.f32 %v788_v34, 0.0  ;;  %vm13204_vm5 = vcmask 60416  }
 0x1bf   : > { %v3475_v20 = vunpack.c.l.b16 %v3425_v24  ;;  %v3476_v45 = vunpack.c.h.b16 %v3425_v24  ;;  %3906 = vst.msk [vmem:[#allocation2 + $0xcc] sm:$0xf] %vm13204_vm5, %v913_v37  ;;  %v4153_v33 = vunpack.c.l.b16 %v913_v37  ;;  %v3510_v15 = vpack.c.b16 %v3477_v40, %v3477_v40  ;;  %4335 = vrot.lane.b32.xlu1 %v4220_v59, %s8191_s14  ;;  %vm13209_vm1 = vmmov %vm13204_vm5 }
 0x1c0   : > { %v4449_v51 = vrot.slane %v10213_v14, 5  ;;  %v1037_v48 = vand.u32 15, %v10082_v22  ;;  %v10219_v63 = vpack.c.bf16 %v860_v1, %v860_v1  ;;  %v3511_v4 = vpack.c.b16 %v3478_v6, %v3478_v6 }
 0x1c1   : > { %v3508_v39 = vpack.c.b16 %v3475_v20, %v3475_v20  ;;  %v3509_v62 = vpack.c.b16 %v3476_v45, %v3476_v45  ;;  %v10222_v31 = vpack.c.b16 %v4153_v33, %v4152_v35  ;;  %vm13205_vm10 = vcmask 1042432   ;;  %v13211_v45 = vld [vmem:[#allocation22_spill] sm:$0xff] }
 0x1c2   : > { %v4450_v10 = vsel %vm13205_vm10, %v4447_v32, %v4449_v51  ;;  %v3604_v47 = vshrl.u32 %v3510_v15, 16  ;;  %v3996_v61 = vsel %vm13208_vm14, %v3930_v11, 0  ;;  %3917 = vst.msk [vmem:[#allocation2 + $0xf8] sm:$0xf] %vm13209_vm1, %v10219_v63  ;;  %v3607_v35 = vshll.u32 %v3510_v15, 16 }
 0x1c3   : > { %v3586_v55 = vshrl.u32 %v3508_v39, 16  ;;  %v3589_v7 = vshll.u32 %v3508_v39, 16  ;;  %v3595_v34 = vshrl.u32 %v3509_v62, 16  ;;  %4483 = vrot.lane.b32.xlu0 %v4450_v10, %s8192_s15  ;;  %v3598_v40 = vshll.u32 %v3509_v62, 16  ;;  %v3932_v11 = vld [vmem:[#allocation2 + $0xb0] sm:$0xf] }
 0x1c4   : > { %v3606_v24 = vrot.slane %v3604_v47, 7  ;;  %v3613_v32 = vshrl.u32 %v3511_v4, 16  ;;  %v3616_v59 = vshll.u32 %v3511_v4, 16  ;;  %vm13212_vm6 = vnez %v13211_v45  ;;  %v3933_v15 = vld [vmem:[#allocation2 + $0xb4] sm:$0xf]  ;;  %v13214_v45 = vld [vmem:[#allocation25_spill] sm:$0xff] }
 0x1c5   : > { %v3588_v37 = vrot.slane %v3586_v55, 7  ;;  %v3597_v14 = vrot.slane %v3595_v34, 7  ;;  %vm13213_vm3 = vmpackc.low %vm8898_vm11, %vm13212_vm6  ;;  %v4402_v6 = vunpack.c.l.b16 %v3996_v61  ;;  %v4164_v55 = vunpack.c.l.b16 %v10219_v63 }
 0x1c6   : > { %v3997_v1 = vsel %vm13213_vm3, %v3931_v30, 0  ;;  %v3609_v33 = vor.u32 %v3607_v35, %v3606_v24  ;;  %v3611_v39 = vrot.slane %v3606_v24, 4  ;;  %v10238_v10 = vrot.slane %v3613_v32, 7  ;;  %v13216_v30 = vld [vmem:[#allocation24_spill] sm:$0xff]  ;;  %v789_v35 = vpop.f32.mrf.mxu3  ;;  %v13220_v32 = vld [vmem:[#allocation27_spill] sm:$0xff] }
 0x1c7   : > { %v4403_v49 = vunpack.c.l.b16 %v3997_v1  ;;  %v3591_v62 = vor.u32 %v3589_v7, %v3588_v37  ;;  %v3593_v47 = vrot.slane %v3588_v37, 4  ;;  %v3600_v54 = vor.u32 %v3598_v40, %v3597_v14 }
 0x1c8   : > { %v3602_v4 = vrot.slane %v3597_v14, 4  ;;  %v3618_v34 = vor.u32 %v3616_v59, %v10238_v10  ;;  %vm13215_vm11 = vnez %v13214_v45  ;;  %vm13217_vm12 = vnez %v13216_v30  ;;  %v13222_v59 = vld [vmem:[#allocation26_spill] sm:$0xff] }
 0x1c9   : > { %v4432_v20 = vpack.c.b16 %v4403_v49, %v4402_v6  ;;  %vm13218_vm8 = vmpackc.low %vm13215_vm11, %vm13217_vm12  ;;  %v13219_v24 = vrot.slane %v9834_v23, 4  ;;  %v3601_v40 = vsel %vm8358_vm2, %v3593_v47, %v3600_v54  ;;  %vm13221_vm5 = vnez %v13220_v32 }
 0x1ca   : > { %v3998_v61 = vsel %vm13218_vm8, %v3932_v11, 0  ;;  %v3610_v63 = vsel %vm8358_vm2, %v3602_v4, %v3609_v33  ;;  %vm13223_vm10 = vnez %v13222_v59  ;;  %vm13225_vm1 = vcmask 191488   ;;  %v6513_v4 = vld [vmem:[%s12504_s5] sm:$0xf] }
 0x1cb   : > { %v3592_v7 = vsel %vm8358_vm2, %v13219_v24, %v3591_v62  ;;  %vm13224_vm14 = vmpackc.low %vm13221_vm5, %vm13223_vm10  ;;  %v3619_v23 = vsel %vm8358_vm2, %v3611_v39, %v3618_v34  ;;  %v4451_v14 = vrot.slane %v4432_v20, 5  ;;  %v4404_v1 = vunpack.c.l.b16 %v3998_v61 }
 0x1cc   : > { %v3999_v37 = vsel %vm13224_vm14, %v3933_v15, 0  ;;  %3864 = vst.msk [vmem:[#allocation3 + $0x1c] sm:$0xf] %vm13225_vm1, %v3592_v7  ;;  %vm13226_vm6 = vmmov %vm13225_vm1  ;;  %v4222_v11 = vshrl.u32 %v9574_v44, 16  ;;  %v4225_v33 = vshll.u32 %v9574_v44, 16  ;;  %v790_v49 = vadd.f32 %v9826_v27, %v789_v35 }
 0x1cd   : > { %v4405_v6 = vunpack.c.l.b16 %v3999_v37  ;;  %3865 = vst.msk [vmem:[#allocation3 + $0x20] sm:$0xf] %vm13226_vm6, %v3601_v40  ;;  %v4231_v62 = vshrl.u32 %v9799_v42, 16  ;;  %vm13227_vm3 = vmmov %vm13225_vm1  ;;  %vm13228_vm11 = vcmask 1042432   ;;  %v4234_v39 = vshll.u32 %v9799_v42, 16 }
 0x1ce   : > { %3866 = vst.msk [vmem:[#allocation3 + $0x24] sm:$0xf] %vm13227_vm3, %v3610_v63  ;;  %v4452_v15 = vsel %vm13228_vm11, %v4449_v51, %v4451_v14  ;;  %v4240_v54 = vshrl.u32 %v10074_v41, 16  ;;  %vm13229_vm12 = vmmov %vm13225_vm1  ;;  %v4224_v44 = vrot.slane %v4222_v11, 4  ;;  %v4227_v34 = vrot.slane %v4225_v33, 5 }
 0x1cf   : > { %v10270_v47 = vpack.c.b16 %v4405_v6, %v4404_v1  ;;  %3867 = vst.msk [vmem:[#allocation3 + $0x28] sm:$0xf] %vm13229_vm12, %v3619_v23  ;;  %4485 = vrot.lane.b32.xlu2 %v4452_v15, %s8192_s15  ;;  %v861_v20 = vmax.f32 %v790_v49, 0.0  ;;  %v4233_v45 = vrot.slane %v4231_v62, 4  ;;  %v4236_v30 = vrot.slane %v4234_v39, 5  ;;  %vm13231_vm10 = vmmov %vm13228_vm11  ;;  %v792_v62 = vpop.f32.mrf.mxu3  ;;  %v13237_v39 = vld [vmem:[#allocation29_spill] sm:$0xff] }
 0x1d0   : > { %v4242_v61 = vrot.slane %v4240_v54, 4  ;;  %v4243_v42 = vshll.u32 %v10074_v41, 16  ;;  %v4228_v35 = vor.u32 %v4227_v34, %v4224_v44  ;;  %vm13230_vm8 = vcmask 1043456   ;;  %v3934_v49 = vld [vmem:[#allocation2 + $0xb8] sm:$0xf]  ;;  %v13239_v54 = vld [vmem:[#allocation28_spill] sm:$0xff] }
 0x1d1   : > { %v4453_v51 = vrot.slane %v10270_v47, 5  ;;  %v925_v24 = vpack.c.bf16 %v861_v20, %v861_v20  ;;  %v6618_v7 = vsel %vm13230_vm8, %v6513_v4, 0  ;;  %vm1357_vm5 = vcmp.ne.s32.totalorder %v1037_v48, 0  ;;  %v13242_v44 = vld [vmem:[#allocation31_spill] sm:$0xff]  ;;  %v13244_v34 = vld [vmem:[#allocation30_spill] sm:$0xff] }
 0x1d2   : > { %v4237_v63 = vor.u32 %v4236_v30, %v4233_v45  ;;  %v4245_v32 = vrot.slane %v4243_v42, 5  ;;  %6627 = vmatpush.bf16.msrb.mxu0 %v6618_v7  ;;  %vm1551_vm14 = vmpackc.low %vm1357_vm5, %vm1357_vm5  ;;  %v10288_v59 = vadd.s32 112, %v8292_v21  ;;  %vm13232_vm1 = vsmask.f32 3328  ;;  %v3937_v30 = vld [vmem:[#allocation2 + $0xc4] sm:$0xf] }
 0x1d3   : > { %v4454_v40 = vsel %vm13231_vm10, %v4451_v14, %v4453_v51  ;;  %v4229_v41 = vsel %vm13232_vm1, %v10201_v60, %v4228_v35  ;;  %vm13233_vm6 = vcmask 60416   ;;  %v4165_v22 = vunpack.c.l.b16 %v925_v24  ;;  %v7869_v48 = vld [vmem:[#allocation3 + $0x18] sm:$0xff]  ;;  %vm13234_vm3 = vmmov %vm13232_vm1  ;;  %v3935_v60 = vld [vmem:[#allocation2 + $0xbc] sm:$0xf] }
 0x1d4   : > { %4487 = vrot.lane.b32.xlu1 %v4454_v40, %s8192_s15  ;;  %3918 = vst.msk [vmem:[#allocation2 + $0xfc] sm:$0xf] %vm13233_vm6, %v925_v24  ;;  %v7903_v37 = vld [vmem:[#allocation3 + $0x18] sm:$0xff]  ;;  %v1583_v23 = vsel %vm1551_vm14, 65537, %v12858_v38  ;;  %v10296_v14 = vadd.s32 96, %v8292_v21  ;;  %4337 = vrot.lane.b32.xlu0 %v4229_v41, %s8191_s14  ;;  %v4238_v1 = vsel %vm13234_vm3, %v4228_v35, %v4237_v63  ;;  %v10300_v6 = vor.u32 %v4245_v32, %v4242_v61 }
 0x1d5   : > { %v1708_v11 = vshll.u32 %v1583_v23, 16  ;;  %v1712_v33 = vshrl.u32 %v1583_v23, 16  ;;  %v10302_v15 = vpack.c.b16 %v4165_v22, %v4164_v55  ;;  %vm13235_vm11 = vcmask 195584   ;;  %v3936_v55 = vld [vmem:[#allocation2 + $0xc0] sm:$0xf]  ;;  %v13252_v22 = vld [vmem:[#allocation33_spill] sm:$0xff] }
 0x1d6   : > { %7553 = vmatmul.msk.bf16.gmra.mxu1 %vm13235_vm11, %v7869_v48  ;;  %vm13236_vm12 = vmmov %vm13235_vm11  ;;  %vm13238_vm8 = vnez %v13237_v39  ;;  %vm13240_vm5 = vnez %v13239_v54  ;;  %vm13243_vm14 = vnez %v13242_v44  ;;  %vm13245_vm1 = vnez %v13244_v34  ;;  %v3938_v7 = vld [vmem:[#allocation2 + $0xc8] sm:$0xf]  ;;  %v13257_v54 = vld [vmem:[#allocation36_spill] sm:$0xff] }
 0x1d7   : > { %7595 = vmatmul.msk.bf16.gmra.mxu2 %vm13236_vm12, %v7869_v48  ;;  %vm13241_vm10 = vmpackc.low %vm13238_vm8, %vm13240_vm5  ;;  %v793_v45 = vadd.f32 %v9826_v27, %v792_v62  ;;  %v1710_v42 = vrot.slane %v1708_v11, 5  ;;  %v1714_v35 = vrot.slane %v1712_v33, 4  ;;  %4339 = vrot.lane.b32.xlu2 %v4238_v1, %s8191_s14  ;;  %vm13249_vm12 = vnez %v12954_v56  ;;  %v13254_v48 = vld [vmem:[#allocation32_spill] sm:$0xff]  ;;  %v13262_v34 = vld [vmem:[#allocation38_spill] sm:$0xff] }
 0x1d8   : > { %v4000_v4 = vsel %vm13241_vm10, %v3934_v49, 0  ;;  %vm13246_vm6 = vmpackc.low %vm13243_vm14, %vm13245_vm1  ;;  %vm13250_vm8 = vnez %v12952_v29  ;;  %vm13253_vm10 = vnez %v13252_v22  ;;  %vm13255_vm14 = vnez %v13254_v48  ;;  %v8122_v22 = vld [vmem:[#allocation2 + $0x2c] sm:$0xf] }
 0x1d9   : > { %v4001_v20 = vsel %vm13246_vm6, %v3935_v60, 0  ;;  %vm13247_vm3 = vmmov %vm13235_vm11  ;;  %vm13248_vm11 = vsmask.f32 3328  ;;  %v4406_v24 = vunpack.c.l.b16 %v4000_v4  ;;  %v862_v32 = vmax.f32 %v793_v45, 0.0  ;;  %v13259_v4 = vld [vmem:[#allocation34_spill] sm:$0xff] }
 0x1da   : > { %7765 = vmatmul.msk.bf16.gmra.mxu3 %vm13247_vm3, %v7903_v37  ;;  %v4247_v61 = vsel %vm13248_vm11, %v4237_v63, %v10300_v6  ;;  %v4407_v40 = vunpack.c.l.b16 %v4001_v20  ;;  %vm13251_vm5 = vmpackc.low %vm13249_vm12, %vm13250_vm8  ;;  %v3939_v37 = vld [vmem:[#allocation2 + $0xcc] sm:$0xf]  ;;  %v1711_v23 = vsel %vm8351_vm15, %v8372_v17, %v1710_v42  ;;  %v1715_v1 = vor.u32 %v1714_v35, %v1710_v42  ;;  %v13264_v20 = vld [vmem:[#allocation37_spill] sm:$0xff] }
 0x1db   : > { %v4002_v41 = vsel %vm13251_vm5, %v3936_v55, 0  ;;  %vm13256_vm1 = vmpackc.low %vm13253_vm10, %vm13255_vm14  ;;  %v1997_v49 = vunpack.c.l.b16 %v1711_v23  ;;  %v1998_v56 = vunpack.c.h.b16 %v1711_v23  ;;  %v10334_v29 = vpack.c.bf16 %v862_v32, %v862_v32 }
 0x1dc   : > { %v4003_v63 = vsel %vm13256_vm1, %v3937_v30, 0  ;;  %v4408_v11 = vunpack.c.l.b16 %v4002_v41  ;;  %v4434_v60 = vpack.c.b16 %v4407_v40, %v4406_v24  ;;  %v1716_v62 = vrot.slane %v1715_v1, 4  ;;  %4341 = vrot.lane.b32.xlu1 %v4247_v61, %s8191_s14 }
 0x1dd   : > { %v4409_v33 = vunpack.c.l.b16 %v4003_v63  ;;  %vm13258_vm6 = vnez %v13257_v54  ;;  %vm13260_vm3 = vnez %v13259_v4  ;;  %vm13263_vm12 = vnez %v13262_v34  ;;  %v8123_v54 = vld [vmem:[#allocation2 + $0x30] sm:$0xf]  ;;  %v7870_v34 = vld [vmem:[#allocation3 + $0x20] sm:$0xff] }
 0x1de   : > { %vm13261_vm11 = vmpackc.low %vm13258_vm6, %vm13260_vm3  ;;  %vm13265_vm8 = vnez %v13264_v20  ;;  %vm10348_vm10 = vcmp.ne.s32.totalorder %v1997_v49, %v8341_v58  ;;  %v13267_v55 = vmov 0  ;;  %vm10353_vm14 = vcmp.ne.s32.totalorder %v1998_v56, %v8347_v2  ;;  %v794_v56 = vpop.f32.mrf.mxu3 }
 0x1df   : > { %v4435_v39 = vpack.c.b16 %v4409_v33, %v4408_v11  ;;  %v4004_v44 = vsel %vm13261_vm11, %v3938_v7, 0  ;;  %vm13266_vm5 = vmpackc.low %vm13263_vm12, %vm13265_vm8  ;;  %v13268_v55 = vsel %vm10348_vm10, 4294967295, %v13267_v55  ;;  %v13269_v30 = vmov 0 }
 0x1e0   : > { %v4005_v45 = vsel %vm13266_vm5, %v3939_v37, 0  ;;  %v13270_v30 = vsel %vm10353_vm14, 4294967295, %v13269_v30  ;;  %v4455_v42 = vrot.slane %v4434_v60, 5  ;;  %vm13271_vm1 = vcmask 60416   ;;  %vm12693_vm6 = vmpackc.low %vm10353_vm14, %vm10348_vm10 }
 0x1e1   : > { %3919 = vst.msk [vmem:[#allocation2 + $0x100] sm:$0xf] %vm13271_vm1, %v10334_v29  ;;  %v4166_v35 = vunpack.c.l.b16 %v10334_v29  ;;  %v1721_v61 = vsel %vm8351_vm15, %v1716_v62, %v8338_v57  ;;  %v4457_v24 = vrot.slane %v4435_v39, 5  ;;  %v4410_v7 = vunpack.c.l.b16 %v4004_v44  ;;  %v13278_v62 = vld [vmem:[#allocation35_spill] sm:$0xff] }
 0x1e2   : > { %v4411_v40 = vunpack.c.l.b16 %v4005_v45  ;;  %v2004_v32 = vunpack.c.l.b16 %v1721_v61  ;;  %v2005_v41 = vunpack.c.h.b16 %v1721_v61  ;;  %v2168_v48 = vsel %vm12693_vm6, %v8122_v22, 0 }
 0x1e3   : > { %vm13272_vm3 = vcmask 1042432   ;;  %v2917_v37 = vunpack.c.l.b16 %v2168_v48  ;;  %v1065_v11 = vand.u32 15, %v10288_v59  ;;  %v13274_v33 = vmov 0 }
 0x1e4   : > { %v4456_v63 = vsel %vm13272_vm3, %v4453_v51, %v4455_v42  ;;  %vm13273_vm11 = vmmov %vm13272_vm3  ;;  %v10377_v1 = vpack.c.b16 %v4411_v40, %v4410_v7  ;;  %vm10381_vm12 = vcmp.ne.s32.totalorder %v2004_v32, %v8341_v58  ;;  %vm10386_vm8 = vcmp.ne.s32.totalorder %v2005_v41, %v8347_v2  ;;  %v7904_v7 = vld [vmem:[#allocation3 + $0x20] sm:$0xff]  ;;  %v3191_v40 = vpop.permute.xlu1 %3190 }
 0x1e5   : > { %4489 = vrot.lane.b32.xlu0 %v4456_v63, %s8192_s15  ;;  %v4458_v23 = vsel %vm13273_vm11, %v4455_v42, %v4457_v24  ;;  %v13275_v33 = vsel %vm10381_vm12, 4294967295, %v13274_v33  ;;  %v13276_v49 = vmov 0  ;;  %v4249_v47 = vshrl.u32 %v10222_v31, 16  ;;  %vm12692_vm5 = vmpackc.low %vm10386_vm8, %vm10381_vm12 }
 0x1e6   : > { %v13277_v49 = vsel %vm10386_vm8, 4294967295, %v13276_v49  ;;  %4491 = vrot.lane.b32.xlu2 %v4458_v23, %s8192_s15  ;;  %v4252_v51 = vshll.u32 %v10222_v31, 16  ;;  %v4459_v59 = vrot.slane %v10377_v1, 5  ;;  %vm1361_vm1 = vcmp.ne.s32.totalorder %v1065_v11, 0 }
 0x1e7   : > { %v795_v60 = vadd.f32 %v9826_v27, %v794_v56  ;;  %v4258_v39 = vshrl.u32 %v13278_v62, 16  ;;  %v2169_v31 = vsel %vm12692_vm5, %v8123_v54, 0  ;;  %vm1555_vm3 = vmpackc.low %vm1361_vm1, %vm1361_vm1  ;;  %v4251_v4 = vrot.slane %v4249_v47, 4  ;;  %v13279_v47 = vld [vmem:[#allocation47_spill] sm:$0xff]  ;;  %v3342_v54 = vpop.permute.xlu2 %3341 }
 0x1e8   : > { %v4254_v44 = vrot.slane %v4252_v51, 5  ;;  %v4261_v20 = vshll.u32 %v13278_v62, 16  ;;  %v2918_v45 = vunpack.c.l.b16 %v2169_v31  ;;  %v4460_v27 = vsel %vm13273_vm11, %v4457_v24, %v4459_v59 }
 0x1e9   : > { %v1587_v42 = vsel %vm1555_vm3, 65537, %v12858_v38  ;;  %v863_v61 = vmax.f32 %v795_v60, 0.0  ;;  %4493 = vrot.lane.b32.xlu1 %v4460_v27, %s8192_s15  ;;  %v4260_v48 = vrot.slane %v4258_v39, 4  ;;  %v4267_v51 = vshrl.u32 %v13279_v47, 16 }
 0x1ea   : > { %v1748_v32 = vshll.u32 %v1587_v42, 16  ;;  %v1752_v41 = vshrl.u32 %v1587_v42, 16  ;;  %v4255_v22 = vor.u32 %v4254_v44, %v4251_v4  ;;  %v2945_v63 = vpack.c.b16 %v2918_v45, %v2917_v37 }
 0x1eb   : > { %v927_v23 = vpack.c.bf16 %v863_v61, %v863_v61  ;;  %v4263_v11 = vrot.slane %v4261_v20, 5  ;;  %vm13280_vm1 = vsmask.f32 3328  ;;  %vm13281_vm3 = vcmask 195584  }
 0x1ec   : > { %v1750_v56 = vrot.slane %v1748_v32, 5  ;;  %v1754_v62 = vrot.slane %v1752_v41, 4  ;;  %v4256_v24 = vsel %vm13280_vm1, %v10300_v6, %v4255_v22  ;;  %7554 = vmatmul.msk.bf16.gmra.mxu1 %vm13281_vm3, %v7870_v34  ;;  %vm13282_vm11 = vmmov %vm13281_vm3  ;;  %v4270_v60 = vshll.u32 %v13279_v47, 16 }
 0x1ed   : > { %7596 = vmatmul.msk.bf16.gmra.mxu2 %vm13282_vm11, %v7870_v34  ;;  %vm13283_vm5 = vcmask 64512   ;;  %4343 = vrot.lane.b32.xlu0 %v4256_v24, %s8191_s14  ;;  %vm13284_vm6 = vcmask 60416   ;;  %v4167_v37 = vunpack.c.l.b16 %v927_v23  ;;  %vm13285_vm7 = vmmov %vm13281_vm3  ;;  %v4264_v39 = vor.u32 %v4263_v11, %v4260_v48  ;;  %v3940_v48 = vld [vmem:[#allocation2 + $0xd0] sm:$0xf] }
 0x1ee   : > { %v3383_v31 = vsel %vm13283_vm5, %v2945_v63, %v3191_v40  ;;  %3920 = vst.msk [vmem:[#allocation2 + $0x104] sm:$0xf] %vm13284_vm6, %v927_v23  ;;  %7766 = vmatmul.msk.bf16.gmra.mxu3 %vm13285_vm7, %v7904_v7  ;;  %v4269_v4 = vrot.slane %v4267_v51, 4  ;;  %vm13286_vm9 = vcmask 130048   ;;  %v1751_v44 = vsel %vm8351_vm15, %v8372_v17, %v1750_v56  ;;  %vm13287_vm7 = vmmov %vm13280_vm1  ;;  %v3941_v51 = vld [vmem:[#allocation2 + $0xd4] sm:$0xf] }
 0x1ef   : > { %v3429_v6 = vsel %vm13286_vm9, %v3383_v31, %v3342_v54  ;;  %v1755_v34 = vor.u32 %v1754_v62, %v1750_v56  ;;  %v4272_v20 = vrot.slane %v4270_v60, 5  ;;  %v2025_v42 = vunpack.c.l.b16 %v1751_v44  ;;  %vm13294_vm5 = vmmov %vm13280_vm1  ;;  %v13295_v24 = vld [vmem:[#allocation40_spill] sm:$0xff]  ;;  %v13297_v60 = vld [vmem:[#allocation39_spill] sm:$0xff] }
 0x1f0   : > { %v3479_v45 = vunpack.c.l.b16 %v3429_v6  ;;  %v3480_v27 = vunpack.c.h.b16 %v3429_v6  ;;  %v2026_v61 = vunpack.c.h.b16 %v1751_v44  ;;  %v10427_v32 = vpack.c.b16 %v4167_v37, %v4166_v35  ;;  %v13300_v44 = vld [vmem:[#allocation42_spill] sm:$0xff] }
 0x1f1   : > { %v1756_v40 = vrot.slane %v1755_v34, 4  ;;  %v4265_v7 = vsel %vm13287_vm7, %v4255_v22, %v4264_v39  ;;  %v10430_v41 = vor.u32 %v4272_v20, %v4269_v4  ;;  %vm10433_vm9 = vcmp.ne.s32.totalorder %v2025_v42, %v8341_v58  ;;  %v13302_v34 = vld [vmem:[#allocation41_spill] sm:$0xff] }
 0x1f2   : > { %v3512_v63 = vpack.c.b16 %v3479_v45, %v3479_v45  ;;  %v3513_v23 = vpack.c.b16 %v3480_v27, %v3480_v27  ;;  %v13288_v11 = vmov 0  ;;  %vm10438_vm6 = vcmp.ne.s32.totalorder %v2026_v61, %v8347_v2  ;;  %4345 = vrot.lane.b32.xlu2 %v4265_v7, %s8191_s14 }
 0x1f3   : > { %v13289_v11 = vsel %vm10433_vm9, 4294967295, %v13288_v11  ;;  %v13291_v47 = vmov 0  ;;  %v1761_v29 = vsel %vm8351_vm15, %v1756_v40, %v8338_v57  ;;  %v4274_v35 = vsel %vm13294_vm5, %v4264_v39, %v10430_v41  ;;  %vm12699_vm7 = vmpackc.low %vm10438_vm6, %vm10433_vm9 }
 0x1f4   : > { %13290 = vst [vmem:[#allocation13_spill] sm:$0xff] %v13289_v11  ;;  %v13292_v47 = vsel %vm10438_vm6, 4294967295, %v13291_v47  ;;  %v1051_v22 = vand.u32 15, %v10296_v14  ;;  %v3622_v56 = vshrl.u32 %v3512_v63, 16  ;;  %v3631_v62 = vshrl.u32 %v3513_v23, 16  ;;  %4347 = vrot.lane.b32.xlu1 %v4274_v35, %s8191_s14 }
 0x1f5   : > { %13293 = vst [vmem:[#allocation12_spill] sm:$0xff] %v13292_v47  ;;  %vm13296_vm1 = vnez %v13295_v24  ;;  %vm13298_vm3 = vnez %v13297_v60  ;;  %v3625_v31 = vshll.u32 %v3512_v63, 16  ;;  %v3634_v37 = vshll.u32 %v3513_v23, 16  ;;  %v797_v23 = vpop.f32.mrf.mxu3  ;;  %v8125_v60 = vld [vmem:[%s12501_s2] ss:$0 sm:$0xff] }
 0x1f6   : > { %vm13299_vm11 = vmpackc.low %vm13296_vm1, %vm13298_vm3  ;;  %v2032_v39 = vunpack.c.l.b16 %v1761_v29  ;;  %vm1359_vm5 = vcmp.ne.s32.totalorder %v1051_v22, 0  ;;  %v3624_v14 = vrot.slane %v3622_v56, 7  ;;  %v10459_v4 = vrot.slane %v3631_v62, 7 }
 0x1f7   : > { %v4006_v54 = vsel %vm13299_vm11, %v3940_v48, 0  ;;  %v2033_v6 = vunpack.c.h.b16 %v1761_v29  ;;  %vm1553_vm0 = vmpackc.low %vm1359_vm5, %vm1359_vm5  ;;  %vm13301_vm12 = vnez %v13300_v44  ;;  %vm13303_vm8 = vnez %v13302_v34  ;;  %v8124_v48 = vld [vmem:[#allocation2 + $0x3c] sm:$0xf]  ;;  %v13312_v44 = vld [vmem:[#allocation44_spill] sm:$0xff] }
 0x1f8   : > { %vm13304_vm1 = vmpackc.low %vm13301_vm12, %vm13303_vm8  ;;  %v3620_v45 = vrot.slane %v10238_v10, 4  ;;  %v1585_v27 = vsel %vm1553_vm0, 65537, %v12858_v38  ;;  %v4412_v42 = vunpack.c.l.b16 %v4006_v54  ;;  %v3627_v61 = vor.u32 %v3625_v31, %v3624_v14  ;;  %v3943_v31 = vld [vmem:[#allocation2 + $0xdc] sm:$0xf]  ;;  %v13314_v34 = vld [vmem:[#allocation43_spill] sm:$0xff] }
 0x1f9   : > { %v4007_v20 = vsel %vm13304_vm1, %v3941_v51, 0  ;;  %v3629_v40 = vrot.slane %v3624_v14, 4  ;;  %v3636_v7 = vor.u32 %v3634_v37, %v10459_v4  ;;  %v10474_v63 = vsel %vm12699_vm7, %v8124_v48, 0  ;;  %v3942_v51 = vld [vmem:[#allocation2 + $0xd8] sm:$0xf] }
 0x1fa   : > { %vm10477_vm12 = vcmp.ne.s32.totalorder %v2032_v39, %v8341_v58  ;;  %v13305_v29 = vmov 0  ;;  %v1728_v10 = vshll.u32 %v1585_v27, 16  ;;  %v1732_v35 = vshrl.u32 %v1585_v27, 16  ;;  %v13318_v27 = vld [vmem:[#allocation46_spill] sm:$0xff] }
 0x1fb   : > { %v13306_v29 = vsel %vm10477_vm12, 4294967295, %v13305_v29  ;;  %v4413_v22 = vunpack.c.l.b16 %v4007_v20  ;;  %v3628_v56 = vsel %vm8358_vm2, %v3620_v45, %v3627_v61  ;;  %v3637_v62 = vsel %vm8358_vm2, %v3629_v40, %v3636_v7  ;;  %v13320_v61 = vld [vmem:[#allocation45_spill] sm:$0xff]  ;;  %v3944_v48 = vld [vmem:[#allocation2 + $0xe0] sm:$0xf] }
 0x1fc   : > { %13307 = vst [vmem:[#allocation15_spill] sm:$0xff] %v13306_v29  ;;  %vm10486_vm0 = vcmp.ne.s32.totalorder %v2033_v6, %v8347_v2  ;;  %v13308_v24 = vmov 0  ;;  %v798_v54 = vadd.f32 %v8125_v60, %v797_v23  ;;  %vm13311_vm8 = vcmask 191488  }
 0x1fd   : > { %v13309_v24 = vsel %vm10486_vm0, 4294967295, %v13308_v24  ;;  %3868 = vst.msk [vmem:[#allocation3 + $0x2c] sm:$0xf] %vm13311_vm8, %v3628_v56  ;;  %v1730_v37 = vrot.slane %v1728_v10, 5  ;;  %v1734_v39 = vrot.slane %v1732_v35, 4  ;;  %v4437_v14 = vpack.c.b16 %v4413_v22, %v4412_v42  ;;  %vm13317_vm1 = vmmov %vm13311_vm8 }
 0x1fe   : > { %13310 = vst [vmem:[#allocation14_spill] sm:$0xff] %v13309_v24  ;;  %vm13313_vm3 = vnez %v13312_v44  ;;  %vm13315_vm11 = vnez %v13314_v34  ;;  %v864_v45 = vmax.f32 %v798_v54, 0.0  ;;  %vm13319_vm7 = vnez %v13318_v27  ;;  %vm12702_vm8 = vmpackc.low %vm10486_vm0, %vm10477_vm12  ;;  %v3945_v22 = vld [vmem:[#allocation2 + $0xe4] sm:$0xf]  ;;  %v13326_v27 = vld [vmem:[#allocation48_spill] sm:$0xff] }
 0x1ff   : > { %vm13316_vm5 = vmpackc.low %vm13313_vm3, %vm13315_vm11  ;;  %3869 = vst.msk [vmem:[#allocation3 + $0x30] sm:$0xf] %vm13317_vm1, %v3637_v62  ;;  %vm13321_vm9 = vnez %v13320_v61  ;;  %v1731_v42 = vsel %vm8351_vm15, %v8372_v17, %v1730_v37  ;;  %v1735_v23 = vor.u32 %v1734_v39, %v1730_v37  ;;  %v4461_v10 = vrot.slane %v4437_v14, 5  ;;  %v8126_v39 = vld [vmem:[#allocation2 + $0x40] sm:$0xf] }
 0x200   : > { %v4008_v6 = vsel %vm13316_vm5, %v3942_v51, 0  ;;  %vm13322_vm6 = vmpackc.low %vm13319_vm7, %vm13321_vm9  ;;  %v2011_v56 = vunpack.c.l.b16 %v1731_v42  ;;  %v2012_v62 = vunpack.c.h.b16 %v1731_v42  ;;  %v10514_v54 = vpack.c.bf16 %v864_v45, %v864_v45  ;;  %v13334_v45 = vld [vmem:[#allocation51_spill] sm:$0xff]  ;;  %v13336_v61 = vld [vmem:[#allocation50_spill] sm:$0xff] }
 0x201   : > { %v4009_v40 = vsel %vm13322_vm6, %v3943_v31, 0  ;;  %v4414_v7 = vunpack.c.l.b16 %v4008_v6  ;;  %v1736_v31 = vrot.slane %v1735_v23, 4  ;;  %vm13323_vm9 = vcmask 1042432   ;;  %v13324_v6 = vld [vmem:[#allocation49_spill] sm:$0xff] }
 0x202   : > { %v4415_v35 = vunpack.c.l.b16 %v4009_v40  ;;  %v4462_v44 = vsel %vm13323_vm9, %v4459_v59, %v4461_v10  ;;  %vm13325_vm6 = vnez %v13324_v6  ;;  %vm13327_vm7 = vnez %v13326_v27 }
 0x203   : > { %vm13328_vm3 = vmpackc.low %vm13325_vm6, %vm13327_vm7  ;;  %v10529_v14 = vsel %vm12702_vm8, %v8126_v39, 0  ;;  %vm10532_vm11 = vcmp.ne.s32.totalorder %v2011_v56, %v8341_v58  ;;  %v13329_v1 = vmov 0  ;;  %vm10537_vm5 = vcmp.ne.s32.totalorder %v2012_v62, %v8347_v2  ;;  %4495 = vrot.lane.b32.xlu0 %v4462_v44, %s8192_s15  ;;  %v8127_v62 = vld [vmem:[#allocation2 + $0x34] sm:$0xf] }
 0x204   : > { %v4438_v34 = vpack.c.b16 %v4415_v35, %v4414_v7  ;;  %v4010_v37 = vsel %vm13328_vm3, %v3944_v48, 0  ;;  %v13330_v1 = vsel %vm10532_vm11, 4294967295, %v13329_v1  ;;  %v13331_v59 = vmov 0  ;;  %vm12703_vm3 = vmpackc.low %vm10537_vm5, %vm10532_vm11  ;;  %v7871_v6 = vld [vmem:[#allocation3 + $0x28] sm:$0xff] }
 0x205   : > { %v13332_v59 = vsel %vm10537_vm5, 4294967295, %v13331_v59  ;;  %vm13333_vm1 = vcmask 60416   ;;  %vm13335_vm9 = vnez %v13334_v45  ;;  %vm13337_vm6 = vnez %v13336_v61 }
 0x206   : > { %3921 = vst.msk [vmem:[#allocation2 + $0x108] sm:$0xf] %vm13333_vm1, %v10514_v54  ;;  %vm13338_vm7 = vmpackc.low %vm13335_vm9, %vm13337_vm6  ;;  %v1741_v7 = vsel %vm8351_vm15, %v1736_v31, %v8338_v57  ;;  %v4463_v48 = vrot.slane %v4438_v34, 5  ;;  %v4416_v42 = vunpack.c.l.b16 %v4010_v37  ;;  %v951_v44 = vadd.s32 160, %v8292_v21  ;;  %v799_v31 = vpop.f32.mrf.mxu3  ;;  %v7905_v37 = vld [vmem:[#allocation3 + $0x28] sm:$0xff] }
 0x207   : > { %v4011_v40 = vsel %vm13338_vm7, %v3945_v22, 0  ;;  %v2018_v35 = vunpack.c.l.b16 %v1741_v7  ;;  %v2019_v56 = vunpack.c.h.b16 %v1741_v7  ;;  %v2170_v22 = vsel %vm12703_vm3, %v8127_v62, 0  ;;  %v8128_v62 = vld [vmem:[#allocation2 + $0x38] sm:$0xf] }
 0x208   : > { %v4417_v23 = vunpack.c.l.b16 %v4011_v40  ;;  %v2919_v27 = vunpack.c.l.b16 %v2170_v22  ;;  %vm13339_vm1 = vcmask 1042432   ;;  %v4276_v34 = vshrl.u32 %v9768_v46, 16 }
 0x209   : > { %v4464_v39 = vsel %vm13339_vm1, %v4461_v10, %v4463_v48  ;;  %vm10567_vm9 = vcmp.ne.s32.totalorder %v2018_v35, %v8341_v58  ;;  %v13340_v61 = vmov 0  ;;  %vm10572_vm6 = vcmp.ne.s32.totalorder %v2019_v56, %v8347_v2 }
 0x20a   : > { %v10563_v45 = vpack.c.b16 %v4417_v23, %v4416_v42  ;;  %v13341_v61 = vsel %vm10567_vm9, 4294967295, %v13340_v61  ;;  %v13342_v40 = vmov 0  ;;  %4497 = vrot.lane.b32.xlu2 %v4464_v39, %s8192_s15  ;;  %v1107_v7 = vand.u32 15, %v951_v44  ;;  %vm12708_vm1 = vmpackc.low %vm10572_vm6, %vm10567_vm9 }
 0x20b   : > { %v13343_v40 = vsel %vm10572_vm6, 4294967295, %v13342_v40  ;;  %v4279_v10 = vshll.u32 %v9768_v46, 16  ;;  %vm13344_vm7 = vcmask 195584   ;;  %v4278_v23 = vrot.slane %v4276_v34, 4  ;;  %v3193_v34 = vpop.permute.xlu0 %3192 }
 0x20c   : > { %7555 = vmatmul.msk.bf16.gmra.mxu1 %vm13344_vm7, %v7871_v6  ;;  %v12706_v42 = vrot.slane %v10563_v45, 5  ;;  %v800_v35 = vadd.f32 %v8125_v60, %v799_v31  ;;  %vm13345_vm8 = vmmov %vm13344_vm7  ;;  %v4285_v56 = vshrl.u32 %v10066_v50, 16  ;;  %v2171_v46 = vsel %vm12708_vm1, %v8128_v62, 0  ;;  %v3344_v62 = vpop.permute.xlu1 %3343 }
 0x20d   : > { %7597 = vmatmul.msk.bf16.gmra.mxu2 %vm13345_vm8, %v7871_v6  ;;  %vm13346_vm3 = vmmov %vm13344_vm7  ;;  %vm1367_vm7 = vcmp.ne.s32.totalorder %v1107_v7, 0  ;;  %v4281_v22 = vrot.slane %v4279_v10, 5  ;;  %v4288_v44 = vshll.u32 %v10066_v50, 16  ;;  %v2920_v39 = vunpack.c.l.b16 %v2171_v46 }
 0x20e   : > { %7767 = vmatmul.msk.bf16.gmra.mxu3 %vm13346_vm3, %v7905_v37  ;;  %vm13347_vm12 = vcmask 1042432   ;;  %vm1561_vm8 = vmpackc.low %vm1367_vm7, %vm1367_vm7  ;;  %v865_v31 = vmax.f32 %v800_v35, 0.0  ;;  %v4287_v6 = vrot.slane %v4285_v56, 4  ;;  %v4294_v7 = vshrl.u32 %v10194_v53, 16 }
 0x20f   : > { %v4466_v60 = vsel %vm13347_vm12, %v4463_v48, %v12706_v42  ;;  %v1593_v37 = vsel %vm1561_vm8, 65537, %v12858_v38  ;;  %v4282_v51 = vor.u32 %v4281_v22, %v4278_v23  ;;  %v4290_v20 = vrot.slane %v4288_v44, 5 }
 0x210   : > { %4499 = vrot.lane.b32.xlu1 %v4466_v60, %s8192_s15  ;;  %v2946_v10 = vpack.c.b16 %v2920_v39, %v2919_v27  ;;  %v1808_v50 = vshll.u32 %v1593_v37, 16  ;;  %v1812_v46 = vshrl.u32 %v1593_v37, 16  ;;  %v929_v29 = vpack.c.bf16 %v865_v31, %v865_v31 }
 0x211   : > { %vm13348_vm3 = vsmask.f32 3328  ;;  %v4291_v42 = vor.u32 %v4290_v20, %v4287_v6  ;;  %v4296_v35 = vrot.slane %v4294_v7, 4  ;;  %v4297_v56 = vshll.u32 %v10194_v53, 16 }
 0x212   : > { %v4283_v48 = vsel %vm13348_vm3, %v10430_v41, %v4282_v51  ;;  %v2922_v60 = vunpack.c.l.b16 %v10529_v14  ;;  %vm13349_vm12 = vcmask 64512   ;;  %v1810_v23 = vrot.slane %v1808_v50, 5  ;;  %vm13352_vm1 = vmmov %vm13348_vm3 }
 0x213   : > { %v3386_v24 = vsel %vm13349_vm12, %v2946_v10, %v3193_v34  ;;  %v1814_v22 = vrot.slane %v1812_v46, 4  ;;  %4349 = vrot.lane.b32.xlu0 %v4283_v48, %s8191_s14  ;;  %vm13350_vm7 = vcmask 60416   ;;  %vm13351_vm8 = vcmask 130048  }
 0x214   : > { %3922 = vst.msk [vmem:[#allocation2 + $0x10c] sm:$0xf] %vm13350_vm7, %v929_v29  ;;  %v3431_v27 = vsel %vm13351_vm8, %v3386_v24, %v3344_v62  ;;  %v4292_v44 = vsel %vm13352_vm1, %v4282_v51, %v4291_v42  ;;  %v4299_v39 = vrot.slane %v4297_v56, 5  ;;  %v947_v41 = vadd.s32 128, %v8292_v21 }
 0x215   : > { %v3481_v20 = vunpack.c.l.b16 %v3431_v27  ;;  %v3482_v31 = vunpack.c.h.b16 %v3431_v27  ;;  %v1811_v53 = vsel %vm8351_vm15, %v8372_v17, %v1810_v23  ;;  %v1815_v14 = vor.u32 %v1814_v22, %v1810_v23  ;;  %4351 = vrot.lane.b32.xlu2 %v4292_v44, %s8191_s14  ;;  %v3195_v23 = vpop.permute.xlu2 %3194 }
 0x216   : > { %v4168_v6 = vunpack.c.l.b16 %v10514_v54  ;;  %v2067_v34 = vunpack.c.l.b16 %v1811_v53  ;;  %v2068_v37 = vunpack.c.h.b16 %v1811_v53  ;;  %v10614_v7 = vor.u32 %v4299_v39, %v4296_v35  ;;  %v8129_v53 = vld [vmem:[#allocation2 + $0x54] sm:$0xf] }
 0x217   : > { %v3514_v24 = vpack.c.b16 %v3481_v20, %v3481_v20  ;;  %v3515_v51 = vpack.c.b16 %v3482_v31, %v3482_v31  ;;  %v1816_v10 = vrot.slane %v1815_v14, 4  ;;  %v1079_v62 = vand.u32 15, %v947_v41 }
 0x218   : > { %vm10617_vm1 = vcmp.ne.s32.totalorder %v2067_v34, %v8341_v58  ;;  %v13353_v50 = vmov 0  ;;  %vm10622_vm3 = vcmp.ne.s32.totalorder %v2068_v37, %v8347_v2  ;;  %v13356_v46 = vmov 0 }
 0x219   : > { %v13354_v50 = vsel %vm10617_vm1, 4294967295, %v13353_v50  ;;  %v13357_v46 = vsel %vm10622_vm3, 4294967295, %v13356_v46  ;;  %v4169_v48 = vunpack.c.l.b16 %v929_v29  ;;  %vm13359_vm12 = vsmask.f32 3328  ;;  %vm12710_vm7 = vmpackc.low %vm10622_vm3, %vm10617_vm1 }
 0x21a   : > { %13355 = vst [vmem:[#allocation21_spill] sm:$0xff] %v13354_v50  ;;  %v4301_v54 = vsel %vm13359_vm12, %v4291_v42, %v10614_v7  ;;  %v13360_v35 = vunpack.c.l.b16 %v10474_v63  ;;  %v3640_v22 = vshrl.u32 %v3514_v24, 16  ;;  %v3649_v27 = vshrl.u32 %v3515_v51, 16  ;;  %v13488_v50 = vld [vmem:[#allocation63_spill] sm:$0xff] }
 0x21b   : > { %13358 = vst [vmem:[#allocation18_spill] sm:$0xff] %v13357_v46  ;;  %4353 = vrot.lane.b32.xlu1 %v4301_v54, %s8191_s14  ;;  %v949_v44 = vadd.s32 144, %v8292_v21  ;;  %v3643_v39 = vshll.u32 %v3514_v24, 16  ;;  %v3652_v29 = vshll.u32 %v3515_v51, 16  ;;  %v1821_v42 = vsel %vm8351_vm15, %v1816_v10, %v8338_v57  ;;  %v3947_v54 = vld [vmem:[#allocation2 + $0xec] sm:$0xf] }
 0x21c   : > { %v2947_v56 = vpack.c.b16 %v2922_v60, %v13360_v35  ;;  %vm1363_vm8 = vcmp.ne.s32.totalorder %v1079_v62, 0  ;;  %v3642_v63 = vrot.slane %v3640_v22, 7  ;;  %v10639_v60 = vrot.slane %v3649_v27, 7  ;;  %v3946_v62 = vld [vmem:[#allocation2 + $0xe8] sm:$0xf]  ;;  %v3346_v22 = vpop.permute.xlu0 %3345 }
 0x21d   : > { %v2074_v41 = vunpack.c.l.b16 %v1821_v42  ;;  %v2075_v20 = vunpack.c.h.b16 %v1821_v42  ;;  %vm1557_vm12 = vmpackc.low %vm1363_vm8, %vm1363_vm8  ;;  %vm13361_vm0 = vcmask 64512   ;;  %v10647_v14 = vsel %vm12710_vm7, %v8129_v53, 0  ;;  %v13372_v42 = vld [vmem:[#allocation52_spill] sm:$0xff] }
 0x21e   : > { %v3389_v31 = vsel %vm13361_vm0, %v2947_v56, %v3195_v23  ;;  %v10649_v34 = vpack.c.b16 %v4169_v48, %v4168_v6  ;;  %v1589_v37 = vsel %vm1557_vm12, 65537, %v12858_v38  ;;  %v3645_v24 = vor.u32 %v3643_v39, %v3642_v63 }
 0x21f   : > { %v3647_v51 = vrot.slane %v3642_v63, 4  ;;  %v3654_v10 = vor.u32 %v3652_v29, %v10639_v60  ;;  %v1093_v35 = vand.u32 15, %v949_v44  ;;  %vm10654_vm0 = vcmp.ne.s32.totalorder %v2074_v41, %v8341_v58 }
 0x220   : > { %v13362_v56 = vmov 0  ;;  %vm10659_vm8 = vcmp.ne.s32.totalorder %v2075_v20, %v8347_v2  ;;  %v13365_v23 = vmov 0  ;;  %v1768_v6 = vshll.u32 %v1589_v37, 16 }
 0x221   : > { %v13363_v56 = vsel %vm10654_vm0, 4294967295, %v13362_v56  ;;  %v13366_v23 = vsel %vm10659_vm8, 4294967295, %v13365_v23  ;;  %v1772_v48 = vshrl.u32 %v1589_v37, 16  ;;  %v13368_v27 = vrot.slane %v10459_v4, 4 }
 0x222   : > { %13364 = vst [vmem:[#allocation23_spill] sm:$0xff] %v13363_v56  ;;  %v3655_v44 = vsel %vm8358_vm2, %v3647_v51, %v3654_v10  ;;  %vm13369_vm7 = vnez %v13059_v16  ;;  %vm13370_vm1 = vnez %v13057_v19  ;;  %vm13373_vm9 = vnez %v13372_v42  ;;  %v8130_v16 = vld [vmem:[#allocation2 + $0x58] sm:$0xf]  ;;  %v3951_v56 = vld [vmem:[#allocation2 + $0xfc] sm:$0xf] }
 0x223   : > { %13367 = vst [vmem:[#allocation22_spill] sm:$0xff] %v13366_v23  ;;  %v3646_v39 = vsel %vm8358_vm2, %v13368_v27, %v3645_v24  ;;  %vm13371_vm3 = vmpackc.low %vm13369_vm7, %vm13370_vm1  ;;  %vm13374_vm6 = vnez %v13062_v18  ;;  %vm13376_vm5 = vcmask 191488   ;;  %v1770_v41 = vrot.slane %v1768_v6, 5  ;;  %v3948_v6 = vld [vmem:[#allocation2 + $0xf0] sm:$0xf] }
 0x224   : > { %v4012_v29 = vsel %vm13371_vm3, %v3946_v62, 0  ;;  %vm13375_vm11 = vmpackc.low %vm13373_vm9, %vm13374_vm6  ;;  %3870 = vst.msk [vmem:[#allocation3 + $0x34] sm:$0xf] %vm13376_vm5, %v3646_v39  ;;  %v1774_v20 = vrot.slane %v1772_v48, 4  ;;  %vm13379_vm9 = vcmask 130048   ;;  %v3656_v48 = vrot.slane %v10639_v60, 4 }
 0x225   : > { %v4013_v4 = vsel %vm13375_vm11, %v3947_v54, 0  ;;  %v4418_v53 = vunpack.c.l.b16 %v4012_v29  ;;  %vm13377_vm12 = vmmov %vm13376_vm5  ;;  %v3433_v37 = vsel %vm13379_vm9, %v3389_v31, %v3346_v22  ;;  %vm10694_vm11 = vcmp.ne.s32.totalorder %v1093_v35, 0  ;;  %v3949_v29 = vld [vmem:[#allocation2 + $0xf4] sm:$0xf] }
 0x226   : > { %3871 = vst.msk [vmem:[#allocation3 + $0x38] sm:$0xf] %vm13377_vm12, %v3655_v44  ;;  %vm13378_vm1 = vmpackc.low %vm10659_vm8, %vm10654_vm0  ;;  %v4419_v18 = vunpack.c.l.b16 %v4013_v4  ;;  %v1771_v51 = vsel %vm8351_vm15, %v8372_v17, %v1770_v41  ;;  %v1775_v10 = vor.u32 %v1774_v20, %v1770_v41  ;;  %v3483_v62 = vunpack.c.l.b16 %v3433_v37  ;;  %v13386_v20 = vld [vmem:[#allocation54_spill] sm:$0xff] }
 0x227   : > { %v10691_v19 = vsel %vm13378_vm1, %v8130_v16, 0  ;;  %v3484_v54 = vunpack.c.h.b16 %v3433_v37  ;;  %v2039_v27 = vunpack.c.l.b16 %v1771_v51  ;;  %v2040_v39 = vunpack.c.h.b16 %v1771_v51 }
 0x228   : > { %v10702_v44 = vpack.c.b16 %v4419_v18, %v4418_v53  ;;  %v1776_v35 = vrot.slane %v1775_v10, 4  ;;  %v3516_v22 = vpack.c.b16 %v3483_v62, %v3483_v62  ;;  %v13382_v4 = vmov 0  ;;  %v13388_v53 = vld [vmem:[#allocation53_spill] sm:$0xff]  ;;  %v13391_v10 = vld [vmem:[#allocation56_spill] sm:$0xff]  ;;  %v13393_v62 = vld [vmem:[#allocation55_spill] sm:$0xff] }
 0x229   : > { %v3517_v42 = vpack.c.b16 %v3484_v54, %v3484_v54  ;;  %vm10706_vm5 = vcmp.ne.s32.totalorder %v2039_v27, %v8341_v58  ;;  %vm10711_vm6 = vcmp.ne.s32.totalorder %v2040_v39, %v8347_v2  ;;  %vm13387_vm3 = vnez %v13386_v20 }
 0x22a   : > { %v13383_v4 = vsel %vm10706_vm5, 4294967295, %v13382_v4  ;;  %v4467_v60 = vrot.slane %v10702_v44, 5  ;;  %vm13389_vm7 = vnez %v13388_v53  ;;  %v1781_v18 = vsel %vm8351_vm15, %v1776_v35, %v8338_v57  ;;  %vm12721_vm1 = vmpackc.low %vm10711_vm6, %vm10706_vm5  ;;  %v3950_v53 = vld [vmem:[#allocation2 + $0xf8] sm:$0xf] }
 0x22b   : > { %vm13390_vm12 = vmpackc.low %vm13387_vm3, %vm13389_vm7  ;;  %v3658_v37 = vshrl.u32 %v3516_v22, 16  ;;  %v3667_v51 = vshrl.u32 %v3517_v42, 16  ;;  %vm13392_vm9 = vnez %v13391_v10  ;;  %vm13394_vm0 = vnez %v13393_v62  ;;  %v7872_v31 = vld [vmem:[#allocation3 + $0x30] sm:$0xff] }
 0x22c   : > { %v4014_v16 = vsel %vm13390_vm12, %v3948_v6, 0  ;;  %vm13395_vm8 = vmpackc.low %vm13392_vm9, %vm13394_vm0  ;;  %v2046_v27 = vunpack.c.l.b16 %v1781_v18  ;;  %v2047_v39 = vunpack.c.h.b16 %v1781_v18  ;;  %v8131_v6 = vld [vmem:[#allocation2 + $0x44] sm:$0xf]  ;;  %v13396_v35 = vrot.slane %v10563_v45, 5  ;;  %v7906_v10 = vld [vmem:[#allocation3 + $0x30] sm:$0xff] }
 0x22d   : > { %v4015_v54 = vsel %vm13395_vm8, %v3949_v29, 0  ;;  %v2174_v44 = vsel %vm12721_vm1, %v8131_v6, 0  ;;  %vm13397_vm3 = vcmask 1042432   ;;  %v3660_v62 = vrot.slane %v3658_v37, 7 }
 0x22e   : > { %v4468_v20 = vsel %vm13397_vm3, %v13396_v35, %v4467_v60  ;;  %v3661_v29 = vshll.u32 %v3516_v22, 16  ;;  %v10742_v63 = vrot.slane %v3667_v51, 7  ;;  %v3670_v18 = vshll.u32 %v3517_v42, 16 }
 0x22f   : > { %4501 = vrot.lane.b32.xlu0 %v4468_v20, %s8192_s15  ;;  %vm10745_vm0 = vcmp.ne.s32.totalorder %v2046_v27, %v8341_v58  ;;  %v13398_v23 = vmov 0  ;;  %vm10750_vm8 = vcmp.ne.s32.totalorder %v2047_v39, %v8347_v2  ;;  %v4420_v6 = vunpack.c.l.b16 %v4014_v16  ;;  %v8132_v27 = vld [vmem:[#allocation2 + $0x48] sm:$0xf] }
 0x230   : > { %v13399_v23 = vsel %vm10745_vm0, 4294967295, %v13398_v23  ;;  %v4421_v35 = vunpack.c.l.b16 %v4015_v54  ;;  %vm13402_vm7 = vcmask 195584   ;;  %vm12727_vm9 = vmpackc.low %vm10750_vm8, %vm10745_vm0  ;;  %v2923_v22 = vunpack.c.l.b16 %v2174_v44  ;;  %v3348_v44 = vpop.permute.xlu2 %3347 }
 0x231   : > { %7556 = vmatmul.msk.bf16.gmra.mxu1 %vm13402_vm7, %v7872_v31  ;;  %vm13403_vm12 = vmmov %vm13402_vm7  ;;  %v3663_v42 = vor.u32 %v3661_v29, %v3660_v62  ;;  %v3665_v37 = vrot.slane %v3660_v62, 4  ;;  %v3672_v51 = vor.u32 %v3670_v18, %v10742_v63  ;;  %v2175_v16 = vsel %vm12727_vm9, %v8132_v27, 0 }
 0x232   : > { %7598 = vmatmul.msk.bf16.gmra.mxu2 %vm13403_vm12, %v7872_v31  ;;  %vm13404_vm3 = vmmov %vm13402_vm7  ;;  %v4441_v31 = vpack.c.b16 %v4421_v35, %v4420_v6  ;;  %vm13405_vm7 = vnez %v13097_v8  ;;  %vm13406_vm12 = vnez %v13094_v52  ;;  %vm13408_vm10 = vnez %v13108_v25 }
 0x233   : > { %7768 = vmatmul.msk.bf16.gmra.mxu3 %vm13404_vm3, %v7906_v10  ;;  %vm13407_vm1 = vmpackc.low %vm13405_vm7, %vm13406_vm12  ;;  %vm13409_vm14 = vnez %v13106_v43  ;;  %v2924_v20 = vunpack.c.l.b16 %v2175_v16  ;;  %v3664_v10 = vsel %vm8358_vm2, %v3656_v48, %v3663_v42  ;;  %v3673_v52 = vsel %vm8358_vm2, %v3665_v37, %v3672_v51 }
 0x234   : > { %v4016_v54 = vsel %vm13407_vm1, %v3950_v53, 0  ;;  %vm13410_vm5 = vmpackc.low %vm13408_vm10, %vm13409_vm14  ;;  %v3197_v53 = vpop.permute.xlu1 %3196  ;;  %vm13411_vm1 = vcmask 191488   ;;  %v4469_v25 = vrot.slane %v4441_v31, 5  ;;  %v4303_v62 = vshrl.u32 %v10302_v15, 16 }
 0x235   : > { %v4017_v39 = vsel %vm13410_vm5, %v3951_v56, 0  ;;  %vm1559_vm3 = vmpackc.low %vm10694_vm11, %vm10694_vm11  ;;  %v4422_v8 = vunpack.c.l.b16 %v4016_v54  ;;  %3872 = vst.msk [vmem:[#allocation3 + $0x3c] sm:$0xf] %vm13411_vm1, %v3664_v10  ;;  %v957_v56 = vadd.s32 208, %v8292_v21  ;;  %v2948_v29 = vpack.c.b16 %v2924_v20, %v2923_v22 }
 0x236   : > { %v4423_v43 = vunpack.c.l.b16 %v4017_v39  ;;  %v3674_v18 = vrot.slane %v10742_v63, 4  ;;  %vm13412_vm10 = vmmov %vm13411_vm1  ;;  %v4306_v48 = vshll.u32 %v10302_v15, 16  ;;  %v1591_v6 = vsel %vm1559_vm3, 65537, %v12858_v38 }
 0x237   : > { %3873 = vst.msk [vmem:[#allocation3 + $0x40] sm:$0xf] %vm13412_vm10, %v3673_v52  ;;  %vm13413_vm14 = vcmask 1042432   ;;  %v1149_v37 = vand.u32 15, %v957_v56  ;;  %v4305_v51 = vrot.slane %v4303_v62, 4  ;;  %vm13414_vm5 = vcmask 64512  }
 0x238   : > { %v4470_v35 = vsel %vm13413_vm14, %v4467_v60, %v4469_v25  ;;  %v10797_v42 = vpack.c.b16 %v4423_v43, %v4422_v8  ;;  %v3392_v22 = vsel %vm13414_vm5, %v2948_v29, %v3197_v53  ;;  %v4308_v27 = vrot.slane %v4306_v48, 5  ;;  %vm13416_vm3 = vmmov %vm13413_vm14 }
 0x239   : > { %4503 = vrot.lane.b32.xlu2 %v4470_v35, %s8192_s15  ;;  %v1788_v16 = vshll.u32 %v1591_v6, 16  ;;  %v1792_v15 = vshrl.u32 %v1591_v6, 16  ;;  %vm13415_vm7 = vcmask 130048   ;;  %vm1373_vm12 = vcmp.ne.s32.totalorder %v1149_v37, 0  ;;  %v10821_v37 = vpop.permute.xlu2 %3200 }
 0x23a   : > { %v3435_v31 = vsel %vm13415_vm7, %v3392_v22, %v3348_v44  ;;  %v12725_v54 = vrot.slane %v10797_v42, 5  ;;  %v10804_v24 = vadd.s32 176, %v8292_v21  ;;  %vm1567_vm11 = vmpackc.low %vm1373_vm12, %vm1373_vm12  ;;  %v10806_v20 = vor.u32 %v4308_v27, %v4305_v51 }
 0x23b   : > { %v3485_v60 = vunpack.c.l.b16 %v3435_v31  ;;  %v3486_v39 = vunpack.c.h.b16 %v3435_v31  ;;  %v1790_v10 = vrot.slane %v1788_v16, 5  ;;  %v1599_v8 = vsel %vm1567_vm11, 65537, %v12858_v38 }
 0x23c   : > { %v4472_v52 = vsel %vm13416_vm3, %v4469_v25, %v12725_v54  ;;  %v1794_v53 = vrot.slane %v1792_v15, 4  ;;  %v4312_v44 = vshrl.u32 %v10427_v32, 16  ;;  %v1868_v62 = vshll.u32 %v1599_v8, 16 }
 0x23d   : > { %v3518_v43 = vpack.c.b16 %v3485_v60, %v3485_v60  ;;  %v3519_v56 = vpack.c.b16 %v3486_v39, %v3486_v39  ;;  %4505 = vrot.lane.b32.xlu1 %v4472_v52, %s8192_s15  ;;  %v1872_v29 = vshrl.u32 %v1599_v8, 16  ;;  %vm13417_vm1 = vsmask.f32 3328 }
 0x23e   : > { %v4310_v48 = vsel %vm13417_vm1, %v10614_v7, %v10806_v20  ;;  %v1791_v6 = vsel %vm8351_vm15, %v8372_v17, %v1790_v10  ;;  %v1795_v25 = vor.u32 %v1794_v53, %v1790_v10  ;;  %v1121_v35 = vand.u32 15, %v10804_v24 }
 0x23f   : > { %v3676_v51 = vshrl.u32 %v3518_v43, 16  ;;  %v3679_v22 = vshll.u32 %v3518_v43, 16  ;;  %v3685_v27 = vshrl.u32 %v3519_v56, 16  ;;  %4355 = vrot.lane.b32.xlu0 %v4310_v48, %s8191_s14  ;;  %v4314_v16 = vrot.slane %v4312_v44, 4 }
 0x240   : > { %v1870_v15 = vrot.slane %v1868_v62, 5  ;;  %v1874_v31 = vrot.slane %v1872_v29, 4  ;;  %v1796_v60 = vrot.slane %v1795_v25, 4  ;;  %v2053_v39 = vunpack.c.l.b16 %v1791_v6 }
 0x241   : > { %v3678_v7 = vrot.slane %v3676_v51, 7  ;;  %v10824_v52 = vrot.slane %v3685_v27, 7  ;;  %v3688_v8 = vshll.u32 %v3519_v56, 16  ;;  %v2054_v54 = vunpack.c.h.b16 %v1791_v6 }
 0x242   : > { %v1871_v24 = vsel %vm8351_vm15, %v8372_v17, %v1870_v15  ;;  %v1875_v10 = vor.u32 %v1874_v31, %v1870_v15  ;;  %v1801_v53 = vsel %vm8351_vm15, %v1796_v60, %v8338_v57  ;;  %vm10833_vm10 = vcmp.ne.s32.totalorder %v2053_v39, %v8341_v58  ;;  %v3199_v39 = vpop.permute.xlu0 %3198 }
 0x243   : > { %v13418_v44 = vmov 0  ;;  %v3681_v43 = vor.u32 %v3679_v22, %v3678_v7  ;;  %v3683_v62 = vrot.slane %v3678_v7, 4  ;;  %v3690_v29 = vor.u32 %v3688_v8, %v10824_v52 }
 0x244   : > { %v13419_v44 = vsel %vm10833_vm10, 4294967295, %v13418_v44  ;;  %v4315_v56 = vshll.u32 %v10427_v32, 16  ;;  %v1876_v48 = vrot.slane %v1875_v10, 4  ;;  %v2109_v6 = vunpack.c.l.b16 %v1871_v24 }
 0x245   : > { %v2110_v25 = vunpack.c.h.b16 %v1871_v24  ;;  %vm10840_vm14 = vcmp.ne.s32.totalorder %v2054_v54, %v8347_v2  ;;  %v13420_v51 = vmov 0  ;;  %v3691_v27 = vsel %vm8358_vm2, %v3683_v62, %v3690_v29  ;;  %v10889_v29 = vpop.permute.xlu2 %3353 }
 0x246   : > { %v13421_v51 = vsel %vm10840_vm14, 4294967295, %v13420_v51  ;;  %v3682_v22 = vsel %vm8358_vm2, %v3674_v18, %v3681_v43  ;;  %vm12726_vm5 = vmpackc.low %vm10840_vm14, %vm10833_vm10  ;;  %v2060_v32 = vunpack.c.l.b16 %v1801_v53  ;;  %v2061_v15 = vunpack.c.h.b16 %v1801_v53  ;;  %v8133_v18 = vld [vmem:[#allocation2 + $0x4c] sm:$0xf] }
 0x247   : > { %vm13422_vm7 = vcmask 191488   ;;  %v1881_v54 = vsel %vm8351_vm15, %v1876_v48, %v8338_v57  ;;  %vm10859_vm12 = vcmp.ne.s32.totalorder %v2109_v6, %v8341_v58  ;;  %v13423_v31 = vmov 0 }
 0x248   : > { %3875 = vst.msk [vmem:[#allocation3 + $0x48] sm:$0xf] %vm13422_vm7, %v3691_v27  ;;  %v13424_v31 = vsel %vm10859_vm12, 4294967295, %v13423_v31  ;;  %vm10864_vm11 = vcmp.ne.s32.totalorder %v2110_v25, %v8347_v2  ;;  %v13426_v63 = vmov 0  ;;  %v2176_v60 = vsel %vm12726_vm5, %v8133_v18, 0  ;;  %vm13429_vm3 = vmmov %vm13422_vm7 }
 0x249   : > { %13425 = vst [vmem:[#allocation25_spill] sm:$0xff] %v13424_v31  ;;  %v13427_v63 = vsel %vm10864_vm11, 4294967295, %v13426_v63  ;;  %v2116_v7 = vunpack.c.l.b16 %v1881_v54  ;;  %v2117_v8 = vunpack.c.h.b16 %v1881_v54  ;;  %vm10875_vm1 = vcmp.ne.s32.totalorder %v2060_v32, %v8341_v58 }
 0x24a   : > { %13428 = vst [vmem:[#allocation24_spill] sm:$0xff] %v13427_v63  ;;  %v13430_v24 = vmov 0  ;;  %vm10880_vm7 = vcmp.ne.s32.totalorder %v2061_v15, %v8347_v2  ;;  %v13432_v10 = vmov 0  ;;  %v2925_v53 = vunpack.c.l.b16 %v2176_v60 }
 0x24b   : > { %3874 = vst.msk [vmem:[#allocation3 + $0x44] sm:$0xf] %vm13429_vm3, %v3682_v22  ;;  %v13431_v24 = vsel %vm10875_vm1, 4294967295, %v13430_v24  ;;  %v13433_v10 = vsel %vm10880_vm7, 4294967295, %v13432_v10  ;;  %vm12730_vm5 = vmpackc.low %vm10880_vm7, %vm10875_vm1  ;;  %v4317_v43 = vrot.slane %v4315_v56, 5  ;;  %v4321_v62 = vshrl.u32 %v10649_v34, 16 }
 0x24c   : > { %vm10896_vm9 = vcmp.ne.s32.totalorder %v2116_v7, %v8341_v58  ;;  %v13434_v48 = vmov 0  ;;  %vm10901_vm10 = vcmp.ne.s32.totalorder %v2117_v8, %v8347_v2  ;;  %v13437_v6 = vmov 0  ;;  %v8134_v56 = vld [vmem:[#allocation2 + $0x50] sm:$0xf]  ;;  %v8135_v7 = vld [vmem:[#allocation2 + $0x6c] sm:$0xf] }
 0x24d   : > { %v13435_v48 = vsel %vm10896_vm9, 4294967295, %v13434_v48  ;;  %v13438_v6 = vsel %vm10901_vm10, 4294967295, %v13437_v6  ;;  %v2177_v25 = vsel %vm12730_vm5, %v8134_v56, 0  ;;  %v4318_v22 = vor.u32 %v4317_v43, %v4314_v16  ;;  %vm13442_vm5 = vmpackc.low %vm10864_vm11, %vm10859_vm12 }
 0x24e   : > { %13436 = vst [vmem:[#allocation27_spill] sm:$0xff] %v13435_v48  ;;  %v2926_v27 = vunpack.c.l.b16 %v2177_v25  ;;  %v4323_v32 = vrot.slane %v4321_v62, 4  ;;  %v4324_v15 = vshll.u32 %v10649_v34, 16  ;;  %v13440_v54 = vunpack.c.l.b16 %v10647_v14  ;;  %v8136_v34 = vld [vmem:[#allocation2 + $0x70] sm:$0xf]  ;;  %vm13445_vm0 = vmpackc.low %vm10901_vm10, %vm10896_vm9 }
 0x24f   : > { %13439 = vst [vmem:[#allocation26_spill] sm:$0xff] %v13438_v6  ;;  %v13441_v18 = vunpack.c.l.b16 %v10691_v19  ;;  %vm1369_vm14 = vcmp.ne.s32.totalorder %v1121_v35, 0  ;;  %v10924_v8 = vsel %vm13442_vm5, %v8135_v7, 0  ;;  %vm13443_vm3 = vsmask.f32 3328 }
 0x250   : > { %v2949_v56 = vpack.c.b16 %v2926_v27, %v2925_v53  ;;  %v4319_v16 = vsel %vm13443_vm3, %v10806_v20, %v4318_v22  ;;  %v4326_v43 = vrot.slane %v4324_v15, 5  ;;  %vm1563_vm1 = vmpackc.low %vm1369_vm14, %vm1369_vm14  ;;  %vm13444_vm7 = vcmask 64512   ;;  %v3350_v20 = vpop.permute.xlu1 %3349 }
 0x251   : > { %v2950_v60 = vpack.c.b16 %v13441_v18, %v13440_v54  ;;  %v10935_v19 = vsel %vm13445_vm0, %v8136_v34, 0  ;;  %4357 = vrot.lane.b32.xlu2 %v4319_v16, %s8191_s14  ;;  %v1595_v35 = vsel %vm1563_vm1, 65537, %v12858_v38  ;;  %vm13446_vm5 = vmmov %vm13444_vm7  ;;  %vm13447_vm14 = vcmask 130048   ;;  %v3952_v18 = vld [vmem:[#allocation2 + $0x100] sm:$0xf]  ;;  %v7907_v16 = vld [vmem:[#allocation3 + $0x38] sm:$0xff] }
 0x252   : > { %v3395_v62 = vsel %vm13446_vm5, %v2949_v56, %v3199_v39  ;;  %v10941_v25 = vor.u32 %v4326_v43, %v4323_v32  ;;  %v1832_v54 = vshrl.u32 %v1595_v35, 16  ;;  %v955_v7 = vadd.s32 192, %v8292_v21  ;;  %vm13448_vm0 = vmmov %vm13443_vm3  ;;  %v3352_v39 = vpop.permute.xlu0 %3351 }
 0x253   : > { %v3398_v14 = vsel %vm13444_vm7, %v2950_v60, %v10821_v37  ;;  %v1828_v37 = vshll.u32 %v1595_v35, 16  ;;  %v3437_v15 = vsel %vm13447_vm14, %v3395_v62, %v3350_v20  ;;  %v3953_v60 = vld [vmem:[#allocation2 + $0x104] sm:$0xf]  ;;  %vm13449_vm1 = vnez %v13114_v26  ;;  %vm13454_vm5 = vmpackc.low %vm9952_vm13, %vm9947_vm4 }
 0x254   : > { %v3487_v34 = vunpack.c.l.b16 %v3437_v15  ;;  %v3488_v48 = vunpack.c.h.b16 %v3437_v15  ;;  %v4328_v53 = vsel %vm13448_vm0, %v4318_v22, %v10941_v25  ;;  %v1834_v56 = vrot.slane %v1832_v54, 4  ;;  %v7873_v15 = vld [vmem:[#allocation3 + $0x38] sm:$0xff] }
 0x255   : > { %4359 = vrot.lane.b32.xlu1 %v4328_v53, %s8191_s14  ;;  %v1830_v32 = vrot.slane %v1828_v37, 5  ;;  %vm13450_vm7 = vnez %v13112_v0  ;;  %v4019_v62 = vsel %vm13454_vm5, %v3953_v60, 0  ;;  %v10960_v37 = vpop.permute.xlu2 %3206  ;;  %v3439_v54 = vsel %vm13447_vm14, %v3398_v14, %v3352_v39 }
 0x256   : > { %vm13451_vm3 = vmpackc.low %vm13449_vm1, %vm13450_vm7  ;;  %v3520_v22 = vpack.c.b16 %v3487_v34, %v3487_v34  ;;  %v3521_v27 = vpack.c.b16 %v3488_v48, %v3488_v48  ;;  %v4425_v53 = vunpack.c.l.b16 %v4019_v62  ;;  %vm13455_vm0 = vcmask 195584  }
 0x257   : > { %v4018_v43 = vsel %vm13451_vm3, %v3952_v18, 0  ;;  %v1831_v0 = vsel %vm8351_vm15, %v8372_v17, %v1830_v32  ;;  %v1835_v26 = vor.u32 %v1834_v56, %v1830_v32  ;;  %7557 = vmatmul.msk.bf16.gmra.mxu1 %vm13455_vm0, %v7873_v15  ;;  %vm13456_vm1 = vmmov %vm13455_vm0  ;;  %v1135_v18 = vand.u32 15, %v955_v7 }
 0x258   : > { %v4424_v6 = vunpack.c.l.b16 %v4018_v43  ;;  %7599 = vmatmul.msk.bf16.gmra.mxu2 %vm13456_vm1, %v7873_v15  ;;  %v3694_v60 = vshrl.u32 %v3520_v22, 16  ;;  %v3697_v35 = vshll.u32 %v3520_v22, 16  ;;  %v3703_v34 = vshrl.u32 %v3521_v27, 16  ;;  %vm13457_vm13 = vmmov %vm13455_vm0 }
 0x259   : > { %v3706_v48 = vshll.u32 %v3521_v27, 16  ;;  %7769 = vmatmul.msk.bf16.gmra.mxu3 %vm13457_vm13, %v7907_v16  ;;  %v1836_v43 = vrot.slane %v1835_v26, 4  ;;  %v2081_v20 = vunpack.c.l.b16 %v1831_v0  ;;  %v2082_v62 = vunpack.c.h.b16 %v1831_v0 }
 0x25a   : > { %v10969_v31 = vpack.c.b16 %v4425_v53, %v4424_v6  ;;  %v3696_v63 = vrot.slane %v3694_v60, 7  ;;  %v10971_v32 = vrot.slane %v3703_v34, 7  ;;  %v3489_v14 = vunpack.c.l.b16 %v3439_v54  ;;  %v3954_v34 = vld [vmem:[#allocation2 + $0x108] sm:$0xf] }
 0x25b   : > { %v3490_v39 = vunpack.c.h.b16 %v3439_v54  ;;  %v1841_v7 = vsel %vm8351_vm15, %v1836_v43, %v8338_v57  ;;  %vm10977_vm4 = vcmp.ne.s32.totalorder %v2081_v20, %v8341_v58  ;;  %vm10982_vm7 = vcmp.ne.s32.totalorder %v2082_v62, %v8347_v2  ;;  %v8137_v54 = vld [vmem:[#allocation2 + $0x5c] sm:$0xf] }
 0x25c   : > { %v12742_v6 = vrot.slane %v10969_v31, 5  ;;  %v3699_v16 = vor.u32 %v3697_v35, %v3696_v63  ;;  %v3701_v15 = vrot.slane %v3696_v63, 4  ;;  %v3708_v22 = vor.u32 %v3706_v48, %v10971_v32  ;;  %vm12738_vm3 = vmpackc.low %vm10982_vm7, %vm10977_vm4 }
 0x25d   : > { %v2151_v53 = vunpack.c.l.b16 %v8372_v17  ;;  %v2088_v0 = vunpack.c.l.b16 %v1841_v7  ;;  %v2089_v26 = vunpack.c.h.b16 %v1841_v7  ;;  %v2180_v60 = vsel %vm12738_vm3, %v8137_v54, 0  ;;  %v13478_v54 = vld [vmem:[#allocation61_spill] sm:$0xff] }
 0x25e   : > { %v13462_v63 = vrot.slane %v10797_v42, 5  ;;  %vm13463_vm5 = vcmask 1042432   ;;  %v13464_v48 = vrot.slane %v10824_v52, 4  ;;  %v3709_v20 = vsel %vm8358_vm2, %v3701_v15, %v3708_v22 }
 0x25f   : > { %v3522_v62 = vpack.c.b16 %v3489_v14, %v3489_v14  ;;  %vm11010_vm14 = vcmp.ne.s32.totalorder %v1135_v18, 0  ;;  %vm13467_vm0 = vcmask 191488   ;;  %vm11016_vm1 = vcmp.ne.s32.totalorder %v2088_v0, %v8341_v58  ;;  %v3955_v14 = vld [vmem:[#allocation2 + $0x10c] sm:$0xf]  ;;  %v3989_v18 = vld [vmem:[#allocation2 + $0x110] sm:$0x1] }
 0x260   : > { %v4474_v35 = vsel %vm13463_vm5, %v13462_v63, %v12742_v6  ;;  %v3700_v43 = vsel %vm8358_vm2, %v13464_v48, %v3699_v16  ;;  %v13468_v42 = vmov 0  ;;  %vm11021_vm13 = vcmp.ne.s32.totalorder %v2089_v26, %v8347_v2  ;;  %vm13474_vm5 = vmmov %vm13467_vm0  ;;  %v8138_v48 = vld [vmem:[#allocation2 + $0x60] sm:$0xf] }
 0x261   : > { %4507 = vrot.lane.b32.xlu0 %v4474_v35, %s8192_s15  ;;  %3876 = vst.msk [vmem:[#allocation3 + $0x4c] sm:$0xf] %vm13467_vm0, %v3700_v43  ;;  %v13469_v42 = vsel %vm11016_vm1, 4294967295, %v13468_v42  ;;  %v13471_v52 = vmov 0  ;;  %v3523_v16 = vpack.c.b16 %v3490_v39, %v3490_v39  ;;  %v2152_v15 = vunpack.c.h.b16 %v8372_v17  ;;  %vm12747_vm0 = vmpackc.low %vm11021_vm13, %vm11016_vm1  ;;  %v13480_v39 = vld [vmem:[#allocation60_spill] sm:$0xff]  ;;  %v11041_v35 = vpop.permute.xlu2 %3359 }
 0x262   : > { %13470 = vst [vmem:[#allocation29_spill] sm:$0xff] %v13469_v42  ;;  %v13472_v52 = vsel %vm11021_vm13, 4294967295, %v13471_v52  ;;  %v2929_v22 = vunpack.c.l.b16 %v2180_v60  ;;  %v3712_v0 = vshrl.u32 %v3522_v62, 16  ;;  %vm11032_vm3 = vcmp.ne.s32.totalorder %v2151_v53, %v8341_v58 }
 0x263   : > { %13473 = vst [vmem:[#allocation28_spill] sm:$0xff] %v13472_v52  ;;  %v13475_v26 = vmov 0  ;;  %vm13479_vm9 = vnez %v13478_v54  ;;  %vm13481_vm10 = vnez %v13480_v39  ;;  %v2181_v60 = vsel %vm12747_vm0, %v8138_v48, 0  ;;  %v3203_v39 = vpop.permute.xlu1 %3202  ;;  %vm1565_vm0 = vmpackc.low %vm11010_vm14, %vm11010_vm14 }
 0x264   : > { %3877 = vst.msk [vmem:[#allocation3 + $0x50] sm:$0xf] %vm13474_vm5, %v3709_v20  ;;  %v13476_v26 = vsel %vm11032_vm3, 4294967295, %v13475_v26  ;;  %vm13482_vm12 = vmpackc.low %vm13479_vm9, %vm13481_vm10  ;;  %v3715_v43 = vshll.u32 %v3522_v62, 16  ;;  %v3721_v53 = vshrl.u32 %v3523_v16, 16  ;;  %vm11049_vm5 = vcmp.ne.s32.totalorder %v2152_v15, %v8347_v2 }
 0x265   : > { %13477 = vst [vmem:[#allocation31_spill] sm:$0xff] %v13476_v26  ;;  %v4020_v63 = vsel %vm13482_vm12, %v3954_v34, 0  ;;  %v13483_v20 = vmov 0  ;;  %v2930_v54 = vunpack.c.l.b16 %v2181_v60  ;;  %v3714_v6 = vrot.slane %v3712_v0, 7  ;;  %v13486_v34 = vld [vmem:[#allocation64_spill] sm:$0xff]  ;;  %vm12753_vm1 = vmpackc.low %vm11049_vm5, %vm11032_vm3 }
 0x266   : > { %v13484_v20 = vsel %vm11049_vm5, 4294967295, %v13483_v20  ;;  %vm13487_vm9 = vnez %v13486_v34  ;;  %vm13489_vm10 = vnez %v13488_v50  ;;  %vm13491_vm11 = vnez %v13160_v36  ;;  %v13537_v26 = vld [vmem:[#allocation20_spill] sm:$0xff] }
 0x267   : > { %13485 = vst [vmem:[#allocation30_spill] sm:$0xff] %v13484_v20  ;;  %vm13490_vm12 = vmpackc.low %vm13487_vm9, %vm13489_vm10  ;;  %v4022_v11 = vsel %vm13491_vm11, %v3989_v18, 0  ;;  %v11063_v62 = vrot.slane %v3721_v53, 7  ;;  %v3724_v15 = vshll.u32 %v3523_v16, 16  ;;  %v4426_v0 = vunpack.c.l.b16 %v4020_v63  ;;  %v8139_v63 = vld [vmem:[#allocation2 + $0x84] sm:$0xf] }
 0x268   : > { %v4021_v46 = vsel %vm13490_vm12, %v3955_v14, 0  ;;  %v3710_v50 = vrot.slane %v10971_v32, 4  ;;  %v2951_v14 = vpack.c.b16 %v2930_v54, %v2929_v22  ;;  %v3717_v60 = vor.u32 %v3715_v43, %v3714_v6  ;;  %v13539_v20 = vld [vmem:[#allocation19_spill] sm:$0xff] }
 0x269   : > { %v4427_v48 = vunpack.c.l.b16 %v4021_v46  ;;  %v3719_v36 = vrot.slane %v3714_v6, 4  ;;  %v13492_v18 = vunpack.c.l.b16 %v10924_v8  ;;  %v13493_v34 = vunpack.c.l.b16 %v10935_v19  ;;  %4361 = vrot.lane.b32.xlu0 %v10941_v25, %s8191_s14 }
 0x26a   : > { %v3726_v53 = vor.u32 %v3724_v15, %v11063_v62  ;;  %v4428_v16 = vunpack.c.l.b16 %v4022_v11  ;;  %vm13494_vm11 = vcmask 64512   ;;  %v3718_v46 = vsel %vm8358_vm2, %v3710_v50, %v3717_v60  ;;  %v3213_v60 = vpop.permute.xlu2 %3212 }
 0x26b   : > { %v2953_v47 = vpack.c.b16 %v13493_v34, %v13492_v18  ;;  %v11075_v42 = vpack.c.b16 %v4427_v48, %v4426_v0  ;;  %v3401_v52 = vsel %vm13494_vm11, %v2951_v14, %v3203_v39  ;;  %v2190_v8 = vsel %vm12753_vm1, %v8139_v63, 0  ;;  %v8140_v34 = vld [vmem:[#allocation2 + $0x94] sm:$0xf] }
 0x26c   : > { %v1597_v11 = vsel %vm1565_vm0, 65537, %v12858_v38  ;;  %vm13495_vm9 = vcmask 130048   ;;  %v3727_v32 = vsel %vm8358_vm2, %v3719_v36, %v3726_v53  ;;  %vm13496_vm10 = vcmask 191488   ;;  %v13499_v53 = vld [vmem:[#allocation9_spill] sm:$0xff] }
 0x26d   : > { %v3441_v19 = vsel %vm13495_vm9, %v3401_v52, %v10889_v29  ;;  %3878 = vst.msk [vmem:[#allocation3 + $0x54] sm:$0xf] %vm13496_vm10, %v3718_v46  ;;  %v4445_v6 = vpack.c.b16 %v4428_v16, %v4428_v16  ;;  %v12752_v22 = vrot.slane %v11075_v42, 5  ;;  %vm13497_vm12 = vmmov %vm13496_vm10  ;;  %v1848_v54 = vshll.u32 %v1597_v11, 16  ;;  %v11102_v29 = vpop.permute.xlu0 %3204 }
 0x26e   : > { %v3491_v43 = vunpack.c.l.b16 %v3441_v19  ;;  %v3492_v25 = vunpack.c.h.b16 %v3441_v19  ;;  %3879 = vst.msk [vmem:[#allocation3 + $0x58] sm:$0xf] %vm13497_vm12, %v3727_v32  ;;  %v3407_v7 = vsel %vm13494_vm11, %v2953_v47, %v10960_v37  ;;  %v2939_v39 = vunpack.c.l.b16 %v2190_v8  ;;  %v13501_v47 = vld [vmem:[#allocation8_spill] sm:$0xff]  ;;  %v13504_v19 = vld [vmem:[#allocation11_spill] sm:$0xff]  ;;  %v13506_v32 = vld [vmem:[#allocation10_spill] sm:$0xff] }
 0x26f   : > { %v4477_v15 = vrot.slane %v4445_v6, 5  ;;  %v1852_v0 = vshrl.u32 %v1597_v11, 16  ;;  %v3728_v50 = vrot.slane %v11063_v62, 4  ;;  %v1850_v14 = vrot.slane %v1848_v54, 5  ;;  %v11114_v62 = vpop.permute.xlu1 %3355  ;;  %v8141_v11 = vld [vmem:[#allocation2 + $0x98] sm:$0xf] }
 0x270   : > { %v3524_v52 = vpack.c.b16 %v3491_v43, %v3491_v43  ;;  %v3525_v48 = vpack.c.b16 %v3492_v25, %v3492_v25  ;;  %vm13498_vm14 = vcmask 1042432   ;;  %vm13500_vm0 = vnez %v13499_v53 }
 0x271   : > { %v4478_v36 = vsel %vm13498_vm14, %v12752_v22, %v4477_v15  ;;  %v1854_v18 = vrot.slane %v1852_v0, 4  ;;  %vm13502_vm9 = vnez %v13501_v47  ;;  %v959_v16 = vadd.s32 224, %v8292_v21 }
 0x272   : > { %vm13503_vm10 = vmpackc.low %vm13500_vm0, %vm13502_vm9  ;;  %v3730_v46 = vshrl.u32 %v3524_v52, 16  ;;  %v3733_v63 = vshll.u32 %v3524_v52, 16  ;;  %v3739_v8 = vshrl.u32 %v3525_v48, 16  ;;  %4511 = vrot.lane.b32.xlu1 %v4478_v36, %s8192_s15  ;;  %vm13505_vm12 = vnez %v13504_v19 }
 0x273   : > { %v3958_v37 = vsel %vm13503_vm10, %v8140_v34, 0  ;;  %vm13507_vm11 = vnez %v13506_v32  ;;  %v3742_v43 = vshll.u32 %v3525_v48, 16  ;;  %v1851_v25 = vsel %vm8351_vm15, %v8372_v17, %v1850_v14 }
 0x274   : > { %vm13508_vm14 = vmpackc.low %vm13505_vm12, %vm13507_vm11  ;;  %v1855_v54 = vor.u32 %v1854_v18, %v1850_v14  ;;  %v1163_v15 = vand.u32 15, %v959_v16  ;;  %v3732_v0 = vrot.slane %v3730_v46, 7  ;;  %v11125_v52 = vrot.slane %v3739_v8, 7 }
 0x275   : > { %v3959_v6 = vsel %vm13508_vm14, %v8141_v11, 0  ;;  %v2095_v34 = vunpack.c.l.b16 %v1851_v25  ;;  %v2096_v53 = vunpack.c.h.b16 %v1851_v25  ;;  %v2956_v36 = vpack.c.b16 %v2939_v39, %v2939_v39 }
 0x276   : > { %v1856_v47 = vrot.slane %v1855_v54, 4  ;;  %v4058_v22 = vunpack.c.l.b16 %v3958_v37  ;;  %vm1375_vm0 = vcmp.ne.s32.totalorder %v1163_v15, 0  ;;  %v3735_v19 = vor.u32 %v3733_v63, %v3732_v0  ;;  %v3358_v15 = vpop.permute.xlu0 %3357 }
 0x277   : > { %v3737_v32 = vrot.slane %v3732_v0, 4  ;;  %v3744_v11 = vor.u32 %v3742_v43, %v11125_v52  ;;  %v4059_v48 = vunpack.c.l.b16 %v3959_v6  ;;  %vm1569_vm9 = vmpackc.low %vm1375_vm0, %vm1375_vm0  ;;  %vm11132_vm10 = vcmp.ne.s32.totalorder %v2095_v34, %v8341_v58  ;;  %v8142_v43 = vld [vmem:[#allocation2 + $0x64] sm:$0xf] }
 0x278   : > { %v1861_v14 = vsel %vm8351_vm15, %v1856_v47, %v8338_v57  ;;  %v13509_v18 = vmov 0  ;;  %vm11137_vm12 = vcmp.ne.s32.totalorder %v2096_v53, %v8347_v2  ;;  %v13512_v39 = vmov 0  ;;  %v4332_v47 = vpop.permute.xlu2 %4331 }
 0x279   : > { %v13510_v18 = vsel %vm11132_vm10, 4294967295, %v13509_v18  ;;  %v13513_v39 = vsel %vm11137_vm12, 4294967295, %v13512_v39  ;;  %v1601_v37 = vsel %vm1569_vm9, 65537, %v12858_v38  ;;  %v3745_v16 = vsel %vm8358_vm2, %v3737_v32, %v3744_v11  ;;  %vm12754_vm11 = vmpackc.low %vm11137_vm12, %vm11132_vm10 }
 0x27a   : > { %13511 = vst [vmem:[#allocation33_spill] sm:$0xff] %v13510_v18  ;;  %v3736_v46 = vsel %vm8358_vm2, %v3728_v50, %v3735_v19  ;;  %v2102_v63 = vunpack.c.l.b16 %v1861_v14  ;;  %v2103_v8 = vunpack.c.h.b16 %v1861_v14  ;;  %vm13515_vm14 = vcmask 191488  }
 0x27b   : > { %13514 = vst [vmem:[#allocation32_spill] sm:$0xff] %v13513_v39  ;;  %vm13516_vm0 = vcmask 64512   ;;  %v2182_v25 = vsel %vm12754_vm11, %v8142_v43, 0  ;;  %v1888_v50 = vshll.u32 %v1601_v37, 16  ;;  %v1892_v54 = vshrl.u32 %v1601_v37, 16  ;;  %vm13517_vm9 = vmmov %vm13515_vm14  ;;  %v7908_v37 = vld [vmem:[#allocation3 + $0x40] sm:$0xff] }
 0x27c   : > { %3881 = vst.msk [vmem:[#allocation3 + $0x60] sm:$0xf] %vm13515_vm14, %v3745_v16  ;;  %v11152_v6 = vsel %vm13516_vm0, %v2956_v36, %v3213_v60  ;;  %vm11161_vm1 = vcmp.ne.s32.totalorder %v2102_v63, %v8341_v58  ;;  %v13518_v0 = vmov 0  ;;  %vm11166_vm14 = vcmp.ne.s32.totalorder %v2103_v8, %v8347_v2  ;;  %v7874_v36 = vld [vmem:[#allocation3 + $0x40] sm:$0xff]  ;;  %v8143_v16 = vld [vmem:[#allocation2 + $0x68] sm:$0xf]  ;;  %v11180_v63 = vpop.permute.xlu1 %3208 }
 0x27d   : > { %3880 = vst.msk [vmem:[#allocation3 + $0x5c] sm:$0xf] %vm13517_vm9, %v3736_v46  ;;  %v13519_v0 = vsel %vm11161_vm1, 4294967295, %v13518_v0  ;;  %v13521_v60 = vmov 0  ;;  %v2931_v34 = vunpack.c.l.b16 %v2182_v25  ;;  %vm13524_vm0 = vcmask 130048   ;;  %vm12759_vm11 = vmpackc.low %vm11166_vm14, %vm11161_vm1 }
 0x27e   : > { %13520 = vst [vmem:[#allocation36_spill] sm:$0xff] %v13519_v0  ;;  %v13522_v60 = vsel %vm11166_vm14, 4294967295, %v13521_v60  ;;  %v3445_v53 = vsel %vm13524_vm0, %v3407_v7, %v3358_v15  ;;  %v1890_v19 = vrot.slane %v1888_v50, 5  ;;  %v1894_v32 = vrot.slane %v1892_v54, 4  ;;  %v8144_v50 = vld [vmem:[#allocation2 + $0x9c] sm:$0xf] }
 0x27f   : > { %13523 = vst [vmem:[#allocation34_spill] sm:$0xff] %v13522_v60  ;;  %v3495_v11 = vunpack.c.l.b16 %v3445_v53  ;;  %v3496_v14 = vunpack.c.h.b16 %v3445_v53  ;;  %v2183_v46 = vsel %vm12759_vm11, %v8143_v16, 0  ;;  %v4090_v7 = vpack.c.b16 %v4059_v48, %v4058_v22  ;;  %v13528_v54 = vld [vmem:[#allocation17_spill] sm:$0xff]  ;;  %v13530_v15 = vld [vmem:[#allocation16_spill] sm:$0xff] }
 0x280   : > { %v13525_v8 = vrot.slane %v11075_v42, 5  ;;  %v13526_v43 = vrot.slane %v10969_v31, 5  ;;  %vm13527_vm9 = vcmask 1042432   ;;  %vm13529_vm0 = vnez %v13528_v54  ;;  %v13555_v60 = vld [vmem:[#allocation5_spill] sm:$0xff] }
 0x281   : > { %vm13531_vm3 = vnez %v13530_v15  ;;  %vm13533_vm10 = vcmask 195584   ;;  %v2932_v22 = vunpack.c.l.b16 %v2183_v46  ;;  %v1891_v42 = vsel %vm8351_vm15, %v8372_v17, %v1890_v19  ;;  %v8145_v46 = vld [vmem:[#allocation2 + $0xa0] sm:$0xf] }
 0x282   : > { %v4476_v25 = vsel %vm13527_vm9, %v13526_v43, %v13525_v8  ;;  %vm13532_vm5 = vmpackc.low %vm13529_vm0, %vm13531_vm3  ;;  %7558 = vmatmul.msk.bf16.gmra.mxu1 %vm13533_vm10, %v7874_v36  ;;  %v1895_v48 = vor.u32 %v1894_v32, %v1890_v19  ;;  %v3528_v31 = vpack.c.b16 %v3495_v11, %v3495_v11  ;;  %vm13536_vm11 = vcmask 64512  }
 0x283   : > { %v3960_v53 = vsel %vm13532_vm5, %v8144_v50, 0  ;;  %vm13534_vm1 = vmmov %vm13533_vm10  ;;  %4509 = vrot.lane.b32.xlu2 %v4476_v25, %s8192_s15  ;;  %v11200_v16 = vsel %vm13536_vm11, %v4090_v7, %v4332_v47  ;;  %v2123_v8 = vunpack.c.l.b16 %v1891_v42  ;;  %v2124_v43 = vunpack.c.h.b16 %v1891_v42 }
 0x284   : > { %7600 = vmatmul.msk.bf16.gmra.mxu2 %vm13534_vm1, %v7874_v36  ;;  %vm13535_vm9 = vmmov %vm13534_vm1  ;;  %v3529_v50 = vpack.c.b16 %v3496_v14, %v3496_v14  ;;  %v2952_v54 = vpack.c.b16 %v2932_v22, %v2931_v34  ;;  %v1896_v15 = vrot.slane %v1895_v48, 4  ;;  %v3766_v36 = vshrl.u32 %v3528_v31, 16 }
 0x285   : > { %7770 = vmatmul.msk.bf16.gmra.mxu3 %vm13535_vm9, %v7908_v37  ;;  %vm13538_vm3 = vnez %v13537_v26  ;;  %vm13540_vm1 = vnez %v13539_v20  ;;  %vm11208_vm10 = vcmp.ne.s32.totalorder %v2123_v8, %v8341_v58  ;;  %v13542_v32 = vmov 0 }
 0x286   : > { %vm13541_vm5 = vmpackc.low %vm13538_vm3, %vm13540_vm1  ;;  %v13543_v32 = vsel %vm11208_vm10, 4294967295, %v13542_v32  ;;  %vm11213_vm11 = vcmp.ne.s32.totalorder %v2124_v43, %v8347_v2  ;;  %v3775_v34 = vshrl.u32 %v3529_v50, 16  ;;  %v4060_v11 = vunpack.c.l.b16 %v3960_v53 }
 0x287   : > { %v3961_v19 = vsel %vm13541_vm5, %v8145_v46, 0  ;;  %13544 = vst [vmem:[#allocation38_spill] sm:$0xff] %v13543_v32  ;;  %vm13547_vm0 = vcmask 64512   ;;  %v1901_v26 = vsel %vm8351_vm15, %v1896_v15, %v8338_v57  ;;  %vm12764_vm9 = vmpackc.low %vm11213_vm11, %vm11208_vm10  ;;  %v3768_v20 = vrot.slane %v3766_v36, 7  ;;  %v3923_v15 = vld [vmem:[#allocation2 + $0x8c] sm:$0x8] }
 0x288   : > { %v3404_v14 = vsel %vm13547_vm0, %v2952_v54, %v11102_v29  ;;  %v3769_v37 = vshll.u32 %v3528_v31, 16  ;;  %vm13548_vm3 = vcmask 130048   ;;  %v2130_v25 = vunpack.c.l.b16 %v1901_v26  ;;  %v8146_v29 = vld [vmem:[#allocation2 + $0x74] sm:$0xf]  ;;  %v13561_v32 = vld [vmem:[#allocation7_spill] sm:$0xff] }
 0x289   : > { %v3443_v7 = vsel %vm13548_vm3, %v3404_v14, %v11114_v62  ;;  %v2131_v22 = vunpack.c.h.b16 %v1901_v26  ;;  %v3778_v53 = vshll.u32 %v3529_v50, 16  ;;  %v2186_v8 = vsel %vm12764_vm9, %v8146_v29, 0  ;;  %v8147_v26 = vld [vmem:[#allocation2 + $0x78] sm:$0xf] }
 0x28a   : > { %v3493_v42 = vunpack.c.l.b16 %v3443_v7  ;;  %v3494_v48 = vunpack.c.h.b16 %v3443_v7  ;;  %v4061_v43 = vunpack.c.l.b16 %v3961_v19  ;;  %vm11234_vm1 = vcmp.ne.s32.totalorder %v2130_v25, %v8341_v58 }
 0x28b   : > { %v13549_v54 = vmov 0  ;;  %vm11239_vm5 = vcmp.ne.s32.totalorder %v2131_v22, %v8347_v2  ;;  %v13552_v62 = vmov 0  ;;  %v3773_v31 = vrot.slane %v3768_v20, 4  ;;  %v11257_v22 = vpop.permute.xlu1 %3361 }
 0x28c   : > { %v13550_v54 = vsel %vm11234_vm1, 4294967295, %v13549_v54  ;;  %v13553_v62 = vsel %vm11239_vm5, 4294967295, %v13552_v62  ;;  %v11243_v50 = vrot.slane %v3775_v34, 7  ;;  %v3746_v36 = vrot.slane %v11125_v52, 4  ;;  %vm12769_vm0 = vmpackc.low %vm11239_vm5, %vm11234_vm1 }
 0x28d   : > { %13551 = vst [vmem:[#allocation37_spill] sm:$0xff] %v13550_v54  ;;  %v3526_v46 = vpack.c.b16 %v3493_v42, %v3493_v42  ;;  %v3527_v14 = vpack.c.b16 %v3494_v48, %v3494_v48  ;;  %v961_v19 = vadd.s32 240, %v8292_v21  ;;  %v2187_v34 = vsel %vm12769_vm0, %v8147_v26, 0  ;;  %v11259_v42 = vpop.permute.xlu0 %3210  ;;  %v13557_v21 = vld [vmem:[#allocation4_spill] sm:$0xff] }
 0x28e   : > { %13554 = vst [vmem:[#allocation35_spill] sm:$0xff] %v13553_v62  ;;  %v2935_v7 = vunpack.c.l.b16 %v2186_v8  ;;  %v3771_v25 = vor.u32 %v3769_v37, %v3768_v20  ;;  %v3780_v52 = vor.u32 %v3778_v53, %v11243_v50  ;;  %v4091_v0 = vpack.c.b16 %v4061_v43, %v4060_v11  ;;  %v8148_v62 = vld [vmem:[#allocation2 + $0x90] sm:$0xf]  ;;  %v13563_v11 = vld [vmem:[#allocation6_spill] sm:$0xff] }
 0x28f   : > { %v3748_v48 = vshrl.u32 %v3526_v46, 16  ;;  %v3757_v29 = vshrl.u32 %v3527_v14, 16  ;;  %vm13556_vm3 = vnez %v13555_v60  ;;  %vm13558_vm9 = vnez %v13557_v21 }
 0x290   : > { %vm13559_vm14 = vmpackc.low %vm13556_vm3, %vm13558_vm9  ;;  %v3751_v39 = vshll.u32 %v3526_v46, 16  ;;  %v2936_v54 = vunpack.c.l.b16 %v2187_v34  ;;  %v3781_v20 = vsel %vm8358_vm2, %v3773_v31, %v3780_v52  ;;  %v1177_v37 = vand.u32 15, %v961_v19  ;;  %v4334_v52 = vpop.permute.xlu2 %4333 }
 0x291   : > { %v3956_v18 = vsel %vm13559_vm14, %v3923_v15, 0  ;;  %v3750_v53 = vrot.slane %v3748_v48, 7  ;;  %v3759_v8 = vrot.slane %v3757_v29, 7  ;;  %v3760_v26 = vshll.u32 %v3527_v14, 16 }
 0x292   : > { %vm13560_vm0 = vcmask 191488   ;;  %vm13562_vm12 = vnez %v13561_v32  ;;  %vm13564_vm1 = vnez %v13563_v11  ;;  %v2954_v43 = vpack.c.b16 %v2936_v54, %v2935_v7  ;;  %v8149_v32 = vld [vmem:[#allocation2 + $0xcc] sm:$0xf] }
 0x293   : > { %3885 = vst.msk [vmem:[#allocation3 + $0x70] sm:$0xf] %vm13560_vm0, %v3781_v20  ;;  %vm13565_vm5 = vmpackc.low %vm13562_vm12, %vm13564_vm1  ;;  %vm1377_vm14 = vcmp.ne.s32.totalorder %v1177_v37, 0  ;;  %v4056_v15 = vunpack.c.l.b16 %v3956_v18  ;;  %v3753_v34 = vor.u32 %v3751_v39, %v3750_v53  ;;  %v3755_v21 = vrot.slane %v3750_v53, 4  ;;  %v8150_v18 = vld [vmem:[#allocation2 + $0xd0] sm:$0xf]  ;;  %v5593_v20 = vpop.f32.mrf.mxu2  ;;  %v4330_v11 = vpop.permute.xlu1 %4329 }
 0x294   : > { %v3957_v60 = vsel %vm13565_vm5, %v8148_v62, 0  ;;  %v3762_v31 = vor.u32 %v3760_v26, %v3759_v8  ;;  %v3764_v19 = vrot.slane %v3759_v8, 4  ;;  %vm1571_vm9 = vmpackc.low %vm1377_vm14, %vm1377_vm14  ;;  %vm13566_vm3 = vcmask 64512  }
 0x295   : > { %v4057_v46 = vunpack.c.l.b16 %v3957_v60  ;;  %v3410_v14 = vsel %vm13566_vm3, %v2954_v43, %v11180_v63  ;;  %v1603_v48 = vsel %vm1571_vm9, 65537, %v12858_v38  ;;  %vm13567_vm12 = vnez %v13383_v4  ;;  %vm13574_vm9 = vmmov %vm13566_vm3  ;;  %v3364_v60 = vpop.permute.xlu0 %3363  ;;  %v7875_v43 = vld [vmem:[#allocation3 + $0x48] sm:$0xff] }
 0x296   : > { %vm13568_vm1 = vmpackc.low %vm10711_vm6, %vm13567_vm12  ;;  %vm13569_vm5 = vnez %v13399_v23  ;;  %v3754_v63 = vsel %vm8358_vm2, %v3746_v36, %v3753_v34  ;;  %v3763_v38 = vsel %vm8358_vm2, %v3755_v21, %v3762_v31  ;;  %vm13571_vm14 = vcmask 130048   ;;  %v7909_v21 = vld [vmem:[#allocation3 + $0x48] sm:$0xff]  ;;  %v8151_v31 = vld [vmem:[#allocation2 + $0xd4] sm:$0xf] }
 0x297   : > { %v11282_v54 = vsel %vm13568_vm1, %v8149_v32, 0  ;;  %vm13570_vm0 = vmpackc.low %vm10750_vm8, %vm13569_vm5  ;;  %v3447_v4 = vsel %vm13571_vm14, %v3410_v14, %v11041_v35  ;;  %v3772_v41 = vsel %vm8358_vm2, %v3764_v19, %v3771_v25  ;;  %vm13572_vm6 = vcmask 191488  }
 0x298   : > { %v11289_v39 = vsel %vm13570_vm0, %v8150_v18, 0  ;;  %3882 = vst.msk [vmem:[#allocation3 + $0x64] sm:$0xf] %vm13572_vm6, %v3754_v63  ;;  %v3497_v45 = vunpack.c.l.b16 %v3447_v4  ;;  %v3498_v62 = vunpack.c.h.b16 %v3447_v4  ;;  %v1908_v23 = vshll.u32 %v1603_v48, 16  ;;  %vm13573_vm8 = vmmov %vm13572_vm6  ;;  %v11339_v4 = vpop.permute.xlu2 %4485 }
 0x299   : > { %v1912_v7 = vshrl.u32 %v1603_v48, 16  ;;  %3883 = vst.msk [vmem:[#allocation3 + $0x68] sm:$0xf] %vm13573_vm8, %v3763_v38  ;;  %v3782_v29 = vrot.slane %v11243_v50, 4  ;;  %v11303_v36 = vsel %vm13574_vm9, %v4091_v0, %v4334_v52  ;;  %v4089_v37 = vpack.c.b16 %v4057_v46, %v4056_v15  ;;  %vm13575_vm3 = vmmov %vm13572_vm6  ;;  %v5399_v50 = vpop.f32.mrf.mxu1  ;;  %v8152_v46 = vld [vmem:[#allocation2 + $0xd8] sm:$0xf] }
 0x29a   : > { %v4072_v35 = vunpack.c.l.b16 %v11282_v54  ;;  %v3530_v53 = vpack.c.b16 %v3497_v45, %v3497_v45  ;;  %v3531_v8 = vpack.c.b16 %v3498_v62, %v3498_v62  ;;  %3884 = vst.msk [vmem:[#allocation3 + $0x6c] sm:$0xf] %vm13575_vm3, %v3772_v41  ;;  %v1910_v25 = vrot.slane %v1908_v23, 5  ;;  %vm13576_vm12 = vmmov %vm13571_vm14  ;;  %v8153_v48 = vld [vmem:[#allocation2 + $0xb4] sm:$0xf] }
 0x29b   : > { %v1914_v26 = vrot.slane %v1912_v7, 4  ;;  %v3451_v34 = vsel %vm13576_vm12, %v11152_v6, %v3364_v60  ;;  %v4073_v0 = vunpack.c.l.b16 %v11289_v39  ;;  %vm13577_vm1 = vnez %v13421_v51  ;;  %v8154_v62 = vld [vmem:[#allocation2 + $0xb8] sm:$0xf] }
 0x29c   : > { %vm13578_vm5 = vnez %v13419_v44  ;;  %vm13580_vm14 = vnez %v13433_v10  ;;  %vm13581_vm6 = vnez %v13431_v24  ;;  %v3784_v6 = vshrl.u32 %v3530_v53, 16 }
 0x29d   : > { %vm13579_vm0 = vmpackc.low %vm13577_vm1, %vm13578_vm5  ;;  %v3787_v52 = vshll.u32 %v3530_v53, 16  ;;  %v3793_v14 = vshrl.u32 %v3531_v8, 16  ;;  %vm13583_vm9 = vnez %v13270_v30  ;;  %vm13584_vm3 = vnez %v13268_v55 }
 0x29e   : > { %v11315_v15 = vsel %vm13579_vm0, %v8151_v31, 0  ;;  %vm13582_vm8 = vmpackc.low %vm13580_vm14, %vm13581_vm6  ;;  %vm13586_vm1 = vcmask 195584   ;;  %v3796_v51 = vshll.u32 %v3531_v8, 16  ;;  %v1911_v24 = vsel %vm8351_vm15, %v8372_v17, %v1910_v25  ;;  %v8155_v31 = vld [vmem:[#allocation2 + $0x7c] sm:$0xf] }
 0x29f   : > { %v11322_v19 = vsel %vm13582_vm8, %v8152_v46, 0  ;;  %vm13585_vm12 = vmpackc.low %vm13583_vm9, %vm13584_vm3  ;;  %7559 = vmatmul.msk.bf16.gmra.mxu1 %vm13586_vm1, %v7875_v43  ;;  %v1915_v10 = vor.u32 %v1914_v26, %v1910_v25  ;;  %v3501_v32 = vunpack.c.l.b16 %v3451_v34  ;;  %v3786_v18 = vrot.slane %v3784_v6, 7  ;;  %v11362_v26 = vpop.f32.mrf.mxu2  ;;  %v4480_v34 = vpop.permute.xlu0 %4479 }
 0x2a0   : > { %v11329_v44 = vsel %vm13585_vm12, %v8153_v48, 0  ;;  %vm13587_vm5 = vmmov %vm13586_vm1  ;;  %v11337_v30 = vrot.slane %v3793_v14, 7  ;;  %v2137_v55 = vunpack.c.l.b16 %v1911_v24  ;;  %v2138_v63 = vunpack.c.h.b16 %v1911_v24 }
 0x2a1   : > { %7601 = vmatmul.msk.bf16.gmra.mxu2 %vm13587_vm5, %v7875_v43  ;;  %vm13588_vm0 = vmmov %vm13586_vm1  ;;  %v1916_v38 = vrot.slane %v1915_v10, 4  ;;  %vm13589_vm14 = vcmask 64512   ;;  %v3534_v45 = vpack.c.b16 %v3501_v32, %v3501_v32  ;;  %vm13590_vm6 = vnez %v13277_v49  ;;  %v4482_v43 = vpop.permute.xlu1 %4481  ;;  %v8156_v10 = vld [vmem:[#allocation2 + $0x80] sm:$0xf] }
 0x2a2   : > { %7771 = vmatmul.msk.bf16.gmra.mxu3 %vm13588_vm0, %v7909_v21  ;;  %v4515_v41 = vsel %vm13589_vm14, %v4089_v37, %v4330_v11  ;;  %vm13591_vm8 = vnez %v13275_v33  ;;  %v3789_v23 = vor.u32 %v3787_v52, %v3786_v18  ;;  %v3791_v7 = vrot.slane %v3786_v18, 4  ;;  %v11381_v52 = vpop.f32.mrf.mxu1  ;;  %v8157_v18 = vld [vmem:[#allocation2 + $0xa4] sm:$0xf] }
 0x2a3   : > { %vm13592_vm9 = vmpackc.low %vm13590_vm6, %vm13591_vm8  ;;  %v3798_v53 = vor.u32 %v3796_v51, %v11337_v30  ;;  %v4066_v8 = vunpack.c.l.b16 %v11329_v44  ;;  %v1921_v25 = vsel %vm8351_vm15, %v1916_v38, %v8338_v57  ;;  %vm11353_vm3 = vcmp.ne.s32.totalorder %v2137_v55, %v8341_v58  ;;  %v8158_v55 = vld [vmem:[#allocation2 + $0xa8] sm:$0xf] }
 0x2a4   : > { %v3967_v17 = vsel %vm13592_vm9, %v8154_v62, 0  ;;  %v13593_v37 = vmov 0  ;;  %vm11358_vm12 = vcmp.ne.s32.totalorder %v2138_v63, %v8347_v2  ;;  %v13595_v33 = vmov 0 }
 0x2a5   : > { %v13594_v37 = vsel %vm11353_vm3, 4294967295, %v13593_v37  ;;  %v13596_v33 = vsel %vm11358_vm12, 4294967295, %v13595_v33  ;;  %v3820_v49 = vshrl.u32 %v3534_v45, 16  ;;  %v3799_v11 = vsel %vm8358_vm2, %v3791_v7, %v3798_v53  ;;  %vm12775_vm15 = vmpackc.low %vm11358_vm12, %vm11353_vm3 }
 0x2a6   : > { %v3790_v3 = vsel %vm8358_vm2, %v3782_v29, %v3789_v23  ;;  %v2144_v57 = vunpack.c.l.b16 %v1921_v25  ;;  %v2145_v60 = vunpack.c.h.b16 %v1921_v25  ;;  %v3800_v21 = vrot.slane %v11337_v30, 4  ;;  %v11481_v30 = vld [vmem:[%s12503_s4] ss:$0 sm:$0xff] }
 0x2a7   : > { %vm13597_vm1 = vcmask 191488   ;;  %v2188_v29 = vsel %vm12775_vm15, %v8155_v31, 0  ;;  %v4067_v46 = vunpack.c.l.b16 %v3967_v17  ;;  %v11379_v6 = vadd.f32 %v5593_v20, %v5399_v50  ;;  %v7876_v31 = vld [vmem:[#allocation3 + $0x50] sm:$0xff] }
 0x2a8   : > { %3887 = vst.msk [vmem:[#allocation3 + $0x78] sm:$0xf] %vm13597_vm1, %v3799_v11  ;;  %vm13598_vm5 = vmmov %vm13597_vm1  ;;  %vm11385_vm0 = vcmp.ne.s32.totalorder %v2144_v57, %v8341_v58  ;;  %vm11390_vm14 = vcmp.ne.s32.totalorder %v2145_v60, %v8347_v2  ;;  %v3822_v44 = vrot.slane %v3820_v49, 7  ;;  %vm13603_vm6 = vcmask 130048  }
 0x2a9   : > { %3886 = vst.msk [vmem:[#allocation3 + $0x74] sm:$0xf] %vm13598_vm5, %v3790_v3  ;;  %v4567_v51 = vsel %vm13603_vm6, %v11200_v16, %v4482_v43  ;;  %vm2150_vm8 = vmpackc.low %vm11390_vm14, %vm11385_vm0  ;;  %v2937_v20 = vunpack.c.l.b16 %v2188_v29  ;;  %v3823_v50 = vshll.u32 %v3534_v45, 16  ;;  %vm13605_vm1 = vnez %v13180_v13  ;;  %v11418_v3 = vpop.f32.mrf.mxu2  ;;  %v4336_v43 = vpop.permute.xlu1 %4335 }
 0x2aa   : > { %v4617_v58 = vunpack.c.l.b16 %v4567_v51  ;;  %v4618_v24 = vunpack.c.h.b16 %v4567_v51  ;;  %v2189_v2 = vsel %vm2150_vm8, %v8156_v10, 0  ;;  %vm13604_vm9 = vmmov %vm13603_vm6  ;;  %vm13606_vm5 = vnez %v13178_v28  ;;  %v4340_v28 = vpop.permute.xlu2 %4339  ;;  %v11424_v51 = vpop.f32.mrf.mxu1 }
 0x2ab   : > { %v4565_v32 = vsel %vm13604_vm9, %v4515_v41, %v4480_v34  ;;  %vm13607_vm6 = vmpackc.low %vm13605_vm1, %vm13606_vm5  ;;  %vm13608_vm15 = vnez %v13186_v5  ;;  %vm13609_vm3 = vnez %v13184_v12  ;;  %v2938_v38 = vunpack.c.l.b16 %v2189_v2  ;;  %v4484_v34 = vpop.permute.xlu0 %4483 }
 0x2ac   : > { %v3962_v16 = vsel %vm13607_vm6, %v8157_v18, 0  ;;  %vm13610_vm12 = vmpackc.low %vm13608_vm15, %vm13609_vm3  ;;  %v4650_v45 = vpack.c.b16 %v4617_v58, %v4617_v58  ;;  %v4651_v62 = vpack.c.b16 %v4618_v24, %v4618_v24  ;;  %v4615_v17 = vunpack.c.l.b16 %v4565_v32 }
 0x2ad   : > { %v3963_v63 = vsel %vm13610_vm12, %v8158_v55, 0  ;;  %v4094_v23 = vpack.c.b16 %v4067_v46, %v4066_v8  ;;  %v4616_v41 = vunpack.c.h.b16 %v4565_v32  ;;  %v4062_v7 = vunpack.c.l.b16 %v3962_v16  ;;  %vm13612_vm12 = vmmov %vm13604_vm9 }
 0x2ae   : > { %v4063_v53 = vunpack.c.l.b16 %v3963_v63  ;;  %v2955_v13 = vpack.c.b16 %v2938_v38, %v2937_v20  ;;  %v11416_v25 = vor.u32 %v3823_v50, %v3822_v44  ;;  %v4696_v49 = vshrl.u32 %v4650_v45, 16  ;;  %v7910_v20 = vld [vmem:[#allocation3 + $0x50] sm:$0xff]  ;;  %vm13613_vm15 = vmmov %vm13604_vm9 }
 0x2af   : > { %v4705_v11 = vshrl.u32 %v4651_v62, 16  ;;  %v4699_v5 = vshll.u32 %v4650_v45, 16  ;;  %v4708_v12 = vshll.u32 %v4651_v62, 16  ;;  %v4648_v57 = vpack.c.b16 %v4615_v17, %v4615_v17  ;;  %v11435_v17 = vpop.f32.mrf.mxu3 }
 0x2b0   : > { %v4649_v60 = vpack.c.b16 %v4616_v41, %v4616_v41  ;;  %vm13611_vm3 = vcmask 64512   ;;  %v4698_v29 = vrot.slane %v4696_v49, 7  ;;  %v4092_v44 = vpack.c.b16 %v4063_v53, %v4062_v7 }
 0x2b1   : > { %v3413_v8 = vsel %vm13611_vm3, %v2955_v13, %v11259_v42  ;;  %v11422_v46 = vrot.slane %v4705_v11, 7  ;;  %v4682_v58 = vshrl.u32 %v4648_v57, 16  ;;  %v4569_v10 = vsel %vm13613_vm15, %v11303_v36, %v4484_v34  ;;  %vm13617_vm6 = vmmov %vm13611_vm3  ;;  %v11445_v57 = vpop.f32.mrf.mxu2 }
 0x2b2   : > { %v3449_v50 = vsel %vm13612_vm12, %v3413_v8, %v11257_v22  ;;  %v4687_v24 = vshrl.u32 %v4649_v60, 16  ;;  %vm13614_vm9 = vcmask 195584   ;;  %v4703_v32 = vrot.slane %v4698_v29, 4  ;;  %vm13618_vm3 = vmmov %vm13612_vm12  ;;  %v11451_v8 = vpop.permute.xlu1 %4487 }
 0x2b3   : > { %7560 = vmatmul.msk.bf16.gmra.mxu1 %vm13614_vm9, %v7876_v31  ;;  %vm13615_vm1 = vmmov %vm13614_vm9  ;;  %v3499_v42 = vunpack.c.l.b16 %v3449_v50  ;;  %v3500_v2 = vunpack.c.h.b16 %v3449_v50  ;;  %v4690_v18 = vshll.u32 %v4649_v60, 16  ;;  %v4701_v16 = vor.u32 %v4699_v5, %v4698_v29  ;;  %v11458_v50 = vpop.f32.mrf.mxu1 }
 0x2b4   : > { %7602 = vmatmul.msk.bf16.gmra.mxu2 %vm13615_vm1, %v7876_v31  ;;  %vm13616_vm5 = vmmov %vm13615_vm1  ;;  %v4710_v55 = vor.u32 %v4708_v12, %v11422_v46  ;;  %v7411_v63 = vrot.slane %v4682_v58, 11  ;;  %v4689_v22 = vrot.slane %v4687_v24, 7  ;;  %v4524_v62 = vsel %vm13617_vm6, %v4092_v44, %v4336_v43 }
 0x2b5   : > { %7772 = vmatmul.msk.bf16.gmra.mxu3 %vm13616_vm5, %v7910_v20  ;;  %v3532_v38 = vpack.c.b16 %v3499_v42, %v3499_v42  ;;  %v3533_v45 = vpack.c.b16 %v3500_v2, %v3500_v2  ;;  %v4619_v36 = vunpack.c.l.b16 %v4569_v10  ;;  %v4571_v13 = vsel %vm13618_vm3, %v4524_v62, %v11339_v4  ;;  %vm13619_vm12 = vmmov %vm13617_vm6  ;;  %v11453_v4 = vpop.permute.xlu0 %4337 }
 0x2b6   : > { %v4711_v41 = vsel %vm8358_vm2, %v4703_v32, %v4710_v55  ;;  %v4692_v7 = vor.u32 %v4690_v18, %v4689_v22  ;;  %v4694_v53 = vrot.slane %v4689_v22, 4  ;;  %v11442_v12 = vsel %vm13619_vm12, %v4094_v23, %v4340_v28  ;;  %v11456_v28 = vpop.permute.xlu2 %4491 }
 0x2b7   : > { %v3802_v49 = vshrl.u32 %v3532_v38, 16  ;;  %v3805_v11 = vshll.u32 %v3532_v38, 16  ;;  %v3811_v5 = vshrl.u32 %v3533_v45, 16  ;;  %vm13620_vm15 = vcmask 191488  }
 0x2b8   : > { %5007 = vst.msk [vmem:[#allocation3 + $0x98] sm:$0xf] %vm13620_vm15, %v4711_v41  ;;  %v4693_v60 = vsel %vm8358_vm2, %v7411_v63, %v4692_v7  ;;  %v4702_v43 = vsel %vm8358_vm2, %v4694_v53, %v4701_v16  ;;  %v4621_v34 = vunpack.c.l.b16 %v4571_v13  ;;  %v4622_v31 = vunpack.c.h.b16 %v4571_v13  ;;  %vm13621_vm9 = vmmov %vm13620_vm15  ;;  %v8159_v13 = vld [vmem:[#allocation2 + $0xac] sm:$0xf] }
 0x2b9   : > { %v3804_v29 = vrot.slane %v3802_v49, 7  ;;  %v3813_v44 = vrot.slane %v3811_v5, 7  ;;  %v3814_v23 = vshll.u32 %v3533_v45, 16  ;;  %5005 = vst.msk [vmem:[#allocation3 + $0x90] sm:$0xf] %vm13621_vm9, %v4693_v60  ;;  %v4620_v20 = vunpack.c.h.b16 %v4569_v10  ;;  %vm13622_vm1 = vmmov %vm13621_vm9  ;;  %v13625_v49 = vld [vmem:[#allocation62_spill] sm:$0xff]  ;;  %v11495_v60 = vpop.f32.mrf.mxu2 }
 0x2ba   : > { %5006 = vst.msk [vmem:[#allocation3 + $0x94] sm:$0xf] %vm13622_vm1, %v4702_v43  ;;  %v4654_v58 = vpack.c.b16 %v4621_v34, %v4621_v34  ;;  %v4655_v24 = vpack.c.b16 %v4622_v31, %v4622_v31  ;;  %v11463_v42 = vadd.f32 %v11362_v26, %v11381_v52  ;;  %v4652_v2 = vpack.c.b16 %v4619_v36, %v4619_v36  ;;  %vm13623_vm5 = vmmov %vm13622_vm1  ;;  %v6115_v43 = vpop.f32.mrf.mxu3 }
 0x2bb   : > { %v3807_v32 = vor.u32 %v3805_v11, %v3804_v29  ;;  %v3809_v18 = vrot.slane %v3804_v29, 4  ;;  %v3816_v16 = vor.u32 %v3814_v23, %v3813_v44  ;;  %v3818_v55 = vrot.slane %v3813_v44, 4  ;;  %vm13624_vm6 = vmmov %vm13622_vm1  ;;  %v13627_v11 = vld [vmem:[#allocation57_spill] sm:$0xff]  ;;  %v8160_v23 = vld [vmem:[#allocation2 + $0xb0] sm:$0xf] }
 0x2bc   : > { %v4712_v63 = vrot.slane %v11422_v46, 4  ;;  %v4732_v22 = vshrl.u32 %v4654_v58, 16  ;;  %v4735_v38 = vshll.u32 %v4654_v58, 16  ;;  %v4741_v10 = vshrl.u32 %v4655_v24, 16  ;;  %vm13630_vm9 = vmmov %vm13622_vm1  ;;  %v13633_v58 = vld [vmem:[#allocation65_spill] sm:$0xff] }
 0x2bd   : > { %v3808_v45 = vsel %vm8358_vm2, %v3800_v21, %v3807_v32  ;;  %v3817_v62 = vsel %vm8358_vm2, %v3809_v18, %v3816_v16  ;;  %v3826_v26 = vsel %vm8358_vm2, %v3818_v55, %v11416_v25  ;;  %v4653_v52 = vpack.c.b16 %v4620_v20, %v4620_v20  ;;  %v4490_v39 = vpop.permute.xlu0 %4489  ;;  %v13631_v20 = vld [vmem:[#allocation66_spill] sm:$0xff]  ;;  %v11504_v32 = vpop.f32.mrf.mxu1  ;;  %v7911_v18 = vld [vmem:[#allocation3 + $0x58] sm:$0xff] }
 0x2be   : > { %3888 = vst.msk [vmem:[#allocation3 + $0x7c] sm:$0xf] %vm13623_vm5, %v3808_v45  ;;  %v4734_v36 = vrot.slane %v4732_v22, 7  ;;  %v11476_v46 = vrot.slane %v4741_v10, 7  ;;  %v4744_v41 = vshll.u32 %v4655_v24, 16  ;;  %v4714_v7 = vshrl.u32 %v4652_v2, 16  ;;  %v4342_v45 = vpop.permute.xlu1 %4341 }
 0x2bf   : > { %3889 = vst.msk [vmem:[#allocation3 + $0x80] sm:$0xf] %vm13624_vm6, %v3817_v62  ;;  %v4717_v21 = vshll.u32 %v4652_v2, 16  ;;  %v4723_v53 = vshrl.u32 %v4653_v52, 16  ;;  %v11488_v25 = vpack.c.b16 %v4073_v0, %v4072_v35  ;;  %vm13626_vm3 = vnez %v13625_v49  ;;  %v7877_v35 = vld [vmem:[#allocation3 + $0x58] sm:$0xff] }
 0x2c0   : > { %vm13628_vm12 = vnez %v13627_v11  ;;  %3890 = vst.msk [vmem:[#allocation3 + $0x84] sm:$0xf] %vm13630_vm9, %v3826_v26  ;;  %v4737_v34 = vor.u32 %v4735_v38, %v4734_v36  ;;  %v4739_v31 = vrot.slane %v4734_v36, 4  ;;  %v4746_v54 = vor.u32 %v4744_v41, %v11476_v46  ;;  %v8161_v38 = vld [vmem:[#allocation2 + $0xbc] sm:$0xf]  ;;  %v11518_v41 = vpop.permute.xlu2 %4345 }
 0x2c1   : > { %vm13629_vm15 = vmpackc.low %vm13626_vm3, %vm13628_vm12  ;;  %v4726_v29 = vshll.u32 %v4653_v52, 16  ;;  %v4716_v0 = vrot.slane %v4714_v7, 7  ;;  %v4725_v44 = vrot.slane %v4723_v53, 7  ;;  %vm13632_vm1 = vnez %v13631_v20  ;;  %v8164_v20 = vld [vmem:[#allocation2 + $0xe8] sm:$0xf] }
 0x2c2   : > { %v3964_v5 = vsel %vm13629_vm15, %v8159_v13, 0  ;;  %vm13634_vm5 = vnez %v13633_v58  ;;  %v4747_v16 = vsel %vm8358_vm2, %v4739_v31, %v4746_v54  ;;  %v6278_v22 = vadd.f32 %v11435_v17, %v11379_v6  ;;  %v8162_v6 = vld [vmem:[#allocation2 + $0xc0] sm:$0xf]  ;;  %v11566_v27 = vpop.f32.mrf.mxu3 }
 0x2c3   : > { %vm13635_vm6 = vmpackc.low %vm13632_vm1, %vm13634_vm5  ;;  %v4064_v2 = vunpack.c.l.b16 %v3964_v5  ;;  %vm13636_vm3 = vnez %v13332_v59  ;;  %vm13637_vm12 = vnez %v13330_v1  ;;  %vm13639_vm9 = vcmask 195584  }
 0x2c4   : > { %v3965_v24 = vsel %vm13635_vm6, %v8160_v23, 0  ;;  %vm13638_vm15 = vmpackc.low %vm13636_vm3, %vm13637_vm12  ;;  %7561 = vmatmul.msk.bf16.gmra.mxu1 %vm13639_vm9, %v7877_v35  ;;  %vm13641_vm5 = vcmask 191488   ;;  %v4719_v62 = vor.u32 %v4717_v21, %v4716_v0  ;;  %v4721_v26 = vrot.slane %v4716_v0, 4 }
 0x2c5   : > { %v4065_v55 = vunpack.c.l.b16 %v3965_v24  ;;  %v3968_v10 = vsel %vm13638_vm15, %v8161_v38, 0  ;;  %vm13640_vm1 = vmmov %vm13639_vm9  ;;  %5011 = vst.msk [vmem:[#allocation3 + $0xa8] sm:$0xf] %vm13641_vm5, %v4747_v16  ;;  %v4728_v52 = vor.u32 %v4726_v29, %v4725_v44  ;;  %v4730_v36 = vrot.slane %v4725_v44, 4  ;;  %v11545_v29 = vpop.f32.mrf.mxu2  ;;  %v8163_v44 = vld [vmem:[#allocation2 + $0xe4] sm:$0xf] }
 0x2c6   : > { %7603 = vmatmul.msk.bf16.gmra.mxu2 %vm13640_vm1, %v7877_v35  ;;  %vm13642_vm6 = vmmov %vm13640_vm1  ;;  %v11522_v1 = vadd.f32 %v11481_v30, %v6278_v22  ;;  %vm13643_vm3 = vnez %v13343_v40  ;;  %vm13644_vm12 = vnez %v13341_v61  ;;  %v4068_v7 = vunpack.c.l.b16 %v3968_v10  ;;  %v13655_v24 = vld [vmem:[#allocation29_spill] sm:$0xff] }
 0x2c7   : > { %7773 = vmatmul.msk.bf16.gmra.mxu3 %vm13642_vm6, %v7911_v18  ;;  %v4093_v59 = vpack.c.b16 %v4065_v55, %v4064_v2  ;;  %vm13645_vm15 = vmpackc.low %vm13643_vm3, %vm13644_vm12  ;;  %v4720_v21 = vsel %vm8358_vm2, %v4712_v63, %v4719_v62  ;;  %v4729_v53 = vsel %vm8358_vm2, %v4721_v26, %v4728_v52  ;;  %v4738_v13 = vsel %vm8358_vm2, %v4730_v36, %v4737_v34  ;;  %v11571_v55 = vpop.f32.mrf.mxu1 }
 0x2c8   : > { %v3969_v17 = vsel %vm13645_vm15, %v8162_v6, 0  ;;  %v4748_v11 = vrot.slane %v11476_v46, 4  ;;  %vm13646_vm9 = vmmov %vm13641_vm5  ;;  %vm13647_vm1 = vcmask 64512   ;;  %v6414_v40 = vmax.f32 %v11522_v1, 0.0  ;;  %v11575_v1 = vpop.permute.xlu2 %4497 }
 0x2c9   : > { %v4069_v49 = vunpack.c.l.b16 %v3969_v17  ;;  %5008 = vst.msk [vmem:[#allocation3 + $0x9c] sm:$0xf] %vm13646_vm9, %v4720_v21  ;;  %v4527_v61 = vsel %vm13647_vm1, %v4093_v59, %v11453_v4  ;;  %vm13648_vm5 = vcmask 130048   ;;  %vm13649_vm6 = vmmov %vm13646_vm9  ;;  %v6279_v4 = vadd.f32 %v6115_v43, %v11463_v42  ;;  %v11564_v42 = vpop.permute.xlu0 %4343  ;;  %v11573_v59 = vpop.permute.xlu1 %4493 }
 0x2ca   : > { %v4575_v5 = vsel %vm13648_vm5, %v11442_v12, %v4490_v39  ;;  %5009 = vst.msk [vmem:[#allocation3 + $0xa0] sm:$0xf] %vm13649_vm6, %v4729_v53  ;;  %vm13650_vm3 = vmmov %vm13648_vm5  ;;  %vm13748_vm0 = vcmask 130048  }
 0x2cb   : > { %v4573_v63 = vsel %vm13650_vm3, %v4527_v61, %v11451_v8  ;;  %v4095_v31 = vpack.c.b16 %v4069_v49, %v4068_v7  ;;  %v4625_v34 = vunpack.c.l.b16 %v4575_v5  ;;  %v4626_v54 = vunpack.c.h.b16 %v4575_v5  ;;  %vm13651_vm12 = vmmov %vm13649_vm6 }
 0x2cc   : > { %5010 = vst.msk [vmem:[#allocation3 + $0xa4] sm:$0xf] %vm13651_vm12, %v4738_v13  ;;  %v4623_v35 = vunpack.c.l.b16 %v4573_v63  ;;  %v4624_v0 = vunpack.c.h.b16 %v4573_v63  ;;  %vm13652_vm15 = vmpackc.low %vm10982_vm7, %vm10977_vm4  ;;  %v6349_v16 = vadd.f32 %v11481_v30, %v6279_v4  ;;  %vm13659_vm7 = vcmask 195584  }
 0x2cd   : > { %v11554_v12 = vsel %vm13652_vm15, %v8163_v44, 0  ;;  %vm13653_vm9 = vmmov %vm13647_vm1  ;;  %v4658_v39 = vpack.c.b16 %v4625_v34, %v4625_v34  ;;  %v4659_v23 = vpack.c.b16 %v4626_v54, %v4626_v54  ;;  %vm13656_vm1 = vnez %v13655_v24  ;;  %v11577_v34 = vpop.f32.mrf.mxu2  ;;  %v7878_v44 = vld [vmem:[#allocation3 + $0x60] sm:$0xff] }
 0x2ce   : > { %v4533_v8 = vsel %vm13653_vm9, %v4095_v31, %v4342_v45  ;;  %vm13657_vm5 = vmpackc.low %vm11021_vm13, %vm13656_vm1  ;;  %v4656_v56 = vpack.c.b16 %v4623_v35, %v4623_v35  ;;  %v4657_v43 = vpack.c.b16 %v4624_v0, %v4624_v0  ;;  %v6415_v49 = vmax.f32 %v6349_v16, 0.0  ;;  %v7912_v24 = vld [vmem:[#allocation3 + $0x60] sm:$0xff]  ;;  %v6120_v16 = vpop.f32.mrf.mxu3 }
 0x2cf   : > { %v11562_v2 = vsel %vm13657_vm5, %v8164_v20, 0  ;;  %vm13658_vm4 = vmmov %vm13650_vm3  ;;  %v4768_v10 = vshrl.u32 %v4658_v39, 16  ;;  %v4771_v45 = vshll.u32 %v4658_v39, 16  ;;  %v4780_v13 = vshll.u32 %v4659_v23, 16 }
 0x2d0   : > { %v4577_v18 = vsel %vm13658_vm4, %v4533_v8, %v11456_v28  ;;  %v4750_v62 = vshrl.u32 %v4656_v56, 16  ;;  %v4753_v26 = vshll.u32 %v4656_v56, 16  ;;  %v4759_v52 = vshrl.u32 %v4657_v43, 16  ;;  %vm13660_vm13 = vmmov %vm13659_vm7 }
 0x2d1   : > { %v4627_v22 = vunpack.c.l.b16 %v4577_v18  ;;  %v4628_v38 = vunpack.c.h.b16 %v4577_v18  ;;  %v4762_v36 = vshll.u32 %v4657_v43, 16  ;;  %v4770_v7 = vrot.slane %v4768_v10, 7  ;;  %v4496_v10 = vpop.permute.xlu0 %4495  ;;  %vm13661_vm3 = vmmov %vm13659_vm7 }
 0x2d2   : > { %v4777_v28 = vshrl.u32 %v4659_v23, 16  ;;  %v4752_v21 = vrot.slane %v4750_v62, 7  ;;  %v4761_v53 = vrot.slane %v4759_v52, 7  ;;  %v6480_v18 = vpack.c.bf16 %v6415_v49, %v6414_v40  ;;  %vm13662_vm12 = vmmov %vm13649_vm6  ;;  %v8165_v52 = vld [vmem:[#allocation2 + $0xc4] sm:$0xf]  ;;  %v4348_v49 = vpop.permute.xlu1 %4347 }
 0x2d3   : > { %v4660_v6 = vpack.c.b16 %v4627_v22, %v4627_v22  ;;  %v4661_v17 = vpack.c.b16 %v4628_v38, %v4628_v38  ;;  %v4773_v20 = vor.u32 %v4771_v45, %v4770_v7  ;;  %v4775_v58 = vrot.slane %v4770_v7, 4  ;;  %v11595_v45 = vpop.f32.mrf.mxu1  ;;  %vm13663_vm15 = vmmov %vm13653_vm9 }
 0x2d4   : > { %v4755_v54 = vor.u32 %v4753_v26, %v4752_v21  ;;  %v4757_v35 = vrot.slane %v4752_v21, 4  ;;  %v4764_v0 = vor.u32 %v4762_v36, %v4761_v53  ;;  %v4766_v4 = vrot.slane %v4761_v53, 4  ;;  %7562 = vmatmul.msk.bf16.gmra.mxu1 %vm13659_vm7, %v7878_v44  ;;  %7797 = vmatmul.msk.bf16.vlgmr.msrb.gmra.mxu0 %vm13663_vm15, %v6480_v18  ;;  %vm13664_vm9 = vmmov %vm13649_vm6  ;;  %v13665_v36 = vld [vmem:[#allocation12_spill] sm:$0xff]  ;;  %v8166_v21 = vld [vmem:[#allocation2 + $0xc8] sm:$0xf] }
 0x2d5   : > { %v4786_v61 = vshrl.u32 %v4660_v6, 16  ;;  %v4789_v5 = vshll.u32 %v4660_v6, 16  ;;  %v4795_v63 = vshrl.u32 %v4661_v17, 16  ;;  %v4798_v31 = vshll.u32 %v4661_v17, 16  ;;  %v13667_v6 = vld [vmem:[#allocation13_spill] sm:$0xff]  ;;  %vm13670_vm7 = vmmov %vm13649_vm6  ;;  %v13671_v53 = vld [vmem:[#allocation14_spill] sm:$0xff] }
 0x2d6   : > { %v4756_v23 = vsel %vm8358_vm2, %v4748_v11, %v4755_v54  ;;  %v4765_v56 = vsel %vm8358_vm2, %v4757_v35, %v4764_v0  ;;  %v4779_v43 = vrot.slane %v4777_v28, 7  ;;  %7604 = vmatmul.msk.bf16.gmra.mxu2 %vm13660_vm13, %v7878_v44  ;;  %v5599_v22 = vadd.f32 %v11418_v3, %v11424_v51  ;;  %v11628_v35 = vpop.f32.mrf.mxu2 }
 0x2d7   : > { %v4788_v8 = vrot.slane %v4786_v61, 7  ;;  %v11579_v39 = vrot.slane %v4795_v63, 7  ;;  %5012 = vst.msk [vmem:[#allocation3 + $0xac] sm:$0xf] %vm13649_vm6, %v4756_v23  ;;  %v5601_v11 = vadd.f32 %v11445_v57, %v11458_v50  ;;  %7774 = vmatmul.msk.bf16.gmra.mxu3 %vm13661_vm3, %v7912_v24  ;;  %v4774_v62 = vsel %vm8358_vm2, %v4766_v4, %v4773_v20 }
 0x2d8   : > { %5013 = vst.msk [vmem:[#allocation3 + $0xb0] sm:$0xf] %vm13662_vm12, %v4765_v56  ;;  %v4782_v3 = vor.u32 %v4780_v13, %v4779_v43  ;;  %v4784_v51 = vrot.slane %v4779_v43, 4  ;;  %v4078_v57 = vunpack.c.l.b16 %v11554_v12  ;;  %v4079_v50 = vunpack.c.l.b16 %v11562_v2  ;;  %v13673_v12 = vld [vmem:[#allocation15_spill] sm:$0xff]  ;;  %vm13676_vm12 = vmmov %vm13663_vm15 }
 0x2d9   : > { %v4793_v38 = vrot.slane %v4788_v8, 4  ;;  %v4800_v46 = vor.u32 %v4798_v31, %v11579_v39  ;;  %v4791_v40 = vor.u32 %v4789_v5, %v4788_v8  ;;  %5014 = vst.msk [vmem:[#allocation3 + $0xb4] sm:$0xf] %vm13664_vm9, %v4774_v62  ;;  %vm13666_vm1 = vnez %v13665_v36  ;;  %vm13677_vm15 = vmmov %vm13670_vm7  ;;  %v4352_v5 = vpop.permute.xlu2 %4351  ;;  %v13687_v36 = vld [vmem:[#allocation35_spill] sm:$0xff] }
 0x2da   : > { %vm13668_vm5 = vnez %v13667_v6  ;;  %v4783_v7 = vsel %vm8358_vm2, %v4775_v58, %v4782_v3  ;;  %vm13672_vm13 = vnez %v13671_v53  ;;  %vm13674_vm6 = vnez %v13673_v12  ;;  %vm13678_vm9 = vmmov %vm13670_vm7  ;;  %v13689_v6 = vld [vmem:[#allocation37_spill] sm:$0xff]  ;;  %v11682_v12 = vpop.permute.xlu1 %4499 }
 0x2db   : > { %v4801_v26 = vsel %vm8358_vm2, %v4793_v38, %v4800_v46  ;;  %vm13669_vm4 = vmpackc.low %vm13666_vm1, %vm13668_vm5  ;;  %v4792_v28 = vsel %vm8358_vm2, %v4784_v51, %v4791_v40  ;;  %v4539_v61 = vsel %vm13676_vm12, %v11488_v25, %v11518_v41  ;;  %5015 = vst.msk [vmem:[#allocation3 + $0xb8] sm:$0xf] %vm13677_vm15, %v4783_v7  ;;  %v6280_v31 = vadd.f32 %v11566_v27, %v5599_v22  ;;  %v8167_v22 = vld [vmem:[#allocation2 + $0xfc] sm:$0xf]  ;;  %v11663_v38 = vpop.f32.mrf.mxu3  ;;  %v11669_v40 = vpop.f32.mrf.mxu1 }
 0x2dc   : > { %v3970_v17 = vsel %vm13669_vm4, %v8165_v52, 0  ;;  %5017 = vst.msk [vmem:[#allocation3 + $0xc0] sm:$0xf] %vm13670_vm7, %v4801_v26  ;;  %vm13675_vm3 = vmpackc.low %vm13672_vm13, %vm13674_vm6  ;;  %v4074_v54 = vunpack.c.l.b16 %v11315_v15  ;;  %v4802_v0 = vrot.slane %v11579_v39, 4  ;;  %v4075_v4 = vunpack.c.l.b16 %v11322_v19  ;;  %v8168_v52 = vld [vmem:[#allocation2 + $0x100] sm:$0xf] }
 0x2dd   : > { %v3971_v2 = vsel %vm13675_vm3, %v8166_v21, 0  ;;  %v4070_v13 = vunpack.c.l.b16 %v3970_v17  ;;  %5016 = vst.msk [vmem:[#allocation3 + $0xbc] sm:$0xf] %vm13678_vm9, %v4792_v28  ;;  %vm13679_vm1 = vcmask 130048   ;;  %v6281_v8 = vadd.f32 %v6120_v16, %v5601_v11  ;;  %vm13680_vm5 = vmmov %vm13676_vm12 }
 0x2de   : > { %v4071_v63 = vunpack.c.l.b16 %v3971_v2  ;;  %v4581_v44 = vsel %vm13679_vm1, %v4539_v61, %v4496_v10  ;;  %v4100_v25 = vpack.c.b16 %v4079_v50, %v4078_v57  ;;  %v11636_v41 = vadd.f32 %v11495_v60, %v11504_v32  ;;  %vm13681_vm4 = vmmov %vm13680_vm5  ;;  %v11679_v17 = vpop.f32.mrf.mxu2  ;;  %v7879_v2 = vld [vmem:[#allocation3 + $0x68] sm:$0xff] }
 0x2df   : > { %v4631_v27 = vunpack.c.l.b16 %v4581_v44  ;;  %v11639_v15 = vadd.f32 %v11481_v30, %v6280_v31  ;;  %v4098_v58 = vpack.c.b16 %v4075_v4, %v4074_v54  ;;  %v11643_v24 = vadd.f32 %v11545_v29, %v11571_v55  ;;  %vm13682_vm7 = vmmov %vm13679_vm1  ;;  %v7913_v31 = vld [vmem:[#allocation3 + $0x68] sm:$0xff] }
 0x2e0   : > { %v4096_v20 = vpack.c.b16 %v4071_v63, %v4070_v13  ;;  %v4632_v23 = vunpack.c.h.b16 %v4581_v44  ;;  %v11646_v19 = vsel %vm13680_vm5, %v4100_v25, %v4352_v5  ;;  %v11651_v60 = vadd.f32 %v11481_v30, %v6281_v8  ;;  %vm13683_vm13 = vmmov %vm13681_vm4 }
 0x2e1   : > { %v4664_v43 = vpack.c.b16 %v4631_v27, %v4631_v27  ;;  %v4542_v18 = vsel %vm13683_vm13, %v4098_v58, %v4348_v49  ;;  %vm13685_vm6 = vmpackc.low %vm11213_vm11, %vm11208_vm10  ;;  %v6416_v62 = vmax.f32 %v11639_v15, 0.0  ;;  %vm13688_vm10 = vnez %v13687_v36  ;;  %v11684_v61 = vpop.permute.xlu2 %4503 }
 0x2e2   : > { %v4536_v56 = vsel %vm13681_vm4, %v4096_v20, %v11564_v42  ;;  %v4665_v16 = vpack.c.b16 %v4632_v23, %v4632_v23  ;;  %v11661_v55 = vsel %vm13685_vm6, %v8167_v22, 0  ;;  %vm13686_vm3 = vmmov %vm13679_vm1  ;;  %vm13690_vm11 = vnez %v13689_v6 }
 0x2e3   : > { %v4579_v32 = vsel %vm13682_vm7, %v4536_v56, %v11573_v59  ;;  %v4583_v11 = vsel %vm13686_vm3, %v4542_v18, %v11575_v1  ;;  %v4822_v10 = vshrl.u32 %v4664_v43, 16  ;;  %v11667_v59 = vpop.permute.xlu0 %4349  ;;  %vm13691_vm12 = vmpackc.low %vm13688_vm10, %vm13690_vm11  ;;  %v6417_v53 = vmax.f32 %v11651_v60, 0.0  ;;  %v6125_v18 = vpop.f32.mrf.mxu3 }
 0x2e4   : > { %v4629_v42 = vunpack.c.l.b16 %v4579_v32  ;;  %v4630_v46 = vunpack.c.h.b16 %v4579_v32  ;;  %v4633_v47 = vunpack.c.l.b16 %v4583_v11  ;;  %v4634_v3 = vunpack.c.h.b16 %v4583_v11 }
 0x2e5   : > { %v4831_v51 = vshrl.u32 %v4665_v16, 16  ;;  %v4824_v50 = vrot.slane %v4822_v10, 7  ;;  %v11677_v1 = vsel %vm13691_vm12, %v8168_v52, 0  ;;  %v4825_v5 = vshll.u32 %v4664_v43, 16 }
 0x2e6   : > { %v4662_v26 = vpack.c.b16 %v4629_v42, %v4629_v42  ;;  %v4663_v57 = vpack.c.b16 %v4630_v46, %v4630_v46  ;;  %v4666_v7 = vpack.c.b16 %v4633_v47, %v4633_v47  ;;  %v4667_v28 = vpack.c.b16 %v4634_v3, %v4634_v3  ;;  %v11691_v46 = vpop.f32.mrf.mxu1  ;;  %v11701_v36 = vpop.f32.mrf.mxu2 }
 0x2e7   : > { %v4833_v21 = vrot.slane %v4831_v51, 7  ;;  %v4834_v63 = vshll.u32 %v4665_v16, 16  ;;  %vm13692_vm15 = vcmask 195584   ;;  %v4827_v58 = vor.u32 %v4825_v5, %v4824_v50  ;;  %v13704_v5 = vld [vmem:[#allocation23_spill] sm:$0xff] }
 0x2e8   : > { %v4804_v13 = vshrl.u32 %v4662_v26, 16  ;;  %v4813_v49 = vshrl.u32 %v4663_v57, 16  ;;  %v4807_v54 = vshll.u32 %v4662_v26, 16  ;;  %v4816_v4 = vshll.u32 %v4663_v57, 16  ;;  %7563 = vmatmul.msk.bf16.gmra.mxu1 %vm13692_vm15, %v7879_v2  ;;  %vm13693_vm9 = vmmov %vm13692_vm15 }
 0x2e9   : > { %v4840_v44 = vshrl.u32 %v4666_v7, 16  ;;  %v4849_v8 = vshrl.u32 %v4667_v28, 16  ;;  %7605 = vmatmul.msk.bf16.gmra.mxu2 %vm13693_vm9, %v7879_v2  ;;  %v4852_v27 = vshll.u32 %v4667_v28, 16  ;;  %vm13694_vm1 = vmmov %vm13693_vm9  ;;  %v4829_v43 = vrot.slane %v4824_v50, 4  ;;  %v8169_v28 = vld [vmem:[#allocation2 + $0xdc] sm:$0xf] }
 0x2ea   : > { %v4806_v25 = vrot.slane %v4804_v13, 7  ;;  %v4815_v20 = vrot.slane %v4813_v49, 7  ;;  %7775 = vmatmul.msk.bf16.gmra.mxu3 %vm13694_vm1, %v7913_v31  ;;  %v4836_v32 = vor.u32 %v4834_v63, %v4833_v21  ;;  %v4843_v42 = vshll.u32 %v4666_v7, 16  ;;  %v8170_v13 = vld [vmem:[#allocation2 + $0xe0] sm:$0xf] }
 0x2eb   : > { %v4842_v23 = vrot.slane %v4840_v44, 7  ;;  %v11689_v56 = vrot.slane %v4849_v8, 7  ;;  %v4838_v3 = vrot.slane %v4833_v21, 4  ;;  %v4084_v50 = vunpack.c.l.b16 %v11661_v55  ;;  %v4502_v52 = vpop.permute.xlu0 %4501  ;;  %v13697_v55 = vld [vmem:[#allocation18_spill] sm:$0xff]  ;;  %v13699_v21 = vld [vmem:[#allocation21_spill] sm:$0xff] }
 0x2ec   : > { %v4809_v16 = vor.u32 %v4807_v54, %v4806_v25  ;;  %v4811_v22 = vrot.slane %v4806_v25, 4  ;;  %v4818_v29 = vor.u32 %v4816_v4, %v4815_v20  ;;  %v4820_v11 = vrot.slane %v4815_v20, 4  ;;  %v13702_v49 = vld [vmem:[#allocation22_spill] sm:$0xff]  ;;  %v13707_v54 = vld [vmem:[#allocation32_spill] sm:$0xff]  ;;  %v13709_v4 = vld [vmem:[#allocation33_spill] sm:$0xff] }
 0x2ed   : > { %v4847_v10 = vrot.slane %v4842_v23, 4  ;;  %v4854_v47 = vor.u32 %v4852_v27, %v11689_v56  ;;  %v4845_v57 = vor.u32 %v4843_v42, %v4842_v23  ;;  %vm13695_vm5 = vcmask 191488   ;;  %v8172_v27 = vld [vmem:[#allocation2 + $0xf0] sm:$0xf] }
 0x2ee   : > { %v4810_v51 = vsel %vm8358_vm2, %v4802_v0, %v4809_v16  ;;  %v4819_v26 = vsel %vm8358_vm2, %v4811_v22, %v4818_v29  ;;  %v4828_v39 = vsel %vm8358_vm2, %v4820_v11, %v4827_v58  ;;  %v4837_v0 = vsel %vm8358_vm2, %v4829_v43, %v4836_v32  ;;  %vm13696_vm4 = vmmov %vm13695_vm5  ;;  %v13713_v58 = vld [vmem:[#allocation34_spill] sm:$0xff]  ;;  %v13715_v23 = vld [vmem:[#allocation36_spill] sm:$0xff]  ;;  %v4358_v43 = vpop.permute.xlu2 %4357 }
 0x2ef   : > { %5018 = vst.msk [vmem:[#allocation3 + $0xc4] sm:$0xf] %vm13695_vm5, %v4810_v51  ;;  %v4855_v6 = vsel %vm8358_vm2, %v4847_v10, %v4854_v47  ;;  %v4085_v7 = vunpack.c.l.b16 %v11677_v1  ;;  %vm13698_vm7 = vnez %v13697_v55  ;;  %vm13700_vm13 = vnez %v13699_v21  ;;  %v8171_v1 = vld [vmem:[#allocation2 + $0xec] sm:$0xf]  ;;  %vm13712_vm1 = vmmov %vm13696_vm4  ;;  %v13728_v55 = vld [vmem:[#allocation24_spill] sm:$0xff] }
 0x2f0   : > { %5019 = vst.msk [vmem:[#allocation3 + $0xc8] sm:$0xf] %vm13696_vm4, %v4819_v26  ;;  %vm13701_vm6 = vmpackc.low %vm13698_vm7, %vm13700_vm13  ;;  %vm13703_vm3 = vnez %v13702_v49  ;;  %vm13705_vm10 = vnez %v13704_v5  ;;  %v6282_v31 = vadd.f32 %v11663_v38, %v11636_v41  ;;  %vm13708_vm12 = vnez %v13707_v54  ;;  %v4354_v38 = vpop.permute.xlu1 %4353  ;;  %v7880_v5 = vld [vmem:[#allocation3 + $0x70] sm:$0xff] }
 0x2f1   : > { %v3976_v2 = vsel %vm13701_vm6, %v8169_v28, 0  ;;  %vm13706_vm11 = vmpackc.low %vm13703_vm3, %vm13705_vm10  ;;  %vm13710_vm15 = vnez %v13709_v4  ;;  %5023 = vst.msk [vmem:[#allocation3 + $0xd8] sm:$0xf] %vm13712_vm1, %v4855_v6  ;;  %v4846_v8 = vsel %vm8358_vm2, %v4838_v3, %v4845_v57  ;;  %vm13714_vm5 = vnez %v13713_v58  ;;  %v11767_v6 = vpop.f32.mrf.mxu2  ;;  %v8173_v28 = vld [vmem:[#allocation2 + $0xf4] sm:$0xf]  ;;  %v7914_v54 = vld [vmem:[#allocation3 + $0x70] sm:$0xff] }
 0x2f2   : > { %v3977_v63 = vsel %vm13706_vm11, %v8170_v13, 0  ;;  %vm13711_vm9 = vmpackc.low %vm13708_vm12, %vm13710_vm15  ;;  %v4076_v25 = vunpack.c.l.b16 %v3976_v2  ;;  %vm13716_vm4 = vnez %v13715_v23  ;;  %v11739_v32 = vadd.f32 %v11481_v30, %v6282_v31 }
 0x2f3   : > { %v3980_v44 = vsel %vm13711_vm9, %v8171_v1, 0  ;;  %v4077_v20 = vunpack.c.l.b16 %v3977_v63  ;;  %vm13717_vm7 = vmpackc.low %vm13714_vm5, %vm13716_vm4  ;;  %v6481_v29 = vpack.c.bf16 %v6417_v53, %v6416_v62  ;;  %v4856_v42 = vrot.slane %v11689_v56, 4  ;;  %v11755_v62 = vpop.f32.mrf.mxu3  ;;  %v11783_v49 = vpop.permute.xlu0 %4355 }
 0x2f4   : > { %v3981_v41 = vsel %vm13717_vm7, %v8172_v27, 0  ;;  %vm13718_vm13 = vmmov %vm13712_vm1  ;;  %v4080_v16 = vunpack.c.l.b16 %v3980_v44  ;;  %v4103_v11 = vpack.c.b16 %v4085_v7, %v4084_v50  ;;  %vm13720_vm3 = vcmask 130048  }
 0x2f5   : > { %5020 = vst.msk [vmem:[#allocation3 + $0xcc] sm:$0xf] %vm13718_vm13, %v4828_v39  ;;  %v4081_v22 = vunpack.c.l.b16 %v3981_v41  ;;  %vm13719_vm6 = vmmov %vm13712_vm1  ;;  %v4099_v10 = vpack.c.b16 %v4077_v20, %v4076_v25  ;;  %v4587_v47 = vsel %vm13720_vm3, %v11646_v19, %v4502_v52  ;;  %v11752_v3 = vadd.f32 %v11577_v34, %v11595_v45  ;;  %v11769_v39 = vpop.f32.mrf.mxu1 }
 0x2f6   : > { %5021 = vst.msk [vmem:[#allocation3 + $0xd0] sm:$0xf] %vm13719_vm6, %v4837_v0  ;;  %vm13721_vm10 = vmmov %vm13712_vm1  ;;  %vm13722_vm11 = vcmask 64512   ;;  %v4637_v15 = vunpack.c.l.b16 %v4587_v47  ;;  %v4638_v60 = vunpack.c.h.b16 %v4587_v47  ;;  %v6418_v19 = vmax.f32 %v11739_v32, 0.0 }
 0x2f7   : > { %5022 = vst.msk [vmem:[#allocation3 + $0xd4] sm:$0xf] %vm13721_vm10, %v4846_v8  ;;  %v4101_v51 = vpack.c.b16 %v4081_v22, %v4080_v16  ;;  %7798 = vmatmul.msk.bf16.gmra.mxu0 %vm13722_vm11, %v6481_v29  ;;  %vm13723_vm12 = vmmov %vm13722_vm11  ;;  %v6283_v57 = vadd.f32 %v6125_v18, %v11643_v24  ;;  %vm13729_vm4 = vnez %v13728_v55  ;;  %v13730_v24 = vld [vmem:[#allocation25_spill] sm:$0xff]  ;;  %vm13733_vm6 = vcmask 195584  }
 0x2f8   : > { %v11758_v53 = vsel %vm13723_vm12, %v4103_v11, %v4358_v43  ;;  %vm13724_vm15 = vmmov %vm13722_vm11  ;;  %v4670_v50 = vpack.c.b16 %v4637_v15, %v4637_v15  ;;  %v4671_v52 = vpack.c.b16 %v4638_v60, %v4638_v60  ;;  %vm13731_vm7 = vnez %v13730_v24  ;;  %7564 = vmatmul.msk.bf16.gmra.mxu1 %vm13733_vm6, %v7880_v5  ;;  %v11787_v41 = vpop.permute.xlu1 %4505 }
 0x2f9   : > { %v4545_v26 = vsel %vm13724_vm15, %v4099_v10, %v11667_v59  ;;  %vm13725_vm9 = vmmov %vm13720_vm3  ;;  %v11781_v13 = vadd.f32 %v11481_v30, %v6283_v57  ;;  %v8174_v57 = vld [vmem:[#allocation2 + $0xf8] sm:$0xf] }
 0x2fa   : > { %v4585_v34 = vsel %vm13725_vm9, %v4545_v26, %v11682_v12  ;;  %vm13726_vm1 = vmmov %vm13722_vm11  ;;  %v4876_v2 = vshrl.u32 %v4670_v50, 16  ;;  %v4885_v1 = vshrl.u32 %v4671_v52, 16  ;;  %v4888_v25 = vshll.u32 %v4671_v52, 16  ;;  %v11797_v52 = vpop.f32.mrf.mxu2 }
 0x2fb   : > { %v4551_v45 = vsel %vm13726_vm1, %v4101_v51, %v4354_v38  ;;  %v4635_v0 = vunpack.c.l.b16 %v4585_v34  ;;  %v4636_v7 = vunpack.c.h.b16 %v4585_v34  ;;  %vm13727_vm5 = vmmov %vm13720_vm3  ;;  %v6130_v29 = vpop.f32.mrf.mxu3  ;;  %v13736_v34 = vld [vmem:[#allocation26_spill] sm:$0xff]  ;;  %vm13741_vm9 = vcmask 191488   ;;  %v4508_v56 = vpop.permute.xlu0 %4507 }
 0x2fc   : > { %v4589_v59 = vsel %vm13727_vm5, %v4551_v45, %v11684_v61  ;;  %vm13732_vm13 = vmpackc.low %vm13729_vm4, %vm13731_vm7  ;;  %v4879_v61 = vshll.u32 %v4670_v50, 16  ;;  %v4878_v8 = vrot.slane %v4876_v2, 7  ;;  %v4887_v26 = vrot.slane %v4885_v1, 7  ;;  %v13738_v45 = vld [vmem:[#allocation27_spill] sm:$0xff] }
 0x2fd   : > { %v11778_v12 = vsel %vm13732_vm13, %v8173_v28, 0  ;;  %v4639_v18 = vunpack.c.l.b16 %v4589_v59  ;;  %v4640_v21 = vunpack.c.h.b16 %v4589_v59  ;;  %v4668_v63 = vpack.c.b16 %v4635_v0, %v4635_v0  ;;  %vm13734_vm3 = vmmov %vm13733_vm6  ;;  %v11799_v0 = vpop.f32.mrf.mxu1 }
 0x2fe   : > { %v4669_v31 = vpack.c.b16 %v4636_v7, %v4636_v7  ;;  %7606 = vmatmul.msk.bf16.gmra.mxu2 %vm13734_vm3, %v7880_v5  ;;  %vm13735_vm10 = vmmov %vm13734_vm3  ;;  %v4881_v47 = vor.u32 %v4879_v61, %v4878_v8  ;;  %v4883_v51 = vrot.slane %v4878_v8, 4  ;;  %vm13737_vm11 = vnez %v13736_v34  ;;  %v8175_v8 = vld [vmem:[#allocation2 + $0x104] sm:$0xf] }
 0x2ff   : > { %v4672_v4 = vpack.c.b16 %v4639_v18, %v4639_v18  ;;  %v4673_v44 = vpack.c.b16 %v4640_v21, %v4640_v21  ;;  %v4858_v20 = vshrl.u32 %v4668_v63, 16  ;;  %v4861_v27 = vshll.u32 %v4668_v63, 16  ;;  %7776 = vmatmul.msk.bf16.gmra.mxu3 %vm13735_vm10, %v7914_v54  ;;  %vm13742_vm1 = vmmov %vm13741_vm9 }
 0x300   : > { %v4867_v58 = vshrl.u32 %v4669_v31, 16  ;;  %v4870_v23 = vshll.u32 %v4669_v31, 16  ;;  %vm13739_vm12 = vnez %v13738_v45  ;;  %v6419_v2 = vmax.f32 %v11781_v13, 0.0  ;;  %vm13746_vm13 = vmmov %vm13742_vm1  ;;  %v4360_v48 = vpop.permute.xlu1 %4359  ;;  %v8177_v45 = vld [vmem:[#allocation2 + $0x10c] sm:$0xf] }
 0x301   : > { %v4894_v38 = vshrl.u32 %v4672_v4, 16  ;;  %v4897_v43 = vshll.u32 %v4672_v4, 16  ;;  %v4903_v16 = vshrl.u32 %v4673_v44, 16  ;;  %v4906_v22 = vshll.u32 %v4673_v44, 16  ;;  %vm13740_vm15 = vmpackc.low %vm13737_vm11, %vm13739_vm12 }
 0x302   : > { %v4860_v11 = vrot.slane %v4858_v20, 7  ;;  %v4869_v10 = vrot.slane %v4867_v58, 7  ;;  %v3983_v50 = vsel %vm13740_vm15, %v8174_v57, 0  ;;  %v4890_v61 = vor.u32 %v4888_v25, %v4887_v26  ;;  %v8176_v20 = vld [vmem:[#allocation2 + $0x108] sm:$0xf]  ;;  %vm13747_vm6 = vmmov %vm13742_vm1 }
 0x303   : > { %v4896_v15 = vrot.slane %v4894_v38, 7  ;;  %v11790_v60 = vrot.slane %v4903_v16, 7  ;;  %v4892_v54 = vrot.slane %v4887_v26, 4  ;;  %v4082_v13 = vunpack.c.l.b16 %v11778_v12  ;;  %vm13749_vm14 = vmmov %vm13742_vm1  ;;  %v7881_v26 = vld [vmem:[#allocation3 + $0x78] sm:$0xff] }
 0x304   : > { %v4863_v7 = vor.u32 %v4861_v27, %v4860_v11  ;;  %v4865_v59 = vrot.slane %v4860_v11, 4  ;;  %v4872_v28 = vor.u32 %v4870_v23, %v4869_v10  ;;  %v4874_v55 = vrot.slane %v4869_v10, 4  ;;  %v4510_v23 = vpop.permute.xlu2 %4509  ;;  %v11845_v10 = vpop.f32.mrf.mxu2  ;;  %vm13751_vm3 = vmmov %vm13742_vm1 }
 0x305   : > { %v4899_v24 = vor.u32 %v4897_v43, %v4896_v15  ;;  %v4901_v18 = vrot.slane %v4896_v15, 4  ;;  %v4908_v21 = vor.u32 %v4906_v22, %v11790_v60  ;;  %v4083_v4 = vunpack.c.l.b16 %v3983_v50  ;;  %vm13752_vm10 = vmmov %vm13748_vm0  ;;  %v13758_v50 = vld [vmem:[#allocation31_spill] sm:$0xff] }
 0x306   : > { %v4864_v5 = vsel %vm8358_vm2, %v4856_v42, %v4863_v7  ;;  %v4873_v63 = vsel %vm8358_vm2, %v4865_v59, %v4872_v28  ;;  %v4882_v31 = vsel %vm8358_vm2, %v4874_v55, %v4881_v47  ;;  %v4891_v42 = vsel %vm8358_vm2, %v4883_v51, %v4890_v61  ;;  %vm13755_vm15 = vmmov %vm13748_vm0 }
 0x307   : > { %5024 = vst.msk [vmem:[#allocation3 + $0xdc] sm:$0xf] %vm13741_vm9, %v4864_v5  ;;  %v4909_v1 = vsel %vm8358_vm2, %v4901_v18, %v4908_v21  ;;  %v6284_v44 = vadd.f32 %v11755_v62, %v11752_v3  ;;  %vm13743_vm5 = vnez %v13596_v33  ;;  %vm13744_vm4 = vnez %v13594_v37  ;;  %v11833_v33 = vpop.f32.mrf.mxu3 }
 0x308   : > { %5025 = vst.msk [vmem:[#allocation3 + $0xe0] sm:$0xf] %vm13742_vm1, %v4873_v63  ;;  %vm13745_vm7 = vmpackc.low %vm13743_vm5, %vm13744_vm4  ;;  %v3987_v12 = vsel %vm2150_vm8, %v8176_v20, 0  ;;  %v4900_v27 = vsel %vm8358_vm2, %v4892_v54, %v4899_v24  ;;  %v4102_v3 = vpack.c.b16 %v4083_v4, %v4082_v13  ;;  %v5611_v37 = vadd.f32 %v11628_v35, %v11669_v40  ;;  %v11847_v35 = vpop.f32.mrf.mxu1 }
 0x309   : > { %v3986_v25 = vsel %vm13745_vm7, %v8175_v8, 0  ;;  %5029 = vst.msk [vmem:[#allocation3 + $0xf0] sm:$0xf] %vm13746_vm13, %v4909_v1  ;;  %v4087_v58 = vunpack.c.l.b16 %v3987_v12  ;;  %v6482_v14 = vpack.c.bf16 %v6419_v2, %v6418_v19  ;;  %v4593_v38 = vsel %vm13748_vm0, %v11758_v53, %v4508_v56  ;;  %vm13765_vm0 = vmmov %vm13751_vm3 }
 0x30a   : > { %v4086_v62 = vunpack.c.l.b16 %v3986_v25  ;;  %5026 = vst.msk [vmem:[#allocation3 + $0xe4] sm:$0xf] %vm13747_vm6, %v4882_v31  ;;  %vm13750_vm8 = vcmask 64512   ;;  %v4643_v22 = vunpack.c.l.b16 %v4593_v38  ;;  %v4644_v11 = vunpack.c.h.b16 %v4593_v38  ;;  %vm13764_vm6 = vmmov %vm13751_vm3 }
 0x30b   : > { %5027 = vst.msk [vmem:[#allocation3 + $0xe8] sm:$0xf] %vm13749_vm14, %v4891_v42  ;;  %v4554_v43 = vsel %vm13750_vm8, %v4102_v3, %v11783_v49  ;;  %v4910_v40 = vrot.slane %v11790_v60, 4  ;;  %v11854_v53 = vadd.f32 %v11481_v30, %v6284_v44  ;;  %vm13753_vm11 = vmmov %vm13750_vm8  ;;  %v6285_v19 = vadd.f32 %v6130_v29, %v5611_v37  ;;  %v7915_v29 = vld [vmem:[#allocation3 + $0x78] sm:$0xff] }
 0x30c   : > { %v4104_v16 = vpack.c.b16 %v4087_v58, %v4086_v62  ;;  %5028 = vst.msk [vmem:[#allocation3 + $0xec] sm:$0xf] %vm13751_vm3, %v4900_v27  ;;  %v4591_v32 = vsel %vm13752_vm10, %v4554_v43, %v11787_v41  ;;  %7799 = vmatmul.msk.bf16.gmra.mxu0 %vm13753_vm11, %v6482_v14  ;;  %vm13754_vm12 = vmmov %vm13750_vm8  ;;  %v4676_v15 = vpack.c.b16 %v4643_v22, %v4643_v22  ;;  %v13756_v41 = vld [vmem:[#allocation30_spill] sm:$0xff]  ;;  %vm13761_vm4 = vcmask 195584   ;;  %v11871_v12 = vpop.f32.mrf.mxu2 }
 0x30d   : > { %v4641_v49 = vunpack.c.l.b16 %v4591_v32  ;;  %v4642_v47 = vunpack.c.h.b16 %v4591_v32  ;;  %v4677_v60 = vpack.c.b16 %v4644_v11, %v4644_v11  ;;  %v11860_v34 = vadd.f32 %v11481_v30, %v6285_v19  ;;  %7565 = vmatmul.msk.bf16.gmra.mxu1 %vm13761_vm4, %v7881_v26  ;;  %vm13762_vm7 = vmmov %vm13761_vm4 }
 0x30e   : > { %v4560_v51 = vsel %vm13754_vm12, %v4104_v16, %v4360_v48  ;;  %vm13757_vm9 = vnez %v13756_v41  ;;  %vm13759_vm1 = vnez %v13758_v50  ;;  %7607 = vmatmul.msk.bf16.gmra.mxu2 %vm13762_vm7, %v7881_v26  ;;  %v4930_v18 = vshrl.u32 %v4676_v15, 16  ;;  %vm13763_vm13 = vmmov %vm13761_vm4  ;;  %v4512_v41 = vpop.permute.xlu1 %4511 }
 0x30f   : > { %v4595_v57 = vsel %vm13755_vm15, %v4560_v51, %v4510_v23  ;;  %vm13760_vm5 = vmpackc.low %vm13757_vm9, %vm13759_vm1  ;;  %v4674_v59 = vpack.c.b16 %v4641_v49, %v4641_v49  ;;  %v4675_v28 = vpack.c.b16 %v4642_v47, %v4642_v47  ;;  %v4933_v21 = vshll.u32 %v4676_v15, 16  ;;  %7777 = vmatmul.msk.bf16.gmra.mxu3 %vm13763_vm13, %v7915_v29  ;;  %v6135_v54 = vpop.f32.mrf.mxu3 }
 0x310   : > { %v3988_v7 = vsel %vm13760_vm5, %v8177_v45, 0  ;;  %v4645_v55 = vunpack.c.l.b16 %v4595_v57  ;;  %v4646_v24 = vunpack.c.h.b16 %v4595_v57  ;;  %v4939_v2 = vshrl.u32 %v4677_v60, 16  ;;  %v11873_v27 = vpop.f32.mrf.mxu1  ;;  %vm13766_vm14 = vmmov %vm13765_vm0 }
 0x311   : > { %v4942_v5 = vshll.u32 %v4677_v60, 16  ;;  %v4912_v63 = vshrl.u32 %v4674_v59, 16  ;;  %v4915_v31 = vshll.u32 %v4674_v59, 16  ;;  %v4921_v61 = vshrl.u32 %v4675_v28, 16  ;;  %v4362_v60 = vpop.permute.xlu0 %4361  ;;  %vm13767_vm8 = vmmov %vm13765_vm0 }
 0x312   : > { %v4924_v1 = vshll.u32 %v4675_v28, 16  ;;  %v4678_v13 = vpack.c.b16 %v4645_v55, %v4645_v55  ;;  %v4679_v4 = vpack.c.b16 %v4646_v24, %v4646_v24  ;;  %v4932_v56 = vrot.slane %v4930_v18, 7  ;;  %vm13768_vm3 = vmmov %vm13753_vm11 }
 0x313   : > { %v4941_v42 = vrot.slane %v4939_v2, 7  ;;  %v4914_v44 = vrot.slane %v4912_v63, 7  ;;  %v4923_v8 = vrot.slane %v4921_v61, 7  ;;  %v6421_v25 = vmax.f32 %v11860_v34, 0.0  ;;  %vm13769_vm10 = vmmov %vm13765_vm0  ;;  %v7882_v2 = vld [vmem:[#allocation3 + $0x80] sm:$0xff] }
 0x314   : > { %v4088_v20 = vunpack.c.l.b16 %v3988_v7  ;;  %v4948_v3 = vshrl.u32 %v4678_v13, 16  ;;  %v4951_v62 = vshll.u32 %v4678_v13, 16  ;;  %v4957_v58 = vshrl.u32 %v4679_v4, 16  ;;  %v11895_v55 = vpop.f32.mrf.mxu2  ;;  %vm13770_vm11 = vmmov %vm13755_vm15  ;;  %v7916_v63 = vld [vmem:[#allocation3 + $0x80] sm:$0xff] }
 0x315   : > { %v4960_v37 = vshll.u32 %v4679_v4, 16  ;;  %v4917_v48 = vor.u32 %v4915_v31, %v4914_v44  ;;  %v4919_v14 = vrot.slane %v4914_v44, 4  ;;  %v4926_v23 = vor.u32 %v4924_v1, %v4923_v8  ;;  %vm13771_vm12 = vmmov %vm13768_vm3 }
 0x316   : > { %v4928_v38 = vrot.slane %v4923_v8, 4  ;;  %v4950_v43 = vrot.slane %v4948_v3, 7  ;;  %v4959_v16 = vrot.slane %v4957_v58, 7  ;;  %v4935_v22 = vor.u32 %v4933_v21, %v4932_v56  ;;  %vm13772_vm15 = vmmov %vm13765_vm0 }
 0x317   : > { %v4937_v11 = vrot.slane %v4932_v56, 4  ;;  %v4918_v32 = vsel %vm8358_vm2, %v4910_v40, %v4917_v48  ;;  %v4927_v19 = vsel %vm8358_vm2, %v4919_v14, %v4926_v23  ;;  %v4944_v49 = vor.u32 %v4942_v5, %v4941_v42  ;;  %v6138_v50 = vpop.f32.mrf.mxu3  ;;  %vm13773_vm9 = vmmov %vm13761_vm4  ;;  %v7883_v48 = vld [vmem:[#allocation3 + $0x88] sm:$0xff] }
 0x318   : > { %v4946_v47 = vrot.slane %v4941_v42, 4  ;;  %5030 = vst.msk [vmem:[#allocation3 + $0xf4] sm:$0xf] %vm13764_vm6, %v4918_v32  ;;  %v6420_v51 = vmax.f32 %v11854_v53, 0.0  ;;  %v4953_v15 = vor.u32 %v4951_v62, %v4950_v43  ;;  %v4955_v26 = vrot.slane %v4950_v43, 4  ;;  %v5431_v24 = vpop.f32.mrf.mxu1  ;;  %vm13774_vm1 = vmmov %vm13761_vm4 }
 0x319   : > { %v4962_v57 = vor.u32 %v4960_v37, %v4959_v16  ;;  %5031 = vst.msk [vmem:[#allocation3 + $0xf8] sm:$0xf] %vm13765_vm0, %v4927_v19  ;;  %v4936_v34 = vsel %vm8358_vm2, %v4928_v38, %v4935_v22  ;;  %v4945_v40 = vsel %vm8358_vm2, %v4937_v11, %v4944_v49  ;;  %v4105_v45 = vpack.c.b16 %v4088_v20, %v4088_v20  ;;  %vm13775_vm5 = vmmov %vm13774_vm1  ;;  %v7917_v38 = vld [vmem:[#allocation3 + $0x88] sm:$0xff] }
 0x31a   : > { %v5616_v53 = vadd.f32 %v11701_v36, %v11769_v39  ;;  %v4954_v29 = vsel %vm8358_vm2, %v4946_v47, %v4953_v15  ;;  %5032 = vst.msk [vmem:[#allocation3 + $0xfc] sm:$0xf] %vm13766_vm14, %v4936_v34  ;;  %v6483_v59 = vpack.c.bf16 %v6421_v25, %v6420_v51  ;;  %v5614_v18 = vadd.f32 %v11679_v17, %v11691_v46  ;;  %vm13776_vm4 = vmmov %vm13765_vm0 }
 0x31b   : > { %v4963_v7 = vsel %vm8358_vm2, %v4955_v26, %v4962_v57  ;;  %v4563_v28 = vsel %vm13768_vm3, %v4105_v45, %v4362_v60  ;;  %5033 = vst.msk [vmem:[#allocation3 + $0x100] sm:$0xf] %vm13769_vm10, %v4945_v40  ;;  %v5621_v62 = vadd.f32 %v11797_v52, %v11847_v35  ;;  %v5619_v14 = vadd.f32 %v11767_v6, %v11799_v0  ;;  %vm13777_vm7 = vmmov %vm13768_vm3  ;;  %v7884_v26 = vld [vmem:[#allocation3 + $0x90] sm:$0xff] }
 0x31c   : > { %5035 = vst.msk [vmem:[#allocation3 + $0x108] sm:$0xf] %vm13767_vm8, %v4963_v7  ;;  %v4597_v36 = vsel %vm13770_vm11, %v4563_v28, %v4512_v41  ;;  %7800 = vmatmul.msk.bf16.gmra.mxu0 %vm13771_vm12, %v6483_v59  ;;  %v6287_v39 = vadd.f32 %v6135_v54, %v5616_v53  ;;  %v6286_v5 = vadd.f32 %v11833_v33, %v5614_v18  ;;  %v5630_v4 = vpop.f32.mrf.mxu2  ;;  %v4964_v33 = vrot.slane %v4959_v16, 4  ;;  %vm13779_vm13 = vmmov %vm13774_vm1  ;;  %v7918_v60 = vld [vmem:[#allocation3 + $0x90] sm:$0xff]  ;;  %v7885_v18 = vld [vmem:[#allocation3 + $0x98] sm:$0xff] }
 0x31d   : > { %5034 = vst.msk [vmem:[#allocation3 + $0x104] sm:$0xf] %vm13772_vm15, %v4954_v29  ;;  %v4647_v21 = vunpack.c.l.b16 %v4597_v36  ;;  %7566 = vmatmul.msk.bf16.gmra.mxu1 %vm13773_vm9, %v7882_v2  ;;  %v6288_v9 = vadd.f32 %v6138_v50, %v5619_v14  ;;  %vm13780_vm6 = vmmov %vm13774_vm1  ;;  %v5626_v19 = vadd.f32 %v11871_v12, %v5431_v24  ;;  %v5624_v51 = vadd.f32 %v11845_v10, %v11873_v27  ;;  %v7919_v36 = vld [vmem:[#allocation3 + $0x98] sm:$0xff] }
 0x31e   : > { %7608 = vmatmul.msk.bf16.gmra.mxu2 %vm13774_vm1, %v7882_v2  ;;  %v6357_v17 = vadd.f32 %v11481_v30, %v6287_v39  ;;  %v6356_v1 = vadd.f32 %v11481_v30, %v6286_v5  ;;  %vm13781_vm0 = vmmov %vm13768_vm3  ;;  %v11948_v39 = vld [vmem:[%s12503_s4] ss:$0 sm:$0xff] }
 0x31f   : > { %v4680_v31 = vpack.c.b16 %v4647_v21, %v4647_v21  ;;  %7778 = vmatmul.msk.bf16.gmra.mxu3 %vm13775_vm5, %v7916_v63  ;;  %v6140_v61 = vpop.f32.mrf.mxu3  ;;  %v6358_v35 = vadd.f32 %v11481_v30, %v6288_v9  ;;  %vm13782_vm14 = vmmov %vm13774_vm1 }
 0x320   : > { %v5434_v56 = vpop.f32.mrf.mxu1  ;;  %v6423_v42 = vmax.f32 %v6357_v17, 0.0  ;;  %v6422_v8 = vmax.f32 %v6356_v1, 0.0  ;;  %v6289_v23 = vadd.f32 %v6140_v61, %v5621_v62  ;;  %vm13783_vm8 = vmmov %vm13774_vm1  ;;  %v7937_v61 = vld [vmem:[%s8255_s11] sm:$0xff]   ;;  %v7920_v62 = vld [vmem:[#allocation3 + $0xa0] sm:$0xff] }
 0x321   : > { %v4966_v46 = vshrl.u32 %v4680_v31, 16  ;;  %v4969_v13 = vshll.u32 %v4680_v31, 16  ;;  %v6424_v6 = vmax.f32 %v6358_v35, 0.0  ;;  %vm13784_vm3 = vmmov %vm13774_vm1  ;;  %v5629_v28 = vadd.f32 %v11895_v55, %v5434_v56 }
 0x322   : > { %v6484_v20 = vpack.c.bf16 %v6423_v42, %v6422_v8  ;;  %v6359_v43 = vadd.f32 %v11481_v30, %v6289_v23  ;;  %vm13785_vm10 = vmmov %vm13781_vm0  ;;  %v7939_v35 = vunpack.c.h.bf16 %v7937_v61 }
 0x323   : > { %v4968_v54 = vrot.slane %v4966_v46, 7  ;;  %vm13786_vm11 = vmmov %vm13774_vm1 }
 0x324   : > { %v11914_v58 = vpop.f32.mrf.mxu2  ;;  %v6425_v11 = vmax.f32 %v6359_v43, 0.0  ;;  %vm13787_vm12 = vmmov %vm13774_vm1 }
 0x325   : > { %v4971_v44 = vor.u32 %v4969_v13, %v4968_v54  ;;  %vm13788_vm15 = vmmov %vm13774_vm1  ;;  %v11961_v13 = vld [vmem:[%s12505_s6] ss:$0 sm:$0xff] }
 0x326   : > { %v6485_v0 = vpack.c.bf16 %v6425_v11, %v6424_v6  ;;  %vm13789_vm9 = vmmov %vm13781_vm0 }
 0x327   : > { %v4972_v25 = vsel %vm8358_vm2, %v4964_v33, %v4971_v44  ;;  %v6143_v3 = vpop.f32.mrf.mxu3  ;;  %vm13778_vm2 = vmmov %vm13774_vm1  ;;  %v7938_v44 = vunpack.c.l.bf16 %v7937_v61 }
 0x328   : > { %5036 = vst.msk [vmem:[#allocation3 + $0x10c] sm:$0xf] %vm13776_vm4, %v4972_v25  ;;  %v5436_v37 = vpop.f32.mrf.mxu1  ;;  %v6290_v57 = vadd.f32 %v6143_v3, %v5624_v51  ;;  %v7886_v25 = vld [vmem:[#allocation3 + $0xa0] sm:$0xff]  ;;  %vm13790_vm5 = vmmov %vm13774_vm1 }
 0x329   : > { %v5631_v53 = vadd.f32 %v5630_v4, %v5436_v37  ;;  %vm13791_vm4 = vmmov %vm13774_vm1 }
 0x32a   : > { %v6360_v40 = vadd.f32 %v11481_v30, %v6290_v57 }
 0x32c   : > { %7801 = vmatmul.msk.bf16.gmra.mxu0 %vm13777_vm7, %v6484_v20  ;;  %v5635_v16 = vpop.f32.mrf.mxu2  ;;  %v6426_v41 = vmax.f32 %v6360_v40, 0.0  ;;  %vm6952_vm7 = vcmask 257024   ;;  %v7921_v40 = vld [vmem:[#allocation3 + $0xa8] sm:$0xff] }
 0x32d   : > { %7567 = vmatmul.msk.bf16.gmra.mxu1 %vm13778_vm2, %v7883_v48  ;;  %vm13792_vm2 = vmmov %vm13781_vm0 }
 0x32e   : > { %7609 = vmatmul.msk.bf16.gmra.mxu2 %vm13779_vm13, %v7883_v48  ;;  %vm13793_vm13 = vmmov %vm13774_vm1 }
 0x32f   : > { %7779 = vmatmul.msk.bf16.gmra.mxu3 %vm13780_vm6, %v7917_v38  ;;  %v6145_v52 = vpop.f32.mrf.mxu3  ;;  %vm13794_vm6 = vmmov %vm13774_vm1 }
 0x330   : > { %v5439_v22 = vpop.f32.mrf.mxu1  ;;  %v6291_v15 = vadd.f32 %v6145_v52, %v5626_v19 }
 0x331   : > { %v5634_v42 = vadd.f32 %v11914_v58, %v5439_v22 }
 0x332   : > { %v6361_v34 = vadd.f32 %v11481_v30, %v6291_v15 }
 0x334   : > { %v11925_v49 = vpop.f32.mrf.mxu2  ;;  %v6427_v27 = vmax.f32 %v6361_v34, 0.0  ;;  %v7887_v34 = vld [vmem:[#allocation3 + $0xa8] sm:$0xff] }
 0x336   : > { %v6486_v50 = vpack.c.bf16 %v6427_v27, %v6426_v41 }
 0x337   : > { %v6148_v32 = vpop.f32.mrf.mxu3 }
 0x338   : > { %v5441_v47 = vpop.f32.mrf.mxu1  ;;  %v6292_v30 = vadd.f32 %v6148_v32, %v5629_v28 }
 0x339   : > { %v5636_v54 = vadd.f32 %v5635_v16, %v5441_v47 }
 0x33a   : > { %v6362_v2 = vadd.f32 %v11948_v39, %v6292_v30 }
 0x33c   : > { %7802 = vmatmul.msk.bf16.gmra.mxu0 %vm13781_vm0, %v6485_v0  ;;  %v11935_v45 = vpop.f32.mrf.mxu2  ;;  %v6428_v17 = vmax.f32 %v6362_v2, 0.0  ;;  %vm13795_vm0 = vmmov %vm13774_vm1 }
 0x33d   : > { %7568 = vmatmul.msk.bf16.gmra.mxu1 %vm13782_vm14, %v7884_v26  ;;  %vm13796_vm14 = vmmov %vm13792_vm2 }
 0x33e   : > { %7610 = vmatmul.msk.bf16.gmra.mxu2 %vm13783_vm8, %v7884_v26  ;;  %vm13797_vm8 = vmmov %vm13795_vm0 }
 0x33f   : > { %7780 = vmatmul.msk.bf16.gmra.mxu3 %vm13784_vm3, %v7918_v60  ;;  %v6150_v12 = vpop.f32.mrf.mxu3  ;;  %vm13798_vm3 = vmmov %vm13795_vm0 }
 0x340   : > { %v11937_v10 = vpop.f32.mrf.mxu1  ;;  %v6293_v24 = vadd.f32 %v6150_v12, %v5631_v53 }
 0x341   : > { %v5639_v26 = vadd.f32 %v11925_v49, %v11937_v10  ;;  %v8064_v10 = vld [vmem:[%s8255_s11 + $0x8] sm:$0xff]  }
 0x342   : > { %v6363_v21 = vadd.f32 %v11948_v39, %v6293_v24  ;;  %v7942_v53 = vunpack.c.l.bf16 %v8064_v10 }
 0x344   : > { %v11939_v29 = vpop.f32.mrf.mxu2  ;;  %v6429_v31 = vmax.f32 %v6363_v21, 0.0 }
 0x346   : > { %v6487_v46 = vpack.c.bf16 %v6429_v31, %v6428_v17 }
 0x347   : > { %v6153_v7 = vpop.f32.mrf.mxu3 }
 0x348   : > { %v5446_v59 = vpop.f32.mrf.mxu1  ;;  %v6294_v20 = vadd.f32 %v6153_v7, %v5634_v42 }
 0x349   : > { %v5641_v19 = vadd.f32 %v11935_v45, %v5446_v59 }
 0x34a   : > { %v6364_v14 = vadd.f32 %v11948_v39, %v6294_v20 }
 0x34c   : > { %7803 = vmatmul.msk.bf16.gmra.mxu0 %vm13785_vm10, %v6486_v50  ;;  %v11953_v5 = vpop.f32.mrf.mxu2  ;;  %v6430_v22 = vmax.f32 %v6364_v14, 0.0  ;;  %vm13799_vm10 = vmmov %vm13795_vm0 }
 0x34d   : > { %7569 = vmatmul.msk.bf16.gmra.mxu1 %vm13786_vm11, %v7885_v18  ;;  %vm13800_vm11 = vmmov %vm13792_vm2 }
 0x34e   : > { %7611 = vmatmul.msk.bf16.gmra.mxu2 %vm13787_vm12, %v7885_v18  ;;  %vm13801_vm12 = vmmov %vm13795_vm0 }
 0x34f   : > { %7781 = vmatmul.msk.bf16.gmra.mxu3 %vm13788_vm15, %v7919_v36  ;;  %v6155_v55 = vpop.f32.mrf.mxu3  ;;  %vm13802_vm15 = vmmov %vm13795_vm0 }
 0x350   : > { %v11955_v63 = vpop.f32.mrf.mxu1  ;;  %v6295_v33 = vadd.f32 %v6155_v55, %v5636_v54  ;;  %v7888_v54 = vld [vmem:[#allocation3 + $0xb0] sm:$0xff] }
 0x351   : > { %v6629_v8 = vpop.f32.mrf.mxu0  ;;  %v5644_v17 = vadd.f32 %v11939_v29, %v11955_v63 }
 0x352   : > { %v6630_v3 = vadd.f32 %v11961_v13, %v6629_v8  ;;  %v6365_v37 = vadd.f32 %v11948_v39, %v6295_v33 }
 0x354   : > { %v11963_v4 = vpop.f32.mrf.mxu2  ;;  %v6856_v48 = vadd.f32 %v7938_v44, %v6630_v3  ;;  %v6431_v43 = vmax.f32 %v6365_v37, 0.0  ;;  %v7922_v44 = vld [vmem:[#allocation3 + $0xb0] sm:$0xff] }
 0x356   : > { %v6888_v23 = vmax.f32 %v6856_v48, 0.0  ;;  %v6488_v6 = vpack.c.bf16 %v6431_v43, %v6430_v22  ;;  %v8065_v48 = vld [vmem:[%s8255_s11 + $0x10] sm:$0xff]  }
 0x357   : > { %v6158_v1 = vpop.f32.mrf.mxu3 }
 0x358   : > { %v5451_v56 = vpop.f32.mrf.mxu1  ;;  %v6920_v52 = vpack.c.bf16 %v6888_v23, %v6888_v23  ;;  %v6296_v12 = vadd.f32 %v6158_v1, %v5639_v26  ;;  %v7943_v1 = vunpack.c.h.bf16 %v8064_v10  ;;  %v7946_v23 = vunpack.c.l.bf16 %v8065_v48  ;;  %v8066_v10 = vld [vmem:[%s8255_s11 + $0x18] sm:$0xff]  }
 0x359   : > { %v6631_v16 = vpop.f32.mrf.mxu0  ;;  %v5646_v21 = vadd.f32 %v11953_v5, %v5451_v56 }
 0x35a   : > { %6953 = vst.msk [vmem:[%s11978_s26] sm:$0xf] %vm6952_vm7, %v6920_v52  ;;  %v6632_v11 = vadd.f32 %v11961_v13, %v6631_v16  ;;  %v6366_v49 = vadd.f32 %v11948_v39, %v6296_v12 }
 0x35c   : > { %7804 = vmatmul.msk.bf16.gmra.mxu0 %vm13789_vm9, %v6487_v46  ;;  %v11980_v38 = vpop.f32.mrf.mxu2  ;;  %v6857_v0 = vadd.f32 %v7939_v35, %v6632_v11  ;;  %v6432_v59 = vmax.f32 %v6366_v49, 0.0  ;;  %vm13803_vm9 = vmmov %vm13795_vm0 }
 0x35d   : > { %7570 = vmatmul.msk.bf16.gmra.mxu1 %vm13774_vm1, %v7886_v25  ;;  %vm13804_vm1 = vmmov %vm13792_vm2 }
 0x35e   : > { %7612 = vmatmul.msk.bf16.gmra.mxu2 %vm13790_vm5, %v7886_v25  ;;  %v6889_v47 = vmax.f32 %v6857_v0, 0.0  ;;  %vm13805_vm5 = vmmov %vm13795_vm0 }
 0x35f   : > { %7782 = vmatmul.msk.bf16.gmra.mxu3 %vm13791_vm4, %v7920_v62  ;;  %v6160_v58 = vpop.f32.mrf.mxu3  ;;  %vm13806_vm4 = vmmov %vm13795_vm0 }
 0x360   : > { %v11982_v9 = vpop.f32.mrf.mxu1  ;;  %v6921_v57 = vpack.c.bf16 %v6889_v47, %v6889_v47  ;;  %v6297_v60 = vadd.f32 %v6160_v58, %v5641_v19  ;;  %v7889_v19 = vld [vmem:[#allocation3 + $0xb8] sm:$0xff] }
 0x362   : > { %6954 = vst.msk [vmem:[%s11978_s26 + $0x4] sm:$0xf] %vm6952_vm7, %v6921_v57  ;;  %v6367_v45 = vadd.f32 %v11948_v39, %v6297_v60  ;;  %v7923_v57 = vld [vmem:[#allocation3 + $0xb8] sm:$0xff] }
 0x364   : > { %v11988_v51 = vpop.f32.mrf.mxu2  ;;  %v6433_v7 = vmax.f32 %v6367_v45, 0.0 }
 0x366   : > { %v6489_v18 = vpack.c.bf16 %v6433_v7, %v6432_v59 }
 0x367   : > { %v6163_v32 = vpop.f32.mrf.mxu3 }
 0x368   : > { %v5456_v15 = vpop.f32.mrf.mxu1  ;;  %v6298_v42 = vadd.f32 %v6163_v32, %v5644_v17 }
 0x369   : > { %v5651_v35 = vadd.f32 %v11980_v38, %v5456_v15  ;;  %v7947_v15 = vunpack.c.h.bf16 %v8065_v48 }
 0x36a   : > { %v6368_v8 = vadd.f32 %v11948_v39, %v6298_v42 }
 0x36c   : > { %7805 = vmatmul.msk.bf16.gmra.mxu0 %vm13792_vm2, %v6488_v6  ;;  %v12001_v41 = vpop.f32.mrf.mxu2  ;;  %v6434_v58 = vmax.f32 %v6368_v8, 0.0  ;;  %v5649_v6 = vadd.f32 %v11963_v4, %v11982_v9  ;;  %vm13807_vm2 = vmmov %vm13795_vm0 }
 0x36d   : > { %7571 = vmatmul.msk.bf16.gmra.mxu1 %vm13793_vm13, %v7887_v34  ;;  %vm13808_vm13 = vmmov %vm13804_vm1 }
 0x36e   : > { %7613 = vmatmul.msk.bf16.gmra.mxu2 %vm13794_vm6, %v7887_v34  ;;  %vm13809_vm6 = vmmov %vm13795_vm0 }
 0x36f   : > { %7783 = vmatmul.msk.bf16.gmra.mxu3 %vm13795_vm0, %v7921_v40  ;;  %v6165_v27 = vpop.f32.mrf.mxu3 }
 0x370   : > { %v12003_v50 = vpop.f32.mrf.mxu1  ;;  %v6299_v46 = vadd.f32 %v6165_v27, %v5646_v21 }
 0x372   : > { %v6369_v29 = vadd.f32 %v11948_v39, %v6299_v46  ;;  %v5654_v46 = vadd.f32 %v11988_v51, %v12003_v50 }
 0x374   : > { %v6634_v28 = vpop.f32.mrf.mxu0  ;;  %v12007_v2 = vpop.f32.mrf.mxu2  ;;  %v6435_v62 = vmax.f32 %v6369_v29, 0.0 }
 0x375   : > { %v6635_v24 = vadd.f32 %v11961_v13, %v6634_v28 }
 0x376   : > { %v6490_v14 = vpack.c.bf16 %v6435_v62, %v6434_v58 }
 0x377   : > { %v6858_v30 = vadd.f32 %v7942_v53, %v6635_v24  ;;  %v6168_v36 = vpop.f32.mrf.mxu3  ;;  %v7950_v24 = vunpack.c.l.bf16 %v8066_v10 }
 0x378   : > { %v12009_v31 = vpop.f32.mrf.mxu1  ;;  %v6300_v26 = vadd.f32 %v6168_v36, %v5649_v6 }
 0x379   : > { %v6890_v55 = vmax.f32 %v6858_v30, 0.0  ;;  %v5656_v36 = vadd.f32 %v12001_v41, %v12009_v31  ;;  %v7924_v41 = vld [vmem:[#allocation3 + $0xc0] sm:$0xff] }
 0x37a   : > { %v6370_v34 = vadd.f32 %v11948_v39, %v6300_v26 }
 0x37b   : > { %v6922_v61 = vpack.c.bf16 %v6890_v55, %v6890_v55 }
 0x37c   : > { %7806 = vmatmul.msk.bf16.gmra.mxu0 %vm13796_vm14, %v6489_v18  ;;  %v6636_v33 = vpop.f32.mrf.mxu0  ;;  %v12022_v20 = vpop.f32.mrf.mxu2  ;;  %v6436_v7 = vmax.f32 %v6370_v34, 0.0  ;;  %vm13810_vm14 = vmmov %vm13795_vm0 }
 0x37d   : > { %6955 = vst.msk [vmem:[%s11978_s26 + $0x8] sm:$0xf] %vm6952_vm7, %v6922_v61  ;;  %v6637_v5 = vadd.f32 %v11961_v13, %v6636_v33  ;;  %7572 = vmatmul.msk.bf16.gmra.mxu1 %vm13797_vm8, %v7888_v54  ;;  %vm13811_vm8 = vmmov %vm13804_vm1 }
 0x37e   : > { %7614 = vmatmul.msk.bf16.gmra.mxu2 %vm13798_vm3, %v7888_v54  ;;  %v7890_v54 = vld [vmem:[#allocation3 + $0xc0] sm:$0xff]  ;;  %vm13812_vm3 = vmmov %vm13795_vm0 }
 0x37f   : > { %7784 = vmatmul.msk.bf16.gmra.mxu3 %vm13799_vm10, %v7922_v44  ;;  %v6859_v63 = vadd.f32 %v7943_v1, %v6637_v5  ;;  %v6170_v56 = vpop.f32.mrf.mxu3  ;;  %v7951_v44 = vunpack.c.h.bf16 %v8066_v10  ;;  %vm13813_vm10 = vmmov %vm13795_vm0 }
 0x380   : > { %v12024_v3 = vpop.f32.mrf.mxu1  ;;  %v6301_v32 = vadd.f32 %v6170_v56, %v5651_v35 }
 0x381   : > { %v6891_v25 = vmax.f32 %v6859_v63, 0.0 }
 0x382   : > { %v6371_v60 = vadd.f32 %v11948_v39, %v6301_v32 }
 0x383   : > { %v6923_v37 = vpack.c.bf16 %v6891_v25, %v6891_v25 }
 0x384   : > { %v12031_v22 = vpop.f32.mrf.mxu2  ;;  %v6437_v49 = vmax.f32 %v6371_v60, 0.0 }
 0x385   : > { %6956 = vst.msk [vmem:[%s11978_s26 + $0xc] sm:$0xf] %vm6952_vm7, %v6923_v37  ;;  %v8067_v37 = vld [vmem:[%s8255_s11 + $0x20] sm:$0xff]  }
 0x386   : > { %v6491_v28 = vpack.c.bf16 %v6437_v49, %v6436_v7  ;;  %v7955_v60 = vunpack.c.h.bf16 %v8067_v37  ;;  %v8068_v7 = vld [vmem:[%s8255_s11 + $0x28] sm:$0xff]  }
 0x387   : > { %v6173_v52 = vpop.f32.mrf.mxu3 }
 0x388   : > { %v12033_v11 = vpop.f32.mrf.mxu1  ;;  %v6302_v33 = vadd.f32 %v6173_v52, %v5654_v46 }
 0x389   : > { %v6639_v43 = vpop.f32.mrf.mxu0 }
 0x38a   : > { %v6640_v16 = vadd.f32 %v11961_v13, %v6639_v43  ;;  %v6372_v29 = vadd.f32 %v11948_v39, %v6302_v33  ;;  %v7954_v43 = vunpack.c.l.bf16 %v8067_v37 }
 0x38c   : > { %v6860_v0 = vadd.f32 %v7946_v23, %v6640_v16  ;;  %7807 = vmatmul.msk.bf16.gmra.mxu0 %vm13800_vm11, %v6490_v14  ;;  %v12046_v40 = vpop.f32.mrf.mxu2  ;;  %v6438_v48 = vmax.f32 %v6372_v29, 0.0  ;;  %v5661_v16 = vadd.f32 %v12022_v20, %v12033_v11  ;;  %v7925_v20 = vld [vmem:[#allocation3 + $0xc8] sm:$0xff]  ;;  %vm13814_vm11 = vmmov %vm13795_vm0 }
 0x38d   : > { %7573 = vmatmul.msk.bf16.gmra.mxu1 %vm13801_vm12, %v7889_v19  ;;  %vm13815_vm12 = vmmov %vm13804_vm1 }
 0x38e   : > { %v6892_v47 = vmax.f32 %v6860_v0, 0.0  ;;  %7615 = vmatmul.msk.bf16.gmra.mxu2 %vm13802_vm15, %v7889_v19  ;;  %v5659_v19 = vadd.f32 %v12007_v2, %v12024_v3  ;;  %vm13816_vm15 = vmmov %vm13795_vm0 }
 0x38f   : > { %7785 = vmatmul.msk.bf16.gmra.mxu3 %vm13803_vm9, %v7923_v57  ;;  %v6175_v9 = vpop.f32.mrf.mxu3  ;;  %v7891_v57 = vld [vmem:[#allocation3 + $0xc8] sm:$0xff]  ;;  %vm13817_vm9 = vmmov %vm13795_vm0 }
 0x390   : > { %v6924_v38 = vpack.c.bf16 %v6892_v47, %v6892_v47  ;;  %v12048_v45 = vpop.f32.mrf.mxu1  ;;  %v6303_v1 = vadd.f32 %v6175_v9, %v5656_v36 }
 0x391   : > { %v6641_v4 = vpop.f32.mrf.mxu0 }
 0x392   : > { %6957 = vst.msk [vmem:[%s11978_s26 + $0x10] sm:$0xf] %vm6952_vm7, %v6924_v38  ;;  %v6642_v12 = vadd.f32 %v11961_v13, %v6641_v4  ;;  %v6373_v5 = vadd.f32 %v11948_v39, %v6303_v1 }
 0x394   : > { %v6861_v27 = vadd.f32 %v7947_v15, %v6642_v12  ;;  %v12056_v55 = vpop.f32.mrf.mxu2  ;;  %v6439_v62 = vmax.f32 %v6373_v5, 0.0  ;;  %v7959_v5 = vunpack.c.h.bf16 %v8068_v7 }
 0x396   : > { %v6893_v53 = vmax.f32 %v6861_v27, 0.0  ;;  %v6492_v23 = vpack.c.bf16 %v6439_v62, %v6438_v48  ;;  %v8069_v48 = vld [vmem:[%s8255_s11 + $0x30] sm:$0xff]  }
 0x397   : > { %v6178_v30 = vpop.f32.mrf.mxu3 }
 0x398   : > { %v6925_v59 = vpack.c.bf16 %v6893_v53, %v6893_v53  ;;  %v12058_v17 = vpop.f32.mrf.mxu1  ;;  %v6304_v15 = vadd.f32 %v6178_v30, %v5659_v19 }
 0x399   : > { %v6644_v18 = vpop.f32.mrf.mxu0 }
 0x39a   : > { %6958 = vst.msk [vmem:[%s11978_s26 + $0x14] sm:$0xf] %vm6952_vm7, %v6925_v59  ;;  %v6645_v21 = vadd.f32 %v11961_v13, %v6644_v18  ;;  %v6374_v9 = vadd.f32 %v11948_v39, %v6304_v15  ;;  %v7958_v18 = vunpack.c.l.bf16 %v8068_v7 }
 0x39c   : > { %v6862_v61 = vadd.f32 %v7950_v24, %v6645_v21  ;;  %7808 = vmatmul.msk.bf16.gmra.mxu0 %vm13804_vm1, %v6491_v28  ;;  %v12071_v56 = vpop.f32.mrf.mxu2  ;;  %v6440_v53 = vmax.f32 %v6374_v9, 0.0  ;;  %v5666_v21 = vadd.f32 %v12046_v40, %v12058_v17  ;;  %v7926_v40 = vld [vmem:[#allocation3 + $0xd0] sm:$0xff]  ;;  %vm13818_vm1 = vmmov %vm13795_vm0 }
 0x39d   : > { %7574 = vmatmul.msk.bf16.gmra.mxu1 %vm13805_vm5, %v7890_v54  ;;  %vm13819_vm5 = vmmov %vm13811_vm8 }
 0x39e   : > { %v6894_v42 = vmax.f32 %v6862_v61, 0.0  ;;  %7616 = vmatmul.msk.bf16.gmra.mxu2 %vm13806_vm4, %v7890_v54  ;;  %v5664_v54 = vadd.f32 %v12031_v22, %v12048_v45  ;;  %vm13820_vm4 = vmmov %vm13795_vm0 }
 0x39f   : > { %7786 = vmatmul.msk.bf16.gmra.mxu3 %vm13807_vm2, %v7924_v41  ;;  %v6180_v50 = vpop.f32.mrf.mxu3  ;;  %v7892_v41 = vld [vmem:[#allocation3 + $0xd0] sm:$0xff]  ;;  %vm13821_vm2 = vmmov %vm13795_vm0 }
 0x3a0   : > { %v6926_v31 = vpack.c.bf16 %v6894_v42, %v6894_v42  ;;  %v12073_v8 = vpop.f32.mrf.mxu1  ;;  %v6305_v26 = vadd.f32 %v6180_v50, %v5661_v16 }
 0x3a1   : > { %v6646_v51 = vpop.f32.mrf.mxu0 }
 0x3a2   : > { %6959 = vst.msk [vmem:[%s11978_s26 + $0x18] sm:$0xf] %vm6952_vm7, %v6926_v31  ;;  %v6647_v63 = vadd.f32 %v11961_v13, %v6646_v51  ;;  %v6375_v4 = vadd.f32 %v11948_v39, %v6305_v26 }
 0x3a4   : > { %v6863_v25 = vadd.f32 %v7951_v44, %v6647_v63  ;;  %v12081_v0 = vpop.f32.mrf.mxu2  ;;  %v6441_v10 = vmax.f32 %v6375_v4, 0.0  ;;  %v7963_v4 = vunpack.c.h.bf16 %v8069_v48 }
 0x3a6   : > { %v6895_v58 = vmax.f32 %v6863_v25, 0.0  ;;  %v6493_v24 = vpack.c.bf16 %v6441_v10, %v6440_v53  ;;  %v8070_v53 = vld [vmem:[%s8255_s11 + $0x38] sm:$0xff]  }
 0x3a7   : > { %v6183_v35 = vpop.f32.mrf.mxu3 }
 0x3a8   : > { %v6927_v14 = vpack.c.bf16 %v6895_v58, %v6895_v58  ;;  %v12083_v32 = vpop.f32.mrf.mxu1  ;;  %v6306_v44 = vadd.f32 %v6183_v35, %v5664_v54 }
 0x3a9   : > { %v6649_v52 = vpop.f32.mrf.mxu0 }
 0x3aa   : > { %6960 = vst.msk [vmem:[%s11978_s26 + $0x1c] sm:$0xf] %vm6952_vm7, %v6927_v14  ;;  %v6650_v6 = vadd.f32 %v11961_v13, %v6649_v52  ;;  %v6376_v50 = vadd.f32 %v11948_v39, %v6306_v44  ;;  %v7962_v52 = vunpack.c.l.bf16 %v8069_v48 }
 0x3ac   : > { %v6864_v47 = vadd.f32 %v7954_v43, %v6650_v6  ;;  %7809 = vmatmul.msk.bf16.gmra.mxu0 %vm13808_vm13, %v6492_v23  ;;  %v12096_v12 = vpop.f32.mrf.mxu2  ;;  %v6442_v58 = vmax.f32 %v6376_v50, 0.0  ;;  %v5671_v6 = vadd.f32 %v12071_v56, %v12083_v32  ;;  %v7927_v56 = vld [vmem:[#allocation3 + $0xd8] sm:$0xff]  ;;  %vm13822_vm13 = vmmov %vm13795_vm0 }
 0x3ad   : > { %7575 = vmatmul.msk.bf16.gmra.mxu1 %vm13809_vm6, %v7891_v57  ;;  %vm13823_vm6 = vmmov %vm13819_vm5 }
 0x3ae   : > { %v6896_v38 = vmax.f32 %v6864_v47, 0.0  ;;  %7617 = vmatmul.msk.bf16.gmra.mxu2 %vm13795_vm0, %v7891_v57  ;;  %v5669_v57 = vadd.f32 %v12056_v55, %v12073_v8 }
 0x3af   : > { %7787 = vmatmul.msk.bf16.gmra.mxu3 %vm13810_vm14, %v7925_v20  ;;  %v6185_v3 = vpop.f32.mrf.mxu3  ;;  %v7893_v20 = vld [vmem:[#allocation3 + $0xd8] sm:$0xff]  ;;  %vm13824_vm14 = vmmov %vm13795_vm0 }
 0x3b0   : > { %v6928_v11 = vpack.c.bf16 %v6896_v38, %v6896_v38  ;;  %v12098_v27 = vpop.f32.mrf.mxu1  ;;  %v6307_v33 = vadd.f32 %v6185_v3, %v5666_v21 }
 0x3b1   : > { %v6651_v2 = vpop.f32.mrf.mxu0 }
 0x3b2   : > { %6961 = vst.msk [vmem:[%s11978_s26 + $0x20] sm:$0xf] %vm6952_vm7, %v6928_v11  ;;  %v6652_v34 = vadd.f32 %v11961_v13, %v6651_v2  ;;  %v6377_v51 = vadd.f32 %v11948_v39, %v6307_v33 }
 0x3b4   : > { %v6865_v49 = vadd.f32 %v7955_v60, %v6652_v34  ;;  %v12106_v61 = vpop.f32.mrf.mxu2  ;;  %v6443_v37 = vmax.f32 %v6377_v51, 0.0  ;;  %v7967_v51 = vunpack.c.h.bf16 %v8070_v53 }
 0x3b6   : > { %v6897_v59 = vmax.f32 %v6865_v49, 0.0  ;;  %v6494_v43 = vpack.c.bf16 %v6443_v37, %v6442_v58  ;;  %v8071_v58 = vld [vmem:[%s8255_s11 + $0x40] sm:$0xff]  }
 0x3b7   : > { %v6188_v36 = vpop.f32.mrf.mxu3 }
 0x3b8   : > { %v6929_v28 = vpack.c.bf16 %v6897_v59, %v6897_v59  ;;  %v12108_v1 = vpop.f32.mrf.mxu1  ;;  %v6308_v60 = vadd.f32 %v6188_v36, %v5669_v57 }
 0x3b9   : > { %v6654_v30 = vpop.f32.mrf.mxu0 }
 0x3ba   : > { %6962 = vst.msk [vmem:[%s11978_s26 + $0x24] sm:$0xf] %vm6952_vm7, %v6929_v28  ;;  %v6655_v46 = vadd.f32 %v11961_v13, %v6654_v30  ;;  %v6378_v3 = vadd.f32 %v11948_v39, %v6308_v60  ;;  %v7966_v30 = vunpack.c.l.bf16 %v8070_v53 }
 0x3bc   : > { %v6866_v42 = vadd.f32 %v7958_v18, %v6655_v46  ;;  %7810 = vmatmul.msk.bf16.gmra.mxu0 %vm13811_vm8, %v6493_v24  ;;  %v12121_v63 = vpop.f32.mrf.mxu2  ;;  %v6444_v59 = vmax.f32 %v6378_v3, 0.0  ;;  %v5676_v46 = vadd.f32 %v12096_v12, %v12108_v1  ;;  %v7928_v12 = vld [vmem:[#allocation3 + $0xe0] sm:$0xff]  ;;  %vm13825_vm8 = vmmov %vm13795_vm0 }
 0x3bd   : > { %7576 = vmatmul.msk.bf16.gmra.mxu1 %vm13812_vm3, %v7892_v41  ;;  %vm13826_vm3 = vmmov %vm13819_vm5 }
 0x3be   : > { %v6898_v31 = vmax.f32 %v6866_v42, 0.0  ;;  %7618 = vmatmul.msk.bf16.gmra.mxu2 %vm13813_vm10, %v7892_v41  ;;  %v5674_v41 = vadd.f32 %v12081_v0, %v12098_v27  ;;  %vm13827_vm10 = vmmov %vm13795_vm0 }
 0x3bf   : > { %7788 = vmatmul.msk.bf16.gmra.mxu3 %vm13814_vm11, %v7926_v40  ;;  %v6190_v45 = vpop.f32.mrf.mxu3  ;;  %v7894_v40 = vld [vmem:[#allocation3 + $0xe0] sm:$0xff]  ;;  %vm13828_vm11 = vmmov %vm13795_vm0 }
 0x3c0   : > { %v6930_v17 = vpack.c.bf16 %v6898_v31, %v6898_v31  ;;  %v12123_v25 = vpop.f32.mrf.mxu1  ;;  %v6309_v15 = vadd.f32 %v6190_v45, %v5671_v6 }
 0x3c1   : > { %v6656_v22 = vpop.f32.mrf.mxu0 }
 0x3c2   : > { %6963 = vst.msk [vmem:[%s11978_s26 + $0x28] sm:$0xf] %vm6952_vm7, %v6930_v17  ;;  %v6657_v29 = vadd.f32 %v11961_v13, %v6656_v22  ;;  %v6379_v2 = vadd.f32 %v11948_v39, %v6309_v15 }
 0x3c4   : > { %v6867_v62 = vadd.f32 %v7959_v5, %v6657_v29  ;;  %v12131_v47 = vpop.f32.mrf.mxu2  ;;  %v6445_v7 = vmax.f32 %v6379_v2, 0.0  ;;  %v7971_v2 = vunpack.c.h.bf16 %v8071_v58 }
 0x3c6   : > { %v6899_v14 = vmax.f32 %v6867_v62, 0.0  ;;  %v6495_v18 = vpack.c.bf16 %v6445_v7, %v6444_v59  ;;  %v8072_v59 = vld [vmem:[%s8255_s11 + $0x48] sm:$0xff]  }
 0x3c7   : > { %v6193_v16 = vpop.f32.mrf.mxu3 }
 0x3c8   : > { %v6931_v23 = vpack.c.bf16 %v6899_v14, %v6899_v14  ;;  %v12133_v26 = vpop.f32.mrf.mxu1  ;;  %v6310_v5 = vadd.f32 %v6193_v16, %v5674_v41 }
 0x3c9   : > { %v6659_v35 = vpop.f32.mrf.mxu0 }
 0x3ca   : > { %6964 = vst.msk [vmem:[%s11978_s26 + $0x2c] sm:$0xf] %vm6952_vm7, %v6931_v23  ;;  %v6660_v19 = vadd.f32 %v11961_v13, %v6659_v35  ;;  %v6380_v45 = vadd.f32 %v11948_v39, %v6310_v5  ;;  %v7970_v35 = vunpack.c.l.bf16 %v8071_v58 }
 0x3cc   : > { %v6868_v38 = vadd.f32 %v7962_v52, %v6660_v19  ;;  %7811 = vmatmul.msk.bf16.gmra.mxu0 %vm13815_vm12, %v6494_v43  ;;  %v12146_v34 = vpop.f32.mrf.mxu2  ;;  %v6446_v14 = vmax.f32 %v6380_v45, 0.0  ;;  %v5681_v19 = vadd.f32 %v12121_v63, %v12133_v26  ;;  %v7929_v63 = vld [vmem:[#allocation3 + $0xe8] sm:$0xff]  ;;  %vm13829_vm12 = vmmov %vm13795_vm0 }
 0x3cd   : > { %7577 = vmatmul.msk.bf16.gmra.mxu1 %vm13816_vm15, %v7893_v20  ;;  %vm13830_vm15 = vmmov %vm13826_vm3 }
 0x3ce   : > { %v6900_v11 = vmax.f32 %v6868_v38, 0.0  ;;  %7619 = vmatmul.msk.bf16.gmra.mxu2 %vm13817_vm9, %v7893_v20  ;;  %v5679_v20 = vadd.f32 %v12106_v61, %v12123_v25  ;;  %vm13831_vm9 = vmmov %vm13795_vm0 }
 0x3cf   : > { %7789 = vmatmul.msk.bf16.gmra.mxu3 %vm13818_vm1, %v7927_v56  ;;  %v6195_v8 = vpop.f32.mrf.mxu3  ;;  %v7895_v56 = vld [vmem:[#allocation3 + $0xe8] sm:$0xff]  ;;  %vm13832_vm1 = vmmov %vm13795_vm0 }
 0x3d0   : > { %v6932_v32 = vpack.c.bf16 %v6900_v11, %v6900_v11  ;;  %v12148_v49 = vpop.f32.mrf.mxu1  ;;  %v6311_v44 = vadd.f32 %v6195_v8, %v5676_v46 }
 0x3d1   : > { %v6661_v55 = vpop.f32.mrf.mxu0 }
 0x3d2   : > { %6965 = vst.msk [vmem:[%s11978_s26 + $0x30] sm:$0xf] %vm6952_vm7, %v6932_v32  ;;  %v6662_v9 = vadd.f32 %v11961_v13, %v6661_v55  ;;  %v6381_v22 = vadd.f32 %v11948_v39, %v6311_v44 }
 0x3d4   : > { %v6869_v10 = vadd.f32 %v7963_v4, %v6662_v9  ;;  %v12156_v42 = vpop.f32.mrf.mxu2  ;;  %v6447_v48 = vmax.f32 %v6381_v22, 0.0  ;;  %v7975_v22 = vunpack.c.h.bf16 %v8072_v59 }
 0x3d6   : > { %v6901_v28 = vmax.f32 %v6869_v10, 0.0  ;;  %v6496_v52 = vpack.c.bf16 %v6447_v48, %v6446_v14  ;;  %v8073_v14 = vld [vmem:[%s8255_s11 + $0x50] sm:$0xff]  }
 0x3d7   : > { %v6198_v21 = vpop.f32.mrf.mxu3 }
 0x3d8   : > { %v6933_v24 = vpack.c.bf16 %v6901_v28, %v6901_v28  ;;  %v12158_v33 = vpop.f32.mrf.mxu1  ;;  %v6312_v4 = vadd.f32 %v6198_v21, %v5679_v20 }
 0x3d9   : > { %v6664_v36 = vpop.f32.mrf.mxu0 }
 0x3da   : > { %6966 = vst.msk [vmem:[%s11978_s26 + $0x34] sm:$0xf] %vm6952_vm7, %v6933_v24  ;;  %v6665_v54 = vadd.f32 %v11961_v13, %v6664_v36  ;;  %v6382_v8 = vadd.f32 %v11948_v39, %v6312_v4  ;;  %v7974_v36 = vunpack.c.l.bf16 %v8072_v59 }
 0x3dc   : > { %v6870_v31 = vadd.f32 %v7966_v30, %v6665_v54  ;;  %7812 = vmatmul.msk.bf16.gmra.mxu0 %vm13819_vm5, %v6495_v18  ;;  %v12171_v29 = vpop.f32.mrf.mxu2  ;;  %v6448_v28 = vmax.f32 %v6382_v8, 0.0  ;;  %v5686_v54 = vadd.f32 %v12146_v34, %v12158_v33  ;;  %v7930_v34 = vld [vmem:[#allocation3 + $0xf0] sm:$0xff]  ;;  %vm13833_vm5 = vmmov %vm13795_vm0 }
 0x3dd   : > { %7578 = vmatmul.msk.bf16.gmra.mxu1 %vm13820_vm4, %v7894_v40  ;;  %vm13834_vm4 = vmmov %vm13826_vm3 }
 0x3de   : > { %v6902_v17 = vmax.f32 %v6870_v31, 0.0  ;;  %7620 = vmatmul.msk.bf16.gmra.mxu2 %vm13821_vm2, %v7894_v40  ;;  %v5684_v40 = vadd.f32 %v12131_v47, %v12148_v49  ;;  %vm13835_vm2 = vmmov %vm13795_vm0 }
 0x3df   : > { %7790 = vmatmul.msk.bf16.gmra.mxu3 %vm13822_vm13, %v7928_v12  ;;  %v6200_v27 = vpop.f32.mrf.mxu3  ;;  %v7896_v12 = vld [vmem:[#allocation3 + $0xf0] sm:$0xff]  ;;  %vm13836_vm13 = vmmov %vm13795_vm0 }
 0x3e0   : > { %v6934_v1 = vpack.c.bf16 %v6902_v17, %v6902_v17  ;;  %v12173_v62 = vpop.f32.mrf.mxu1  ;;  %v6313_v60 = vadd.f32 %v6200_v27, %v5681_v19 }
 0x3e1   : > { %v6666_v0 = vpop.f32.mrf.mxu0 }
 0x3e2   : > { %6967 = vst.msk [vmem:[%s11978_s26 + $0x38] sm:$0xf] %vm6952_vm7, %v6934_v1  ;;  %v6667_v50 = vadd.f32 %v11961_v13, %v6666_v0  ;;  %v6383_v55 = vadd.f32 %v11948_v39, %v6313_v60 }
 0x3e4   : > { %v6871_v37 = vadd.f32 %v7967_v51, %v6667_v50  ;;  %v12181_v38 = vpop.f32.mrf.mxu2  ;;  %v6449_v53 = vmax.f32 %v6383_v55, 0.0  ;;  %v7979_v55 = vunpack.c.h.bf16 %v8073_v14 }
 0x3e6   : > { %v6903_v23 = vmax.f32 %v6871_v37, 0.0  ;;  %v6497_v30 = vpack.c.bf16 %v6449_v53, %v6448_v28  ;;  %v8074_v28 = vld [vmem:[%s8255_s11 + $0x58] sm:$0xff]  }
 0x3e7   : > { %v6203_v6 = vpop.f32.mrf.mxu3 }
 0x3e8   : > { %v6935_v43 = vpack.c.bf16 %v6903_v23, %v6903_v23  ;;  %v12183_v15 = vpop.f32.mrf.mxu1  ;;  %v6314_v51 = vadd.f32 %v6203_v6, %v5684_v40 }
 0x3e9   : > { %v6669_v16 = vpop.f32.mrf.mxu0 }
 0x3ea   : > { %6968 = vst.msk [vmem:[%s11978_s26 + $0x3c] sm:$0xf] %vm6952_vm7, %v6935_v43  ;;  %v6670_v57 = vadd.f32 %v11961_v13, %v6669_v16  ;;  %v6384_v27 = vadd.f32 %v11948_v39, %v6314_v51  ;;  %v7978_v16 = vunpack.c.l.bf16 %v8073_v14 }
 0x3ec   : > { %v6872_v11 = vadd.f32 %v7970_v35, %v6670_v57  ;;  %7813 = vmatmul.msk.bf16.gmra.mxu0 %vm13823_vm6, %v6496_v52  ;;  %v12196_v9 = vpop.f32.mrf.mxu2  ;;  %v6450_v23 = vmax.f32 %v6384_v27, 0.0  ;;  %v5691_v57 = vadd.f32 %v12171_v29, %v12183_v15  ;;  %v7931_v29 = vld [vmem:[#allocation3 + $0xf8] sm:$0xff]  ;;  %vm13837_vm6 = vmmov %vm13795_vm0 }
 0x3ed   : > { %7579 = vmatmul.msk.bf16.gmra.mxu1 %vm13795_vm0, %v7895_v56  ;;  %vm13838_vm0 = vmmov %vm13826_vm3 }
 0x3ee   : > { %v6904_v32 = vmax.f32 %v6872_v11, 0.0  ;;  %7621 = vmatmul.msk.bf16.gmra.mxu2 %vm13824_vm14, %v7895_v56  ;;  %v5689_v56 = vadd.f32 %v12156_v42, %v12173_v62  ;;  %vm13839_vm14 = vmmov %vm13832_vm1 }
 0x3ef   : > { %7791 = vmatmul.msk.bf16.gmra.mxu3 %vm13825_vm8, %v7929_v63  ;;  %v6205_v25 = vpop.f32.mrf.mxu3  ;;  %v7897_v63 = vld [vmem:[#allocation3 + $0xf8] sm:$0xff]  ;;  %vm13840_vm8 = vmmov %vm13832_vm1 }
 0x3f0   : > { %v6936_v26 = vpack.c.bf16 %v6904_v32, %v6904_v32  ;;  %v12198_v10 = vpop.f32.mrf.mxu1  ;;  %v6315_v5 = vadd.f32 %v6205_v25, %v5686_v54 }
 0x3f1   : > { %v6671_v61 = vpop.f32.mrf.mxu0 }
 0x3f2   : > { %6969 = vst.msk [vmem:[%s11978_s26 + $0x40] sm:$0xf] %vm6952_vm7, %v6936_v26  ;;  %v6672_v3 = vadd.f32 %v11961_v13, %v6671_v61  ;;  %v6385_v0 = vadd.f32 %v11948_v39, %v6315_v5 }
 0x3f4   : > { %v6873_v7 = vadd.f32 %v7971_v2, %v6672_v3  ;;  %v12206_v31 = vpop.f32.mrf.mxu2  ;;  %v6451_v58 = vmax.f32 %v6385_v0, 0.0  ;;  %v7983_v0 = vunpack.c.h.bf16 %v8074_v28 }
 0x3f6   : > { %v6905_v24 = vmax.f32 %v6873_v7, 0.0  ;;  %v6498_v35 = vpack.c.bf16 %v6451_v58, %v6450_v23  ;;  %v8075_v23 = vld [vmem:[%s8255_s11 + $0x60] sm:$0xff]  }
 0x3f7   : > { %v6208_v46 = vpop.f32.mrf.mxu3 }
 0x3f8   : > { %v6937_v18 = vpack.c.bf16 %v6905_v24, %v6905_v24  ;;  %v12208_v44 = vpop.f32.mrf.mxu1  ;;  %v6316_v2 = vadd.f32 %v6208_v46, %v5689_v56 }
 0x3f9   : > { %v6674_v21 = vpop.f32.mrf.mxu0 }
 0x3fa   : > { %6970 = vst.msk [vmem:[%s11978_s26 + $0x44] sm:$0xf] %vm6952_vm7, %v6937_v18  ;;  %v6675_v41 = vadd.f32 %v11961_v13, %v6674_v21  ;;  %v6386_v25 = vadd.f32 %v11948_v39, %v6316_v2  ;;  %v7982_v21 = vunpack.c.l.bf16 %v8074_v28  ;;  %v7900_v2 = vld [vmem:[#allocation3 + $0x108] sm:$0xff]  ;;  %v8076_v28 = vld [vmem:[%s8255_s11 + $0x68] sm:$0xff]  }
 0x3fc   : > { %v6874_v17 = vadd.f32 %v7974_v36, %v6675_v41  ;;  %7814 = vmatmul.msk.bf16.gmra.mxu0 %vm13826_vm3, %v6497_v30  ;;  %v12221_v50 = vpop.f32.mrf.mxu2  ;;  %v6452_v24 = vmax.f32 %v6386_v25, 0.0  ;;  %v5696_v41 = vadd.f32 %v12196_v9, %v12208_v44  ;;  %v7932_v9 = vld [vmem:[#allocation3 + $0x100] sm:$0xff]  ;;  %vm13841_vm3 = vmmov %vm13838_vm0 }
 0x3fd   : > { %7580 = vmatmul.msk.bf16.gmra.mxu1 %vm13827_vm10, %v7896_v12  ;;  %vm13842_vm10 = vmmov %vm13832_vm1 }
 0x3fe   : > { %v6906_v1 = vmax.f32 %v6874_v17, 0.0  ;;  %7622 = vmatmul.msk.bf16.gmra.mxu2 %vm13828_vm11, %v7896_v12  ;;  %v5694_v12 = vadd.f32 %v12181_v38, %v12198_v10  ;;  %vm13843_vm11 = vmmov %vm13838_vm0 }
 0x3ff   : > { %7792 = vmatmul.msk.bf16.gmra.mxu3 %vm13829_vm12, %v7930_v34  ;;  %v6210_v49 = vpop.f32.mrf.mxu3  ;;  %v7898_v34 = vld [vmem:[#allocation3 + $0x100] sm:$0xff]  ;;  %vm13844_vm12 = vmmov %vm13838_vm0 }
 0x400   : > { %v6938_v33 = vpack.c.bf16 %v6906_v1, %v6906_v1  ;;  %v12223_v37 = vpop.f32.mrf.mxu1  ;;  %v6317_v4 = vadd.f32 %v6210_v49, %v5691_v57 }
 0x401   : > { %v6676_v47 = vpop.f32.mrf.mxu0 }
 0x402   : > { %6971 = vst.msk [vmem:[%s11978_s26 + $0x48] sm:$0xf] %vm6952_vm7, %v6938_v33  ;;  %v6677_v45 = vadd.f32 %v11961_v13, %v6676_v47  ;;  %v6387_v61 = vadd.f32 %v11948_v39, %v6317_v4  ;;  %v5699_v4 = vadd.f32 %v12206_v31, %v12223_v37 }
 0x404   : > { %v6875_v48 = vadd.f32 %v7975_v22, %v6677_v45  ;;  %v12231_v11 = vpop.f32.mrf.mxu2  ;;  %v6453_v59 = vmax.f32 %v6387_v61, 0.0  ;;  %v7987_v61 = vunpack.c.h.bf16 %v8075_v23 }
 0x406   : > { %v6907_v43 = vmax.f32 %v6875_v48, 0.0  ;;  %v6499_v36 = vpack.c.bf16 %v6453_v59, %v6452_v24 }
 0x407   : > { %v6213_v19 = vpop.f32.mrf.mxu3 }
 0x408   : > { %v6939_v52 = vpack.c.bf16 %v6907_v43, %v6907_v43  ;;  %v12233_v60 = vpop.f32.mrf.mxu1  ;;  %v6318_v22 = vadd.f32 %v6213_v19, %v5694_v12 }
 0x409   : > { %v6679_v6 = vpop.f32.mrf.mxu0 }
 0x40a   : > { %6972 = vst.msk [vmem:[%s11978_s26 + $0x4c] sm:$0xf] %vm6952_vm7, %v6939_v52  ;;  %v6680_v20 = vadd.f32 %v11961_v13, %v6679_v6  ;;  %v6388_v49 = vadd.f32 %v11948_v39, %v6318_v22  ;;  %v7986_v6 = vunpack.c.l.bf16 %v8075_v23 }
 0x40c   : > { %v6876_v32 = vadd.f32 %v7978_v16, %v6680_v20  ;;  %7815 = vmatmul.msk.bf16.gmra.mxu0 %vm13830_vm15, %v6498_v35  ;;  %v12246_v3 = vpop.f32.mrf.mxu2  ;;  %v6454_v43 = vmax.f32 %v6388_v49, 0.0  ;;  %v5701_v20 = vadd.f32 %v12221_v50, %v12233_v60  ;;  %v7933_v50 = vld [vmem:[#allocation3 + $0x108] sm:$0xff]  ;;  %vm13845_vm15 = vmmov %vm13838_vm0 }
 0x40d   : > { %7581 = vmatmul.msk.bf16.gmra.mxu1 %vm13831_vm9, %v7897_v63  ;;  %vm13846_vm9 = vmmov %vm13838_vm0 }
 0x40e   : > { %v6908_v26 = vmax.f32 %v6876_v32, 0.0  ;;  %7623 = vmatmul.msk.bf16.gmra.mxu2 %vm13832_vm1, %v7897_v63  ;;  %vm13847_vm1 = vmmov %vm13838_vm0 }
 0x40f   : > { %7793 = vmatmul.msk.bf16.gmra.mxu3 %vm13833_vm5, %v7931_v29  ;;  %v6215_v62 = vpop.f32.mrf.mxu3  ;;  %vm13848_vm5 = vmmov %vm13838_vm0 }
 0x410   : > { %v6940_v15 = vpack.c.bf16 %v6908_v26, %v6908_v26  ;;  %v12248_v7 = vpop.f32.mrf.mxu1  ;;  %v6319_v51 = vadd.f32 %v6215_v62, %v5696_v41 }
 0x411   : > { %v6681_v42 = vpop.f32.mrf.mxu0 }
 0x412   : > { %6973 = vst.msk [vmem:[%s11978_s26 + $0x50] sm:$0xf] %vm6952_vm7, %v6940_v15  ;;  %v6682_v8 = vadd.f32 %v11961_v13, %v6681_v42  ;;  %v6389_v47 = vadd.f32 %v11948_v39, %v6319_v51 }
 0x414   : > { %v6877_v53 = vadd.f32 %v7979_v55, %v6682_v8  ;;  %v12256_v17 = vpop.f32.mrf.mxu2  ;;  %v6455_v58 = vmax.f32 %v6389_v47, 0.0 }
 0x416   : > { %v6909_v18 = vmax.f32 %v6877_v53, 0.0  ;;  %v6500_v16 = vpack.c.bf16 %v6455_v58, %v6454_v43  ;;  %v8077_v58 = vld [vmem:[%s8255_s11 + $0x70] sm:$0xff]  }
 0x417   : > { %v6218_v54 = vpop.f32.mrf.mxu3 }
 0x418   : > { %v6941_v30 = vpack.c.bf16 %v6909_v18, %v6909_v18  ;;  %v12258_v5 = vpop.f32.mrf.mxu1  ;;  %v6320_v15 = vadd.f32 %v6218_v54, %v5699_v4 }
 0x419   : > { %v6684_v46 = vpop.f32.mrf.mxu0 }
 0x41a   : > { %6974 = vst.msk [vmem:[%s11978_s26 + $0x54] sm:$0xf] %vm6952_vm7, %v6941_v30  ;;  %v6685_v40 = vadd.f32 %v11961_v13, %v6684_v46  ;;  %v6390_v62 = vadd.f32 %v11948_v39, %v6320_v15  ;;  %v7995_v15 = vunpack.c.h.bf16 %v8077_v58 }
 0x41c   : > { %v6878_v1 = vadd.f32 %v7982_v21, %v6685_v40  ;;  %7816 = vmatmul.msk.bf16.gmra.mxu0 %vm13834_vm4, %v6499_v36  ;;  %v12273_v14 = vpop.f32.mrf.mxu2  ;;  %v6456_v24 = vmax.f32 %v6390_v62, 0.0  ;;  %v7990_v21 = vunpack.c.l.bf16 %v8076_v28  ;;  %v5706_v40 = vadd.f32 %v12246_v3, %v12258_v5  ;;  %v12311_v3 = vld [vmem:[%s12503_s4] ss:$0 sm:$0xff]  ;;  %v8078_v62 = vld [vmem:[%s8255_s11 + $0x78] sm:$0xff]   ;;  %vm13849_vm4 = vmmov %vm13838_vm0 }
 0x41d   : > { %7582 = vmatmul.msk.bf16.gmra.mxu1 %vm13835_vm2, %v7898_v34  ;;  %vm13850_vm2 = vmmov %vm13838_vm0 }
 0x41e   : > { %v6910_v33 = vmax.f32 %v6878_v1, 0.0  ;;  %7624 = vmatmul.msk.bf16.gmra.mxu2 %vm13836_vm13, %v7898_v34  ;;  %v5704_v1 = vadd.f32 %v12231_v11, %v12248_v7  ;;  %vm13851_vm13 = vmmov %vm13838_vm0 }
 0x41f   : > { %7794 = vmatmul.msk.bf16.gmra.mxu3 %vm13837_vm6, %v7932_v9  ;;  %v6220_v10 = vpop.f32.mrf.mxu3  ;;  %vm13852_vm6 = vmmov %vm13838_vm0 }
 0x420   : > { %v6942_v44 = vpack.c.bf16 %v6910_v33, %v6910_v33  ;;  %v12271_v45 = vpop.f32.mrf.mxu1  ;;  %v6321_v26 = vadd.f32 %v6220_v10, %v5701_v20  ;;  %v7934_v33 = vld [vmem:[#allocation3 + $0x110] sm:$0xff] }
 0x421   : > { %v6686_v38 = vpop.f32.mrf.mxu0  ;;  %v5709_v4 = vadd.f32 %v12256_v17, %v12271_v45 }
 0x422   : > { %6975 = vst.msk [vmem:[%s11978_s26 + $0x58] sm:$0xf] %vm6952_vm7, %v6942_v44  ;;  %v6687_v27 = vadd.f32 %v11961_v13, %v6686_v38  ;;  %v6391_v42 = vadd.f32 %v11948_v39, %v6321_v26 }
 0x424   : > { %v6879_v48 = vadd.f32 %v7983_v0, %v6687_v27  ;;  %v12286_v55 = vpop.f32.mrf.mxu2  ;;  %v6457_v59 = vmax.f32 %v6391_v42, 0.0  ;;  %v7991_v0 = vunpack.c.h.bf16 %v8076_v28 }
 0x426   : > { %v6911_v52 = vmax.f32 %v6879_v48, 0.0  ;;  %v6501_v36 = vpack.c.bf16 %v6457_v59, %v6456_v24 }
 0x427   : > { %v6223_v57 = vpop.f32.mrf.mxu3 }
 0x428   : > { %v6943_v35 = vpack.c.bf16 %v6911_v52, %v6911_v52  ;;  %v12281_v32 = vpop.f32.mrf.mxu1  ;;  %v6322_v9 = vadd.f32 %v6223_v57, %v5704_v1 }
 0x429   : > { %v6689_v19 = vpop.f32.mrf.mxu0  ;;  %v5711_v57 = vadd.f32 %v12273_v14, %v12281_v32 }
 0x42a   : > { %6976 = vst.msk [vmem:[%s11978_s26 + $0x5c] sm:$0xf] %vm6952_vm7, %v6943_v35  ;;  %v6690_v56 = vadd.f32 %v11961_v13, %v6689_v19  ;;  %v6392_v47 = vadd.f32 %v12311_v3, %v6322_v9 }
 0x42c   : > { %v6880_v63 = vadd.f32 %v7986_v6, %v6690_v56  ;;  %7817 = vmatmul.msk.bf16.gmra.mxu0 %vm13838_vm0, %v6500_v16  ;;  %v12298_v46 = vpop.f32.mrf.mxu2  ;;  %v6458_v23 = vmax.f32 %v6392_v47, 0.0  ;;  %v7994_v16 = vunpack.c.l.bf16 %v8077_v58 }
 0x42d   : > { %7583 = vmatmul.msk.bf16.gmra.mxu1 %vm13839_vm14, %v7900_v2 }
 0x42e   : > { %v6912_v29 = vmax.f32 %v6880_v63, 0.0 }
 0x42f   : > { %7795 = vmatmul.msk.bf16.gmra.mxu3 %vm13840_vm8, %v7933_v50  ;;  %v6225_v37 = vpop.f32.mrf.mxu3 }
 0x430   : > { %v6944_v60 = vpack.c.bf16 %v6912_v29, %v6912_v29  ;;  %v12295_v8 = vpop.f32.mrf.mxu1  ;;  %v6323_v34 = vadd.f32 %v6225_v37, %v5706_v40 }
 0x431   : > { %v6691_v31 = vpop.f32.mrf.mxu0 }
 0x432   : > { %6977 = vst.msk [vmem:[%s11978_s26 + $0x60] sm:$0xf] %vm6952_vm7, %v6944_v60  ;;  %v6692_v25 = vadd.f32 %v11961_v13, %v6691_v31  ;;  %v6393_v5 = vadd.f32 %v12311_v3, %v6323_v34 }
 0x434   : > { %v6881_v53 = vadd.f32 %v7987_v61, %v6692_v25  ;;  %v12319_v10 = vpop.f32.mrf.mxu2  ;;  %v6459_v48 = vmax.f32 %v6393_v5, 0.0 }
 0x436   : > { %v6913_v18 = vmax.f32 %v6881_v53, 0.0  ;;  %v6502_v35 = vpack.c.bf16 %v6459_v48, %v6458_v23 }
 0x437   : > { %v6228_v41 = vpop.f32.mrf.mxu3 }
 0x438   : > { %v6945_v30 = vpack.c.bf16 %v6913_v18, %v6913_v18  ;;  %v5521_v12 = vpop.f32.mrf.mxu1  ;;  %v6324_v2 = vadd.f32 %v6228_v41, %v5709_v4  ;;  %v7998_v18 = vunpack.c.l.bf16 %v8078_v62  ;;  %v5714_v41 = vadd.f32 %v12286_v55, %v12295_v8 }
 0x439   : > { %v6694_v54 = vpop.f32.mrf.mxu0 }
 0x43a   : > { %6978 = vst.msk [vmem:[%s11978_s26 + $0x64] sm:$0xf] %vm6952_vm7, %v6945_v30  ;;  %v6695_v39 = vadd.f32 %v11961_v13, %v6694_v54  ;;  %v6394_v42 = vadd.f32 %v12311_v3, %v6324_v2 }
 0x43c   : > { %v6882_v51 = vadd.f32 %v7990_v21, %v6695_v39  ;;  %7818 = vmatmul.msk.bf16.gmra.mxu0 %vm13841_vm3, %v6501_v36  ;;  %v5720_v26 = vpop.f32.mrf.mxu2  ;;  %v6460_v25 = vmax.f32 %v6394_v42, 0.0  ;;  %v5716_v21 = vadd.f32 %v12298_v46, %v5521_v12 }
 0x43e   : > { %v6914_v22 = vmax.f32 %v6882_v51, 0.0 }
 0x43f   : > { %7796 = vmatmul.msk.bf16.gmra.mxu3 %vm13842_vm10, %v7934_v33  ;;  %v6230_v7 = vpop.f32.mrf.mxu3 }
 0x440   : > { %v6946_v44 = vpack.c.bf16 %v6914_v22, %v6914_v22  ;;  %v12321_v49 = vpop.f32.mrf.mxu1  ;;  %v6325_v14 = vadd.f32 %v6230_v7, %v5711_v57  ;;  %v7999_v22 = vunpack.c.h.bf16 %v8078_v62 }
 0x441   : > { %v6696_v11 = vpop.f32.mrf.mxu0 }
 0x442   : > { %6979 = vst.msk [vmem:[%s11978_s26 + $0x68] sm:$0xf] %vm6952_vm7, %v6946_v44  ;;  %v6697_v38 = vadd.f32 %v11961_v13, %v6696_v11  ;;  %v12331_v13 = vld [vmem:[%s12505_s6] ss:$0 sm:$0xff]  ;;  %v6395_v50 = vadd.f32 %v12311_v3, %v6325_v14 }
 0x444   : > { %v6883_v27 = vadd.f32 %v7991_v0, %v6697_v38  ;;  %v6461_v31 = vmax.f32 %v6395_v50, 0.0  ;;  %v5723_v59 = vpop.f32.mrf.mxu2 }
 0x446   : > { %v6915_v43 = vmax.f32 %v6883_v27, 0.0  ;;  %v6503_v24 = vpack.c.bf16 %v6461_v31, %v6460_v25 }
 0x447   : > { %v6233_v19 = vpop.f32.mrf.mxu3 }
 0x448   : > { %v6947_v52 = vpack.c.bf16 %v6915_v43, %v6915_v43  ;;  %v5526_v56 = vpop.f32.mrf.mxu1  ;;  %v6326_v51 = vadd.f32 %v6233_v19, %v5714_v41 }
 0x449   : > { %v6699_v6 = vpop.f32.mrf.mxu0  ;;  %v5721_v23 = vadd.f32 %v5720_v26, %v5526_v56  ;;  %v8079_v56 = vld [vmem:[%s8255_s11 + $0x80] sm:$0xff]  }
 0x44a   : > { %6980 = vst.msk [vmem:[%s11978_s26 + $0x6c] sm:$0xf] %vm6952_vm7, %v6947_v52  ;;  %v6700_v20 = vadd.f32 %v12331_v13, %v6699_v6  ;;  %v6396_v0 = vadd.f32 %v12311_v3, %v6326_v51  ;;  %v5719_v52 = vadd.f32 %v12319_v10, %v12321_v49  ;;  %v8002_v2 = vunpack.c.l.bf16 %v8079_v56 }
 0x44b   : > { %v8003_v25 = vunpack.c.h.bf16 %v8079_v56 }
 0x44c   : > { %v6884_v63 = vadd.f32 %v7994_v16, %v6700_v20  ;;  %7819 = vmatmul.msk.bf16.gmra.mxu0 %vm13843_vm11, %v6502_v35  ;;  %v5725_v9 = vpop.f32.mrf.mxu2  ;;  %v6462_v11 = vmax.f32 %v6396_v0, 0.0 }
 0x44e   : > { %v6916_v32 = vmax.f32 %v6884_v63, 0.0 }
 0x44f   : > { %v6235_v61 = vpop.f32.mrf.mxu3 }
 0x450   : > { %v6948_v29 = vpack.c.bf16 %v6916_v32, %v6916_v32  ;;  %v5529_v37 = vpop.f32.mrf.mxu1  ;;  %v6327_v39 = vadd.f32 %v6235_v61, %v5716_v21 }
 0x451   : > { %v6701_v60 = vpop.f32.mrf.mxu0  ;;  %v5724_v50 = vadd.f32 %v5723_v59, %v5529_v37 }
 0x452   : > { %6981 = vst.msk [vmem:[%s11978_s26 + $0x70] sm:$0xf] %vm6952_vm7, %v6948_v29  ;;  %v6702_v17 = vadd.f32 %v12331_v13, %v6701_v60  ;;  %v6397_v46 = vadd.f32 %v12311_v3, %v6327_v39 }
 0x454   : > { %v6885_v45 = vadd.f32 %v7995_v15, %v6702_v17  ;;  %v6463_v5 = vmax.f32 %v6397_v46, 0.0  ;;  %v5728_v43 = vpop.f32.mrf.mxu2 }
 0x456   : > { %v6917_v53 = vmax.f32 %v6885_v45, 0.0  ;;  %v6504_v38 = vpack.c.bf16 %v6463_v5, %v6462_v11 }
 0x457   : > { %v6238_v36 = vpop.f32.mrf.mxu3 }
 0x458   : > { %v6949_v28 = vpack.c.bf16 %v6917_v53, %v6917_v53  ;;  %v5531_v34 = vpop.f32.mrf.mxu1  ;;  %v6328_v16 = vadd.f32 %v6238_v36, %v5719_v52  ;;  %v8080_v36 = vld [vmem:[%s8255_s11 + $0x88] sm:$0xff]   ;;  %v8081_v52 = vld [vmem:[%s8255_s11 + $0x90] sm:$0xff]  }
 0x459   : > { %v6704_v30 = vpop.f32.mrf.mxu0  ;;  %v5726_v10 = vadd.f32 %v5725_v9, %v5531_v34  ;;  %v8006_v51 = vunpack.c.l.bf16 %v8080_v36  ;;  %v8007_v5 = vunpack.c.h.bf16 %v8080_v36 }
 0x45a   : > { %6982 = vst.msk [vmem:[%s11978_s26 + $0x74] sm:$0xf] %vm6952_vm7, %v6949_v28  ;;  %v6705_v54 = vadd.f32 %v12331_v13, %v6704_v30  ;;  %v6398_v20 = vadd.f32 %v12311_v3, %v6328_v16 }
 0x45c   : > { %v6886_v40 = vadd.f32 %v7998_v18, %v6705_v54  ;;  %7820 = vmatmul.msk.bf16.gmra.mxu0 %vm13844_vm12, %v6503_v24  ;;  %v5730_v63 = vpop.f32.mrf.mxu2  ;;  %v6464_v26 = vmax.f32 %v6398_v20, 0.0 }
 0x45e   : > { %v6918_v1 = vmax.f32 %v6886_v40, 0.0 }
 0x45f   : > { %v6240_v44 = vpop.f32.mrf.mxu3 }
 0x460   : > { %v6950_v33 = vpack.c.bf16 %v6918_v1, %v6918_v1  ;;  %v5534_v27 = vpop.f32.mrf.mxu1  ;;  %v6329_v35 = vadd.f32 %v6240_v44, %v5721_v23 }
 0x461   : > { %v6706_v12 = vpop.f32.mrf.mxu0  ;;  %v5729_v46 = vadd.f32 %v5728_v43, %v5534_v27 }
 0x462   : > { %6983 = vst.msk [vmem:[%s11978_s26 + $0x78] sm:$0xf] %vm6952_vm7, %v6950_v33  ;;  %v6707_v55 = vadd.f32 %v12331_v13, %v6706_v12  ;;  %v6399_v6 = vadd.f32 %v12311_v3, %v6329_v35 }
 0x464   : > { %v6887_v8 = vadd.f32 %v7999_v22, %v6707_v55  ;;  %v6465_v14 = vmax.f32 %v6399_v6, 0.0  ;;  %v5733_v45 = vpop.f32.mrf.mxu2 }
 0x466   : > { %v6919_v7 = vmax.f32 %v6887_v8, 0.0  ;;  %v6505_v32 = vpack.c.bf16 %v6465_v14, %v6464_v26 }
 0x467   : > { %v6243_v58 = vpop.f32.mrf.mxu3 }
 0x468   : > { %v6951_v47 = vpack.c.bf16 %v6919_v7, %v6919_v7  ;;  %v5536_v4 = vpop.f32.mrf.mxu1  ;;  %v6330_v31 = vadd.f32 %v6243_v58, %v5724_v50  ;;  %v8011_v50 = vunpack.c.h.bf16 %v8081_v52 }
 0x469   : > { %v6709_v48 = vpop.f32.mrf.mxu0  ;;  %v5731_v22 = vadd.f32 %v5730_v63, %v5536_v4 }
 0x46a   : > { %6984 = vst.msk [vmem:[%s11978_s26 + $0x7c] sm:$0xf] %vm6952_vm7, %v6951_v47  ;;  %v6400_v37 = vadd.f32 %v12311_v3, %v6330_v31 }
 0x46c   : > { %7821 = vmatmul.msk.bf16.gmra.mxu0 %vm13845_vm15, %v6504_v38  ;;  %v6466_v21 = vmax.f32 %v6400_v37, 0.0  ;;  %v5735_v39 = vpop.f32.mrf.mxu2 }
 0x46f   : > { %v6245_v57 = vpop.f32.mrf.mxu3 }
 0x470   : > { %v6331_v61 = vadd.f32 %v6245_v57, %v5726_v10  ;;  %v5539_v42 = vpop.f32.mrf.mxu1  ;;  %v8010_v57 = vunpack.c.l.bf16 %v8081_v52 }
 0x471   : > { %v6710_v19 = vpop.f32.mrf.mxu0  ;;  %v5734_v26 = vadd.f32 %v5733_v45, %v5539_v42 }
 0x472   : > { %v6401_v53 = vadd.f32 %v12311_v3, %v6331_v61 }
 0x474   : > { %v6467_v30 = vmax.f32 %v6401_v53, 0.0  ;;  %v5738_v48 = vpop.f32.mrf.mxu2  ;;  %v8082_v53 = vld [vmem:[%s8255_s11 + $0x98] sm:$0xff]  }
 0x476   : > { %v6506_v1 = vpack.c.bf16 %v6467_v30, %v6466_v21  ;;  %v8014_v30 = vunpack.c.l.bf16 %v8082_v53 }
 0x477   : > { %v6248_v15 = vpop.f32.mrf.mxu3 }
 0x478   : > { %v5541_v41 = vpop.f32.mrf.mxu1  ;;  %v6332_v55 = vadd.f32 %v6248_v15, %v5729_v46  ;;  %v8015_v46 = vunpack.c.h.bf16 %v8082_v53 }
 0x479   : > { %v6712_v29 = vpop.f32.mrf.mxu0  ;;  %v5736_v63 = vadd.f32 %v5735_v39, %v5541_v41 }
 0x47a   : > { %v6713_v49 = vadd.f32 %v12331_v13, %v6712_v29  ;;  %v6402_v27 = vadd.f32 %v12311_v3, %v6332_v55 }
 0x47c   : > { %v7049_v60 = vadd.f32 %v8002_v2, %v6713_v49  ;;  %7822 = vmatmul.msk.bf16.gmra.mxu0 %vm13846_vm9, %v6505_v32  ;;  %v6468_v35 = vmax.f32 %v6402_v27, 0.0  ;;  %v5740_v32 = vpop.f32.mrf.mxu2 }
 0x47e   : > { %v7081_v17 = vmax.f32 %v7049_v60, 0.0 }
 0x47f   : > { %v6250_v24 = vpop.f32.mrf.mxu3 }
 0x480   : > { %v7113_v62 = vpack.c.bf16 %v7081_v17, %v7081_v17  ;;  %v6333_v44 = vadd.f32 %v6250_v24, %v5731_v22  ;;  %v5544_v7 = vpop.f32.mrf.mxu1 }
 0x481   : > { %v6714_v28 = vpop.f32.mrf.mxu0 }
 0x482   : > { %7145 = vst.msk [vmem:[%s11978_s26 + $0x80] sm:$0xf] %vm6952_vm7, %v7113_v62  ;;  %v6715_v59 = vadd.f32 %v12331_v13, %v6714_v28  ;;  %v6403_v11 = vadd.f32 %v12311_v3, %v6333_v44 }
 0x484   : > { %v7050_v18 = vadd.f32 %v8003_v25, %v6715_v59  ;;  %v6469_v43 = vmax.f32 %v6403_v11, 0.0  ;;  %v5743_v28 = vpop.f32.mrf.mxu2 }
 0x486   : > { %v7082_v54 = vmax.f32 %v7050_v18, 0.0  ;;  %v6507_v19 = vpack.c.bf16 %v6469_v43, %v6468_v35 }
 0x487   : > { %v6253_v33 = vpop.f32.mrf.mxu3 }
 0x488   : > { %v7114_v40 = vpack.c.bf16 %v7082_v54, %v7082_v54  ;;  %v5546_v56 = vpop.f32.mrf.mxu1  ;;  %v6334_v10 = vadd.f32 %v6253_v33, %v5734_v26 }
 0x489   : > { %v6717_v34 = vpop.f32.mrf.mxu0  ;;  %v5741_v54 = vadd.f32 %v5740_v32, %v5546_v56 }
 0x48a   : > { %7146 = vst.msk [vmem:[%s11978_s26 + $0x84] sm:$0xf] %vm6952_vm7, %v7114_v40  ;;  %v6718_v9 = vadd.f32 %v12331_v13, %v6717_v34  ;;  %v6404_v31 = vadd.f32 %v12311_v3, %v6334_v10  ;;  %v5739_v40 = vadd.f32 %v5738_v48, %v5544_v7  ;;  %v8083_v7 = vld [vmem:[%s8255_s11 + $0xa0] sm:$0xff]  }
 0x48b   : > { %v8019_v56 = vunpack.c.h.bf16 %v8083_v7 }
 0x48c   : > { %v7051_v12 = vadd.f32 %v8006_v51, %v6718_v9  ;;  %7823 = vmatmul.msk.bf16.gmra.mxu0 %vm13847_vm1, %v6506_v1  ;;  %v6470_v24 = vmax.f32 %v6404_v31, 0.0  ;;  %v5745_v22 = vpop.f32.mrf.mxu2 }
 0x48e   : > { %v7083_v0 = vmax.f32 %v7051_v12, 0.0 }
 0x48f   : > { %v6255_v38 = vpop.f32.mrf.mxu3 }
 0x490   : > { %v7115_v8 = vpack.c.bf16 %v7083_v0, %v7083_v0  ;;  %v6335_v29 = vadd.f32 %v6255_v38, %v5736_v63  ;;  %v5549_v25 = vpop.f32.mrf.mxu1 }
 0x491   : > { %v6719_v47 = vpop.f32.mrf.mxu0 }
 0x492   : > { %7147 = vst.msk [vmem:[%s11978_s26 + $0x88] sm:$0xf] %vm6952_vm7, %v7115_v8  ;;  %v6720_v58 = vadd.f32 %v12331_v13, %v6719_v47  ;;  %v6405_v60 = vadd.f32 %v12311_v3, %v6335_v29 }
 0x494   : > { %v7052_v23 = vadd.f32 %v8007_v5, %v6720_v58  ;;  %v6471_v62 = vmax.f32 %v6405_v60, 0.0  ;;  %v8018_v58 = vunpack.c.l.bf16 %v8083_v7  ;;  %v5748_v52 = vpop.f32.mrf.mxu2  ;;  %v8084_v60 = vld [vmem:[%s8255_s11 + $0xa8] sm:$0xff]  }
 0x496   : > { %v7084_v16 = vmax.f32 %v7052_v23, 0.0  ;;  %v6508_v18 = vpack.c.bf16 %v6471_v62, %v6470_v24  ;;  %v8022_v62 = vunpack.c.l.bf16 %v8084_v60 }
 0x497   : > { %v6258_v4 = vpop.f32.mrf.mxu3 }
 0x498   : > { %v7116_v6 = vpack.c.bf16 %v7084_v16, %v7084_v16  ;;  %v6336_v34 = vadd.f32 %v6258_v4, %v5739_v40  ;;  %v5551_v33 = vpop.f32.mrf.mxu1  ;;  %v8023_v40 = vunpack.c.h.bf16 %v8084_v60 }
 0x499   : > { %v6722_v20 = vpop.f32.mrf.mxu0  ;;  %v5746_v35 = vadd.f32 %v5745_v22, %v5551_v33 }
 0x49a   : > { %7148 = vst.msk [vmem:[%s11978_s26 + $0x8c] sm:$0xf] %vm6952_vm7, %v7116_v6  ;;  %v6723_v14 = vadd.f32 %v12331_v13, %v6722_v20  ;;  %v6406_v55 = vadd.f32 %v12311_v3, %v6336_v34 }
 0x49c   : > { %v7053_v2 = vadd.f32 %v8010_v57, %v6723_v14  ;;  %7824 = vmatmul.msk.bf16.gmra.mxu0 %vm13848_vm5, %v6507_v19  ;;  %v6472_v47 = vmax.f32 %v6406_v55, 0.0  ;;  %v5744_v19 = vadd.f32 %v5743_v28, %v5549_v25  ;;  %v5750_v10 = vpop.f32.mrf.mxu2 }
 0x49e   : > { %v7085_v15 = vmax.f32 %v7053_v2, 0.0 }
 0x49f   : > { %v6260_v17 = vpop.f32.mrf.mxu3 }
 0x4a0   : > { %v7117_v49 = vpack.c.bf16 %v7085_v15, %v7085_v15  ;;  %v6337_v1 = vadd.f32 %v6260_v17, %v5741_v54  ;;  %v5554_v23 = vpop.f32.mrf.mxu1 }
 0x4a1   : > { %v6724_v61 = vpop.f32.mrf.mxu0  ;;  %v5749_v24 = vadd.f32 %v5748_v52, %v5554_v23 }
 0x4a2   : > { %7149 = vst.msk [vmem:[%s11978_s26 + $0x90] sm:$0xf] %vm6952_vm7, %v7117_v49  ;;  %v6725_v42 = vadd.f32 %v12331_v13, %v6724_v61  ;;  %v6407_v12 = vadd.f32 %v12311_v3, %v6337_v1 }
 0x4a4   : > { %v7054_v45 = vadd.f32 %v8011_v50, %v6725_v42  ;;  %v6473_v11 = vmax.f32 %v6407_v12, 0.0 }
 0x4a6   : > { %v7086_v37 = vmax.f32 %v7054_v45, 0.0  ;;  %v6509_v27 = vpack.c.bf16 %v6473_v11, %v6472_v47 }
 0x4a7   : > { %v6263_v21 = vpop.f32.mrf.mxu3 }
 0x4a8   : > { %v7118_v59 = vpack.c.bf16 %v7086_v37, %v7086_v37  ;;  %v6338_v63 = vadd.f32 %v6263_v21, %v5744_v19  ;;  %v5556_v15 = vpop.f32.mrf.mxu1 }
 0x4a9   : > { %v6727_v36 = vpop.f32.mrf.mxu0  ;;  %v5751_v53 = vadd.f32 %v5750_v10, %v5556_v15 }
 0x4aa   : > { %7150 = vst.msk [vmem:[%s11978_s26 + $0x94] sm:$0xf] %vm6952_vm7, %v7118_v59  ;;  %v6728_v41 = vadd.f32 %v12331_v13, %v6727_v36  ;;  %v6408_v2 = vadd.f32 %v12311_v3, %v6338_v63  ;;  %v8086_v63 = vld [vmem:[%s8255_s11 + $0xb8] sm:$0xff]  }
 0x4ac   : > { %v7055_v39 = vadd.f32 %v8014_v30, %v6728_v41  ;;  %7825 = vmatmul.msk.bf16.gmra.mxu0 %vm13849_vm4, %v6508_v18  ;;  %v6474_v17 = vmax.f32 %v6408_v2, 0.0  ;;  %v5753_v30 = vpop.f32.mrf.mxu2  ;;  %v8030_v2 = vunpack.c.l.bf16 %v8086_v63 }
 0x4ae   : > { %v7087_v51 = vmax.f32 %v7055_v39, 0.0 }
 0x4af   : > { %v6265_v0 = vpop.f32.mrf.mxu3 }
 0x4b0   : > { %v7119_v9 = vpack.c.bf16 %v7087_v51, %v7087_v51  ;;  %v6339_v20 = vadd.f32 %v6265_v0, %v5746_v35  ;;  %v5559_v18 = vpop.f32.mrf.mxu1 }
 0x4b1   : > { %v6729_v44 = vpop.f32.mrf.mxu0 }
 0x4b2   : > { %7151 = vst.msk [vmem:[%s11978_s26 + $0x98] sm:$0xf] %vm6952_vm7, %v7119_v9  ;;  %v6730_v8 = vadd.f32 %v12331_v13, %v6729_v44  ;;  %v6409_v26 = vadd.f32 %v12311_v3, %v6339_v20  ;;  %v8085_v9 = vld [vmem:[%s8255_s11 + $0xb0] sm:$0xff]  }
 0x4b3   : > { %v8027_v35 = vunpack.c.h.bf16 %v8085_v9 }
 0x4b4   : > { %v7056_v5 = vadd.f32 %v8015_v46, %v6730_v8  ;;  %v6475_v50 = vmax.f32 %v6409_v26, 0.0  ;;  %v5755_v0 = vpop.f32.mrf.mxu2 }
 0x4b6   : > { %v7088_v38 = vmax.f32 %v7056_v5, 0.0  ;;  %v6510_v45 = vpack.c.bf16 %v6475_v50, %v6474_v17  ;;  %v8026_v5 = vunpack.c.l.bf16 %v8085_v9  ;;  %v8031_v50 = vunpack.c.h.bf16 %v8086_v63 }
 0x4b7   : > { %v6268_v6 = vpop.f32.mrf.mxu3 }
 0x4b8   : > { %v7120_v48 = vpack.c.bf16 %v7088_v38, %v7088_v38  ;;  %v6340_v21 = vadd.f32 %v6268_v6, %v5749_v24  ;;  %v5561_v44 = vpop.f32.mrf.mxu1 }
 0x4b9   : > { %v6732_v43 = vpop.f32.mrf.mxu0  ;;  %v5756_v47 = vadd.f32 %v5755_v0, %v5561_v44  ;;  %v8089_v44 = vld [vmem:[%s8255_s11 + $0xd0] sm:$0xff]  }
 0x4ba   : > { %7152 = vst.msk [vmem:[%s11978_s26 + $0x9c] sm:$0xf] %vm6952_vm7, %v7120_v48  ;;  %v6733_v16 = vadd.f32 %v12331_v13, %v6732_v43  ;;  %v6410_v51 = vadd.f32 %v12311_v3, %v6340_v21  ;;  %v5754_v48 = vadd.f32 %v5753_v30, %v5559_v18  ;;  %v8088_v21 = vld [vmem:[%s8255_s11 + $0xc8] sm:$0xff]  }
 0x4bc   : > { %v7057_v57 = vadd.f32 %v8018_v58, %v6733_v16  ;;  %7826 = vmatmul.msk.bf16.gmra.mxu0 %vm13850_vm2, %v6509_v27  ;;  %v6476_v46 = vmax.f32 %v6410_v51, 0.0 }
 0x4be   : > { %v7089_v4 = vmax.f32 %v7057_v57, 0.0 }
 0x4bf   : > { %v6270_v61 = vpop.f32.mrf.mxu3 }
 0x4c0   : > { %v7121_v14 = vpack.c.bf16 %v7089_v4, %v7089_v4  ;;  %v6341_v59 = vadd.f32 %v6270_v61, %v5751_v53 }
 0x4c1   : > { %v6734_v32 = vpop.f32.mrf.mxu0 }
 0x4c2   : > { %7153 = vst.msk [vmem:[%s11978_s26 + $0xa0] sm:$0xf] %vm6952_vm7, %v7121_v14  ;;  %v6735_v29 = vadd.f32 %v12331_v13, %v6734_v32  ;;  %v6411_v39 = vadd.f32 %v12311_v3, %v6341_v59 }
 0x4c4   : > { %v7058_v49 = vadd.f32 %v8019_v56, %v6735_v29  ;;  %v6477_v22 = vmax.f32 %v6411_v39, 0.0 }
 0x4c6   : > { %v7090_v31 = vmax.f32 %v7058_v49, 0.0  ;;  %v6511_v8 = vpack.c.bf16 %v6477_v22, %v6476_v46  ;;  %v8039_v22 = vunpack.c.h.bf16 %v8088_v21 }
 0x4c7   : > { %v6273_v54 = vpop.f32.mrf.mxu3 }
 0x4c8   : > { %v7122_v42 = vpack.c.bf16 %v7090_v31, %v7090_v31  ;;  %v6342_v43 = vadd.f32 %v6273_v54, %v5754_v48  ;;  %v8087_v31 = vld [vmem:[%s8255_s11 + $0xc0] sm:$0xff]   ;;  %v8043_v48 = vunpack.c.h.bf16 %v8089_v44 }
 0x4c9   : > { %v6737_v25 = vpop.f32.mrf.mxu0  ;;  %v8035_v59 = vunpack.c.h.bf16 %v8087_v31 }
 0x4ca   : > { %7154 = vst.msk [vmem:[%s11978_s26 + $0xa4] sm:$0xf] %vm6952_vm7, %v7122_v42  ;;  %v6738_v28 = vadd.f32 %v12331_v13, %v6737_v25  ;;  %v6412_v19 = vadd.f32 %v12311_v3, %v6342_v43  ;;  %v8090_v43 = vld [vmem:[%s8255_s11 + $0xd8] sm:$0xff]  }
 0x4cb   : > { %v8047_v63 = vunpack.c.h.bf16 %v8090_v43 }
 0x4cc   : > { %v7059_v37 = vadd.f32 %v8022_v62, %v6738_v28  ;;  %7827 = vmatmul.msk.bf16.gmra.mxu0 %vm13851_vm13, %v6510_v45  ;;  %v6478_v14 = vmax.f32 %v6412_v19, 0.0  ;;  %v8034_v62 = vunpack.c.l.bf16 %v8087_v31 }
 0x4ce   : > { %v7091_v36 = vmax.f32 %v7059_v37, 0.0 }
 0x4cf   : > { %v6275_v7 = vpop.f32.mrf.mxu3 }
 0x4d0   : > { %v7123_v41 = vpack.c.bf16 %v7091_v36, %v7091_v36  ;;  %v6343_v58 = vadd.f32 %v6275_v7, %v5756_v47 }
 0x4d1   : > { %v6739_v1 = vpop.f32.mrf.mxu0 }
 0x4d2   : > { %7155 = vst.msk [vmem:[%s11978_s26 + $0xa8] sm:$0xf] %vm6952_vm7, %v7123_v41  ;;  %v6740_v34 = vadd.f32 %v12331_v13, %v6739_v1  ;;  %v6413_v16 = vadd.f32 %v12311_v3, %v6343_v58 }
 0x4d4   : > { %v7060_v33 = vadd.f32 %v8023_v40, %v6740_v34  ;;  %v6479_v4 = vmax.f32 %v6413_v16, 0.0  ;;  %v8038_v40 = vunpack.c.l.bf16 %v8088_v21  ;;  %v8046_v16 = vunpack.c.l.bf16 %v8090_v43 }
 0x4d6   : > { %v7092_v12 = vmax.f32 %v7060_v33, 0.0  ;;  %v6512_v32 = vpack.c.bf16 %v6479_v4, %v6478_v14 }
 0x4d8   : > { %v7124_v55 = vpack.c.bf16 %v7092_v12, %v7092_v12 }
 0x4d9   : > { %v6742_v11 = vpop.f32.mrf.mxu0 }
 0x4da   : > { %7156 = vst.msk [vmem:[%s11978_s26 + $0xac] sm:$0xf] %vm6952_vm7, %v7124_v55  ;;  %v6743_v38 = vadd.f32 %v12331_v13, %v6742_v11 }
 0x4dc   : > { %v7061_v27 = vadd.f32 %v8026_v5, %v6743_v38  ;;  %7828 = vmatmul.msk.bf16.gmra.mxu0 %vm13852_vm6, %v6511_v8  ;;  %v8042_v8 = vunpack.c.l.bf16 %v8089_v44 }
 0x4de   : > { %v7093_v23 = vmax.f32 %v7061_v27, 0.0 }
 0x4e0   : > { %v7125_v52 = vpack.c.bf16 %v7093_v23, %v7093_v23 }
 0x4e1   : > { %v6744_v6 = vpop.f32.mrf.mxu0 }
 0x4e2   : > { %7157 = vst.msk [vmem:[%s11978_s26 + $0xb0] sm:$0xf] %vm6952_vm7, %v7125_v52  ;;  %v6745_v57 = vadd.f32 %v12331_v13, %v6744_v6 }
 0x4e4   : > { %v7062_v20 = vadd.f32 %v8027_v35, %v6745_v57 }
 0x4e6   : > { %v7094_v56 = vmax.f32 %v7062_v20, 0.0 }
 0x4e8   : > { %v7126_v26 = vpack.c.bf16 %v7094_v56, %v7094_v56 }
 0x4e9   : > { %v6747_v29 = vpop.f32.mrf.mxu0 }
 0x4ea   : > { %7158 = vst.msk [vmem:[%s11978_s26 + $0xb4] sm:$0xf] %vm6952_vm7, %v7126_v26  ;;  %v6748_v15 = vadd.f32 %v12331_v13, %v6747_v29 }
 0x4ec   : > { %v7063_v10 = vadd.f32 %v8030_v2, %v6748_v15  ;;  %7829 = vmatmul.msk.bf16.gmra.mxu0 %vm13838_vm0, %v6512_v32  ;;  %v8091_v32 = vld [vmem:[%s8255_s11 + $0xe0] sm:$0xff]  }
 0x4ed   : > { %v8050_v15 = vunpack.c.l.bf16 %v8091_v32 }
 0x4ee   : > { %v7095_v3 = vmax.f32 %v7063_v10, 0.0 }
 0x4f0   : > { %v7127_v49 = vpack.c.bf16 %v7095_v3, %v7095_v3 }
 0x4f1   : > { %v6749_v60 = vpop.f32.mrf.mxu0 }
 0x4f2   : > { %7159 = vst.msk [vmem:[%s11978_s26 + $0xb8] sm:$0xf] %vm6952_vm7, %v7127_v49  ;;  %v6750_v61 = vadd.f32 %v12331_v13, %v6749_v60 }
 0x4f4   : > { %v7064_v17 = vadd.f32 %v8031_v50, %v6750_v61  ;;  %v8051_v61 = vunpack.c.h.bf16 %v8091_v32 }
 0x4f6   : > { %v7096_v42 = vmax.f32 %v7064_v17, 0.0 }
 0x4f8   : > { %v7128_v45 = vpack.c.bf16 %v7096_v42, %v7096_v42 }
 0x4f9   : > { %v6752_v25 = vpop.f32.mrf.mxu0 }
 0x4fa   : > { %7160 = vst.msk [vmem:[%s11978_s26 + $0xbc] sm:$0xf] %vm6952_vm7, %v7128_v45  ;;  %v6753_v53 = vadd.f32 %v12331_v13, %v6752_v25  ;;  %v8092_v45 = vld [vmem:[%s8255_s11 + $0xe8] sm:$0xff]  }
 0x4fc   : > { %v7065_v28 = vadd.f32 %v8034_v62, %v6753_v53  ;;  %v8054_v53 = vunpack.c.l.bf16 %v8092_v45 }
 0x4fe   : > { %v7097_v24 = vmax.f32 %v7065_v28, 0.0 }
 0x500   : > { %v7129_v37 = vpack.c.bf16 %v7097_v24, %v7097_v24 }
 0x501   : > { %v6754_v18 = vpop.f32.mrf.mxu0 }
 0x502   : > { %7161 = vst.msk [vmem:[%s11978_s26 + $0xc0] sm:$0xf] %vm6952_vm7, %v7129_v37  ;;  %v6755_v30 = vadd.f32 %v12331_v13, %v6754_v18 }
 0x504   : > { %v7066_v36 = vadd.f32 %v8035_v59, %v6755_v30  ;;  %v8055_v30 = vunpack.c.h.bf16 %v8092_v45 }
 0x506   : > { %v7098_v54 = vmax.f32 %v7066_v36, 0.0 }
 0x508   : > { %v7130_v41 = vpack.c.bf16 %v7098_v54, %v7098_v54 }
 0x509   : > { %v6757_v39 = vpop.f32.mrf.mxu0 }
 0x50a   : > { %7162 = vst.msk [vmem:[%s11978_s26 + $0xc4] sm:$0xf] %vm6952_vm7, %v7130_v41  ;;  %v6758_v1 = vadd.f32 %v12331_v13, %v6757_v39  ;;  %v8093_v41 = vld [vmem:[%s8255_s11 + $0xf0] sm:$0xff]  }
 0x50c   : > { %v7067_v51 = vadd.f32 %v8038_v40, %v6758_v1  ;;  %v8058_v1 = vunpack.c.l.bf16 %v8093_v41 }
 0x50e   : > { %v7099_v34 = vmax.f32 %v7067_v51, 0.0 }
 0x510   : > { %v7131_v33 = vpack.c.bf16 %v7099_v34, %v7099_v34 }
 0x511   : > { %v6759_v9 = vpop.f32.mrf.mxu0 }
 0x512   : > { %7163 = vst.msk [vmem:[%s11978_s26 + $0xc8] sm:$0xf] %vm6952_vm7, %v7131_v33  ;;  %v6760_v46 = vadd.f32 %v12331_v13, %v6759_v9 }
 0x514   : > { %v7068_v12 = vadd.f32 %v8039_v22, %v6760_v46  ;;  %v8059_v46 = vunpack.c.h.bf16 %v8093_v41 }
 0x516   : > { %v7100_v0 = vmax.f32 %v7068_v12, 0.0 }
 0x518   : > { %v7132_v55 = vpack.c.bf16 %v7100_v0, %v7100_v0 }
 0x519   : > { %v6762_v5 = vpop.f32.mrf.mxu0 }
 0x51a   : > { %7164 = vst.msk [vmem:[%s11978_s26 + $0xcc] sm:$0xf] %vm6952_vm7, %v7132_v55  ;;  %v6763_v11 = vadd.f32 %v12331_v13, %v6762_v5  ;;  %v8094_v55 = vld [vmem:[%s8255_s11 + $0xf8] sm:$0xff]  }
 0x51c   : > { %v7069_v7 = vadd.f32 %v8042_v8, %v6763_v11  ;;  %v8062_v11 = vunpack.c.l.bf16 %v8094_v55 }
 0x51e   : > { %v7101_v47 = vmax.f32 %v7069_v7, 0.0 }
 0x520   : > { %v7133_v38 = vpack.c.bf16 %v7101_v47, %v7101_v47 }
 0x521   : > { %v6764_v27 = vpop.f32.mrf.mxu0 }
 0x522   : > { %7165 = vst.msk [vmem:[%s11978_s26 + $0xd0] sm:$0xf] %vm6952_vm7, %v7133_v38  ;;  %v6765_v58 = vadd.f32 %v12331_v13, %v6764_v27 }
 0x524   : > { %v7070_v23 = vadd.f32 %v8043_v48, %v6765_v58  ;;  %v8063_v58 = vunpack.c.h.bf16 %v8094_v55 }
 0x526   : > { %v7102_v52 = vmax.f32 %v7070_v23, 0.0 }
 0x528   : > { %v7134_v35 = vpack.c.bf16 %v7102_v52, %v7102_v52 }
 0x529   : > { %v6767_v6 = vpop.f32.mrf.mxu0 }
 0x52a   : > { %7166 = vst.msk [vmem:[%s11978_s26 + $0xd4] sm:$0xf] %vm6952_vm7, %v7134_v35  ;;  %v6768_v19 = vadd.f32 %v12331_v13, %v6767_v6 }
 0x52c   : > { %v7071_v57 = vadd.f32 %v8046_v16, %v6768_v19 }
 0x52e   : > { %v7103_v20 = vmax.f32 %v7071_v57, 0.0 }
 0x530   : > { %v7135_v4 = vpack.c.bf16 %v7103_v20, %v7103_v20 }
 0x531   : > { %v6769_v14 = vpop.f32.mrf.mxu0 }
 0x532   : > { %7167 = vst.msk [vmem:[%s11978_s26 + $0xd8] sm:$0xf] %vm6952_vm7, %v7135_v4  ;;  %v6770_v56 = vadd.f32 %v12331_v13, %v6769_v14 }
 0x534   : > { %v7072_v26 = vadd.f32 %v8047_v63, %v6770_v56 }
 0x536   : > { %v7104_v2 = vmax.f32 %v7072_v26, 0.0 }
 0x538   : > { %v7136_v29 = vpack.c.bf16 %v7104_v2, %v7104_v2 }
 0x539   : > { %v6772_v10 = vpop.f32.mrf.mxu0 }
 0x53a   : > { %7168 = vst.msk [vmem:[%s11978_s26 + $0xdc] sm:$0xf] %vm6952_vm7, %v7136_v29  ;;  %v6773_v3 = vadd.f32 %v12331_v13, %v6772_v10 }
 0x53c   : > { %v7073_v49 = vadd.f32 %v8050_v15, %v6773_v3 }
 0x53e   : > { %v7105_v50 = vmax.f32 %v7073_v49, 0.0 }
 0x540   : > { %v7137_v60 = vpack.c.bf16 %v7105_v50, %v7105_v50 }
 0x541   : > { %v6774_v17 = vpop.f32.mrf.mxu0 }
 0x542   : > { %7169 = vst.msk [vmem:[%s11978_s26 + $0xe0] sm:$0xf] %vm6952_vm7, %v7137_v60  ;;  %v6775_v31 = vadd.f32 %v12331_v13, %v6774_v17 }
 0x544   : > { %v7074_v42 = vadd.f32 %v8051_v61, %v6775_v31 }
 0x546   : > { %v7106_v62 = vmax.f32 %v7074_v42, 0.0 }
 0x548   : > { %v7138_v25 = vpack.c.bf16 %v7106_v62, %v7106_v62 }
 0x549   : > { %v6777_v28 = vpop.f32.mrf.mxu0 }
 0x54a   : > { %7170 = vst.msk [vmem:[%s11978_s26 + $0xe4] sm:$0xf] %vm6952_vm7, %v7138_v25  ;;  %v6778_v24 = vadd.f32 %v12331_v13, %v6777_v28 }
 0x54c   : > { %v7075_v37 = vadd.f32 %v8054_v53, %v6778_v24 }
 0x54e   : > { %v7107_v59 = vmax.f32 %v7075_v37, 0.0 }
 0x550   : > { %v7139_v18 = vpack.c.bf16 %v7107_v59, %v7107_v59 }
 0x551   : > { %v6779_v36 = vpop.f32.mrf.mxu0 }
 0x552   : > { %7171 = vst.msk [vmem:[%s11978_s26 + $0xe8] sm:$0xf] %vm6952_vm7, %v7139_v18  ;;  %v6780_v21 = vadd.f32 %v12331_v13, %v6779_v36 }
 0x554   : > { %v7076_v54 = vadd.f32 %v8055_v30, %v6780_v21 }
 0x556   : > { %v7108_v40 = vmax.f32 %v7076_v54, 0.0 }
 0x558   : > { %v7140_v39 = vpack.c.bf16 %v7108_v40, %v7108_v40 }
 0x559   : > { %v6782_v51 = vpop.f32.mrf.mxu0 }
 0x55a   : > { %7172 = vst.msk [vmem:[%s11978_s26 + $0xec] sm:$0xf] %vm6952_vm7, %v7140_v39  ;;  %v6783_v34 = vadd.f32 %v12331_v13, %v6782_v51 }
 0x55c   : > { %v7077_v33 = vadd.f32 %v8058_v1, %v6783_v34 }
 0x55e   : > { %v7109_v22 = vmax.f32 %v7077_v33, 0.0 }
 0x560   : > { %v7141_v9 = vpack.c.bf16 %v7109_v22, %v7109_v22 }
 0x561   : > { %v6784_v12 = vpop.f32.mrf.mxu0 }
 0x562   : > { %7173 = vst.msk [vmem:[%s11978_s26 + $0xf0] sm:$0xf] %vm6952_vm7, %v7141_v9  ;;  %v6785_v44 = vadd.f32 %v12331_v13, %v6784_v12 }
 0x564   : > { %v7078_v0 = vadd.f32 %v8059_v46, %v6785_v44 }
 0x566   : > { %v7110_v8 = vmax.f32 %v7078_v0, 0.0 }
 0x568   : > { %v7142_v5 = vpack.c.bf16 %v7110_v8, %v7110_v8 }
 0x569   : > { %v6787_v7 = vpop.f32.mrf.mxu0 }
 0x56a   : > { %7174 = vst.msk [vmem:[%s11978_s26 + $0xf4] sm:$0xf] %vm6952_vm7, %v7142_v5  ;;  %v6788_v47 = vadd.f32 %v12331_v13, %v6787_v7 }
 0x56c   : > { %v7079_v38 = vadd.f32 %v8062_v11, %v6788_v47 }
 0x56e   : > { %v7111_v48 = vmax.f32 %v7079_v38, 0.0 }
 0x570   : > { %v7143_v27 = vpack.c.bf16 %v7111_v48, %v7111_v48 }
 0x571   : > { %v6789_v23 = vpop.f32.mrf.mxu0 }
 0x572   : > { %7175 = vst.msk [vmem:[%s11978_s26 + $0xf8] sm:$0xf] %vm6952_vm7, %v7143_v27  ;;  %v6790_v43 = vadd.f32 %v12331_v13, %v6789_v23 }
 0x574   : > { %v7080_v52 = vadd.f32 %v8063_v58, %v6790_v43 }
 0x576   : > { %v7112_v35 = vmax.f32 %v7080_v52, 0.0 }
 0x578   : > { %v7144_v16 = vpack.c.bf16 %v7112_v35, %v7112_v35 }
 0x57a   : > { %7176 = vst.msk [vmem:[%s11978_s26 + $0xfc] sm:$0xf] %vm6952_vm7, %v7144_v16 }
 0x57b PF: > { %s17_s24 = sadd.s32 1, %s8187_s24  }
 0x57c   : > { %p14_p4 = scmp.ge.s32.totalorder %s17_s24, 4  }
 0x57e   :  { %16 = sbr.rel (!%p14_p4) target bundleno = 1 (0x1), region = 80 }

</bundles_post_ra>
